<compile_context>
chip_gen: v7x
topology: tpu7x:2x2x1
jax: 0.10.0
libtpu: 0.0.40
codegen_flags: <defaults>
</compile_context>

<pallas_src>
import math

import numpy as np
import jax
import jax.numpy as jnp
from jax import lax
from jax.experimental import pallas as pl
from jax.experimental.pallas import tpu as pltpu

SLOPE = 0.01   # F.leaky_relu default negative_slope
EPS = 1e-5     # torch.nn.GroupNorm default eps


# ----------------------------------------------------------------------------
# Host-side weight repacking (numpy, done once outside the kernel)
# ----------------------------------------------------------------------------
def _band_conv3x3(w, W):
    """w: (3, 3, Ci, Co) -> (3, W*Ci, W*Co) banded matrices (one per kernel row).

    out_row[h] = sum_ky x_row[h + ky - 1] @ band[ky]  (zero rows off top/bottom)
    band[ky][wi*Ci + ci, wo*Co + co] = w[ky, wi - wo + 1, ci, co]
    """
    w = np.asarray(w, np.float32)
    Ci, Co = w.shape[2], w.shape[3]
    band = np.zeros((3, W * Ci, W * Co), np.float32)
    for ky in range(3):
        for wo in range(W):
            for kx in range(3):
                wi = wo + kx - 1
                if 0 <= wi < W:
                    band[ky, wi * Ci:(wi + 1) * Ci, wo * Co:(wo + 1) * Co] = w[ky, kx]
    return band


def _blockdiag_1x1(ws, W):
    """ws: (Ci, Co) -> (W*Ci, W*Co) block-diagonal matrix for the 1x1 shortcut."""
    ws = np.asarray(ws, np.float32)
    Ci, Co = ws.shape
    blk = np.zeros((W * Ci, W * Co), np.float32)
    for wp in range(W):
        blk[wp * Ci:(wp + 1) * Ci, wp * Co:(wp + 1) * Co] = ws
    return blk


def _pack_conv1(w1, ws, W, Sc=None):
    """Fused conv1 + shortcut weight: (3*Lin, 2*Lout).

    Columns [0:Lout]  = stacked 3x3 band matrices (rows: x(r-1), x(r), x(r+1)).
    Columns [Lout:2L] = 1x1 shortcut, applied only to the un-shifted x rows.
    If Sc is given (even-column compaction of the preceding maxpool) it is
    folded in:  (x @ Sc) @ Wconv == x @ (Sc @ Wconv).
    """
    band = _band_conv3x3(w1, W)                   # (3, W*Ci, W*Co)
    sc = _blockdiag_1x1(ws, W)                    # (W*Ci, W*Co)
    if Sc is not None:
        band = np.einsum("pk,ykn->ypn", Sc, band)
        sc = Sc @ sc
    lin, lout = band.shape[1], band.shape[2]
    out = np.zeros((3 * lin, 2 * lout), np.float32)
    out[:, :lout] = band.reshape(3 * lin, lout)
    out[lin:2 * lin, lout:] = sc
    return out


def _pack_conv2(w2, W):
    """Stacked band matrices for conv2: (3*W*Co, W*Co)."""
    band = _band_conv3x3(w2, W)
    return band.reshape(3 * band.shape[1], band.shape[2])


def _group_avg_matrix(H, W, C, groups):
    """(W*C, W*C) matrix M so (per-image lane sums @ M)[l] == mean of l's group."""
    Cg = C // groups
    lane_group = (np.arange(W * C) % C) // Cg
    same = (lane_group[:, None] == lane_group[None, :]).astype(np.float32)
    return same / float(H * W * Cg)


def _img_row_select(B, H):
    """Pb (B, B*H): Pb[b, r] = 1 iff row r belongs to image b."""
    Pb = np.zeros((B, B * H), np.float32)
    for b in range(B):
        Pb[b, b * H:(b + 1) * H] = 1.0
    return Pb


def _row_pool_select(R):
    """(R//2, R) 0/1 matrix selecting the even rows (row-pair max compaction)."""
    Sr = np.zeros((R // 2, R), np.float32)
    Sr[np.arange(R // 2), 2 * np.arange(R // 2)] = 1.0
    return Sr


def _col_pool_select(W, C):
    """(W*C, (W//2)*C) 0/1 matrix selecting the even-w lanes after a 2x2 pool."""
    Sc = np.zeros((W * C, (W // 2) * C), np.float32)
    for wo in range(W // 2):
        for c in range(C):
            Sc[(2 * wo) * C + c, wo * C + c] = 1.0
    return Sc


def _lane_tile(v, W):
    """Per-channel (C,) vector -> lane-tiled row (1, W*C) for the (H, W*C) layout."""
    return np.tile(np.asarray(v, np.float32), W)[None, :]


# ----------------------------------------------------------------------------
# Fused EncoderBlock kernel (one grid step == B batch elements)
# ----------------------------------------------------------------------------
def _make_encoder_kernel(stage_meta, B):
    """stage_meta: per-stage dicts {"H": rows per image, "pool_C": channels or None}."""

    def _dot(a, b):
        return jnp.dot(a, b, preferred_element_type=jnp.float32)

    def _leaky(v):
        return jnp.where(v >= 0, v, SLOPE * v)

    def _xcat(x, H):
        # x: (R, L) with B images of H rows stacked along the row axis.
        # Returns [x(r-1) | x(r) | x(r+1)] of shape (R, 3L), zeroed where the
        # neighbour row falls outside its image (== the conv's zero padding).
        R, L = x.shape
        row = lax.broadcasted_iota(jnp.int32, (R, L), 0)
        zrow = jnp.zeros((1, L), jnp.float32)
        x_m1 = jnp.where(row % H == 0, 0.0,
                         jnp.concatenate([zrow, x[:-1]], axis=0))
        x_p1 = jnp.where(row % H == H - 1, 0.0,
                         jnp.concatenate([x[1:], zrow], axis=0))
        return jnp.concatenate([x_m1, x, x_p1], axis=1)

    def _group_norm(y, gavg_ref, pb2_ref, pbt_ref, gaff_ref, idx):
        # y: (R, L).  Per-image, per-group GroupNorm with 3 small matmuls:
        #   per-image sums of [y ; y^2] -> group means -> broadcast scale/shift.
        R, L = y.shape
        ystack = jnp.concatenate([y, y * y], axis=0)             # (2R, L)
        sums = _dot(pb2_ref[...], ystack)                        # (2B, L)
        stats = _dot(sums, gavg_ref[...])                        # (2B, L): [mean ; E[y^2]]
        mean, ex2 = stats[:B], stats[B:]
        g = gaff_ref[...]                                        # (4, L): g1w,g1b,g2w,g2b
        gamma = g[2 * idx:2 * idx + 1]
        beta = g[2 * idx + 1:2 * idx + 2]
        scale = lax.rsqrt(ex2 - mean * mean + EPS) * gamma       # (B, L)
        shift = beta - mean * scale
        bc = _dot(pbt_ref[...], jnp.concatenate([scale, shift], axis=1))   # (R, 2L)
        return y * bc[:, :L] + bc[:, L:]

    def _resblock(h, w1f_ref, w2_ref, gavg_ref, pb2_ref, pbt_ref, gaff_ref, H):
        # conv1 + 1x1 shortcut fused into one 2*Lout-column matmul.
        t = _dot(_xcat(h, H), w1f_ref[...])                      # (R, 2*Lout)
        Lout = t.shape[1] // 2
        shortcut = t[:, Lout:]
        y = _leaky(t[:, :Lout])
        y = _group_norm(y, gavg_ref, pb2_ref, pbt_ref, gaff_ref, 0)
        y = _dot(_xcat(y, H), w2_ref[...]) + shortcut            # conv2 + residual
        y = _leaky(y)
        y = _group_norm(y, gavg_ref, pb2_ref, pbt_ref, gaff_ref, 1)
        return y

    def _maxpool(y, sr_ref, C):
        # 2x2 / stride-2 max pool.  Column (w) pairs: static lane shift by C +
        # max; row pairs: sublane shift + max; then ONE even-row selection
        # matmul.  The even-COLUMN compaction is pre-folded into the next
        # stage's conv1/shortcut weights, so odd-w lanes remain (ignored) junk
        # and the activation stays 128 lanes wide.
        col = jnp.maximum(y, jnp.concatenate([y[:, C:], y[:, :C]], axis=1))
        row = jnp.maximum(col, jnp.concatenate([col[1:], col[:1]], axis=0))
        return _dot(sr_ref[...], row)                            # (R/2, L)

    def kernel(x_ref, *rest):
        out_ref = rest[-1]
        prm = rest[:-1]
        h = x_ref[...].astype(jnp.float32)                       # (B*H0, W0*C0)
        i = 0
        for meta in stage_meta:
            h = _resblock(h, prm[i], prm[i + 1], prm[i + 2], prm[i + 3],
                          prm[i + 4], prm[i + 5], meta["H"])
            i += 6
            if meta["pool_C"] is not None:
                h = _maxpool(h, prm[i], meta["pool_C"])
                i += 1
        out_ref[...] = h.astype(out_ref.dtype)

    return kernel


# ----------------------------------------------------------------------------
# EncoderBlock forward: pack params, single fused pallas_call, unpack output
# ----------------------------------------------------------------------------
def encoder_block_forward(x_nchw, stage_params, div_groupnorm, block_batch=8):
    """x_nchw: (N, C0, H0, W0) f32.  stage_params: list of per-ResBlock tuples
    (w1 (3,3,Ci,Co), w2 (3,3,Co,Co), ws (Ci,Co), g1w, g1b, g2w, g2b)."""
    N, C0, H0, W0 = x_nchw.shape
    n_stages = len(stage_params)
    B = max(1, min(int(block_batch), N))            # images per grid step
    n_steps = -(-N // B)
    N_pad = n_steps * B

    # NCHW -> row-stacked lane-dense layout: row = n*H0 + h, lane = w*C0 + c.
    x_nhwc = jnp.transpose(x_nchw, (0, 2, 3, 1))
    if N_pad != N:
        pad = jnp.zeros((N_pad - N,) + x_nhwc.shape[1:], x_nhwc.dtype)
        x_nhwc = jnp.concatenate([x_nhwc, pad], axis=0)
    x2d = x_nhwc.reshape(N_pad * H0, W0 * C0)

    flat, stage_meta = [], []
    H, W = H0, W0
    Sc_prev = None                 # even-column compaction of the previous pool
    step_flops = 0
    for s, (w1, w2, ws, g1w, g1b, g2w, g2b) in enumerate(stage_params):
        Co = int(np.shape(w1)[-1])
        groups = math.ceil(Co / div_groupnorm)
        assert Co % groups == 0, "GroupNorm needs num_channels % num_groups == 0"
        R, Lout = B * H, W * Co

        w1f = _pack_conv1(w1, ws, W, Sc_prev)                  # (3*Lin, 2*Lout)
        w2p = _pack_conv2(w2, W)                               # (3*Lout, Lout)
        gavg = _group_avg_matrix(H, W, Co, groups)             # (Lout, Lout)
        pb = _img_row_select(B, H)                             # (B, R)
        pb2 = np.block([[pb, np.zeros_like(pb)],
                        [np.zeros_like(pb), pb]])              # (2B, 2R)
        pbt = np.ascontiguousarray(pb.T)                       # (R, B)
        gaff = np.concatenate([_lane_tile(g1w, W), _lane_tile(g1b, W),
                               _lane_tile(g2w, W), _lane_tile(g2b, W)], axis=0)
        flat += [w1f, w2p, gavg, pb2, pbt, gaff]

        step_flops += 2 * R * w1f.shape[0] * w1f.shape[1]      # conv1 + shortcut
        step_flops += 2 * R * w2p.shape[0] * w2p.shape[1]      # conv2
        step_flops += 2 * (2 * (2 * B) * (2 * R) * Lout        # GN stats
                           + 2 * (2 * B) * Lout * Lout         # GN group means
                           + 2 * R * B * (2 * Lout))           # GN broadcast

        if s < n_stages - 1:
            sr = _row_pool_select(R)
            flat.append(sr)
            step_flops += 2 * (R // 2) * R * Lout
            stage_meta.append(dict(H=H, pool_C=Co))
            Sc_prev = _col_pool_select(W, Co)
            H, W = H // 2, W // 2
        else:
            stage_meta.append(dict(H=H, pool_C=None))

    H_last, W_last = H, W
    C_last = int(np.shape(stage_params[-1][0])[-1])
    flat = [jnp.asarray(a) for a in flat]

    def _const_spec(a):
        zeros = (0,) * a.ndim
        return pl.BlockSpec(a.shape, lambda n: zeros)

    const_bytes = sum(int(a.size) * a.dtype.itemsize for a in flat)
    cost = pl.CostEstimate(
        flops=int(step_flops) * n_steps,
        transcendentals=int(n_steps * n_stages * 2 * B * W_last * C_last),
        bytes_accessed=int(x2d.size * x2d.dtype.itemsize
                           + N_pad * H_last * W_last * C_last * 4 + const_bytes),
    )

    y2d = pl.pallas_call(
        _make_encoder_kernel(stage_meta, B),
        out_shape=jax.ShapeDtypeStruct((N_pad * H_last, W_last * C_last), jnp.float32),
        grid=(n_steps,),
        in_specs=[pl.BlockSpec((B * H0, W0 * C0), lambda n: (n, 0))]
                 + [_const_spec(a) for a in flat],
        out_specs=pl.BlockSpec((B * H_last, W_last * C_last), lambda n: (n, 0)),
        compiler_params=pltpu.CompilerParams(
            dimension_semantics=("parallel",)),    # batch axis -> both TCs on v7x
        cost_estimate=cost,
    )(x2d, *flat)

    y = y2d.reshape(N_pad, H_last, W_last, C_last)[:N]
    return jnp.transpose(y, (0, 3, 1, 2))          # back to NCHW


# ----------------------------------------------------------------------------
# Pure-JAX (XLA) reference, used to validate the fused kernel
# ----------------------------------------------------------------------------
def _ref_resblock(x, w1, w2, ws, g1w, g1b, g2w, g2b, div_groupnorm):
    co = w1.shape[-1]
    groups = math.ceil(co / div_groupnorm)

    def conv(v, w):
        return jax.lax.conv_general_dilated(
            v, w, (1, 1), "SAME",
            dimension_numbers=("NHWC", "HWIO", "NHWC"),
            precision=jax.lax.Precision.HIGHEST)

    def gn(v, gamma, beta):
        n, hh, ww, c = v.shape
        vr = v.reshape(n, hh, ww, groups, c // groups)
        mu = jnp.mean(vr, axis=(1, 2, 4), keepdims=True)
        var = jnp.mean((vr - mu) ** 2, axis=(1, 2, 4), keepdims=True)
        vr = (vr - mu) * jax.lax.rsqrt(var + EPS)
        return vr.reshape(n, hh, ww, c) * gamma + beta

    def leaky(v):
        return jnp.where(v >= 0, v, SLOPE * v)

    out = conv(x, w1)
    out = gn(leaky(out), g1w, g1b)
    out = conv(out, w2)
    out = out + jnp.einsum("nhwi,io->nhwo", x, ws,
                           precision=jax.lax.Precision.HIGHEST)
    out = gn(leaky(out), g2w, g2b)
    return out


def encoder_block_reference(x_nchw, stage_params, div_groupnorm):
    x = jnp.transpose(x_nchw, (0, 2, 3, 1))        # NHWC
    for s, p in enumerate(stage_params):
        x = _ref_resblock(x, *p, div_groupnorm)
        if s < len(stage_params) - 1:
            n, h, w, c = x.shape
            x = x.reshape(n, h // 2, 2, w // 2, 2, c).max(axis=(2, 4))
    return jnp.transpose(x, (0, 3, 1, 2))


# ----------------------------------------------------------------------------
# Parameter init + demo
# ----------------------------------------------------------------------------
def init_resblock_params(key, cin, cout):
    k = jax.random.split(key, 7)
    w1 = jax.random.normal(k[0], (3, 3, cin, cout), jnp.float32) / math.sqrt(9 * cin)
    w2 = jax.random.normal(k[1], (3, 3, cout, cout), jnp.float32) / math.sqrt(9 * cout)
    ws = jax.random.normal(k[2], (cin, cout), jnp.float32) / math.sqrt(cin)
    # GroupNorm affine params (perturbed from the torch ones/zeros default so
    # the affine path is actually exercised by the self-check).
    g1w = 1.0 + 0.1 * jax.random.normal(k[3], (cout,), jnp.float32)
    g1b = 0.1 * jax.random.normal(k[4], (cout,), jnp.float32)
    g2w = 1.0 + 0.1 * jax.random.normal(k[5], (cout,), jnp.float32)
    g2b = 0.1 * jax.random.normal(k[6], (cout,), jnp.float32)
    return (w1, w2, ws, g1w, g1b, g2w, g2b)


if __name__ == "__main__":
    div_groupnorm = 4
    key = jax.random.PRNGKey(0)
    kx, kp = jax.random.split(key)

    # torch-style NCHW input, EncoderBlock default in_channels=1.
    # N=16 with block_batch=8 -> grid of 2 "parallel" steps (keeps both
    # TensorCores busy on v7x) and 128-row matmuls at stage 1.
    N, C0, H0, W0 = 16, 1, 16, 16
    x_nchw = jax.random.normal(kx, (N, C0, H0, W0), jnp.float32)

    chans = [(C0, 8), (8, 16), (16, 32), (32, 64)]
    pkeys = jax.random.split(kp, len(chans))
    params = [init_resblock_params(k, ci, co) for k, (ci, co) in zip(pkeys, chans)]

    y = encoder_block_forward(x_nchw, params, div_groupnorm, block_batch=8)
    y = jax.block_until_ready(y)
    assert y.shape == (N, 64, H0 // 8, W0 // 8), y.shape
    assert bool(jnp.all(jnp.isfinite(y)))

    # validate against the pure-JAX/XLA reference
    y_ref = jax.block_until_ready(
        encoder_block_reference(x_nchw, params, div_groupnorm))
    err = float(jnp.max(jnp.abs(y - y_ref)))
    assert err < 1e-2, f"kernel/reference mismatch: max abs err = {err}"

    print("KERNEL_OK")
</pallas_src>

<mosaic_0001>
module attributes {stable_mosaic.version = 11 : i64} {
  func.func @kernel(%arg0: i32, %arg1: memref<128x16xf32, #tpu.memory_space<vmem>>, %arg2: memref<48x256xf32, #tpu.memory_space<vmem>>, %arg3: memref<384x128xf32, #tpu.memory_space<vmem>>, %arg4: memref<128x128xf32, #tpu.memory_space<vmem>>, %arg5: memref<16x256xf32, #tpu.memory_space<vmem>>, %arg6: memref<128x8xf32, #tpu.memory_space<vmem>>, %arg7: memref<4x128xf32, #tpu.memory_space<vmem>>, %arg8: memref<64x128xf32, #tpu.memory_space<vmem>>, %arg9: memref<384x256xf32, #tpu.memory_space<vmem>>, %arg10: memref<384x128xf32, #tpu.memory_space<vmem>>, %arg11: memref<128x128xf32, #tpu.memory_space<vmem>>, %arg12: memref<16x128xf32, #tpu.memory_space<vmem>>, %arg13: memref<64x8xf32, #tpu.memory_space<vmem>>, %arg14: memref<4x128xf32, #tpu.memory_space<vmem>>, %arg15: memref<32x64xf32, #tpu.memory_space<vmem>>, %arg16: memref<384x256xf32, #tpu.memory_space<vmem>>, %arg17: memref<384x128xf32, #tpu.memory_space<vmem>>, %arg18: memref<128x128xf32, #tpu.memory_space<vmem>>, %arg19: memref<16x64xf32, #tpu.memory_space<vmem>>, %arg20: memref<32x8xf32, #tpu.memory_space<vmem>>, %arg21: memref<4x128xf32, #tpu.memory_space<vmem>>, %arg22: memref<16x32xf32, #tpu.memory_space<vmem>>, %arg23: memref<384x256xf32, #tpu.memory_space<vmem>>, %arg24: memref<384x128xf32, #tpu.memory_space<vmem>>, %arg25: memref<128x128xf32, #tpu.memory_space<vmem>>, %arg26: memref<16x32xf32, #tpu.memory_space<vmem>>, %arg27: memref<16x8xf32, #tpu.memory_space<vmem>>, %arg28: memref<4x128xf32, #tpu.memory_space<vmem>>, %arg29: memref<16x128xf32, #tpu.memory_space<vmem>>) attributes {dimension_semantics = [#tpu.dimension_semantics<parallel>], iteration_bounds = array<i64: 2>, scalar_prefetch = 0 : i64, scratch_operands = 0 : i64, tpu.core_type = #tpu.core_type<tc>, window_params = [{transform_indices = @transform_0, window_bounds = array<i64: 128, 16>}, {pipeline_mode = #tpu.pipeline_mode<synchronous>, transform_indices = @transform_1, window_bounds = array<i64: 48, 256>}, {pipeline_mode = #tpu.pipeline_mode<synchronous>, transform_indices = @transform_2, window_bounds = array<i64: 384, 128>}, {pipeline_mode = #tpu.pipeline_mode<synchronous>, transform_indices = @transform_3, window_bounds = array<i64: 128, 128>}, {pipeline_mode = #tpu.pipeline_mode<synchronous>, transform_indices = @transform_4, window_bounds = array<i64: 16, 256>}, {pipeline_mode = #tpu.pipeline_mode<synchronous>, transform_indices = @transform_5, window_bounds = array<i64: 128, 8>}, {pipeline_mode = #tpu.pipeline_mode<synchronous>, transform_indices = @transform_6, window_bounds = array<i64: 4, 128>}, {pipeline_mode = #tpu.pipeline_mode<synchronous>, transform_indices = @transform_7, window_bounds = array<i64: 64, 128>}, {pipeline_mode = #tpu.pipeline_mode<synchronous>, transform_indices = @transform_8, window_bounds = array<i64: 384, 256>}, {pipeline_mode = #tpu.pipeline_mode<synchronous>, transform_indices = @transform_9, window_bounds = array<i64: 384, 128>}, {pipeline_mode = #tpu.pipeline_mode<synchronous>, transform_indices = @transform_10, window_bounds = array<i64: 128, 128>}, {pipeline_mode = #tpu.pipeline_mode<synchronous>, transform_indices = @transform_11, window_bounds = array<i64: 16, 128>}, {pipeline_mode = #tpu.pipeline_mode<synchronous>, transform_indices = @transform_12, window_bounds = array<i64: 64, 8>}, {pipeline_mode = #tpu.pipeline_mode<synchronous>, transform_indices = @transform_13, window_bounds = array<i64: 4, 128>}, {pipeline_mode = #tpu.pipeline_mode<synchronous>, transform_indices = @transform_14, window_bounds = array<i64: 32, 64>}, {pipeline_mode = #tpu.pipeline_mode<synchronous>, transform_indices = @transform_15, window_bounds = array<i64: 384, 256>}, {pipeline_mode = #tpu.pipeline_mode<synchronous>, transform_indices = @transform_16, window_bounds = array<i64: 384, 128>}, {pipeline_mode = #tpu.pipeline_mode<synchronous>, transform_indices = @transform_17, window_bounds = array<i64: 128, 128>}, {pipeline_mode = #tpu.pipeline_mode<synchronous>, transform_indices = @transform_18, window_bounds = array<i64: 16, 64>}, {pipeline_mode = #tpu.pipeline_mode<synchronous>, transform_indices = @transform_19, window_bounds = array<i64: 32, 8>}, {pipeline_mode = #tpu.pipeline_mode<synchronous>, transform_indices = @transform_20, window_bounds = array<i64: 4, 128>}, {pipeline_mode = #tpu.pipeline_mode<synchronous>, transform_indices = @transform_21, window_bounds = array<i64: 16, 32>}, {pipeline_mode = #tpu.pipeline_mode<synchronous>, transform_indices = @transform_22, window_bounds = array<i64: 384, 256>}, {pipeline_mode = #tpu.pipeline_mode<synchronous>, transform_indices = @transform_23, window_bounds = array<i64: 384, 128>}, {pipeline_mode = #tpu.pipeline_mode<synchronous>, transform_indices = @transform_24, window_bounds = array<i64: 128, 128>}, {pipeline_mode = #tpu.pipeline_mode<synchronous>, transform_indices = @transform_25, window_bounds = array<i64: 16, 32>}, {pipeline_mode = #tpu.pipeline_mode<synchronous>, transform_indices = @transform_26, window_bounds = array<i64: 16, 8>}, {pipeline_mode = #tpu.pipeline_mode<synchronous>, transform_indices = @transform_27, window_bounds = array<i64: 4, 128>}, {transform_indices = @transform_28, window_bounds = array<i64: 16, 128>}]} {
    %c0 = arith.constant 0 : index
    %c0_0 = arith.constant 0 : index
    %0 = vector.load %arg1[%c0, %c0_0] : memref<128x16xf32, #tpu.memory_space<vmem>>, vector<128x16xf32>
    %1 = tpu.iota {dimensions = array<i32: 0>} : vector<128x16xi32>
    %cst = arith.constant 0.000000e+00 : f32
    %2 = vector.broadcast %cst : f32 to vector<1x16xf32>
    %c16_i32 = arith.constant 16 : i32
    %c0_i32 = arith.constant 0 : i32
    %3 = arith.cmpi eq, %c16_i32, %c0_i32 : i32
    %c1_i32 = arith.constant 1 : i32
    %4 = arith.select %3, %c1_i32, %c16_i32 : i32
    %5 = vector.broadcast %4 : i32 to vector<128x16xi32>
    %6 = arith.remsi %1, %5 : vector<128x16xi32>
    %c0_i32_1 = arith.constant 0 : i32
    %7 = vector.broadcast %c0_i32_1 : i32 to vector<128x16xi32>
    %8 = arith.cmpi ne, %6, %7 : vector<128x16xi32>
    %c0_i32_2 = arith.constant 0 : i32
    %9 = vector.broadcast %c0_i32_2 : i32 to vector<128x16xi32>
    %10 = arith.cmpi slt, %6, %9 : vector<128x16xi32>
    %c0_i32_3 = arith.constant 0 : i32
    %11 = arith.cmpi slt, %4, %c0_i32_3 : i32
    %12 = vector.broadcast %11 : i1 to vector<128x16xi1>
    %13 = vector.broadcast %12 : vector<128x16xi1> to vector<128x16xi1>
    %14 = arith.xori %10, %13 : vector<128x16xi1>
    %15 = arith.andi %14, %8 : vector<128x16xi1>
    %16 = vector.broadcast %4 : i32 to vector<128x16xi32>
    %17 = arith.addi %6, %16 : vector<128x16xi32>
    %18 = arith.select %15, %17, %6 : vector<128x16xi1>, vector<128x16xi32>
    %c0_i32_4 = arith.constant 0 : i32
    %19 = vector.broadcast %c0_i32_4 : i32 to vector<128x16xi32>
    %20 = arith.cmpi eq, %18, %19 : vector<128x16xi32>
    %21 = vector.extract_strided_slice %0 {offsets = [0, 0], sizes = [127, 16], strides = [1, 1]} : vector<128x16xf32> to vector<127x16xf32>
    %22 = tpu.concatenate %2, %21 in 0 : vector<1x16xf32>, vector<127x16xf32> -> vector<128x16xf32>
    %cst_5 = arith.constant 0.000000e+00 : f32
    %23 = vector.broadcast %cst_5 : f32 to vector<128x16xf32>
    %24 = arith.select %20, %23, %22 : vector<128x16xi1>, vector<128x16xf32>
    %c16_i32_6 = arith.constant 16 : i32
    %c0_i32_7 = arith.constant 0 : i32
    %25 = arith.cmpi eq, %c16_i32_6, %c0_i32_7 : i32
    %c1_i32_8 = arith.constant 1 : i32
    %26 = arith.select %25, %c1_i32_8, %c16_i32_6 : i32
    %27 = vector.broadcast %26 : i32 to vector<128x16xi32>
    %28 = arith.remsi %1, %27 : vector<128x16xi32>
    %c0_i32_9 = arith.constant 0 : i32
    %29 = vector.broadcast %c0_i32_9 : i32 to vector<128x16xi32>
    %30 = arith.cmpi ne, %28, %29 : vector<128x16xi32>
    %c0_i32_10 = arith.constant 0 : i32
    %31 = vector.broadcast %c0_i32_10 : i32 to vector<128x16xi32>
    %32 = arith.cmpi slt, %28, %31 : vector<128x16xi32>
    %c0_i32_11 = arith.constant 0 : i32
    %33 = arith.cmpi slt, %26, %c0_i32_11 : i32
    %34 = vector.broadcast %33 : i1 to vector<128x16xi1>
    %35 = vector.broadcast %34 : vector<128x16xi1> to vector<128x16xi1>
    %36 = arith.xori %32, %35 : vector<128x16xi1>
    %37 = arith.andi %36, %30 : vector<128x16xi1>
    %38 = vector.broadcast %26 : i32 to vector<128x16xi32>
    %39 = arith.addi %28, %38 : vector<128x16xi32>
    %40 = arith.select %37, %39, %28 : vector<128x16xi1>, vector<128x16xi32>
    %c15_i32 = arith.constant 15 : i32
    %41 = vector.broadcast %c15_i32 : i32 to vector<128x16xi32>
    %42 = arith.cmpi eq, %40, %41 : vector<128x16xi32>
    %43 = vector.extract_strided_slice %0 {offsets = [1, 0], sizes = [127, 16], strides = [1, 1]} : vector<128x16xf32> to vector<127x16xf32>
    %44 = tpu.concatenate %43, %2 in 0 : vector<127x16xf32>, vector<1x16xf32> -> vector<128x16xf32>
    %cst_12 = arith.constant 0.000000e+00 : f32
    %45 = vector.broadcast %cst_12 : f32 to vector<128x16xf32>
    %46 = arith.select %42, %45, %44 : vector<128x16xi1>, vector<128x16xf32>
    %47 = tpu.concatenate %24, %0, %46 in 1 : vector<128x16xf32>, vector<128x16xf32>, vector<128x16xf32> -> vector<128x48xf32>
    %c0_13 = arith.constant 0 : index
    %c0_14 = arith.constant 0 : index
    %48 = vector.load %arg2[%c0_13, %c0_14] : memref<48x256xf32, #tpu.memory_space<vmem>>, vector<48x256xf32>
    %cst_15 = arith.constant dense<0.000000e+00> : vector<128x256xf32>
    %49 = tpu.matmul %47, %48, %cst_15 {dimension_numbers = #tpu.dot_dimension_numbers<[1], [0], [0], [1], [0, 0, 1, 1], [], []>} : vector<128x48xf32>, vector<48x256xf32>, vector<128x256xf32> -> vector<128x256xf32>
    %50 = vector.extract_strided_slice %49 {offsets = [0, 128], sizes = [128, 128], strides = [1, 1]} : vector<128x256xf32> to vector<128x128xf32>
    %51 = vector.extract_strided_slice %49 {offsets = [0, 0], sizes = [128, 128], strides = [1, 1]} : vector<128x256xf32> to vector<128x128xf32>
    %cst_16 = arith.constant 0.000000e+00 : f32
    %52 = vector.broadcast %cst_16 : f32 to vector<128x128xf32>
    %53 = arith.cmpf oge, %51, %52 : vector<128x128xf32>
    %cst_17 = arith.constant 0.00999999977 : f32
    %54 = vector.broadcast %cst_17 : f32 to vector<128x128xf32>
    %55 = arith.mulf %54, %51 : vector<128x128xf32>
    %56 = arith.select %53, %51, %55 : vector<128x128xi1>, vector<128x128xf32>
    %57 = arith.mulf %56, %56 : vector<128x128xf32>
    %58 = tpu.concatenate %56, %57 in 0 : vector<128x128xf32>, vector<128x128xf32> -> vector<256x128xf32>
    %c0_18 = arith.constant 0 : index
    %c0_19 = arith.constant 0 : index
    %59 = vector.load %arg5[%c0_18, %c0_19] : memref<16x256xf32, #tpu.memory_space<vmem>>, vector<16x256xf32>
    %cst_20 = arith.constant dense<0.000000e+00> : vector<16x128xf32>
    %60 = tpu.matmul %59, %58, %cst_20 {dimension_numbers = #tpu.dot_dimension_numbers<[1], [0], [0], [1], [0, 0, 1, 1], [], []>} : vector<16x256xf32>, vector<256x128xf32>, vector<16x128xf32> -> vector<16x128xf32>
    %c0_21 = arith.constant 0 : index
    %c0_22 = arith.constant 0 : index
    %61 = vector.load %arg4[%c0_21, %c0_22] : memref<128x128xf32, #tpu.memory_space<vmem>>, vector<128x128xf32>
    %cst_23 = arith.constant dense<0.000000e+00> : vector<16x128xf32>
    %62 = tpu.matmul %60, %61, %cst_23 {dimension_numbers = #tpu.dot_dimension_numbers<[1], [0], [0], [1], [0, 0, 1, 1], [], []>} : vector<16x128xf32>, vector<128x128xf32>, vector<16x128xf32> -> vector<16x128xf32>
    %63 = vector.extract_strided_slice %62 {offsets = [0, 0], sizes = [8, 128], strides = [1, 1]} : vector<16x128xf32> to vector<8x128xf32>
    %64 = vector.extract_strided_slice %62 {offsets = [8, 0], sizes = [8, 128], strides = [1, 1]} : vector<16x128xf32> to vector<8x128xf32>
    %c0_24 = arith.constant 0 : index
    %c0_25 = arith.constant 0 : index
    %65 = vector.load %arg7[%c0_24, %c0_25] : memref<4x128xf32, #tpu.memory_space<vmem>>, vector<4x128xf32>
    %66 = vector.extract_strided_slice %65 {offsets = [0, 0], sizes = [1, 128], strides = [1, 1]} : vector<4x128xf32> to vector<1x128xf32>
    %67 = vector.extract_strided_slice %65 {offsets = [1, 0], sizes = [1, 128], strides = [1, 1]} : vector<4x128xf32> to vector<1x128xf32>
    %68 = arith.mulf %63, %63 : vector<8x128xf32>
    %69 = arith.subf %64, %68 : vector<8x128xf32>
    %cst_26 = arith.constant 9.99999974E-6 : f32
    %70 = vector.broadcast %cst_26 : f32 to vector<8x128xf32>
    %71 = arith.addf %69, %70 : vector<8x128xf32>
    %72 = math.rsqrt %71 : vector<8x128xf32>
    %73 = vector.broadcast %66 : vector<1x128xf32> to vector<8x128xf32>
    %74 = arith.mulf %72, %73 : vector<8x128xf32>
    %75 = arith.mulf %63, %74 : vector<8x128xf32>
    %76 = vector.broadcast %67 : vector<1x128xf32> to vector<8x128xf32>
    %77 = arith.subf %76, %75 : vector<8x128xf32>
    %c0_27 = arith.constant 0 : index
    %c0_28 = arith.constant 0 : index
    %78 = vector.load %arg6[%c0_27, %c0_28] : memref<128x8xf32, #tpu.memory_space<vmem>>, vector<128x8xf32>
    %79 = tpu.concatenate %74, %77 in 1 : vector<8x128xf32>, vector<8x128xf32> -> vector<8x256xf32>
    %cst_29 = arith.constant dense<0.000000e+00> : vector<128x256xf32>
    %80 = tpu.matmul %78, %79, %cst_29 {dimension_numbers = #tpu.dot_dimension_numbers<[1], [0], [0], [1], [0, 0, 1, 1], [], []>} : vector<128x8xf32>, vector<8x256xf32>, vector<128x256xf32> -> vector<128x256xf32>
    %81 = vector.extract_strided_slice %80 {offsets = [0, 0], sizes = [128, 128], strides = [1, 1]} : vector<128x256xf32> to vector<128x128xf32>
    %82 = arith.mulf %56, %81 : vector<128x128xf32>
    %83 = vector.extract_strided_slice %80 {offsets = [0, 128], sizes = [128, 128], strides = [1, 1]} : vector<128x256xf32> to vector<128x128xf32>
    %84 = arith.addf %82, %83 : vector<128x128xf32>
    %85 = tpu.iota {dimensions = array<i32: 0>} : vector<128x128xi32>
    %cst_30 = arith.constant 0.000000e+00 : f32
    %86 = vector.broadcast %cst_30 : f32 to vector<1x128xf32>
    %c16_i32_31 = arith.constant 16 : i32
    %c0_i32_32 = arith.constant 0 : i32
    %87 = arith.cmpi eq, %c16_i32_31, %c0_i32_32 : i32
    %c1_i32_33 = arith.constant 1 : i32
    %88 = arith.select %87, %c1_i32_33, %c16_i32_31 : i32
    %89 = vector.broadcast %88 : i32 to vector<128x128xi32>
    %90 = arith.remsi %85, %89 : vector<128x128xi32>
    %c0_i32_34 = arith.constant 0 : i32
    %91 = vector.broadcast %c0_i32_34 : i32 to vector<128x128xi32>
    %92 = arith.cmpi ne, %90, %91 : vector<128x128xi32>
    %c0_i32_35 = arith.constant 0 : i32
    %93 = vector.broadcast %c0_i32_35 : i32 to vector<128x128xi32>
    %94 = arith.cmpi slt, %90, %93 : vector<128x128xi32>
    %c0_i32_36 = arith.constant 0 : i32
    %95 = arith.cmpi slt, %88, %c0_i32_36 : i32
    %96 = vector.broadcast %95 : i1 to vector<128x128xi1>
    %97 = vector.broadcast %96 : vector<128x128xi1> to vector<128x128xi1>
    %98 = arith.xori %94, %97 : vector<128x128xi1>
    %99 = arith.andi %98, %92 : vector<128x128xi1>
    %100 = vector.broadcast %88 : i32 to vector<128x128xi32>
    %101 = arith.addi %90, %100 : vector<128x128xi32>
    %102 = arith.select %99, %101, %90 : vector<128x128xi1>, vector<128x128xi32>
    %c0_i32_37 = arith.constant 0 : i32
    %103 = vector.broadcast %c0_i32_37 : i32 to vector<128x128xi32>
    %104 = arith.cmpi eq, %102, %103 : vector<128x128xi32>
    %105 = vector.extract_strided_slice %84 {offsets = [0, 0], sizes = [127, 128], strides = [1, 1]} : vector<128x128xf32> to vector<127x128xf32>
    %106 = tpu.concatenate %86, %105 in 0 : vector<1x128xf32>, vector<127x128xf32> -> vector<128x128xf32>
    %cst_38 = arith.constant 0.000000e+00 : f32
    %107 = vector.broadcast %cst_38 : f32 to vector<128x128xf32>
    %108 = arith.select %104, %107, %106 : vector<128x128xi1>, vector<128x128xf32>
    %c16_i32_39 = arith.constant 16 : i32
    %c0_i32_40 = arith.constant 0 : i32
    %109 = arith.cmpi eq, %c16_i32_39, %c0_i32_40 : i32
    %c1_i32_41 = arith.constant 1 : i32
    %110 = arith.select %109, %c1_i32_41, %c16_i32_39 : i32
    %111 = vector.broadcast %110 : i32 to vector<128x128xi32>
    %112 = arith.remsi %85, %111 : vector<128x128xi32>
    %c0_i32_42 = arith.constant 0 : i32
    %113 = vector.broadcast %c0_i32_42 : i32 to vector<128x128xi32>
    %114 = arith.cmpi ne, %112, %113 : vector<128x128xi32>
    %c0_i32_43 = arith.constant 0 : i32
    %115 = vector.broadcast %c0_i32_43 : i32 to vector<128x128xi32>
    %116 = arith.cmpi slt, %112, %115 : vector<128x128xi32>
    %c0_i32_44 = arith.constant 0 : i32
    %117 = arith.cmpi slt, %110, %c0_i32_44 : i32
    %118 = vector.broadcast %117 : i1 to vector<128x128xi1>
    %119 = vector.broadcast %118 : vector<128x128xi1> to vector<128x128xi1>
    %120 = arith.xori %116, %119 : vector<128x128xi1>
    %121 = arith.andi %120, %114 : vector<128x128xi1>
    %122 = vector.broadcast %110 : i32 to vector<128x128xi32>
    %123 = arith.addi %112, %122 : vector<128x128xi32>
    %124 = arith.select %121, %123, %112 : vector<128x128xi1>, vector<128x128xi32>
    %c15_i32_45 = arith.constant 15 : i32
    %125 = vector.broadcast %c15_i32_45 : i32 to vector<128x128xi32>
    %126 = arith.cmpi eq, %124, %125 : vector<128x128xi32>
    %127 = vector.extract_strided_slice %84 {offsets = [1, 0], sizes = [127, 128], strides = [1, 1]} : vector<128x128xf32> to vector<127x128xf32>
    %128 = tpu.concatenate %127, %86 in 0 : vector<127x128xf32>, vector<1x128xf32> -> vector<128x128xf32>
    %cst_46 = arith.constant 0.000000e+00 : f32
    %129 = vector.broadcast %cst_46 : f32 to vector<128x128xf32>
    %130 = arith.select %126, %129, %128 : vector<128x128xi1>, vector<128x128xf32>
    %131 = tpu.concatenate %108, %84, %130 in 1 : vector<128x128xf32>, vector<128x128xf32>, vector<128x128xf32> -> vector<128x384xf32>
    %c0_47 = arith.constant 0 : index
    %c0_48 = arith.constant 0 : index
    %132 = vector.load %arg3[%c0_47, %c0_48] : memref<384x128xf32, #tpu.memory_space<vmem>>, vector<384x128xf32>
    %cst_49 = arith.constant dense<0.000000e+00> : vector<128x128xf32>
    %133 = tpu.matmul %131, %132, %cst_49 {dimension_numbers = #tpu.dot_dimension_numbers<[1], [0], [0], [1], [0, 0, 1, 1], [], []>} : vector<128x384xf32>, vector<384x128xf32>, vector<128x128xf32> -> vector<128x128xf32>
    %134 = arith.addf %133, %50 : vector<128x128xf32>
    %cst_50 = arith.constant 0.000000e+00 : f32
    %135 = vector.broadcast %cst_50 : f32 to vector<128x128xf32>
    %136 = arith.cmpf oge, %134, %135 : vector<128x128xf32>
    %cst_51 = arith.constant 0.00999999977 : f32
    %137 = vector.broadcast %cst_51 : f32 to vector<128x128xf32>
    %138 = arith.mulf %137, %134 : vector<128x128xf32>
    %139 = arith.select %136, %134, %138 : vector<128x128xi1>, vector<128x128xf32>
    %140 = arith.mulf %139, %139 : vector<128x128xf32>
    %141 = tpu.concatenate %139, %140 in 0 : vector<128x128xf32>, vector<128x128xf32> -> vector<256x128xf32>
    %c0_52 = arith.constant 0 : index
    %c0_53 = arith.constant 0 : index
    %142 = vector.load %arg5[%c0_52, %c0_53] : memref<16x256xf32, #tpu.memory_space<vmem>>, vector<16x256xf32>
    %cst_54 = arith.constant dense<0.000000e+00> : vector<16x128xf32>
    %143 = tpu.matmul %142, %141, %cst_54 {dimension_numbers = #tpu.dot_dimension_numbers<[1], [0], [0], [1], [0, 0, 1, 1], [], []>} : vector<16x256xf32>, vector<256x128xf32>, vector<16x128xf32> -> vector<16x128xf32>
    %c0_55 = arith.constant 0 : index
    %c0_56 = arith.constant 0 : index
    %144 = vector.load %arg4[%c0_55, %c0_56] : memref<128x128xf32, #tpu.memory_space<vmem>>, vector<128x128xf32>
    %cst_57 = arith.constant dense<0.000000e+00> : vector<16x128xf32>
    %145 = tpu.matmul %143, %144, %cst_57 {dimension_numbers = #tpu.dot_dimension_numbers<[1], [0], [0], [1], [0, 0, 1, 1], [], []>} : vector<16x128xf32>, vector<128x128xf32>, vector<16x128xf32> -> vector<16x128xf32>
    %146 = vector.extract_strided_slice %145 {offsets = [0, 0], sizes = [8, 128], strides = [1, 1]} : vector<16x128xf32> to vector<8x128xf32>
    %147 = vector.extract_strided_slice %145 {offsets = [8, 0], sizes = [8, 128], strides = [1, 1]} : vector<16x128xf32> to vector<8x128xf32>
    %c0_58 = arith.constant 0 : index
    %c0_59 = arith.constant 0 : index
    %148 = vector.load %arg7[%c0_58, %c0_59] : memref<4x128xf32, #tpu.memory_space<vmem>>, vector<4x128xf32>
    %149 = vector.extract_strided_slice %148 {offsets = [2, 0], sizes = [1, 128], strides = [1, 1]} : vector<4x128xf32> to vector<1x128xf32>
    %150 = vector.extract_strided_slice %148 {offsets = [3, 0], sizes = [1, 128], strides = [1, 1]} : vector<4x128xf32> to vector<1x128xf32>
    %151 = arith.mulf %146, %146 : vector<8x128xf32>
    %152 = arith.subf %147, %151 : vector<8x128xf32>
    %cst_60 = arith.constant 9.99999974E-6 : f32
    %153 = vector.broadcast %cst_60 : f32 to vector<8x128xf32>
    %154 = arith.addf %152, %153 : vector<8x128xf32>
    %155 = math.rsqrt %154 : vector<8x128xf32>
    %156 = vector.broadcast %149 : vector<1x128xf32> to vector<8x128xf32>
    %157 = arith.mulf %155, %156 : vector<8x128xf32>
    %158 = arith.mulf %146, %157 : vector<8x128xf32>
    %159 = vector.broadcast %150 : vector<1x128xf32> to vector<8x128xf32>
    %160 = arith.subf %159, %158 : vector<8x128xf32>
    %c0_61 = arith.constant 0 : index
    %c0_62 = arith.constant 0 : index
    %161 = vector.load %arg6[%c0_61, %c0_62] : memref<128x8xf32, #tpu.memory_space<vmem>>, vector<128x8xf32>
    %162 = tpu.concatenate %157, %160 in 1 : vector<8x128xf32>, vector<8x128xf32> -> vector<8x256xf32>
    %cst_63 = arith.constant dense<0.000000e+00> : vector<128x256xf32>
    %163 = tpu.matmul %161, %162, %cst_63 {dimension_numbers = #tpu.dot_dimension_numbers<[1], [0], [0], [1], [0, 0, 1, 1], [], []>} : vector<128x8xf32>, vector<8x256xf32>, vector<128x256xf32> -> vector<128x256xf32>
    %164 = vector.extract_strided_slice %163 {offsets = [0, 0], sizes = [128, 128], strides = [1, 1]} : vector<128x256xf32> to vector<128x128xf32>
    %165 = arith.mulf %139, %164 : vector<128x128xf32>
    %166 = vector.extract_strided_slice %163 {offsets = [0, 128], sizes = [128, 128], strides = [1, 1]} : vector<128x256xf32> to vector<128x128xf32>
    %167 = arith.addf %165, %166 : vector<128x128xf32>
    %168 = vector.extract_strided_slice %167 {offsets = [0, 8], sizes = [128, 120], strides = [1, 1]} : vector<128x128xf32> to vector<128x120xf32>
    %169 = vector.extract_strided_slice %167 {offsets = [0, 0], sizes = [128, 8], strides = [1, 1]} : vector<128x128xf32> to vector<128x8xf32>
    %170 = tpu.concatenate %168, %169 in 1 : vector<128x120xf32>, vector<128x8xf32> -> vector<128x128xf32>
    %171 = arith.maximumf %167, %170 : vector<128x128xf32>
    %172 = vector.extract_strided_slice %171 {offsets = [1, 0], sizes = [127, 128], strides = [1, 1]} : vector<128x128xf32> to vector<127x128xf32>
    %173 = vector.extract_strided_slice %171 {offsets = [0, 0], sizes = [1, 128], strides = [1, 1]} : vector<128x128xf32> to vector<1x128xf32>
    %174 = tpu.concatenate %172, %173 in 0 : vector<127x128xf32>, vector<1x128xf32> -> vector<128x128xf32>
    %175 = arith.maximumf %171, %174 : vector<128x128xf32>
    %c0_64 = arith.constant 0 : index
    %c0_65 = arith.constant 0 : index
    %176 = vector.load %arg8[%c0_64, %c0_65] : memref<64x128xf32, #tpu.memory_space<vmem>>, vector<64x128xf32>
    %cst_66 = arith.constant dense<0.000000e+00> : vector<64x128xf32>
    %177 = tpu.matmul %176, %175, %cst_66 {dimension_numbers = #tpu.dot_dimension_numbers<[1], [0], [0], [1], [0, 0, 1, 1], [], []>} : vector<64x128xf32>, vector<128x128xf32>, vector<64x128xf32> -> vector<64x128xf32>
    %178 = tpu.iota {dimensions = array<i32: 0>} : vector<64x128xi32>
    %cst_67 = arith.constant 0.000000e+00 : f32
    %179 = vector.broadcast %cst_67 : f32 to vector<1x128xf32>
    %c8_i32 = arith.constant 8 : i32
    %c0_i32_68 = arith.constant 0 : i32
    %180 = arith.cmpi eq, %c8_i32, %c0_i32_68 : i32
    %c1_i32_69 = arith.constant 1 : i32
    %181 = arith.select %180, %c1_i32_69, %c8_i32 : i32
    %182 = vector.broadcast %181 : i32 to vector<64x128xi32>
    %183 = arith.remsi %178, %182 : vector<64x128xi32>
    %c0_i32_70 = arith.constant 0 : i32
    %184 = vector.broadcast %c0_i32_70 : i32 to vector<64x128xi32>
    %185 = arith.cmpi ne, %183, %184 : vector<64x128xi32>
    %c0_i32_71 = arith.constant 0 : i32
    %186 = vector.broadcast %c0_i32_71 : i32 to vector<64x128xi32>
    %187 = arith.cmpi slt, %183, %186 : vector<64x128xi32>
    %c0_i32_72 = arith.constant 0 : i32
    %188 = arith.cmpi slt, %181, %c0_i32_72 : i32
    %189 = vector.broadcast %188 : i1 to vector<64x128xi1>
    %190 = vector.broadcast %189 : vector<64x128xi1> to vector<64x128xi1>
    %191 = arith.xori %187, %190 : vector<64x128xi1>
    %192 = arith.andi %191, %185 : vector<64x128xi1>
    %193 = vector.broadcast %181 : i32 to vector<64x128xi32>
    %194 = arith.addi %183, %193 : vector<64x128xi32>
    %195 = arith.select %192, %194, %183 : vector<64x128xi1>, vector<64x128xi32>
    %c0_i32_73 = arith.constant 0 : i32
    %196 = vector.broadcast %c0_i32_73 : i32 to vector<64x128xi32>
    %197 = arith.cmpi eq, %195, %196 : vector<64x128xi32>
    %198 = vector.extract_strided_slice %177 {offsets = [0, 0], sizes = [63, 128], strides = [1, 1]} : vector<64x128xf32> to vector<63x128xf32>
    %199 = tpu.concatenate %179, %198 in 0 : vector<1x128xf32>, vector<63x128xf32> -> vector<64x128xf32>
    %cst_74 = arith.constant 0.000000e+00 : f32
    %200 = vector.broadcast %cst_74 : f32 to vector<64x128xf32>
    %201 = arith.select %197, %200, %199 : vector<64x128xi1>, vector<64x128xf32>
    %c8_i32_75 = arith.constant 8 : i32
    %c0_i32_76 = arith.constant 0 : i32
    %202 = arith.cmpi eq, %c8_i32_75, %c0_i32_76 : i32
    %c1_i32_77 = arith.constant 1 : i32
    %203 = arith.select %202, %c1_i32_77, %c8_i32_75 : i32
    %204 = vector.broadcast %203 : i32 to vector<64x128xi32>
    %205 = arith.remsi %178, %204 : vector<64x128xi32>
    %c0_i32_78 = arith.constant 0 : i32
    %206 = vector.broadcast %c0_i32_78 : i32 to vector<64x128xi32>
    %207 = arith.cmpi ne, %205, %206 : vector<64x128xi32>
    %c0_i32_79 = arith.constant 0 : i32
    %208 = vector.broadcast %c0_i32_79 : i32 to vector<64x128xi32>
    %209 = arith.cmpi slt, %205, %208 : vector<64x128xi32>
    %c0_i32_80 = arith.constant 0 : i32
    %210 = arith.cmpi slt, %203, %c0_i32_80 : i32
    %211 = vector.broadcast %210 : i1 to vector<64x128xi1>
    %212 = vector.broadcast %211 : vector<64x128xi1> to vector<64x128xi1>
    %213 = arith.xori %209, %212 : vector<64x128xi1>
    %214 = arith.andi %213, %207 : vector<64x128xi1>
    %215 = vector.broadcast %203 : i32 to vector<64x128xi32>
    %216 = arith.addi %205, %215 : vector<64x128xi32>
    %217 = arith.select %214, %216, %205 : vector<64x128xi1>, vector<64x128xi32>
    %c7_i32 = arith.constant 7 : i32
    %218 = vector.broadcast %c7_i32 : i32 to vector<64x128xi32>
    %219 = arith.cmpi eq, %217, %218 : vector<64x128xi32>
    %220 = vector.extract_strided_slice %177 {offsets = [1, 0], sizes = [63, 128], strides = [1, 1]} : vector<64x128xf32> to vector<63x128xf32>
    %221 = tpu.concatenate %220, %179 in 0 : vector<63x128xf32>, vector<1x128xf32> -> vector<64x128xf32>
    %cst_81 = arith.constant 0.000000e+00 : f32
    %222 = vector.broadcast %cst_81 : f32 to vector<64x128xf32>
    %223 = arith.select %219, %222, %221 : vector<64x128xi1>, vector<64x128xf32>
    %224 = tpu.concatenate %201, %177, %223 in 1 : vector<64x128xf32>, vector<64x128xf32>, vector<64x128xf32> -> vector<64x384xf32>
    %c0_82 = arith.constant 0 : index
    %c0_83 = arith.constant 0 : index
    %225 = vector.load %arg9[%c0_82, %c0_83] : memref<384x256xf32, #tpu.memory_space<vmem>>, vector<384x256xf32>
    %cst_84 = arith.constant dense<0.000000e+00> : vector<64x256xf32>
    %226 = tpu.matmul %224, %225, %cst_84 {dimension_numbers = #tpu.dot_dimension_numbers<[1], [0], [0], [1], [0, 0, 1, 1], [], []>} : vector<64x384xf32>, vector<384x256xf32>, vector<64x256xf32> -> vector<64x256xf32>
    %227 = vector.extract_strided_slice %226 {offsets = [0, 128], sizes = [64, 128], strides = [1, 1]} : vector<64x256xf32> to vector<64x128xf32>
    %228 = vector.extract_strided_slice %226 {offsets = [0, 0], sizes = [64, 128], strides = [1, 1]} : vector<64x256xf32> to vector<64x128xf32>
    %cst_85 = arith.constant 0.000000e+00 : f32
    %229 = vector.broadcast %cst_85 : f32 to vector<64x128xf32>
    %230 = arith.cmpf oge, %228, %229 : vector<64x128xf32>
    %cst_86 = arith.constant 0.00999999977 : f32
    %231 = vector.broadcast %cst_86 : f32 to vector<64x128xf32>
    %232 = arith.mulf %231, %228 : vector<64x128xf32>
    %233 = arith.select %230, %228, %232 : vector<64x128xi1>, vector<64x128xf32>
    %234 = arith.mulf %233, %233 : vector<64x128xf32>
    %235 = tpu.concatenate %233, %234 in 0 : vector<64x128xf32>, vector<64x128xf32> -> vector<128x128xf32>
    %c0_87 = arith.constant 0 : index
    %c0_88 = arith.constant 0 : index
    %236 = vector.load %arg12[%c0_87, %c0_88] : memref<16x128xf32, #tpu.memory_space<vmem>>, vector<16x128xf32>
    %cst_89 = arith.constant dense<0.000000e+00> : vector<16x128xf32>
    %237 = tpu.matmul %236, %235, %cst_89 {dimension_numbers = #tpu.dot_dimension_numbers<[1], [0], [0], [1], [0, 0, 1, 1], [], []>} : vector<16x128xf32>, vector<128x128xf32>, vector<16x128xf32> -> vector<16x128xf32>
    %c0_90 = arith.constant 0 : index
    %c0_91 = arith.constant 0 : index
    %238 = vector.load %arg11[%c0_90, %c0_91] : memref<128x128xf32, #tpu.memory_space<vmem>>, vector<128x128xf32>
    %cst_92 = arith.constant dense<0.000000e+00> : vector<16x128xf32>
    %239 = tpu.matmul %237, %238, %cst_92 {dimension_numbers = #tpu.dot_dimension_numbers<[1], [0], [0], [1], [0, 0, 1, 1], [], []>} : vector<16x128xf32>, vector<128x128xf32>, vector<16x128xf32> -> vector<16x128xf32>
    %240 = vector.extract_strided_slice %239 {offsets = [0, 0], sizes = [8, 128], strides = [1, 1]} : vector<16x128xf32> to vector<8x128xf32>
    %241 = vector.extract_strided_slice %239 {offsets = [8, 0], sizes = [8, 128], strides = [1, 1]} : vector<16x128xf32> to vector<8x128xf32>
    %c0_93 = arith.constant 0 : index
    %c0_94 = arith.constant 0 : index
    %242 = vector.load %arg14[%c0_93, %c0_94] : memref<4x128xf32, #tpu.memory_space<vmem>>, vector<4x128xf32>
    %243 = vector.extract_strided_slice %242 {offsets = [0, 0], sizes = [1, 128], strides = [1, 1]} : vector<4x128xf32> to vector<1x128xf32>
    %244 = vector.extract_strided_slice %242 {offsets = [1, 0], sizes = [1, 128], strides = [1, 1]} : vector<4x128xf32> to vector<1x128xf32>
    %245 = arith.mulf %240, %240 : vector<8x128xf32>
    %246 = arith.subf %241, %245 : vector<8x128xf32>
    %cst_95 = arith.constant 9.99999974E-6 : f32
    %247 = vector.broadcast %cst_95 : f32 to vector<8x128xf32>
    %248 = arith.addf %246, %247 : vector<8x128xf32>
    %249 = math.rsqrt %248 : vector<8x128xf32>
    %250 = vector.broadcast %243 : vector<1x128xf32> to vector<8x128xf32>
    %251 = arith.mulf %249, %250 : vector<8x128xf32>
    %252 = arith.mulf %240, %251 : vector<8x128xf32>
    %253 = vector.broadcast %244 : vector<1x128xf32> to vector<8x128xf32>
    %254 = arith.subf %253, %252 : vector<8x128xf32>
    %c0_96 = arith.constant 0 : index
    %c0_97 = arith.constant 0 : index
    %255 = vector.load %arg13[%c0_96, %c0_97] : memref<64x8xf32, #tpu.memory_space<vmem>>, vector<64x8xf32>
    %256 = tpu.concatenate %251, %254 in 1 : vector<8x128xf32>, vector<8x128xf32> -> vector<8x256xf32>
    %cst_98 = arith.constant dense<0.000000e+00> : vector<64x256xf32>
    %257 = tpu.matmul %255, %256, %cst_98 {dimension_numbers = #tpu.dot_dimension_numbers<[1], [0], [0], [1], [0, 0, 1, 1], [], []>} : vector<64x8xf32>, vector<8x256xf32>, vector<64x256xf32> -> vector<64x256xf32>
    %258 = vector.extract_strided_slice %257 {offsets = [0, 0], sizes = [64, 128], strides = [1, 1]} : vector<64x256xf32> to vector<64x128xf32>
    %259 = arith.mulf %233, %258 : vector<64x128xf32>
    %260 = vector.extract_strided_slice %257 {offsets = [0, 128], sizes = [64, 128], strides = [1, 1]} : vector<64x256xf32> to vector<64x128xf32>
    %261 = arith.addf %259, %260 : vector<64x128xf32>
    %262 = tpu.iota {dimensions = array<i32: 0>} : vector<64x128xi32>
    %cst_99 = arith.constant 0.000000e+00 : f32
    %263 = vector.broadcast %cst_99 : f32 to vector<1x128xf32>
    %c8_i32_100 = arith.constant 8 : i32
    %c0_i32_101 = arith.constant 0 : i32
    %264 = arith.cmpi eq, %c8_i32_100, %c0_i32_101 : i32
    %c1_i32_102 = arith.constant 1 : i32
    %265 = arith.select %264, %c1_i32_102, %c8_i32_100 : i32
    %266 = vector.broadcast %265 : i32 to vector<64x128xi32>
    %267 = arith.remsi %262, %266 : vector<64x128xi32>
    %c0_i32_103 = arith.constant 0 : i32
    %268 = vector.broadcast %c0_i32_103 : i32 to vector<64x128xi32>
    %269 = arith.cmpi ne, %267, %268 : vector<64x128xi32>
    %c0_i32_104 = arith.constant 0 : i32
    %270 = vector.broadcast %c0_i32_104 : i32 to vector<64x128xi32>
    %271 = arith.cmpi slt, %267, %270 : vector<64x128xi32>
    %c0_i32_105 = arith.constant 0 : i32
    %272 = arith.cmpi slt, %265, %c0_i32_105 : i32
    %273 = vector.broadcast %272 : i1 to vector<64x128xi1>
    %274 = vector.broadcast %273 : vector<64x128xi1> to vector<64x128xi1>
    %275 = arith.xori %271, %274 : vector<64x128xi1>
    %276 = arith.andi %275, %269 : vector<64x128xi1>
    %277 = vector.broadcast %265 : i32 to vector<64x128xi32>
    %278 = arith.addi %267, %277 : vector<64x128xi32>
    %279 = arith.select %276, %278, %267 : vector<64x128xi1>, vector<64x128xi32>
    %c0_i32_106 = arith.constant 0 : i32
    %280 = vector.broadcast %c0_i32_106 : i32 to vector<64x128xi32>
    %281 = arith.cmpi eq, %279, %280 : vector<64x128xi32>
    %282 = vector.extract_strided_slice %261 {offsets = [0, 0], sizes = [63, 128], strides = [1, 1]} : vector<64x128xf32> to vector<63x128xf32>
    %283 = tpu.concatenate %263, %282 in 0 : vector<1x128xf32>, vector<63x128xf32> -> vector<64x128xf32>
    %cst_107 = arith.constant 0.000000e+00 : f32
    %284 = vector.broadcast %cst_107 : f32 to vector<64x128xf32>
    %285 = arith.select %281, %284, %283 : vector<64x128xi1>, vector<64x128xf32>
    %c8_i32_108 = arith.constant 8 : i32
    %c0_i32_109 = arith.constant 0 : i32
    %286 = arith.cmpi eq, %c8_i32_108, %c0_i32_109 : i32
    %c1_i32_110 = arith.constant 1 : i32
    %287 = arith.select %286, %c1_i32_110, %c8_i32_108 : i32
    %288 = vector.broadcast %287 : i32 to vector<64x128xi32>
    %289 = arith.remsi %262, %288 : vector<64x128xi32>
    %c0_i32_111 = arith.constant 0 : i32
    %290 = vector.broadcast %c0_i32_111 : i32 to vector<64x128xi32>
    %291 = arith.cmpi ne, %289, %290 : vector<64x128xi32>
    %c0_i32_112 = arith.constant 0 : i32
    %292 = vector.broadcast %c0_i32_112 : i32 to vector<64x128xi32>
    %293 = arith.cmpi slt, %289, %292 : vector<64x128xi32>
    %c0_i32_113 = arith.constant 0 : i32
    %294 = arith.cmpi slt, %287, %c0_i32_113 : i32
    %295 = vector.broadcast %294 : i1 to vector<64x128xi1>
    %296 = vector.broadcast %295 : vector<64x128xi1> to vector<64x128xi1>
    %297 = arith.xori %293, %296 : vector<64x128xi1>
    %298 = arith.andi %297, %291 : vector<64x128xi1>
    %299 = vector.broadcast %287 : i32 to vector<64x128xi32>
    %300 = arith.addi %289, %299 : vector<64x128xi32>
    %301 = arith.select %298, %300, %289 : vector<64x128xi1>, vector<64x128xi32>
    %c7_i32_114 = arith.constant 7 : i32
    %302 = vector.broadcast %c7_i32_114 : i32 to vector<64x128xi32>
    %303 = arith.cmpi eq, %301, %302 : vector<64x128xi32>
    %304 = vector.extract_strided_slice %261 {offsets = [1, 0], sizes = [63, 128], strides = [1, 1]} : vector<64x128xf32> to vector<63x128xf32>
    %305 = tpu.concatenate %304, %263 in 0 : vector<63x128xf32>, vector<1x128xf32> -> vector<64x128xf32>
    %cst_115 = arith.constant 0.000000e+00 : f32
    %306 = vector.broadcast %cst_115 : f32 to vector<64x128xf32>
    %307 = arith.select %303, %306, %305 : vector<64x128xi1>, vector<64x128xf32>
    %308 = tpu.concatenate %285, %261, %307 in 1 : vector<64x128xf32>, vector<64x128xf32>, vector<64x128xf32> -> vector<64x384xf32>
    %c0_116 = arith.constant 0 : index
    %c0_117 = arith.constant 0 : index
    %309 = vector.load %arg10[%c0_116, %c0_117] : memref<384x128xf32, #tpu.memory_space<vmem>>, vector<384x128xf32>
    %cst_118 = arith.constant dense<0.000000e+00> : vector<64x128xf32>
    %310 = tpu.matmul %308, %309, %cst_118 {dimension_numbers = #tpu.dot_dimension_numbers<[1], [0], [0], [1], [0, 0, 1, 1], [], []>} : vector<64x384xf32>, vector<384x128xf32>, vector<64x128xf32> -> vector<64x128xf32>
    %311 = arith.addf %310, %227 : vector<64x128xf32>
    %cst_119 = arith.constant 0.000000e+00 : f32
    %312 = vector.broadcast %cst_119 : f32 to vector<64x128xf32>
    %313 = arith.cmpf oge, %311, %312 : vector<64x128xf32>
    %cst_120 = arith.constant 0.00999999977 : f32
    %314 = vector.broadcast %cst_120 : f32 to vector<64x128xf32>
    %315 = arith.mulf %314, %311 : vector<64x128xf32>
    %316 = arith.select %313, %311, %315 : vector<64x128xi1>, vector<64x128xf32>
    %317 = arith.mulf %316, %316 : vector<64x128xf32>
    %318 = tpu.concatenate %316, %317 in 0 : vector<64x128xf32>, vector<64x128xf32> -> vector<128x128xf32>
    %c0_121 = arith.constant 0 : index
    %c0_122 = arith.constant 0 : index
    %319 = vector.load %arg12[%c0_121, %c0_122] : memref<16x128xf32, #tpu.memory_space<vmem>>, vector<16x128xf32>
    %cst_123 = arith.constant dense<0.000000e+00> : vector<16x128xf32>
    %320 = tpu.matmul %319, %318, %cst_123 {dimension_numbers = #tpu.dot_dimension_numbers<[1], [0], [0], [1], [0, 0, 1, 1], [], []>} : vector<16x128xf32>, vector<128x128xf32>, vector<16x128xf32> -> vector<16x128xf32>
    %c0_124 = arith.constant 0 : index
    %c0_125 = arith.constant 0 : index
    %321 = vector.load %arg11[%c0_124, %c0_125] : memref<128x128xf32, #tpu.memory_space<vmem>>, vector<128x128xf32>
    %cst_126 = arith.constant dense<0.000000e+00> : vector<16x128xf32>
    %322 = tpu.matmul %320, %321, %cst_126 {dimension_numbers = #tpu.dot_dimension_numbers<[1], [0], [0], [1], [0, 0, 1, 1], [], []>} : vector<16x128xf32>, vector<128x128xf32>, vector<16x128xf32> -> vector<16x128xf32>
    %323 = vector.extract_strided_slice %322 {offsets = [0, 0], sizes = [8, 128], strides = [1, 1]} : vector<16x128xf32> to vector<8x128xf32>
    %324 = vector.extract_strided_slice %322 {offsets = [8, 0], sizes = [8, 128], strides = [1, 1]} : vector<16x128xf32> to vector<8x128xf32>
    %c0_127 = arith.constant 0 : index
    %c0_128 = arith.constant 0 : index
    %325 = vector.load %arg14[%c0_127, %c0_128] : memref<4x128xf32, #tpu.memory_space<vmem>>, vector<4x128xf32>
    %326 = vector.extract_strided_slice %325 {offsets = [2, 0], sizes = [1, 128], strides = [1, 1]} : vector<4x128xf32> to vector<1x128xf32>
    %327 = vector.extract_strided_slice %325 {offsets = [3, 0], sizes = [1, 128], strides = [1, 1]} : vector<4x128xf32> to vector<1x128xf32>
    %328 = arith.mulf %323, %323 : vector<8x128xf32>
    %329 = arith.subf %324, %328 : vector<8x128xf32>
    %cst_129 = arith.constant 9.99999974E-6 : f32
    %330 = vector.broadcast %cst_129 : f32 to vector<8x128xf32>
    %331 = arith.addf %329, %330 : vector<8x128xf32>
    %332 = math.rsqrt %331 : vector<8x128xf32>
    %333 = vector.broadcast %326 : vector<1x128xf32> to vector<8x128xf32>
    %334 = arith.mulf %332, %333 : vector<8x128xf32>
    %335 = arith.mulf %323, %334 : vector<8x128xf32>
    %336 = vector.broadcast %327 : vector<1x128xf32> to vector<8x128xf32>
    %337 = arith.subf %336, %335 : vector<8x128xf32>
    %c0_130 = arith.constant 0 : index
    %c0_131 = arith.constant 0 : index
    %338 = vector.load %arg13[%c0_130, %c0_131] : memref<64x8xf32, #tpu.memory_space<vmem>>, vector<64x8xf32>
    %339 = tpu.concatenate %334, %337 in 1 : vector<8x128xf32>, vector<8x128xf32> -> vector<8x256xf32>
    %cst_132 = arith.constant dense<0.000000e+00> : vector<64x256xf32>
    %340 = tpu.matmul %338, %339, %cst_132 {dimension_numbers = #tpu.dot_dimension_numbers<[1], [0], [0], [1], [0, 0, 1, 1], [], []>} : vector<64x8xf32>, vector<8x256xf32>, vector<64x256xf32> -> vector<64x256xf32>
    %341 = vector.extract_strided_slice %340 {offsets = [0, 0], sizes = [64, 128], strides = [1, 1]} : vector<64x256xf32> to vector<64x128xf32>
    %342 = arith.mulf %316, %341 : vector<64x128xf32>
    %343 = vector.extract_strided_slice %340 {offsets = [0, 128], sizes = [64, 128], strides = [1, 1]} : vector<64x256xf32> to vector<64x128xf32>
    %344 = arith.addf %342, %343 : vector<64x128xf32>
    %345 = vector.extract_strided_slice %344 {offsets = [0, 16], sizes = [64, 112], strides = [1, 1]} : vector<64x128xf32> to vector<64x112xf32>
    %346 = vector.extract_strided_slice %344 {offsets = [0, 0], sizes = [64, 16], strides = [1, 1]} : vector<64x128xf32> to vector<64x16xf32>
    %347 = tpu.concatenate %345, %346 in 1 : vector<64x112xf32>, vector<64x16xf32> -> vector<64x128xf32>
    %348 = arith.maximumf %344, %347 : vector<64x128xf32>
    %349 = vector.extract_strided_slice %348 {offsets = [1, 0], sizes = [63, 128], strides = [1, 1]} : vector<64x128xf32> to vector<63x128xf32>
    %350 = vector.extract_strided_slice %348 {offsets = [0, 0], sizes = [1, 128], strides = [1, 1]} : vector<64x128xf32> to vector<1x128xf32>
    %351 = tpu.concatenate %349, %350 in 0 : vector<63x128xf32>, vector<1x128xf32> -> vector<64x128xf32>
    %352 = arith.maximumf %348, %351 : vector<64x128xf32>
    %c0_133 = arith.constant 0 : index
    %c0_134 = arith.constant 0 : index
    %353 = vector.load %arg15[%c0_133, %c0_134] : memref<32x64xf32, #tpu.memory_space<vmem>>, vector<32x64xf32>
    %cst_135 = arith.constant dense<0.000000e+00> : vector<32x128xf32>
    %354 = tpu.matmul %353, %352, %cst_135 {dimension_numbers = #tpu.dot_dimension_numbers<[1], [0], [0], [1], [0, 0, 1, 1], [], []>} : vector<32x64xf32>, vector<64x128xf32>, vector<32x128xf32> -> vector<32x128xf32>
    %355 = tpu.iota {dimensions = array<i32: 0>} : vector<32x128xi32>
    %cst_136 = arith.constant 0.000000e+00 : f32
    %356 = vector.broadcast %cst_136 : f32 to vector<1x128xf32>
    %c4_i32 = arith.constant 4 : i32
    %c0_i32_137 = arith.constant 0 : i32
    %357 = arith.cmpi eq, %c4_i32, %c0_i32_137 : i32
    %c1_i32_138 = arith.constant 1 : i32
    %358 = arith.select %357, %c1_i32_138, %c4_i32 : i32
    %359 = vector.broadcast %358 : i32 to vector<32x128xi32>
    %360 = arith.remsi %355, %359 : vector<32x128xi32>
    %c0_i32_139 = arith.constant 0 : i32
    %361 = vector.broadcast %c0_i32_139 : i32 to vector<32x128xi32>
    %362 = arith.cmpi ne, %360, %361 : vector<32x128xi32>
    %c0_i32_140 = arith.constant 0 : i32
    %363 = vector.broadcast %c0_i32_140 : i32 to vector<32x128xi32>
    %364 = arith.cmpi slt, %360, %363 : vector<32x128xi32>
    %c0_i32_141 = arith.constant 0 : i32
    %365 = arith.cmpi slt, %358, %c0_i32_141 : i32
    %366 = vector.broadcast %365 : i1 to vector<32x128xi1>
    %367 = vector.broadcast %366 : vector<32x128xi1> to vector<32x128xi1>
    %368 = arith.xori %364, %367 : vector<32x128xi1>
    %369 = arith.andi %368, %362 : vector<32x128xi1>
    %370 = vector.broadcast %358 : i32 to vector<32x128xi32>
    %371 = arith.addi %360, %370 : vector<32x128xi32>
    %372 = arith.select %369, %371, %360 : vector<32x128xi1>, vector<32x128xi32>
    %c0_i32_142 = arith.constant 0 : i32
    %373 = vector.broadcast %c0_i32_142 : i32 to vector<32x128xi32>
    %374 = arith.cmpi eq, %372, %373 : vector<32x128xi32>
    %375 = vector.extract_strided_slice %354 {offsets = [0, 0], sizes = [31, 128], strides = [1, 1]} : vector<32x128xf32> to vector<31x128xf32>
    %376 = tpu.concatenate %356, %375 in 0 : vector<1x128xf32>, vector<31x128xf32> -> vector<32x128xf32>
    %cst_143 = arith.constant 0.000000e+00 : f32
    %377 = vector.broadcast %cst_143 : f32 to vector<32x128xf32>
    %378 = arith.select %374, %377, %376 : vector<32x128xi1>, vector<32x128xf32>
    %c4_i32_144 = arith.constant 4 : i32
    %c0_i32_145 = arith.constant 0 : i32
    %379 = arith.cmpi eq, %c4_i32_144, %c0_i32_145 : i32
    %c1_i32_146 = arith.constant 1 : i32
    %380 = arith.select %379, %c1_i32_146, %c4_i32_144 : i32
    %381 = vector.broadcast %380 : i32 to vector<32x128xi32>
    %382 = arith.remsi %355, %381 : vector<32x128xi32>
    %c0_i32_147 = arith.constant 0 : i32
    %383 = vector.broadcast %c0_i32_147 : i32 to vector<32x128xi32>
    %384 = arith.cmpi ne, %382, %383 : vector<32x128xi32>
    %c0_i32_148 = arith.constant 0 : i32
    %385 = vector.broadcast %c0_i32_148 : i32 to vector<32x128xi32>
    %386 = arith.cmpi slt, %382, %385 : vector<32x128xi32>
    %c0_i32_149 = arith.constant 0 : i32
    %387 = arith.cmpi slt, %380, %c0_i32_149 : i32
    %388 = vector.broadcast %387 : i1 to vector<32x128xi1>
    %389 = vector.broadcast %388 : vector<32x128xi1> to vector<32x128xi1>
    %390 = arith.xori %386, %389 : vector<32x128xi1>
    %391 = arith.andi %390, %384 : vector<32x128xi1>
    %392 = vector.broadcast %380 : i32 to vector<32x128xi32>
    %393 = arith.addi %382, %392 : vector<32x128xi32>
    %394 = arith.select %391, %393, %382 : vector<32x128xi1>, vector<32x128xi32>
    %c3_i32 = arith.constant 3 : i32
    %395 = vector.broadcast %c3_i32 : i32 to vector<32x128xi32>
    %396 = arith.cmpi eq, %394, %395 : vector<32x128xi32>
    %397 = vector.extract_strided_slice %354 {offsets = [1, 0], sizes = [31, 128], strides = [1, 1]} : vector<32x128xf32> to vector<31x128xf32>
    %398 = tpu.concatenate %397, %356 in 0 : vector<31x128xf32>, vector<1x128xf32> -> vector<32x128xf32>
    %cst_150 = arith.constant 0.000000e+00 : f32
    %399 = vector.broadcast %cst_150 : f32 to vector<32x128xf32>
    %400 = arith.select %396, %399, %398 : vector<32x128xi1>, vector<32x128xf32>
    %401 = tpu.concatenate %378, %354, %400 in 1 : vector<32x128xf32>, vector<32x128xf32>, vector<32x128xf32> -> vector<32x384xf32>
    %c0_151 = arith.constant 0 : index
    %c0_152 = arith.constant 0 : index
    %402 = vector.load %arg16[%c0_151, %c0_152] : memref<384x256xf32, #tpu.memory_space<vmem>>, vector<384x256xf32>
    %cst_153 = arith.constant dense<0.000000e+00> : vector<32x256xf32>
    %403 = tpu.matmul %401, %402, %cst_153 {dimension_numbers = #tpu.dot_dimension_numbers<[1], [0], [0], [1], [0, 0, 1, 1], [], []>} : vector<32x384xf32>, vector<384x256xf32>, vector<32x256xf32> -> vector<32x256xf32>
    %404 = vector.extract_strided_slice %403 {offsets = [0, 128], sizes = [32, 128], strides = [1, 1]} : vector<32x256xf32> to vector<32x128xf32>
    %405 = vector.extract_strided_slice %403 {offsets = [0, 0], sizes = [32, 128], strides = [1, 1]} : vector<32x256xf32> to vector<32x128xf32>
    %cst_154 = arith.constant 0.000000e+00 : f32
    %406 = vector.broadcast %cst_154 : f32 to vector<32x128xf32>
    %407 = arith.cmpf oge, %405, %406 : vector<32x128xf32>
    %cst_155 = arith.constant 0.00999999977 : f32
    %408 = vector.broadcast %cst_155 : f32 to vector<32x128xf32>
    %409 = arith.mulf %408, %405 : vector<32x128xf32>
    %410 = arith.select %407, %405, %409 : vector<32x128xi1>, vector<32x128xf32>
    %411 = arith.mulf %410, %410 : vector<32x128xf32>
    %412 = tpu.concatenate %410, %411 in 0 : vector<32x128xf32>, vector<32x128xf32> -> vector<64x128xf32>
    %c0_156 = arith.constant 0 : index
    %c0_157 = arith.constant 0 : index
    %413 = vector.load %arg19[%c0_156, %c0_157] : memref<16x64xf32, #tpu.memory_space<vmem>>, vector<16x64xf32>
    %cst_158 = arith.constant dense<0.000000e+00> : vector<16x128xf32>
    %414 = tpu.matmul %413, %412, %cst_158 {dimension_numbers = #tpu.dot_dimension_numbers<[1], [0], [0], [1], [0, 0, 1, 1], [], []>} : vector<16x64xf32>, vector<64x128xf32>, vector<16x128xf32> -> vector<16x128xf32>
    %c0_159 = arith.constant 0 : index
    %c0_160 = arith.constant 0 : index
    %415 = vector.load %arg18[%c0_159, %c0_160] : memref<128x128xf32, #tpu.memory_space<vmem>>, vector<128x128xf32>
    %cst_161 = arith.constant dense<0.000000e+00> : vector<16x128xf32>
    %416 = tpu.matmul %414, %415, %cst_161 {dimension_numbers = #tpu.dot_dimension_numbers<[1], [0], [0], [1], [0, 0, 1, 1], [], []>} : vector<16x128xf32>, vector<128x128xf32>, vector<16x128xf32> -> vector<16x128xf32>
    %417 = vector.extract_strided_slice %416 {offsets = [0, 0], sizes = [8, 128], strides = [1, 1]} : vector<16x128xf32> to vector<8x128xf32>
    %418 = vector.extract_strided_slice %416 {offsets = [8, 0], sizes = [8, 128], strides = [1, 1]} : vector<16x128xf32> to vector<8x128xf32>
    %c0_162 = arith.constant 0 : index
    %c0_163 = arith.constant 0 : index
    %419 = vector.load %arg21[%c0_162, %c0_163] : memref<4x128xf32, #tpu.memory_space<vmem>>, vector<4x128xf32>
    %420 = vector.extract_strided_slice %419 {offsets = [0, 0], sizes = [1, 128], strides = [1, 1]} : vector<4x128xf32> to vector<1x128xf32>
    %421 = vector.extract_strided_slice %419 {offsets = [1, 0], sizes = [1, 128], strides = [1, 1]} : vector<4x128xf32> to vector<1x128xf32>
    %422 = arith.mulf %417, %417 : vector<8x128xf32>
    %423 = arith.subf %418, %422 : vector<8x128xf32>
    %cst_164 = arith.constant 9.99999974E-6 : f32
    %424 = vector.broadcast %cst_164 : f32 to vector<8x128xf32>
    %425 = arith.addf %423, %424 : vector<8x128xf32>
    %426 = math.rsqrt %425 : vector<8x128xf32>
    %427 = vector.broadcast %420 : vector<1x128xf32> to vector<8x128xf32>
    %428 = arith.mulf %426, %427 : vector<8x128xf32>
    %429 = arith.mulf %417, %428 : vector<8x128xf32>
    %430 = vector.broadcast %421 : vector<1x128xf32> to vector<8x128xf32>
    %431 = arith.subf %430, %429 : vector<8x128xf32>
    %c0_165 = arith.constant 0 : index
    %c0_166 = arith.constant 0 : index
    %432 = vector.load %arg20[%c0_165, %c0_166] : memref<32x8xf32, #tpu.memory_space<vmem>>, vector<32x8xf32>
    %433 = tpu.concatenate %428, %431 in 1 : vector<8x128xf32>, vector<8x128xf32> -> vector<8x256xf32>
    %cst_167 = arith.constant dense<0.000000e+00> : vector<32x256xf32>
    %434 = tpu.matmul %432, %433, %cst_167 {dimension_numbers = #tpu.dot_dimension_numbers<[1], [0], [0], [1], [0, 0, 1, 1], [], []>} : vector<32x8xf32>, vector<8x256xf32>, vector<32x256xf32> -> vector<32x256xf32>
    %435 = vector.extract_strided_slice %434 {offsets = [0, 0], sizes = [32, 128], strides = [1, 1]} : vector<32x256xf32> to vector<32x128xf32>
    %436 = arith.mulf %410, %435 : vector<32x128xf32>
    %437 = vector.extract_strided_slice %434 {offsets = [0, 128], sizes = [32, 128], strides = [1, 1]} : vector<32x256xf32> to vector<32x128xf32>
    %438 = arith.addf %436, %437 : vector<32x128xf32>
    %439 = tpu.iota {dimensions = array<i32: 0>} : vector<32x128xi32>
    %cst_168 = arith.constant 0.000000e+00 : f32
    %440 = vector.broadcast %cst_168 : f32 to vector<1x128xf32>
    %c4_i32_169 = arith.constant 4 : i32
    %c0_i32_170 = arith.constant 0 : i32
    %441 = arith.cmpi eq, %c4_i32_169, %c0_i32_170 : i32
    %c1_i32_171 = arith.constant 1 : i32
    %442 = arith.select %441, %c1_i32_171, %c4_i32_169 : i32
    %443 = vector.broadcast %442 : i32 to vector<32x128xi32>
    %444 = arith.remsi %439, %443 : vector<32x128xi32>
    %c0_i32_172 = arith.constant 0 : i32
    %445 = vector.broadcast %c0_i32_172 : i32 to vector<32x128xi32>
    %446 = arith.cmpi ne, %444, %445 : vector<32x128xi32>
    %c0_i32_173 = arith.constant 0 : i32
    %447 = vector.broadcast %c0_i32_173 : i32 to vector<32x128xi32>
    %448 = arith.cmpi slt, %444, %447 : vector<32x128xi32>
    %c0_i32_174 = arith.constant 0 : i32
    %449 = arith.cmpi slt, %442, %c0_i32_174 : i32
    %450 = vector.broadcast %449 : i1 to vector<32x128xi1>
    %451 = vector.broadcast %450 : vector<32x128xi1> to vector<32x128xi1>
    %452 = arith.xori %448, %451 : vector<32x128xi1>
    %453 = arith.andi %452, %446 : vector<32x128xi1>
    %454 = vector.broadcast %442 : i32 to vector<32x128xi32>
    %455 = arith.addi %444, %454 : vector<32x128xi32>
    %456 = arith.select %453, %455, %444 : vector<32x128xi1>, vector<32x128xi32>
    %c0_i32_175 = arith.constant 0 : i32
    %457 = vector.broadcast %c0_i32_175 : i32 to vector<32x128xi32>
    %458 = arith.cmpi eq, %456, %457 : vector<32x128xi32>
    %459 = vector.extract_strided_slice %438 {offsets = [0, 0], sizes = [31, 128], strides = [1, 1]} : vector<32x128xf32> to vector<31x128xf32>
    %460 = tpu.concatenate %440, %459 in 0 : vector<1x128xf32>, vector<31x128xf32> -> vector<32x128xf32>
    %cst_176 = arith.constant 0.000000e+00 : f32
    %461 = vector.broadcast %cst_176 : f32 to vector<32x128xf32>
    %462 = arith.select %458, %461, %460 : vector<32x128xi1>, vector<32x128xf32>
    %c4_i32_177 = arith.constant 4 : i32
    %c0_i32_178 = arith.constant 0 : i32
    %463 = arith.cmpi eq, %c4_i32_177, %c0_i32_178 : i32
    %c1_i32_179 = arith.constant 1 : i32
    %464 = arith.select %463, %c1_i32_179, %c4_i32_177 : i32
    %465 = vector.broadcast %464 : i32 to vector<32x128xi32>
    %466 = arith.remsi %439, %465 : vector<32x128xi32>
    %c0_i32_180 = arith.constant 0 : i32
    %467 = vector.broadcast %c0_i32_180 : i32 to vector<32x128xi32>
    %468 = arith.cmpi ne, %466, %467 : vector<32x128xi32>
    %c0_i32_181 = arith.constant 0 : i32
    %469 = vector.broadcast %c0_i32_181 : i32 to vector<32x128xi32>
    %470 = arith.cmpi slt, %466, %469 : vector<32x128xi32>
    %c0_i32_182 = arith.constant 0 : i32
    %471 = arith.cmpi slt, %464, %c0_i32_182 : i32
    %472 = vector.broadcast %471 : i1 to vector<32x128xi1>
    %473 = vector.broadcast %472 : vector<32x128xi1> to vector<32x128xi1>
    %474 = arith.xori %470, %473 : vector<32x128xi1>
    %475 = arith.andi %474, %468 : vector<32x128xi1>
    %476 = vector.broadcast %464 : i32 to vector<32x128xi32>
    %477 = arith.addi %466, %476 : vector<32x128xi32>
    %478 = arith.select %475, %477, %466 : vector<32x128xi1>, vector<32x128xi32>
    %c3_i32_183 = arith.constant 3 : i32
    %479 = vector.broadcast %c3_i32_183 : i32 to vector<32x128xi32>
    %480 = arith.cmpi eq, %478, %479 : vector<32x128xi32>
    %481 = vector.extract_strided_slice %438 {offsets = [1, 0], sizes = [31, 128], strides = [1, 1]} : vector<32x128xf32> to vector<31x128xf32>
    %482 = tpu.concatenate %481, %440 in 0 : vector<31x128xf32>, vector<1x128xf32> -> vector<32x128xf32>
    %cst_184 = arith.constant 0.000000e+00 : f32
    %483 = vector.broadcast %cst_184 : f32 to vector<32x128xf32>
    %484 = arith.select %480, %483, %482 : vector<32x128xi1>, vector<32x128xf32>
    %485 = tpu.concatenate %462, %438, %484 in 1 : vector<32x128xf32>, vector<32x128xf32>, vector<32x128xf32> -> vector<32x384xf32>
    %c0_185 = arith.constant 0 : index
    %c0_186 = arith.constant 0 : index
    %486 = vector.load %arg17[%c0_185, %c0_186] : memref<384x128xf32, #tpu.memory_space<vmem>>, vector<384x128xf32>
    %cst_187 = arith.constant dense<0.000000e+00> : vector<32x128xf32>
    %487 = tpu.matmul %485, %486, %cst_187 {dimension_numbers = #tpu.dot_dimension_numbers<[1], [0], [0], [1], [0, 0, 1, 1], [], []>} : vector<32x384xf32>, vector<384x128xf32>, vector<32x128xf32> -> vector<32x128xf32>
    %488 = arith.addf %487, %404 : vector<32x128xf32>
    %cst_188 = arith.constant 0.000000e+00 : f32
    %489 = vector.broadcast %cst_188 : f32 to vector<32x128xf32>
    %490 = arith.cmpf oge, %488, %489 : vector<32x128xf32>
    %cst_189 = arith.constant 0.00999999977 : f32
    %491 = vector.broadcast %cst_189 : f32 to vector<32x128xf32>
    %492 = arith.mulf %491, %488 : vector<32x128xf32>
    %493 = arith.select %490, %488, %492 : vector<32x128xi1>, vector<32x128xf32>
    %494 = arith.mulf %493, %493 : vector<32x128xf32>
    %495 = tpu.concatenate %493, %494 in 0 : vector<32x128xf32>, vector<32x128xf32> -> vector<64x128xf32>
    %c0_190 = arith.constant 0 : index
    %c0_191 = arith.constant 0 : index
    %496 = vector.load %arg19[%c0_190, %c0_191] : memref<16x64xf32, #tpu.memory_space<vmem>>, vector<16x64xf32>
    %cst_192 = arith.constant dense<0.000000e+00> : vector<16x128xf32>
    %497 = tpu.matmul %496, %495, %cst_192 {dimension_numbers = #tpu.dot_dimension_numbers<[1], [0], [0], [1], [0, 0, 1, 1], [], []>} : vector<16x64xf32>, vector<64x128xf32>, vector<16x128xf32> -> vector<16x128xf32>
    %c0_193 = arith.constant 0 : index
    %c0_194 = arith.constant 0 : index
    %498 = vector.load %arg18[%c0_193, %c0_194] : memref<128x128xf32, #tpu.memory_space<vmem>>, vector<128x128xf32>
    %cst_195 = arith.constant dense<0.000000e+00> : vector<16x128xf32>
    %499 = tpu.matmul %497, %498, %cst_195 {dimension_numbers = #tpu.dot_dimension_numbers<[1], [0], [0], [1], [0, 0, 1, 1], [], []>} : vector<16x128xf32>, vector<128x128xf32>, vector<16x128xf32> -> vector<16x128xf32>
    %500 = vector.extract_strided_slice %499 {offsets = [0, 0], sizes = [8, 128], strides = [1, 1]} : vector<16x128xf32> to vector<8x128xf32>
    %501 = vector.extract_strided_slice %499 {offsets = [8, 0], sizes = [8, 128], strides = [1, 1]} : vector<16x128xf32> to vector<8x128xf32>
    %c0_196 = arith.constant 0 : index
    %c0_197 = arith.constant 0 : index
    %502 = vector.load %arg21[%c0_196, %c0_197] : memref<4x128xf32, #tpu.memory_space<vmem>>, vector<4x128xf32>
    %503 = vector.extract_strided_slice %502 {offsets = [2, 0], sizes = [1, 128], strides = [1, 1]} : vector<4x128xf32> to vector<1x128xf32>
    %504 = vector.extract_strided_slice %502 {offsets = [3, 0], sizes = [1, 128], strides = [1, 1]} : vector<4x128xf32> to vector<1x128xf32>
    %505 = arith.mulf %500, %500 : vector<8x128xf32>
    %506 = arith.subf %501, %505 : vector<8x128xf32>
    %cst_198 = arith.constant 9.99999974E-6 : f32
    %507 = vector.broadcast %cst_198 : f32 to vector<8x128xf32>
    %508 = arith.addf %506, %507 : vector<8x128xf32>
    %509 = math.rsqrt %508 : vector<8x128xf32>
    %510 = vector.broadcast %503 : vector<1x128xf32> to vector<8x128xf32>
    %511 = arith.mulf %509, %510 : vector<8x128xf32>
    %512 = arith.mulf %500, %511 : vector<8x128xf32>
    %513 = vector.broadcast %504 : vector<1x128xf32> to vector<8x128xf32>
    %514 = arith.subf %513, %512 : vector<8x128xf32>
    %c0_199 = arith.constant 0 : index
    %c0_200 = arith.constant 0 : index
    %515 = vector.load %arg20[%c0_199, %c0_200] : memref<32x8xf32, #tpu.memory_space<vmem>>, vector<32x8xf32>
    %516 = tpu.concatenate %511, %514 in 1 : vector<8x128xf32>, vector<8x128xf32> -> vector<8x256xf32>
    %cst_201 = arith.constant dense<0.000000e+00> : vector<32x256xf32>
    %517 = tpu.matmul %515, %516, %cst_201 {dimension_numbers = #tpu.dot_dimension_numbers<[1], [0], [0], [1], [0, 0, 1, 1], [], []>} : vector<32x8xf32>, vector<8x256xf32>, vector<32x256xf32> -> vector<32x256xf32>
    %518 = vector.extract_strided_slice %517 {offsets = [0, 0], sizes = [32, 128], strides = [1, 1]} : vector<32x256xf32> to vector<32x128xf32>
    %519 = arith.mulf %493, %518 : vector<32x128xf32>
    %520 = vector.extract_strided_slice %517 {offsets = [0, 128], sizes = [32, 128], strides = [1, 1]} : vector<32x256xf32> to vector<32x128xf32>
    %521 = arith.addf %519, %520 : vector<32x128xf32>
    %522 = vector.extract_strided_slice %521 {offsets = [0, 32], sizes = [32, 96], strides = [1, 1]} : vector<32x128xf32> to vector<32x96xf32>
    %523 = vector.extract_strided_slice %521 {offsets = [0, 0], sizes = [32, 32], strides = [1, 1]} : vector<32x128xf32> to vector<32x32xf32>
    %524 = tpu.concatenate %522, %523 in 1 : vector<32x96xf32>, vector<32x32xf32> -> vector<32x128xf32>
    %525 = arith.maximumf %521, %524 : vector<32x128xf32>
    %526 = vector.extract_strided_slice %525 {offsets = [1, 0], sizes = [31, 128], strides = [1, 1]} : vector<32x128xf32> to vector<31x128xf32>
    %527 = vector.extract_strided_slice %525 {offsets = [0, 0], sizes = [1, 128], strides = [1, 1]} : vector<32x128xf32> to vector<1x128xf32>
    %528 = tpu.concatenate %526, %527 in 0 : vector<31x128xf32>, vector<1x128xf32> -> vector<32x128xf32>
    %529 = arith.maximumf %525, %528 : vector<32x128xf32>
    %c0_202 = arith.constant 0 : index
    %c0_203 = arith.constant 0 : index
    %530 = vector.load %arg22[%c0_202, %c0_203] : memref<16x32xf32, #tpu.memory_space<vmem>>, vector<16x32xf32>
    %cst_204 = arith.constant dense<0.000000e+00> : vector<16x128xf32>
    %531 = tpu.matmul %530, %529, %cst_204 {dimension_numbers = #tpu.dot_dimension_numbers<[1], [0], [0], [1], [0, 0, 1, 1], [], []>} : vector<16x32xf32>, vector<32x128xf32>, vector<16x128xf32> -> vector<16x128xf32>
    %532 = tpu.iota {dimensions = array<i32: 0>} : vector<16x128xi32>
    %cst_205 = arith.constant 0.000000e+00 : f32
    %533 = vector.broadcast %cst_205 : f32 to vector<1x128xf32>
    %c2_i32 = arith.constant 2 : i32
    %c0_i32_206 = arith.constant 0 : i32
    %534 = arith.cmpi eq, %c2_i32, %c0_i32_206 : i32
    %c1_i32_207 = arith.constant 1 : i32
    %535 = arith.select %534, %c1_i32_207, %c2_i32 : i32
    %536 = vector.broadcast %535 : i32 to vector<16x128xi32>
    %537 = arith.remsi %532, %536 : vector<16x128xi32>
    %c0_i32_208 = arith.constant 0 : i32
    %538 = vector.broadcast %c0_i32_208 : i32 to vector<16x128xi32>
    %539 = arith.cmpi ne, %537, %538 : vector<16x128xi32>
    %c0_i32_209 = arith.constant 0 : i32
    %540 = vector.broadcast %c0_i32_209 : i32 to vector<16x128xi32>
    %541 = arith.cmpi slt, %537, %540 : vector<16x128xi32>
    %c0_i32_210 = arith.constant 0 : i32
    %542 = arith.cmpi slt, %535, %c0_i32_210 : i32
    %543 = vector.broadcast %542 : i1 to vector<16x128xi1>
    %544 = vector.broadcast %543 : vector<16x128xi1> to vector<16x128xi1>
    %545 = arith.xori %541, %544 : vector<16x128xi1>
    %546 = arith.andi %545, %539 : vector<16x128xi1>
    %547 = vector.broadcast %535 : i32 to vector<16x128xi32>
    %548 = arith.addi %537, %547 : vector<16x128xi32>
    %549 = arith.select %546, %548, %537 : vector<16x128xi1>, vector<16x128xi32>
    %c0_i32_211 = arith.constant 0 : i32
    %550 = vector.broadcast %c0_i32_211 : i32 to vector<16x128xi32>
    %551 = arith.cmpi eq, %549, %550 : vector<16x128xi32>
    %552 = vector.extract_strided_slice %531 {offsets = [0, 0], sizes = [15, 128], strides = [1, 1]} : vector<16x128xf32> to vector<15x128xf32>
    %553 = tpu.concatenate %533, %552 in 0 : vector<1x128xf32>, vector<15x128xf32> -> vector<16x128xf32>
    %cst_212 = arith.constant 0.000000e+00 : f32
    %554 = vector.broadcast %cst_212 : f32 to vector<16x128xf32>
    %555 = arith.select %551, %554, %553 : vector<16x128xi1>, vector<16x128xf32>
    %c2_i32_213 = arith.constant 2 : i32
    %c0_i32_214 = arith.constant 0 : i32
    %556 = arith.cmpi eq, %c2_i32_213, %c0_i32_214 : i32
    %c1_i32_215 = arith.constant 1 : i32
    %557 = arith.select %556, %c1_i32_215, %c2_i32_213 : i32
    %558 = vector.broadcast %557 : i32 to vector<16x128xi32>
    %559 = arith.remsi %532, %558 : vector<16x128xi32>
    %c0_i32_216 = arith.constant 0 : i32
    %560 = vector.broadcast %c0_i32_216 : i32 to vector<16x128xi32>
    %561 = arith.cmpi ne, %559, %560 : vector<16x128xi32>
    %c0_i32_217 = arith.constant 0 : i32
    %562 = vector.broadcast %c0_i32_217 : i32 to vector<16x128xi32>
    %563 = arith.cmpi slt, %559, %562 : vector<16x128xi32>
    %c0_i32_218 = arith.constant 0 : i32
    %564 = arith.cmpi slt, %557, %c0_i32_218 : i32
    %565 = vector.broadcast %564 : i1 to vector<16x128xi1>
    %566 = vector.broadcast %565 : vector<16x128xi1> to vector<16x128xi1>
    %567 = arith.xori %563, %566 : vector<16x128xi1>
    %568 = arith.andi %567, %561 : vector<16x128xi1>
    %569 = vector.broadcast %557 : i32 to vector<16x128xi32>
    %570 = arith.addi %559, %569 : vector<16x128xi32>
    %571 = arith.select %568, %570, %559 : vector<16x128xi1>, vector<16x128xi32>
    %c1_i32_219 = arith.constant 1 : i32
    %572 = vector.broadcast %c1_i32_219 : i32 to vector<16x128xi32>
    %573 = arith.cmpi eq, %571, %572 : vector<16x128xi32>
    %574 = vector.extract_strided_slice %531 {offsets = [1, 0], sizes = [15, 128], strides = [1, 1]} : vector<16x128xf32> to vector<15x128xf32>
    %575 = tpu.concatenate %574, %533 in 0 : vector<15x128xf32>, vector<1x128xf32> -> vector<16x128xf32>
    %cst_220 = arith.constant 0.000000e+00 : f32
    %576 = vector.broadcast %cst_220 : f32 to vector<16x128xf32>
    %577 = arith.select %573, %576, %575 : vector<16x128xi1>, vector<16x128xf32>
    %578 = tpu.concatenate %555, %531, %577 in 1 : vector<16x128xf32>, vector<16x128xf32>, vector<16x128xf32> -> vector<16x384xf32>
    %c0_221 = arith.constant 0 : index
    %c0_222 = arith.constant 0 : index
    %579 = vector.load %arg23[%c0_221, %c0_222] : memref<384x256xf32, #tpu.memory_space<vmem>>, vector<384x256xf32>
    %cst_223 = arith.constant dense<0.000000e+00> : vector<16x256xf32>
    %580 = tpu.matmul %578, %579, %cst_223 {dimension_numbers = #tpu.dot_dimension_numbers<[1], [0], [0], [1], [0, 0, 1, 1], [], []>} : vector<16x384xf32>, vector<384x256xf32>, vector<16x256xf32> -> vector<16x256xf32>
    %581 = vector.extract_strided_slice %580 {offsets = [0, 128], sizes = [16, 128], strides = [1, 1]} : vector<16x256xf32> to vector<16x128xf32>
    %582 = vector.extract_strided_slice %580 {offsets = [0, 0], sizes = [16, 128], strides = [1, 1]} : vector<16x256xf32> to vector<16x128xf32>
    %cst_224 = arith.constant 0.000000e+00 : f32
    %583 = vector.broadcast %cst_224 : f32 to vector<16x128xf32>
    %584 = arith.cmpf oge, %582, %583 : vector<16x128xf32>
    %cst_225 = arith.constant 0.00999999977 : f32
    %585 = vector.broadcast %cst_225 : f32 to vector<16x128xf32>
    %586 = arith.mulf %585, %582 : vector<16x128xf32>
    %587 = arith.select %584, %582, %586 : vector<16x128xi1>, vector<16x128xf32>
    %588 = arith.mulf %587, %587 : vector<16x128xf32>
    %589 = tpu.concatenate %587, %588 in 0 : vector<16x128xf32>, vector<16x128xf32> -> vector<32x128xf32>
    %c0_226 = arith.constant 0 : index
    %c0_227 = arith.constant 0 : index
    %590 = vector.load %arg26[%c0_226, %c0_227] : memref<16x32xf32, #tpu.memory_space<vmem>>, vector<16x32xf32>
    %cst_228 = arith.constant dense<0.000000e+00> : vector<16x128xf32>
    %591 = tpu.matmul %590, %589, %cst_228 {dimension_numbers = #tpu.dot_dimension_numbers<[1], [0], [0], [1], [0, 0, 1, 1], [], []>} : vector<16x32xf32>, vector<32x128xf32>, vector<16x128xf32> -> vector<16x128xf32>
    %c0_229 = arith.constant 0 : index
    %c0_230 = arith.constant 0 : index
    %592 = vector.load %arg25[%c0_229, %c0_230] : memref<128x128xf32, #tpu.memory_space<vmem>>, vector<128x128xf32>
    %cst_231 = arith.constant dense<0.000000e+00> : vector<16x128xf32>
    %593 = tpu.matmul %591, %592, %cst_231 {dimension_numbers = #tpu.dot_dimension_numbers<[1], [0], [0], [1], [0, 0, 1, 1], [], []>} : vector<16x128xf32>, vector<128x128xf32>, vector<16x128xf32> -> vector<16x128xf32>
    %594 = vector.extract_strided_slice %593 {offsets = [0, 0], sizes = [8, 128], strides = [1, 1]} : vector<16x128xf32> to vector<8x128xf32>
    %595 = vector.extract_strided_slice %593 {offsets = [8, 0], sizes = [8, 128], strides = [1, 1]} : vector<16x128xf32> to vector<8x128xf32>
    %c0_232 = arith.constant 0 : index
    %c0_233 = arith.constant 0 : index
    %596 = vector.load %arg28[%c0_232, %c0_233] : memref<4x128xf32, #tpu.memory_space<vmem>>, vector<4x128xf32>
    %597 = vector.extract_strided_slice %596 {offsets = [0, 0], sizes = [1, 128], strides = [1, 1]} : vector<4x128xf32> to vector<1x128xf32>
    %598 = vector.extract_strided_slice %596 {offsets = [1, 0], sizes = [1, 128], strides = [1, 1]} : vector<4x128xf32> to vector<1x128xf32>
    %599 = arith.mulf %594, %594 : vector<8x128xf32>
    %600 = arith.subf %595, %599 : vector<8x128xf32>
    %cst_234 = arith.constant 9.99999974E-6 : f32
    %601 = vector.broadcast %cst_234 : f32 to vector<8x128xf32>
    %602 = arith.addf %600, %601 : vector<8x128xf32>
    %603 = math.rsqrt %602 : vector<8x128xf32>
    %604 = vector.broadcast %597 : vector<1x128xf32> to vector<8x128xf32>
    %605 = arith.mulf %603, %604 : vector<8x128xf32>
    %606 = arith.mulf %594, %605 : vector<8x128xf32>
    %607 = vector.broadcast %598 : vector<1x128xf32> to vector<8x128xf32>
    %608 = arith.subf %607, %606 : vector<8x128xf32>
    %c0_235 = arith.constant 0 : index
    %c0_236 = arith.constant 0 : index
    %609 = vector.load %arg27[%c0_235, %c0_236] : memref<16x8xf32, #tpu.memory_space<vmem>>, vector<16x8xf32>
    %610 = tpu.concatenate %605, %608 in 1 : vector<8x128xf32>, vector<8x128xf32> -> vector<8x256xf32>
    %cst_237 = arith.constant dense<0.000000e+00> : vector<16x256xf32>
    %611 = tpu.matmul %609, %610, %cst_237 {dimension_numbers = #tpu.dot_dimension_numbers<[1], [0], [0], [1], [0, 0, 1, 1], [], []>} : vector<16x8xf32>, vector<8x256xf32>, vector<16x256xf32> -> vector<16x256xf32>
    %612 = vector.extract_strided_slice %611 {offsets = [0, 0], sizes = [16, 128], strides = [1, 1]} : vector<16x256xf32> to vector<16x128xf32>
    %613 = arith.mulf %587, %612 : vector<16x128xf32>
    %614 = vector.extract_strided_slice %611 {offsets = [0, 128], sizes = [16, 128], strides = [1, 1]} : vector<16x256xf32> to vector<16x128xf32>
    %615 = arith.addf %613, %614 : vector<16x128xf32>
    %616 = tpu.iota {dimensions = array<i32: 0>} : vector<16x128xi32>
    %cst_238 = arith.constant 0.000000e+00 : f32
    %617 = vector.broadcast %cst_238 : f32 to vector<1x128xf32>
    %c2_i32_239 = arith.constant 2 : i32
    %c0_i32_240 = arith.constant 0 : i32
    %618 = arith.cmpi eq, %c2_i32_239, %c0_i32_240 : i32
    %c1_i32_241 = arith.constant 1 : i32
    %619 = arith.select %618, %c1_i32_241, %c2_i32_239 : i32
    %620 = vector.broadcast %619 : i32 to vector<16x128xi32>
    %621 = arith.remsi %616, %620 : vector<16x128xi32>
    %c0_i32_242 = arith.constant 0 : i32
    %622 = vector.broadcast %c0_i32_242 : i32 to vector<16x128xi32>
    %623 = arith.cmpi ne, %621, %622 : vector<16x128xi32>
    %c0_i32_243 = arith.constant 0 : i32
    %624 = vector.broadcast %c0_i32_243 : i32 to vector<16x128xi32>
    %625 = arith.cmpi slt, %621, %624 : vector<16x128xi32>
    %c0_i32_244 = arith.constant 0 : i32
    %626 = arith.cmpi slt, %619, %c0_i32_244 : i32
    %627 = vector.broadcast %626 : i1 to vector<16x128xi1>
    %628 = vector.broadcast %627 : vector<16x128xi1> to vector<16x128xi1>
    %629 = arith.xori %625, %628 : vector<16x128xi1>
    %630 = arith.andi %629, %623 : vector<16x128xi1>
    %631 = vector.broadcast %619 : i32 to vector<16x128xi32>
    %632 = arith.addi %621, %631 : vector<16x128xi32>
    %633 = arith.select %630, %632, %621 : vector<16x128xi1>, vector<16x128xi32>
    %c0_i32_245 = arith.constant 0 : i32
    %634 = vector.broadcast %c0_i32_245 : i32 to vector<16x128xi32>
    %635 = arith.cmpi eq, %633, %634 : vector<16x128xi32>
    %636 = vector.extract_strided_slice %615 {offsets = [0, 0], sizes = [15, 128], strides = [1, 1]} : vector<16x128xf32> to vector<15x128xf32>
    %637 = tpu.concatenate %617, %636 in 0 : vector<1x128xf32>, vector<15x128xf32> -> vector<16x128xf32>
    %cst_246 = arith.constant 0.000000e+00 : f32
    %638 = vector.broadcast %cst_246 : f32 to vector<16x128xf32>
    %639 = arith.select %635, %638, %637 : vector<16x128xi1>, vector<16x128xf32>
    %c2_i32_247 = arith.constant 2 : i32
    %c0_i32_248 = arith.constant 0 : i32
    %640 = arith.cmpi eq, %c2_i32_247, %c0_i32_248 : i32
    %c1_i32_249 = arith.constant 1 : i32
    %641 = arith.select %640, %c1_i32_249, %c2_i32_247 : i32
    %642 = vector.broadcast %641 : i32 to vector<16x128xi32>
    %643 = arith.remsi %616, %642 : vector<16x128xi32>
    %c0_i32_250 = arith.constant 0 : i32
    %644 = vector.broadcast %c0_i32_250 : i32 to vector<16x128xi32>
    %645 = arith.cmpi ne, %643, %644 : vector<16x128xi32>
    %c0_i32_251 = arith.constant 0 : i32
    %646 = vector.broadcast %c0_i32_251 : i32 to vector<16x128xi32>
    %647 = arith.cmpi slt, %643, %646 : vector<16x128xi32>
    %c0_i32_252 = arith.constant 0 : i32
    %648 = arith.cmpi slt, %641, %c0_i32_252 : i32
    %649 = vector.broadcast %648 : i1 to vector<16x128xi1>
    %650 = vector.broadcast %649 : vector<16x128xi1> to vector<16x128xi1>
    %651 = arith.xori %647, %650 : vector<16x128xi1>
    %652 = arith.andi %651, %645 : vector<16x128xi1>
    %653 = vector.broadcast %641 : i32 to vector<16x128xi32>
    %654 = arith.addi %643, %653 : vector<16x128xi32>
    %655 = arith.select %652, %654, %643 : vector<16x128xi1>, vector<16x128xi32>
    %c1_i32_253 = arith.constant 1 : i32
    %656 = vector.broadcast %c1_i32_253 : i32 to vector<16x128xi32>
    %657 = arith.cmpi eq, %655, %656 : vector<16x128xi32>
    %658 = vector.extract_strided_slice %615 {offsets = [1, 0], sizes = [15, 128], strides = [1, 1]} : vector<16x128xf32> to vector<15x128xf32>
    %659 = tpu.concatenate %658, %617 in 0 : vector<15x128xf32>, vector<1x128xf32> -> vector<16x128xf32>
    %cst_254 = arith.constant 0.000000e+00 : f32
    %660 = vector.broadcast %cst_254 : f32 to vector<16x128xf32>
    %661 = arith.select %657, %660, %659 : vector<16x128xi1>, vector<16x128xf32>
    %662 = tpu.concatenate %639, %615, %661 in 1 : vector<16x128xf32>, vector<16x128xf32>, vector<16x128xf32> -> vector<16x384xf32>
    %c0_255 = arith.constant 0 : index
    %c0_256 = arith.constant 0 : index
    %663 = vector.load %arg24[%c0_255, %c0_256] : memref<384x128xf32, #tpu.memory_space<vmem>>, vector<384x128xf32>
    %cst_257 = arith.constant dense<0.000000e+00> : vector<16x128xf32>
    %664 = tpu.matmul %662, %663, %cst_257 {dimension_numbers = #tpu.dot_dimension_numbers<[1], [0], [0], [1], [0, 0, 1, 1], [], []>} : vector<16x384xf32>, vector<384x128xf32>, vector<16x128xf32> -> vector<16x128xf32>
    %665 = arith.addf %664, %581 : vector<16x128xf32>
    %cst_258 = arith.constant 0.000000e+00 : f32
    %666 = vector.broadcast %cst_258 : f32 to vector<16x128xf32>
    %667 = arith.cmpf oge, %665, %666 : vector<16x128xf32>
    %cst_259 = arith.constant 0.00999999977 : f32
    %668 = vector.broadcast %cst_259 : f32 to vector<16x128xf32>
    %669 = arith.mulf %668, %665 : vector<16x128xf32>
    %670 = arith.select %667, %665, %669 : vector<16x128xi1>, vector<16x128xf32>
    %671 = arith.mulf %670, %670 : vector<16x128xf32>
    %672 = tpu.concatenate %670, %671 in 0 : vector<16x128xf32>, vector<16x128xf32> -> vector<32x128xf32>
    %c0_260 = arith.constant 0 : index
    %c0_261 = arith.constant 0 : index
    %673 = vector.load %arg26[%c0_260, %c0_261] : memref<16x32xf32, #tpu.memory_space<vmem>>, vector<16x32xf32>
    %cst_262 = arith.constant dense<0.000000e+00> : vector<16x128xf32>
    %674 = tpu.matmul %673, %672, %cst_262 {dimension_numbers = #tpu.dot_dimension_numbers<[1], [0], [0], [1], [0, 0, 1, 1], [], []>} : vector<16x32xf32>, vector<32x128xf32>, vector<16x128xf32> -> vector<16x128xf32>
    %c0_263 = arith.constant 0 : index
    %c0_264 = arith.constant 0 : index
    %675 = vector.load %arg25[%c0_263, %c0_264] : memref<128x128xf32, #tpu.memory_space<vmem>>, vector<128x128xf32>
    %cst_265 = arith.constant dense<0.000000e+00> : vector<16x128xf32>
    %676 = tpu.matmul %674, %675, %cst_265 {dimension_numbers = #tpu.dot_dimension_numbers<[1], [0], [0], [1], [0, 0, 1, 1], [], []>} : vector<16x128xf32>, vector<128x128xf32>, vector<16x128xf32> -> vector<16x128xf32>
    %677 = vector.extract_strided_slice %676 {offsets = [0, 0], sizes = [8, 128], strides = [1, 1]} : vector<16x128xf32> to vector<8x128xf32>
    %678 = vector.extract_strided_slice %676 {offsets = [8, 0], sizes = [8, 128], strides = [1, 1]} : vector<16x128xf32> to vector<8x128xf32>
    %c0_266 = arith.constant 0 : index
    %c0_267 = arith.constant 0 : index
    %679 = vector.load %arg28[%c0_266, %c0_267] : memref<4x128xf32, #tpu.memory_space<vmem>>, vector<4x128xf32>
    %680 = vector.extract_strided_slice %679 {offsets = [2, 0], sizes = [1, 128], strides = [1, 1]} : vector<4x128xf32> to vector<1x128xf32>
    %681 = vector.extract_strided_slice %679 {offsets = [3, 0], sizes = [1, 128], strides = [1, 1]} : vector<4x128xf32> to vector<1x128xf32>
    %682 = arith.mulf %677, %677 : vector<8x128xf32>
    %683 = arith.subf %678, %682 : vector<8x128xf32>
    %cst_268 = arith.constant 9.99999974E-6 : f32
    %684 = vector.broadcast %cst_268 : f32 to vector<8x128xf32>
    %685 = arith.addf %683, %684 : vector<8x128xf32>
    %686 = math.rsqrt %685 : vector<8x128xf32>
    %687 = vector.broadcast %680 : vector<1x128xf32> to vector<8x128xf32>
    %688 = arith.mulf %686, %687 : vector<8x128xf32>
    %689 = arith.mulf %677, %688 : vector<8x128xf32>
    %690 = vector.broadcast %681 : vector<1x128xf32> to vector<8x128xf32>
    %691 = arith.subf %690, %689 : vector<8x128xf32>
    %c0_269 = arith.constant 0 : index
    %c0_270 = arith.constant 0 : index
    %692 = vector.load %arg27[%c0_269, %c0_270] : memref<16x8xf32, #tpu.memory_space<vmem>>, vector<16x8xf32>
    %693 = tpu.concatenate %688, %691 in 1 : vector<8x128xf32>, vector<8x128xf32> -> vector<8x256xf32>
    %cst_271 = arith.constant dense<0.000000e+00> : vector<16x256xf32>
    %694 = tpu.matmul %692, %693, %cst_271 {dimension_numbers = #tpu.dot_dimension_numbers<[1], [0], [0], [1], [0, 0, 1, 1], [], []>} : vector<16x8xf32>, vector<8x256xf32>, vector<16x256xf32> -> vector<16x256xf32>
    %695 = vector.extract_strided_slice %694 {offsets = [0, 0], sizes = [16, 128], strides = [1, 1]} : vector<16x256xf32> to vector<16x128xf32>
    %696 = arith.mulf %670, %695 : vector<16x128xf32>
    %697 = vector.extract_strided_slice %694 {offsets = [0, 128], sizes = [16, 128], strides = [1, 1]} : vector<16x256xf32> to vector<16x128xf32>
    %698 = arith.addf %696, %697 : vector<16x128xf32>
    %c0_272 = arith.constant 0 : index
    %c0_273 = arith.constant 0 : index
    %699 = vector.load %arg29[%c0_272, %c0_273] : memref<16x128xf32, #tpu.memory_space<vmem>>, vector<16x128xf32>
    tpu.vector_store %arg29[%c0_272, %c0_273], %698 {strides = array<i32>} : memref<16x128xf32, #tpu.memory_space<vmem>>, vector<16x128xf32>,
    return
  }
  func.func @transform_0(%arg0: i32) -> (i32, i32) {
    %c0_i32 = arith.constant 0 : i32
    %c0_i32_0 = arith.constant 0 : i32
    return %arg0, %c0_i32 : i32, i32
  }
  func.func @transform_1(%arg0: i32) -> (i32, i32) {
    %c0_i32 = arith.constant 0 : i32
    %c0_i32_0 = arith.constant 0 : i32
    %c0_i32_1 = arith.constant 0 : i32
    return %c0_i32, %c0_i32_0 : i32, i32
  }
  func.func @transform_2(%arg0: i32) -> (i32, i32) {
    %c0_i32 = arith.constant 0 : i32
    %c0_i32_0 = arith.constant 0 : i32
    %c0_i32_1 = arith.constant 0 : i32
    return %c0_i32, %c0_i32_0 : i32, i32
  }
  func.func @transform_3(%arg0: i32) -> (i32, i32) {
    %c0_i32 = arith.constant 0 : i32
    %c0_i32_0 = arith.constant 0 : i32
    %c0_i32_1 = arith.constant 0 : i32
    return %c0_i32, %c0_i32_0 : i32, i32
  }
  func.func @transform_4(%arg0: i32) -> (i32, i32) {
    %c0_i32 = arith.constant 0 : i32
    %c0_i32_0 = arith.constant 0 : i32
    %c0_i32_1 = arith.constant 0 : i32
    return %c0_i32, %c0_i32_0 : i32, i32
  }
  func.func @transform_5(%arg0: i32) -> (i32, i32) {
    %c0_i32 = arith.constant 0 : i32
    %c0_i32_0 = arith.constant 0 : i32
    %c0_i32_1 = arith.constant 0 : i32
    return %c0_i32, %c0_i32_0 : i32, i32
  }
  func.func @transform_6(%arg0: i32) -> (i32, i32) {
    %c0_i32 = arith.constant 0 : i32
    %c0_i32_0 = arith.constant 0 : i32
    %c0_i32_1 = arith.constant 0 : i32
    return %c0_i32, %c0_i32_0 : i32, i32
  }
  func.func @transform_7(%arg0: i32) -> (i32, i32) {
    %c0_i32 = arith.constant 0 : i32
    %c0_i32_0 = arith.constant 0 : i32
    %c0_i32_1 = arith.constant 0 : i32
    return %c0_i32, %c0_i32_0 : i32, i32
  }
  func.func @transform_8(%arg0: i32) -> (i32, i32) {
    %c0_i32 = arith.constant 0 : i32
    %c0_i32_0 = arith.constant 0 : i32
    %c0_i32_1 = arith.constant 0 : i32
    return %c0_i32, %c0_i32_0 : i32, i32
  }
  func.func @transform_9(%arg0: i32) -> (i32, i32) {
    %c0_i32 = arith.constant 0 : i32
    %c0_i32_0 = arith.constant 0 : i32
    %c0_i32_1 = arith.constant 0 : i32
    return %c0_i32, %c0_i32_0 : i32, i32
  }
  func.func @transform_10(%arg0: i32) -> (i32, i32) {
    %c0_i32 = arith.constant 0 : i32
    %c0_i32_0 = arith.constant 0 : i32
    %c0_i32_1 = arith.constant 0 : i32
    return %c0_i32, %c0_i32_0 : i32, i32
  }
  func.func @transform_11(%arg0: i32) -> (i32, i32) {
    %c0_i32 = arith.constant 0 : i32
    %c0_i32_0 = arith.constant 0 : i32
    %c0_i32_1 = arith.constant 0 : i32
    return %c0_i32, %c0_i32_0 : i32, i32
  }
  func.func @transform_12(%arg0: i32) -> (i32, i32) {
    %c0_i32 = arith.constant 0 : i32
    %c0_i32_0 = arith.constant 0 : i32
    %c0_i32_1 = arith.constant 0 : i32
    return %c0_i32, %c0_i32_0 : i32, i32
  }
  func.func @transform_13(%arg0: i32) -> (i32, i32) {
    %c0_i32 = arith.constant 0 : i32
    %c0_i32_0 = arith.constant 0 : i32
    %c0_i32_1 = arith.constant 0 : i32
    return %c0_i32, %c0_i32_0 : i32, i32
  }
  func.func @transform_14(%arg0: i32) -> (i32, i32) {
    %c0_i32 = arith.constant 0 : i32
    %c0_i32_0 = arith.constant 0 : i32
    %c0_i32_1 = arith.constant 0 : i32
    return %c0_i32, %c0_i32_0 : i32, i32
  }
  func.func @transform_15(%arg0: i32) -> (i32, i32) {
    %c0_i32 = arith.constant 0 : i32
    %c0_i32_0 = arith.constant 0 : i32
    %c0_i32_1 = arith.constant 0 : i32
    return %c0_i32, %c0_i32_0 : i32, i32
  }
  func.func @transform_16(%arg0: i32) -> (i32, i32) {
    %c0_i32 = arith.constant 0 : i32
    %c0_i32_0 = arith.constant 0 : i32
    %c0_i32_1 = arith.constant 0 : i32
    return %c0_i32, %c0_i32_0 : i32, i32
  }
  func.func @transform_17(%arg0: i32) -> (i32, i32) {
    %c0_i32 = arith.constant 0 : i32
    %c0_i32_0 = arith.constant 0 : i32
    %c0_i32_1 = arith.constant 0 : i32
    return %c0_i32, %c0_i32_0 : i32, i32
  }
  func.func @transform_18(%arg0: i32) -> (i32, i32) {
    %c0_i32 = arith.constant 0 : i32
    %c0_i32_0 = arith.constant 0 : i32
    %c0_i32_1 = arith.constant 0 : i32
    return %c0_i32, %c0_i32_0 : i32, i32
  }
  func.func @transform_19(%arg0: i32) -> (i32, i32) {
    %c0_i32 = arith.constant 0 : i32
    %c0_i32_0 = arith.constant 0 : i32
    %c0_i32_1 = arith.constant 0 : i32
    return %c0_i32, %c0_i32_0 : i32, i32
  }
  func.func @transform_20(%arg0: i32) -> (i32, i32) {
    %c0_i32 = arith.constant 0 : i32
    %c0_i32_0 = arith.constant 0 : i32
    %c0_i32_1 = arith.constant 0 : i32
    return %c0_i32, %c0_i32_0 : i32, i32
  }
  func.func @transform_21(%arg0: i32) -> (i32, i32) {
    %c0_i32 = arith.constant 0 : i32
    %c0_i32_0 = arith.constant 0 : i32
    %c0_i32_1 = arith.constant 0 : i32
    return %c0_i32, %c0_i32_0 : i32, i32
  }
  func.func @transform_22(%arg0: i32) -> (i32, i32) {
    %c0_i32 = arith.constant 0 : i32
    %c0_i32_0 = arith.constant 0 : i32
    %c0_i32_1 = arith.constant 0 : i32
    return %c0_i32, %c0_i32_0 : i32, i32
  }
  func.func @transform_23(%arg0: i32) -> (i32, i32) {
    %c0_i32 = arith.constant 0 : i32
    %c0_i32_0 = arith.constant 0 : i32
    %c0_i32_1 = arith.constant 0 : i32
    return %c0_i32, %c0_i32_0 : i32, i32
  }
  func.func @transform_24(%arg0: i32) -> (i32, i32) {
    %c0_i32 = arith.constant 0 : i32
    %c0_i32_0 = arith.constant 0 : i32
    %c0_i32_1 = arith.constant 0 : i32
    return %c0_i32, %c0_i32_0 : i32, i32
  }
  func.func @transform_25(%arg0: i32) -> (i32, i32) {
    %c0_i32 = arith.constant 0 : i32
    %c0_i32_0 = arith.constant 0 : i32
    %c0_i32_1 = arith.constant 0 : i32
    return %c0_i32, %c0_i32_0 : i32, i32
  }
  func.func @transform_26(%arg0: i32) -> (i32, i32) {
    %c0_i32 = arith.constant 0 : i32
    %c0_i32_0 = arith.constant 0 : i32
    %c0_i32_1 = arith.constant 0 : i32
    return %c0_i32, %c0_i32_0 : i32, i32
  }
  func.func @transform_27(%arg0: i32) -> (i32, i32) {
    %c0_i32 = arith.constant 0 : i32
    %c0_i32_0 = arith.constant 0 : i32
    %c0_i32_1 = arith.constant 0 : i32
    return %c0_i32, %c0_i32_0 : i32, i32
  }
  func.func @transform_28(%arg0: i32) -> (i32, i32) {
    %c0_i32 = arith.constant 0 : i32
    %c0_i32_0 = arith.constant 0 : i32
    return %arg0, %c0_i32 : i32, i32
  }
}

</mosaic_0001>

<bundles_post_ra>
// kernel: tpu_custom_call.1
= control target key start
LH: loop header
LB: loop body
LE: loop exit
PB: predicated region body
PF: predicated region fallthrough
CT: control target
= control target key end

     0   :  { %s14611_s0 = inlined_call_operand.vmem [shape: f32[256,16], index: 0, kind: input, shape index: {}]   ;;  %s14612_s1 = inlined_call_operand.hbm [shape: f32[48,256], index: 1, kind: input, shape index: {}]   ;;  %s14613_s2 = inlined_call_operand.vmem [shape: f32[384,128], index: 2, kind: input, shape index: {}]   ;;  %s14614_s3 = inlined_call_operand.vmem [shape: f32[128,128], index: 3, kind: input, shape index: {}]   ;;  %s14615_s4 = inlined_call_operand.hbm [shape: f32[16,256], index: 4, kind: input, shape index: {}]   ;;  %s14616_s5 = inlined_call_operand.vmem [shape: f32[128,8], index: 5, kind: input, shape index: {}]   ;;  %s14617_s6 = inlined_call_operand.hbm [shape: f32[4,128], index: 6, kind: input, shape index: {}]   ;;  %s14618_s7 = inlined_call_operand.hbm [shape: f32[64,128], index: 7, kind: input, shape index: {}]   ;;  %s14619_s8 = inlined_call_operand.hbm [shape: f32[384,256], index: 8, kind: input, shape index: {}]   ;;  %s14620_s9 = inlined_call_operand.hbm [shape: f32[384,128], index: 9, kind: input, shape index: {}]   ;;  %s14621_s10 = inlined_call_operand.hbm [shape: f32[128,128], index: 10, kind: input, shape index: {}]   ;;  %s14622_s11 = inlined_call_operand.hbm [shape: f32[16,128], index: 11, kind: input, shape index: {}]   ;;  %s14623_s12 = inlined_call_operand.vmem [shape: f32[64,8], index: 12, kind: input, shape index: {}]   ;;  %s14624_s13 = inlined_call_operand.hbm [shape: f32[4,128], index: 13, kind: input, shape index: {}]   ;;  %s14625_s14 = inlined_call_operand.hbm [shape: f32[32,64], index: 14, kind: input, shape index: {}]   ;;  %s14626_s15 = inlined_call_operand.hbm [shape: f32[384,256], index: 15, kind: input, shape index: {}]   ;;  %s14627_s16 = inlined_call_operand.hbm [shape: f32[384,128], index: 16, kind: input, shape index: {}]   ;;  %s14628_s17 = inlined_call_operand.hbm [shape: f32[128,128], index: 17, kind: input, shape index: {}]   ;;  %s14629_s18 = inlined_call_operand.hbm [shape: f32[16,64], index: 18, kind: input, shape index: {}]   ;;  %s14630_s19 = inlined_call_operand.vmem [shape: f32[32,8], index: 19, kind: input, shape index: {}]   ;;  %s14631_s20 = inlined_call_operand.hbm [shape: f32[4,128], index: 20, kind: input, shape index: {}]   ;;  %s14632_s21 = inlined_call_operand.hbm [shape: f32[16,32], index: 21, kind: input, shape index: {}]   ;;  %s14633_s22 = inlined_call_operand.hbm [shape: f32[384,256], index: 22, kind: input, shape index: {}]   ;;  %s14634_s23 = inlined_call_operand.hbm [shape: f32[384,128], index: 23, kind: input, shape index: {}]   ;;  %s14635_s24 = inlined_call_operand.vmem [shape: f32[128,128], index: 24, kind: input, shape index: {}]   ;;  %s14636_s25 = inlined_call_operand.hbm [shape: f32[16,32], index: 25, kind: input, shape index: {}]   ;;  %s14637_s26 = inlined_call_operand.vmem [shape: f32[16,8], index: 26, kind: input, shape index: {}]   ;;  %s14638_s27 = inlined_call_operand.vmem [shape: f32[4,128], index: 27, kind: input, shape index: {}]   ;;  %s14639_s28 = inlined_call_operand.hbm [shape: f32[32,128], index: 28, kind: output, shape index: {}]  }
   0x1   :  { %14740 = sst [smem:[#allocation85_spill]] %s14611_s0 }
   0x2   :  { %14741 = sst [smem:[#allocation86_spill]] %s14612_s1 }
   0x3   :  { %14742 = sst [smem:[#allocation87_spill]] %s14613_s2 }
   0x4   :  { %14743 = sst [smem:[#allocation88_spill]] %s14614_s3 }
   0x5   :  { %14744 = sst [smem:[#allocation89_spill]] %s14615_s4 }
   0x6   :  { %14745 = sst [smem:[#allocation90_spill]] %s14616_s5 }
   0x7   :  { %14746 = sst [smem:[#allocation91_spill]] %s14617_s6 }
   0x8   :  { %14747 = sst [smem:[#allocation92_spill]] %s14618_s7 }
   0x9   :  { %14748 = sst [smem:[#allocation93_spill]] %s14619_s8 }
   0xa   :  { %14749 = sst [smem:[#allocation94_spill]] %s14620_s9 }
   0xb   :  { %14750 = sst [smem:[#allocation95_spill]] %s14621_s10 }
   0xc   :  { %14751 = sst [smem:[#allocation96_spill]] %s14622_s11 }
   0xd   :  { %14752 = sst [smem:[#allocation97_spill]] %s14623_s12 }
   0xe   :  { %14753 = sst [smem:[#allocation98_spill]] %s14625_s14 }
   0xf   :  { %14754 = sst [smem:[#allocation99_spill]] %s14627_s16 }
  0x10   :  { %14755 = sst [smem:[#allocation100_spill]] %s14629_s18 }
  0x11   :  { %14756 = sst [smem:[#allocation101_spill]] %s14630_s19 }
  0x12   :  { %14757 = sst [smem:[#allocation102_spill]] %s14635_s24 }
  0x13   :  { %14758 = sst [smem:[#allocation103_spill]] %s14637_s26 }
  0x14   :  { %14759 = sst [smem:[#allocation104_spill]] %s14638_s27 }
  0x15   :  { %14760 = sst [smem:[#allocation105_spill]] %s14639_s28 }
  0x16   :  { %33 = vsyncpa [#allocation3], 0 }
  0x17   :  { %34 = vsyncpa [#allocation6], 0 }
  0x18   :  { %35 = vsyncpa [#allocation9], 0 }
  0x19   :  { %36 = vsyncpa [#allocation12], 0 }
  0x1a   :  { %37 = vsyncpa [#allocation15], 0 }
  0x1b   :  { %38 = vsyncpa [#allocation18], 0 }
  0x1c   :  { %39 = vsyncpa [#allocation21], 0 }
  0x1d   :  { %40 = vsyncpa [#allocation24], 0 }
  0x1e   :  { %41 = vsyncpa [#allocation27], 0 }
  0x1f   :  { %42 = vsyncpa [#allocation30], 0 }
  0x20   :  { %43 = vsyncpa [#allocation4], 0 }
  0x21   :  { %45 = vsyncpa [#allocation4 + $0x1], 0  ;;  %s11771_s8 = smov 0   ;;  %s11773_s5 = smov 0  }
  0x22   :  { %s11775_s9 = smov 0   ;;  %s11777_s30 = smov 0  }
  0x23   :  { %14761 = sst [smem:[#allocation44_spill]] %s11777_s30 }
  0x24 LB: > { %s14763_s30 = sld [smem:[#allocation44_spill]]  ;;  %14765 = sst [smem:[#allocation45_spill]] %s11584_s5  ;;  %s11588_s9 = sphi %s11775_s9, %s15179_s9   ;;  %s11584_s5 = sphi %s11773_s5, %s15178_s5   ;;  %s11580_s8 = sphi %s11771_s8, %s15177_s8  }
  0x25   : > { %14764 = sst [smem:[#allocation44_spill]] %s11580_s8  ;;  %s651_s0 = sadd.s32 1, %s11588_s9 }
  0x26   : > { %14766 = sst [smem:[#allocation46_spill]] %s11588_s9  ;;  %p661_p0 = scmp.ne.s32.totalorder %s11588_s9, %s11584_s5 }
  0x27   : > { %p667_p3 = scmp.ne.s32.totalorder %s11584_s5, %s11580_s8  ;;  %s11594_s1 = smov [#allocation5]  }
  0x28   : > { %s706_s4 = sshll.u32 %s11594_s1, 4  ;;  %s707_s4 = int_to_ptr.vmem [resolvable:$true] %s706_s4 }
  0x2a   : > { %14767 = sst [smem:[#allocation47_spill]] %s14763_s30  ;;  %s11792_s3 = sadd.s32 4294967295, %s14763_s30  }
  0x2b   : > { %14768 = sst [smem:[#allocation48_spill]] %s11792_s3  ;;  %s7951_s6 = sadd.s32 4294967294, %s14763_s30  }
  0x2c   : > { %s11796_s10 = sadd.s32 1, %s14763_s30   ;;  %p662_p2 = scmp.eq.s32.totalorder %s11792_s3, 1 }
  0x2d   : > { %14769 = sst [smem:[#allocation49_spill]] %s11796_s10  ;;  %s648_s11 = ssub.s32 %s14763_s30, %s11796_s10 }
  0x2e   : > { %p649_p1 = scmp.eq.s32.totalorder %s648_s11, 0  ;;  %p668_p4 = scmp.eq.s32.totalorder %s7951_s6, 1 }
  0x2f   : > { %p11809_p5 = por %p662_p2, %p661_p0  ;;  %p7952_p7 = scmp.ge.s32.totalorder %s14763_s30, 1 }
  0x30   : > { %s11807_s29 = scalar_select %p649_p1, %s11588_s9, %s651_s0  }
  0x31   : > { %s14771_s2 = scalar_select %p11809_p5, 1, 0 }
  0x32   : > { %14770 = sst [smem:[#allocation50_spill]] %s11807_s29  ;;  %p11813_p6 = por %p668_p4, %p667_p3 }
  0x33   : > { %14772 = sst [smem:[#allocation51_spill]] %s14771_s2  ;;  %p675_p8 = scmp.lt.s32.totalorder %s14763_s30, 3 }
  0x34   : > { %s14773_s7 = scalar_select %p11813_p6, 1, 0 }
  0x35   : > { %p14659_p9 = scmp.eq.s32.totalorder %s11792_s3, 0  ;;  %p11820_p10 = pnand %p7952_p7, %p675_p8 }
  0x36   : > { %14774 = sst [smem:[#allocation52_spill]] %s14773_s7  ;;  %s11595_s0 = smov [#allocation8]  }
  0x37   : > { %s14775_s12 = scalar_select %p11820_p10, 1, 0 }
  0x38   : > { %p10716_p11 = pneg %p11820_p10  ;;  %s733_s11 = sshll.u32 %s11595_s0, 4  ;;  %s11832_s11 = int_to_ptr.vmem [resolvable:$true] %s733_s11 }
  0x39   : > { %s14777_s10 = sld [smem:[#allocation89_spill]] }
  0x3a   : > { %p11828_p12 = pnand %p14659_p9, %p10716_p11 }
  0x3c   : > { %p11842_p0 = pneg %p11828_p12 }
  0x3f   : > { %s10958_s7 = scalar_lea.hbm %s14777_s10, 512 }
  0x40   : > { %p10959_p13 = scmp.ne.s32.totalorder %s14777_s10, %s10958_s7  ;;  %p10965_p3 = scmp.lt.u32.totalorder %s10958_s7, %s14777_s10 }
  0x42   : > { %p10961_p1 = pnand %p11842_p0, %p10959_p13 }
  0x44   : > { %p10962_p2 = pneg %p10961_p1 }
  0x46   : > { %p10967_p4 = pnand %p10965_p3, %p10962_p2 }
  0x48   : > { %10970 = shalt.err (!%p10967_p4)
}
  0x49   : > { %s10971_s9 = scalar_lea.vmem %s707_s4, 512  ;;  %p10979_p9 = scmp.lt.s32.totalorder %s707_s4, %s707_s4 }
  0x4a   : > { %p10972_p7 = scmp.ne.s32.totalorder %s707_s4, %s10971_s9  ;;  %p10980_p6 = scmp.lt.s32.totalorder %s10971_s9, %s10971_s9 }
  0x4c   : > { %p10974_p8 = pnand %p10972_p7, %p11842_p0  ;;  %p10981_p5 = por %p10980_p6, %p10979_p9 }
  0x4e   : > { %p10975_p11 = pneg %p10974_p8 }
  0x50   : > { %p10982_p10 = pnand %p10981_p5, %p10975_p11 }
  0x52   : > { %10985 = shalt.err (!%p10982_p10)
}
  0x53   : > { %s14667_s8 = smov 256   ;;  %s14669_s30 = smov 16  }
  0x54   : > { %10722 = dma.hbm_to_vmem [thread:$0]  (!%p11828_p12), %s14777_s10, 512, %s707_s4, [#allocation6], %s14667_s8, %s14667_s8, %s14669_s30  }
  0x55   : > { %s14779_s2 = sld [smem:[#allocation92_spill]] }
  0x5b   : > { %s10986_s5 = scalar_lea.hbm %s14779_s2, 1024 }
  0x5c   : > { %p10987_p5 = scmp.ne.s32.totalorder %s14779_s2, %s10986_s5  ;;  %p10993_p10 = scmp.lt.u32.totalorder %s10986_s5, %s14779_s2 }
  0x5e   : > { %p10989_p6 = pnand %p10987_p5, %p11842_p0 }
  0x60   : > { %p10990_p9 = pneg %p10989_p6 }
  0x62   : > { %p10995_p13 = pnand %p10993_p10, %p10990_p9 }
  0x64   : > { %10998 = shalt.err (!%p10995_p13)
}
  0x65   : > { %s10999_s4 = scalar_lea.vmem %s11832_s11, 1024  ;;  %p11007_p4 = scmp.lt.s32.totalorder %s11832_s11, %s11832_s11 }
  0x66   : > { %p11000_p1 = scmp.ne.s32.totalorder %s11832_s11, %s10999_s4  ;;  %p11008_p7 = scmp.lt.s32.totalorder %s10999_s4, %s10999_s4 }
  0x68   : > { %p11002_p2 = pnand %p11000_p1, %p11842_p0  ;;  %p11009_p8 = por %p11008_p7, %p11007_p4 }
  0x6a   : > { %p11003_p3 = pneg %p11002_p2 }
  0x6c   : > { %p11010_p11 = pnand %p11009_p8, %p11003_p3 }
  0x6e   : > { %11013 = shalt.err (!%p11010_p11)
}
  0x6f   : > { %s14675_s26 = smov 128   ;;  %s14677_s24 = smov 8  }
  0x70   : > { %10728 = dma.hbm_to_vmem [thread:$0]  (!%p11828_p12), %s14779_s2, 1024, %s11832_s11, [#allocation9], %s14675_s26, %s14675_s26, %s14677_s24  }
  0x71   : > { %s11600_s28 = smov [#allocation11]   ;;  %s11601_s7 = smov [#allocation14]  }
  0x72   : > { %s759_s29 = sshll.u32 %s11600_s28, 4  ;;  %s785_s0 = sshll.u32 %s11601_s7, 4  ;;  %s760_s29 = int_to_ptr.vmem [resolvable:$true] %s759_s29  ;;  %s11887_s0 = int_to_ptr.vmem [resolvable:$true] %s785_s0 }
  0x73   : > { %s14780_s8 = sld [smem:[#allocation94_spill]] }
  0x79   : > { %s14781_s30 = smov %s14780_s8  ;;  %s11014_s10 = scalar_lea.hbm %s14780_s8, 6144 }
  0x7a   : > { %p11015_p5 = scmp.ne.s32.totalorder %s14781_s30, %s11014_s10  ;;  %p11021_p10 = scmp.lt.u32.totalorder %s11014_s10, %s14781_s30 }
  0x7c   : > { %p11017_p6 = pnand %p11015_p5, %p11842_p0 }
  0x7e   : > { %p11018_p9 = pneg %p11017_p6 }
  0x80   : > { %p11023_p13 = pnand %p11021_p10, %p11018_p9 }
  0x82   : > { %11026 = shalt.err (!%p11023_p13)
}
  0x83   : > { %s11027_s5 = scalar_lea.vmem %s760_s29, 6144  ;;  %p11035_p4 = scmp.lt.s32.totalorder %s760_s29, %s760_s29 }
  0x84   : > { %p11028_p1 = scmp.ne.s32.totalorder %s760_s29, %s11027_s5  ;;  %p11036_p7 = scmp.lt.s32.totalorder %s11027_s5, %s11027_s5 }
  0x86   : > { %p11030_p2 = pnand %p11028_p1, %p11842_p0  ;;  %p11037_p8 = por %p11036_p7, %p11035_p4 }
  0x88   : > { %p11031_p3 = pneg %p11030_p2 }
  0x8a   : > { %p11038_p11 = pnand %p11037_p8, %p11031_p3 }
  0x8c   : > { %11041 = shalt.err (!%p11038_p11)
}
  0x8d   : > { %10734 = dma.hbm_to_vmem [thread:$0]  (!%p11828_p12), %s14781_s30, 6144, %s760_s29, [#allocation12], %s14675_s26, %s14675_s26, %s14677_s24  }
  0x8e   : > { %s14782_s28 = sld [smem:[#allocation96_spill]] }
  0x94   : > { %s11042_s7 = scalar_lea.hbm %s14782_s28, 256 }
  0x95   : > { %p11043_p5 = scmp.ne.s32.totalorder %s14782_s28, %s11042_s7  ;;  %p11049_p10 = scmp.lt.u32.totalorder %s11042_s7, %s14782_s28 }
  0x97   : > { %p11045_p6 = pnand %p11043_p5, %p11842_p0 }
  0x99   : > { %p11046_p9 = pneg %p11045_p6 }
  0x9b   : > { %p11051_p13 = pnand %p11049_p10, %p11046_p9 }
  0x9d   : > { %11054 = shalt.err (!%p11051_p13)
}
  0x9e   : > { %s11055_s29 = scalar_lea.vmem %s11887_s0, 256  ;;  %p11063_p4 = scmp.lt.s32.totalorder %s11887_s0, %s11887_s0 }
  0x9f   : > { %p11056_p1 = scmp.ne.s32.totalorder %s11887_s0, %s11055_s29  ;;  %p11064_p7 = scmp.lt.s32.totalorder %s11055_s29, %s11055_s29 }
  0xa1   : > { %p11058_p2 = pnand %p11056_p1, %p11842_p0  ;;  %p11065_p8 = por %p11064_p7, %p11063_p4 }
  0xa3   : > { %p11059_p3 = pneg %p11058_p2 }
  0xa5   : > { %p11066_p11 = pnand %p11065_p8, %p11059_p3 }
  0xa7   : > { %11069 = shalt.err (!%p11066_p11)
}
  0xa8   : > { %10740 = dma.hbm_to_vmem [thread:$0]  (!%p11828_p12), %s14782_s28, 256, %s11887_s0, [#allocation15], %s14675_s26, %s14675_s26, %s14677_s24  }
  0xa9   : > { %s11602_s3 = smov [#allocation17]   ;;  %s11603_s8 = smov [#allocation20]  }
  0xaa   : > { %s812_s10 = sshll.u32 %s11602_s3, 4  ;;  %s838_s7 = sshll.u32 %s11603_s8, 4  ;;  %s813_s10 = int_to_ptr.vmem [resolvable:$true] %s812_s10  ;;  %s11936_s7 = int_to_ptr.vmem [resolvable:$true] %s838_s7 }
  0xab   : > { %s14783_s14 = sld [smem:[#allocation98_spill]] }
  0xb1   : > { %s11070_s27 = scalar_lea.hbm %s14783_s14, 512 }
  0xb2   : > { %p11071_p5 = scmp.ne.s32.totalorder %s14783_s14, %s11070_s27  ;;  %p11077_p10 = scmp.lt.u32.totalorder %s11070_s27, %s14783_s14 }
  0xb4   : > { %p11073_p6 = pnand %p11071_p5, %p11842_p0 }
  0xb6   : > { %p11074_p9 = pneg %p11073_p6 }
  0xb8   : > { %p11079_p13 = pnand %p11077_p10, %p11074_p9 }
  0xba   : > { %11082 = shalt.err (!%p11079_p13)
}
  0xbb   : > { %s11083_s19 = scalar_lea.vmem %s813_s10, 512  ;;  %p11091_p4 = scmp.lt.s32.totalorder %s813_s10, %s813_s10 }
  0xbc   : > { %p11084_p1 = scmp.ne.s32.totalorder %s813_s10, %s11083_s19  ;;  %p11092_p7 = scmp.lt.s32.totalorder %s11083_s19, %s11083_s19 }
  0xbe   : > { %p11086_p2 = pnand %p11084_p1, %p11842_p0  ;;  %p11093_p8 = por %p11092_p7, %p11091_p4 }
  0xc0   : > { %p11087_p3 = pneg %p11086_p2 }
  0xc2   : > { %p11094_p11 = pnand %p11093_p8, %p11087_p3 }
  0xc4   : > { %11097 = shalt.err (!%p11094_p11)
}
  0xc5   : > { %10746 = dma.hbm_to_vmem [thread:$0]  (!%p11828_p12), %s14783_s14, 512, %s813_s10, [#allocation18], %s14675_s26, %s14675_s26, %s14677_s24  }
  0xc6   : > { %s14784_s16 = sld [smem:[#allocation99_spill]] }
  0xcc   : > { %s11098_s27 = scalar_lea.hbm %s14784_s16, 6144 }
  0xcd   : > { %p11099_p5 = scmp.ne.s32.totalorder %s14784_s16, %s11098_s27  ;;  %p11105_p10 = scmp.lt.u32.totalorder %s11098_s27, %s14784_s16 }
  0xcf   : > { %p11101_p6 = pnand %p11099_p5, %p11842_p0 }
  0xd1   : > { %p11102_p9 = pneg %p11101_p6 }
  0xd3   : > { %p11107_p13 = pnand %p11105_p10, %p11102_p9 }
  0xd5   : > { %11110 = shalt.err (!%p11107_p13)
}
  0xd6   : > { %s11111_s10 = scalar_lea.vmem %s11936_s7, 6144  ;;  %p11119_p4 = scmp.lt.s32.totalorder %s11936_s7, %s11936_s7 }
  0xd7   : > { %p11112_p1 = scmp.ne.s32.totalorder %s11936_s7, %s11111_s10  ;;  %p11120_p7 = scmp.lt.s32.totalorder %s11111_s10, %s11111_s10 }
  0xd9   : > { %p11114_p2 = pnand %p11112_p1, %p11842_p0  ;;  %p11121_p8 = por %p11120_p7, %p11119_p4 }
  0xdb   : > { %p11115_p3 = pneg %p11114_p2 }
  0xdd   : > { %p11122_p11 = pnand %p11121_p8, %p11115_p3 }
  0xdf   : > { %11125 = shalt.err (!%p11122_p11)
}
  0xe0   : > { %10752 = dma.hbm_to_vmem [thread:$0]  (!%p11828_p12), %s14784_s16, 6144, %s11936_s7, [#allocation21], %s14675_s26, %s14675_s26, %s14677_s24  }
  0xe1   : > { %s11604_s8 = smov [#allocation23]   ;;  %s11605_s4 = smov [#allocation26]  }
  0xe2   : > { %s864_s9 = sshll.u32 %s11604_s8, 4  ;;  %s891_s27 = sshll.u32 %s11605_s4, 4  ;;  %s865_s9 = int_to_ptr.vmem [resolvable:$true] %s864_s9  ;;  %s11985_s27 = int_to_ptr.vmem [resolvable:$true] %s891_s27 }
  0xe3   : > { %s14785_s18 = sld [smem:[#allocation100_spill]] }
  0xe9   : > { %s11126_s5 = scalar_lea.hbm %s14785_s18, 256 }
  0xea   : > { %p11127_p5 = scmp.ne.s32.totalorder %s14785_s18, %s11126_s5  ;;  %p11133_p10 = scmp.lt.u32.totalorder %s11126_s5, %s14785_s18 }
  0xec   : > { %p11129_p6 = pnand %p11127_p5, %p11842_p0 }
  0xee   : > { %p11130_p9 = pneg %p11129_p6 }
  0xf0   : > { %p11135_p13 = pnand %p11133_p10, %p11130_p9 }
  0xf2   : > { %11138 = shalt.err (!%p11135_p13)
}
  0xf3   : > { %s11139_s3 = scalar_lea.vmem %s865_s9, 256  ;;  %p11147_p4 = scmp.lt.s32.totalorder %s865_s9, %s865_s9 }
  0xf4   : > { %p11140_p1 = scmp.ne.s32.totalorder %s865_s9, %s11139_s3  ;;  %p11148_p7 = scmp.lt.s32.totalorder %s11139_s3, %s11139_s3 }
  0xf6   : > { %p11142_p2 = pnand %p11140_p1, %p11842_p0  ;;  %p11149_p8 = por %p11148_p7, %p11147_p4 }
  0xf8   : > { %p11143_p3 = pneg %p11142_p2 }
  0xfa   : > { %p11150_p11 = pnand %p11149_p8, %p11143_p3 }
  0xfc   : > { %11153 = shalt.err (!%p11150_p11)
}
  0xfd   : > { %10758 = dma.hbm_to_vmem [thread:$0]  (!%p11828_p12), %s14785_s18, 256, %s865_s9, [#allocation24], %s14675_s26, %s14675_s26, %s14677_s24  }
  0xfe   : > { %s11154_s5 = scalar_lea.hbm %s14632_s21, 256 }
  0xff   : > { %p11155_p5 = scmp.ne.s32.totalorder %s14632_s21, %s11154_s5  ;;  %p11161_p10 = scmp.lt.u32.totalorder %s11154_s5, %s14632_s21 }
 0x101   : > { %p11157_p6 = pnand %p11155_p5, %p11842_p0 }
 0x103   : > { %p11158_p9 = pneg %p11157_p6 }
 0x105   : > { %p11163_p13 = pnand %p11161_p10, %p11158_p9 }
 0x107   : > { %11166 = shalt.err (!%p11163_p13)
}
 0x108   : > { %s11167_s9 = scalar_lea.vmem %s11985_s27, 256  ;;  %p11175_p4 = scmp.lt.s32.totalorder %s11985_s27, %s11985_s27 }
 0x109   : > { %p11168_p1 = scmp.ne.s32.totalorder %s11985_s27, %s11167_s9  ;;  %p11176_p7 = scmp.lt.s32.totalorder %s11167_s9, %s11167_s9 }
 0x10b   : > { %p11170_p2 = pnand %p11168_p1, %p11842_p0  ;;  %p11177_p8 = por %p11176_p7, %p11175_p4 }
 0x10d   : > { %p11171_p3 = pneg %p11170_p2 }
 0x10f   : > { %p11178_p11 = pnand %p11177_p8, %p11171_p3 }
 0x111   : > { %11181 = shalt.err (!%p11178_p11)
}
 0x112   : > { %10764 = dma.hbm_to_vmem [thread:$0]  (!%p11828_p12), %s14632_s21, 256, %s11985_s27, [#allocation27], %s14675_s26, %s14675_s26, %s14677_s24  }
 0x113   : > { %s11606_s4 = smov [#allocation29]   ;;  %s11607_s29 = smov [#allocation2]  }
 0x114   : > { %s917_s11 = sshll.u32 %s11606_s4, 4  ;;  %s687_s5 = sshll.u32 %s11607_s29, 4  ;;  %s918_s11 = int_to_ptr.vmem [resolvable:$true] %s917_s11  ;;  %s12034_s5 = int_to_ptr.vmem [resolvable:$true] %s687_s5 }
 0x115   : > { %s11182_s19 = scalar_lea.hbm %s14634_s23, 6144 }
 0x116   : > { %p11183_p5 = scmp.ne.s32.totalorder %s14634_s23, %s11182_s19  ;;  %p11189_p10 = scmp.lt.u32.totalorder %s11182_s19, %s14634_s23 }
 0x118   : > { %p11185_p6 = pnand %p11183_p5, %p11842_p0 }
 0x11a   : > { %p11186_p9 = pneg %p11185_p6 }
 0x11c   : > { %p11191_p13 = pnand %p11189_p10, %p11186_p9 }
 0x11e   : > { %11194 = shalt.err (!%p11191_p13)
}
 0x11f   : > { %s11195_s8 = scalar_lea.vmem %s918_s11, 6144  ;;  %p11203_p4 = scmp.lt.s32.totalorder %s918_s11, %s918_s11 }
 0x120   : > { %p11196_p1 = scmp.ne.s32.totalorder %s918_s11, %s11195_s8  ;;  %p11204_p7 = scmp.lt.s32.totalorder %s11195_s8, %s11195_s8 }
 0x122   : > { %p11198_p2 = pnand %p11196_p1, %p11842_p0  ;;  %p11205_p8 = por %p11204_p7, %p11203_p4 }
 0x124   : > { %p11199_p3 = pneg %p11198_p2 }
 0x126   : > { %p11206_p11 = pnand %p11205_p8, %p11199_p3 }
 0x128   : > { %11209 = shalt.err (!%p11206_p11)
}
 0x129   : > { %10770 = dma.hbm_to_vmem [thread:$0]  (!%p11828_p12), %s14634_s23, 6144, %s918_s11, [#allocation30], %s14675_s26, %s14675_s26, %s14677_s24  }
 0x12a   : > { %s14786_s19 = sld [smem:[#allocation86_spill]] }
 0x130   : > { %s11210_s7 = scalar_lea.hbm %s14786_s19, 1536 }
 0x131   : > { %p11211_p5 = scmp.ne.s32.totalorder %s14786_s19, %s11210_s7  ;;  %p11217_p10 = scmp.lt.u32.totalorder %s11210_s7, %s14786_s19 }
 0x133   : > { %p11213_p6 = pnand %p11211_p5, %p11842_p0 }
 0x135   : > { %p11214_p9 = pneg %p11213_p6 }
 0x137   : > { %p11219_p13 = pnand %p11217_p10, %p11214_p9 }
 0x139   : > { %11222 = shalt.err (!%p11219_p13)
}
 0x13a   : > { %s11223_s11 = scalar_lea.vmem %s12034_s5, 1536  ;;  %p11231_p4 = scmp.lt.s32.totalorder %s12034_s5, %s12034_s5 }
 0x13b   : > { %p11224_p1 = scmp.ne.s32.totalorder %s12034_s5, %s11223_s11  ;;  %p11232_p7 = scmp.lt.s32.totalorder %s11223_s11, %s11223_s11 }
 0x13d   : > { %p11226_p2 = pnand %p11224_p1, %p11842_p0  ;;  %p11233_p8 = por %p11232_p7, %p11231_p4 }
 0x13f   : > { %p11227_p3 = pneg %p11226_p2 }
 0x141   : > { %p11234_p11 = pnand %p11233_p8, %p11227_p3 }
 0x143   : > { %11237 = shalt.err (!%p11234_p11)
}
 0x144   : > { %s14787_s4 = smov 16   ;;  %s14788_s29 = smov 256  }
 0x145   : > { %10719 = dma.hbm_to_vmem [thread:$0]  (!%p11828_p12), %s14786_s19, 1536, %s12034_s5, [#allocation3], %s14788_s29, %s14788_s29, %s14787_s4  }
 0x146   : > { %s11608_s7 = smov [#allocation7]   ;;  %s11609_s3 = smov [#allocation10]  }
 0x147   : > { %s723_s9 = sshll.u32 %s11608_s7, 4  ;;  %s746_s27 = sshll.u32 %s11609_s3, 4  ;;  %s724_s9 = int_to_ptr.vmem [resolvable:$true] %s723_s9  ;;  %s12083_s27 = int_to_ptr.vmem [resolvable:$true] %s746_s27 }
 0x148   : > { %s14789_s26 = sld [smem:[#allocation91_spill]] }
 0x14e   : > { %s11238_s24 = scalar_lea.hbm %s14789_s26, 64 }
 0x14f   : > { %p11239_p5 = scmp.ne.s32.totalorder %s14789_s26, %s11238_s24  ;;  %p11245_p10 = scmp.lt.u32.totalorder %s11238_s24, %s14789_s26 }
 0x151   : > { %p11241_p6 = pnand %p11239_p5, %p11842_p0 }
 0x153   : > { %p11242_p9 = pneg %p11241_p6 }
 0x155   : > { %p11247_p13 = pnand %p11245_p10, %p11242_p9 }
 0x157   : > { %11250 = shalt.err (!%p11247_p13)
}
 0x158   : > { %s11251_s10 = scalar_lea.vmem %s724_s9, 64  ;;  %p11259_p4 = scmp.lt.s32.totalorder %s724_s9, %s724_s9 }
 0x159   : > { %p11252_p1 = scmp.ne.s32.totalorder %s724_s9, %s11251_s10  ;;  %p11260_p7 = scmp.lt.s32.totalorder %s11251_s10, %s11251_s10 }
 0x15b   : > { %p11254_p2 = pnand %p11252_p1, %p11842_p0  ;;  %p11261_p8 = por %p11260_p7, %p11259_p4 }
 0x15d   : > { %p11255_p3 = pneg %p11254_p2 }
 0x15f   : > { %p11262_p11 = pnand %p11261_p8, %p11255_p3 }
 0x161   : > { %11265 = shalt.err (!%p11262_p11)
}
 0x162   : > { %10725 = dma.hbm_to_vmem [thread:$0]  (!%p11828_p12), %s14789_s26, 64, %s724_s9, [#allocation6]  }
 0x163   : > { %s14790_s3 = sld [smem:[#allocation93_spill]] }
 0x169   : > { %s11266_s8 = scalar_lea.hbm %s14790_s3, 12288 }
 0x16a   : > { %p11267_p5 = scmp.ne.s32.totalorder %s14790_s3, %s11266_s8  ;;  %p11273_p10 = scmp.lt.u32.totalorder %s11266_s8, %s14790_s3 }
 0x16c   : > { %p11269_p6 = pnand %p11267_p5, %p11842_p0 }
 0x16e   : > { %p11270_p9 = pneg %p11269_p6 }
 0x170   : > { %p11275_p13 = pnand %p11273_p10, %p11270_p9 }
 0x172   : > { %11278 = shalt.err (!%p11275_p13)
}
 0x173   : > { %s11279_s9 = scalar_lea.vmem %s12083_s27, 12288  ;;  %p11287_p4 = scmp.lt.s32.totalorder %s12083_s27, %s12083_s27 }
 0x174   : > { %p11280_p1 = scmp.ne.s32.totalorder %s12083_s27, %s11279_s9  ;;  %p11288_p7 = scmp.lt.s32.totalorder %s11279_s9, %s11279_s9 }
 0x176   : > { %p11282_p2 = pnand %p11280_p1, %p11842_p0  ;;  %p11289_p8 = por %p11288_p7, %p11287_p4 }
 0x178   : > { %p11283_p3 = pneg %p11282_p2 }
 0x17a   : > { %p11290_p11 = pnand %p11289_p8, %p11283_p3 }
 0x17c   : > { %11293 = shalt.err (!%p11290_p11)
}
 0x17d   : > { %10731 = dma.hbm_to_vmem [thread:$0]  (!%p11828_p12), %s14790_s3, 12288, %s12083_s27, [#allocation9], %s14788_s29, %s14788_s29, %s14787_s4  }
 0x17e   : > { %s11610_s24 = smov [#allocation13]   ;;  %s11611_s8 = smov [#allocation16]  }
 0x17f   : > { %s772_s7 = sshll.u32 %s11610_s24, 4  ;;  %s802_s11 = sshll.u32 %s11611_s8, 4  ;;  %s773_s7 = int_to_ptr.vmem [resolvable:$true] %s772_s7  ;;  %s12129_s11 = int_to_ptr.vmem [resolvable:$true] %s802_s11 }
 0x180   : > { %s14791_s10 = sld [smem:[#allocation95_spill]] }
 0x186   : > { %s11294_s9 = scalar_lea.hbm %s14791_s10, 2048 }
 0x187   : > { %p11295_p5 = scmp.ne.s32.totalorder %s14791_s10, %s11294_s9  ;;  %p11301_p10 = scmp.lt.u32.totalorder %s11294_s9, %s14791_s10 }
 0x189   : > { %p11297_p6 = pnand %p11295_p5, %p11842_p0 }
 0x18b   : > { %p11298_p9 = pneg %p11297_p6 }
 0x18d   : > { %p11303_p13 = pnand %p11301_p10, %p11298_p9 }
 0x18f   : > { %11306 = shalt.err (!%p11303_p13)
}
 0x190   : > { %s11307_s2 = scalar_lea.vmem %s773_s7, 2048  ;;  %p11315_p4 = scmp.lt.s32.totalorder %s773_s7, %s773_s7 }
 0x191   : > { %p11308_p1 = scmp.ne.s32.totalorder %s773_s7, %s11307_s2  ;;  %p11316_p7 = scmp.lt.s32.totalorder %s11307_s2, %s11307_s2 }
 0x193   : > { %p11310_p2 = pnand %p11308_p1, %p11842_p0  ;;  %p11317_p8 = por %p11316_p7, %p11315_p4 }
 0x195   : > { %p11311_p3 = pneg %p11310_p2 }
 0x197   : > { %p11318_p11 = pnand %p11317_p8, %p11311_p3 }
 0x199   : > { %11321 = shalt.err (!%p11318_p11)
}
 0x19a   : > { %s14792_s16 = smov 8   ;;  %s14793_s18 = smov 128  }
 0x19b   : > { %10737 = dma.hbm_to_vmem [thread:$0]  (!%p11828_p12), %s14791_s10, 2048, %s773_s7, [#allocation12], %s14793_s18, %s14793_s18, %s14792_s16  }
 0x19c   : > { %s11322_s9 = scalar_lea.hbm %s14624_s13, 64 }
 0x19d   : > { %p11323_p5 = scmp.ne.s32.totalorder %s14624_s13, %s11322_s9  ;;  %p11329_p10 = scmp.lt.u32.totalorder %s11322_s9, %s14624_s13 }
 0x19f   : > { %p11325_p6 = pnand %p11323_p5, %p11842_p0 }
 0x1a1   : > { %p11326_p9 = pneg %p11325_p6 }
 0x1a3   : > { %p11331_p13 = pnand %p11329_p10, %p11326_p9 }
 0x1a5   : > { %11334 = shalt.err (!%p11331_p13)
}
 0x1a6   : > { %s11335_s7 = scalar_lea.vmem %s12129_s11, 64  ;;  %p11343_p4 = scmp.lt.s32.totalorder %s12129_s11, %s12129_s11 }
 0x1a7   : > { %p11336_p1 = scmp.ne.s32.totalorder %s12129_s11, %s11335_s7  ;;  %p11344_p7 = scmp.lt.s32.totalorder %s11335_s7, %s11335_s7 }
 0x1a9   : > { %p11338_p2 = pnand %p11336_p1, %p11842_p0  ;;  %p11345_p8 = por %p11344_p7, %p11343_p4 }
 0x1ab   : > { %p11339_p3 = pneg %p11338_p2 }
 0x1ad   : > { %p11346_p11 = pnand %p11345_p8, %p11339_p3 }
 0x1af   : > { %11349 = shalt.err (!%p11346_p11)
}
 0x1b0   : > { %10743 = dma.hbm_to_vmem [thread:$0]  (!%p11828_p12), %s14624_s13, 64, %s12129_s11, [#allocation15]  }
 0x1b1   : > { %s11612_s8 = smov [#allocation19]   ;;  %s11613_s5 = smov [#allocation22]  }
 0x1b2   : > { %s825_s0 = sshll.u32 %s11612_s8, 4  ;;  %s851_s9 = sshll.u32 %s11613_s5, 4  ;;  %s826_s0 = int_to_ptr.vmem [resolvable:$true] %s825_s0  ;;  %s12175_s9 = int_to_ptr.vmem [resolvable:$true] %s851_s9 }
 0x1b3   : > { %s11350_s2 = scalar_lea.hbm %s14626_s15, 12288 }
 0x1b4   : > { %p11351_p5 = scmp.ne.s32.totalorder %s14626_s15, %s11350_s2  ;;  %p11357_p10 = scmp.lt.u32.totalorder %s11350_s2, %s14626_s15 }
 0x1b6   : > { %p11353_p6 = pnand %p11351_p5, %p11842_p0 }
 0x1b8   : > { %p11354_p9 = pneg %p11353_p6 }
 0x1ba   : > { %p11359_p13 = pnand %p11357_p10, %p11354_p9 }
 0x1bc   : > { %11362 = shalt.err (!%p11359_p13)
}
 0x1bd   : > { %s11363_s24 = scalar_lea.vmem %s826_s0, 12288  ;;  %p11371_p4 = scmp.lt.s32.totalorder %s826_s0, %s826_s0 }
 0x1be   : > { %p11364_p1 = scmp.ne.s32.totalorder %s826_s0, %s11363_s24  ;;  %p11372_p7 = scmp.lt.s32.totalorder %s11363_s24, %s11363_s24 }
 0x1c0   : > { %p11366_p2 = pnand %p11364_p1, %p11842_p0  ;;  %p11373_p8 = por %p11372_p7, %p11371_p4 }
 0x1c2   : > { %p11367_p3 = pneg %p11366_p2 }
 0x1c4   : > { %p11374_p11 = pnand %p11373_p8, %p11367_p3 }
 0x1c6   : > { %11377 = shalt.err (!%p11374_p11)
}
 0x1c7   : > { %10749 = dma.hbm_to_vmem [thread:$0]  (!%p11828_p12), %s14626_s15, 12288, %s826_s0, [#allocation18], %s14788_s29, %s14788_s29, %s14787_s4  }
 0x1c8   : > { %s11378_s27 = scalar_lea.hbm %s14628_s17, 2048 }
 0x1c9   : > { %p11379_p5 = scmp.ne.s32.totalorder %s14628_s17, %s11378_s27  ;;  %p11385_p10 = scmp.lt.u32.totalorder %s11378_s27, %s14628_s17 }
 0x1cb   : > { %p11381_p6 = pnand %p11379_p5, %p11842_p0 }
 0x1cd   : > { %p11382_p9 = pneg %p11381_p6 }
 0x1cf   : > { %p11387_p13 = pnand %p11385_p10, %p11382_p9 }
 0x1d1   : > { %11390 = shalt.err (!%p11387_p13)
}
 0x1d2   : > { %s11391_s0 = scalar_lea.vmem %s12175_s9, 2048  ;;  %p11399_p4 = scmp.lt.s32.totalorder %s12175_s9, %s12175_s9 }
 0x1d3   : > { %p11392_p1 = scmp.ne.s32.totalorder %s12175_s9, %s11391_s0  ;;  %p11400_p7 = scmp.lt.s32.totalorder %s11391_s0, %s11391_s0 }
 0x1d5   : > { %p11394_p2 = pnand %p11392_p1, %p11842_p0  ;;  %p11401_p8 = por %p11400_p7, %p11399_p4 }
 0x1d7   : > { %p11395_p3 = pneg %p11394_p2 }
 0x1d9   : > { %p11402_p11 = pnand %p11401_p8, %p11395_p3 }
 0x1db   : > { %11405 = shalt.err (!%p11402_p11)
}
 0x1dc   : > { %10755 = dma.hbm_to_vmem [thread:$0]  (!%p11828_p12), %s14628_s17, 2048, %s12175_s9, [#allocation21], %s14793_s18, %s14793_s18, %s14792_s16  }
 0x1dd   : > { %s11614_s8 = smov [#allocation25]   ;;  %s11615_s14 = smov [#allocation28]  }
 0x1de   : > { %s881_s5 = sshll.u32 %s11614_s8, 4  ;;  %s904_s27 = sshll.u32 %s11615_s14, 4  ;;  %s882_s5 = int_to_ptr.vmem [resolvable:$true] %s881_s5  ;;  %s12224_s27 = int_to_ptr.vmem [resolvable:$true] %s904_s27 }
 0x1df   : > { %s11406_s3 = scalar_lea.hbm %s14631_s20, 64 }
 0x1e0   : > { %p11407_p5 = scmp.ne.s32.totalorder %s14631_s20, %s11406_s3  ;;  %p11413_p10 = scmp.lt.u32.totalorder %s11406_s3, %s14631_s20 }
 0x1e2   : > { %p11409_p6 = pnand %p11407_p5, %p11842_p0 }
 0x1e4   : > { %p11410_p9 = pneg %p11409_p6 }
 0x1e6   : > { %p11415_p13 = pnand %p11413_p10, %p11410_p9 }
 0x1e8   : > { %11418 = shalt.err (!%p11415_p13)
}
 0x1e9   : > { %s11419_s10 = scalar_lea.vmem %s882_s5, 64  ;;  %p11427_p4 = scmp.lt.s32.totalorder %s882_s5, %s882_s5 }
 0x1ea   : > { %p11420_p1 = scmp.ne.s32.totalorder %s882_s5, %s11419_s10  ;;  %p11428_p7 = scmp.lt.s32.totalorder %s11419_s10, %s11419_s10 }
 0x1ec   : > { %p11422_p2 = pnand %p11420_p1, %p11842_p0  ;;  %p11429_p8 = por %p11428_p7, %p11427_p4 }
 0x1ee   : > { %p11423_p3 = pneg %p11422_p2 }
 0x1f0   : > { %p11430_p11 = pnand %p11429_p8, %p11423_p3 }
 0x1f2   : > { %11433 = shalt.err (!%p11430_p11)
}
 0x1f3   : > { %10761 = dma.hbm_to_vmem [thread:$0]  (!%p11828_p12), %s14631_s20, 64, %s882_s5, [#allocation24]  }
 0x1f4   : > { %s11434_s3 = scalar_lea.hbm %s14633_s22, 12288 }
 0x1f5   : > { %p11435_p5 = scmp.ne.s32.totalorder %s14633_s22, %s11434_s3  ;;  %p11441_p10 = scmp.lt.u32.totalorder %s11434_s3, %s14633_s22 }
 0x1f7   : > { %p11437_p6 = pnand %p11435_p5, %p11842_p0 }
 0x1f9   : > { %p11438_p9 = pneg %p11437_p6 }
 0x1fb   : > { %p11443_p13 = pnand %p11441_p10, %p11438_p9 }
 0x1fd   : > { %11446 = shalt.err (!%p11443_p13)
}
 0x1fe   : > { %s11447_s5 = scalar_lea.vmem %s12224_s27, 12288  ;;  %p11455_p4 = scmp.lt.s32.totalorder %s12224_s27, %s12224_s27 }
 0x1ff   : > { %p11448_p1 = scmp.ne.s32.totalorder %s12224_s27, %s11447_s5  ;;  %p11456_p7 = scmp.lt.s32.totalorder %s11447_s5, %s11447_s5 }
 0x201   : > { %p11450_p2 = pnand %p11448_p1, %p11842_p0  ;;  %p11457_p8 = por %p11456_p7, %p11455_p4 }
 0x203   : > { %p11451_p3 = pneg %p11450_p2 }
 0x205   : > { %p11458_p11 = pnand %p11457_p8, %p11451_p3 }
 0x207   : > { %11461 = shalt.err (!%p11458_p11)
}
 0x208   : > { %10767 = dma.hbm_to_vmem [thread:$0]  (!%p11828_p12), %s14633_s22, 12288, %s12224_s27, [#allocation27], %s14788_s29, %s14788_s29, %s14787_s4  }
 0x209   : > { %s11616_s14 = smov [#allocation31]   ;;  %s11462_s11 = scalar_lea.hbm %s14636_s25, 256 }
 0x20a   : > { %s933_s2 = sshll.u32 %s11616_s14, 4  ;;  %p11463_p5 = scmp.ne.s32.totalorder %s14636_s25, %s11462_s11  ;;  %s934_s2 = int_to_ptr.vmem [resolvable:$true] %s933_s2 }
 0x20b   : > { %p11469_p10 = scmp.lt.u32.totalorder %s11462_s11, %s14636_s25 }
 0x20c   : > { %p11465_p6 = pnand %p11463_p5, %p11842_p0 }
 0x20e   : > { %p11466_p9 = pneg %p11465_p6 }
 0x210   : > { %p11471_p13 = pnand %p11469_p10, %p11466_p9 }
 0x212   : > { %11474 = shalt.err (!%p11471_p13)
}
 0x213   : > { %s11475_s4 = scalar_lea.vmem %s934_s2, 256  ;;  %p11483_p4 = scmp.lt.s32.totalorder %s934_s2, %s934_s2 }
 0x214   : > { %p11476_p1 = scmp.ne.s32.totalorder %s934_s2, %s11475_s4  ;;  %p11484_p7 = scmp.lt.s32.totalorder %s11475_s4, %s11475_s4 }
 0x216   : > { %p11478_p2 = pnand %p11476_p1, %p11842_p0  ;;  %p11485_p8 = por %p11484_p7, %p11483_p4 }
 0x218   : > { %p11479_p3 = pneg %p11478_p2 }
 0x21a   : > { %p11486_p11 = pnand %p11485_p8, %p11479_p3 }
 0x21c   : > { %11489 = shalt.err (!%p11486_p11)
}
 0x21d   : > { %10773 = dma.hbm_to_vmem [thread:$0]  (!%p11828_p12), %s14636_s25, 256, %s934_s2, [#allocation30], %s14793_s18, %s14793_s18, %s14792_s16  }
 0x21e   : > { %p14794_p5 = scmp.ne.s32.totalorder %s14775_s12, 0 }
 0x220   : > { %964 = sbr.rel (%p14794_p5) target bundleno = 9427 (0x24d3), region = 132 }
 0x227   : > { %s14795_s1 = sld [smem:[#allocation48_spill]] }
 0x22d   : > { %p14796_p0 = scmp.eq.s32.totalorder %s14795_s1, 0 }
 0x22f   : > { %11535 = dma.done.wait (%p14796_p0), [#allocation3], 1536   ;;  %p14797_p6 = pmov %p14796_p0 }
 0x230   : > { %p14798_p9 = pmov %p14796_p0 }
 0x231   : > { %11537 = vsyncadd (%p14797_p6), [#allocation3], 4294965760 }
 0x232   : > { %11539 = dma.done.wait (%p14798_p9), [#allocation6], 576   ;;  %p14799_p10 = pmov %p14796_p0 }
 0x233   : > { %p14800_p13 = pmov %p14796_p0 }
 0x234   : > { %11541 = vsyncadd (%p14799_p10), [#allocation6], 4294966720 }
 0x235   : > { %11543 = dma.done.wait (%p14800_p13), [#allocation9], 13312   ;;  %p14801_p12 = pmov %p14796_p0 }
 0x236   : > { %p14802_p1 = pmov %p14796_p0 }
 0x237   : > { %11545 = vsyncadd (%p14801_p12), [#allocation9], 4294953984 }
 0x238   : > { %11547 = dma.done.wait (%p14802_p1), [#allocation12], 8192   ;;  %p14803_p2 = pmov %p14796_p0 }
 0x239   : > { %p14804_p3 = pmov %p14796_p0 }
 0x23a   : > { %11549 = vsyncadd (%p14803_p2), [#allocation12], 4294959104 }
 0x23b   : > { %11551 = dma.done.wait (%p14804_p3), [#allocation15], 320   ;;  %p14805_p4 = pmov %p14796_p0 }
 0x23c   : > { %p14806_p7 = pmov %p14796_p0 }
 0x23d   : > { %11553 = vsyncadd (%p14805_p4), [#allocation15], 4294966976 }
 0x23e   : > { %11555 = dma.done.wait (%p14806_p7), [#allocation18], 12800   ;;  %p14807_p8 = pmov %p14796_p0 }
 0x23f   : > { %p14808_p11 = pmov %p14796_p0 }
 0x240   : > { %11557 = vsyncadd (%p14807_p8), [#allocation18], 4294954496 }
 0x241   : > { %11559 = dma.done.wait (%p14808_p11), [#allocation21], 8192   ;;  %p14809_p5 = pmov %p14796_p0 }
 0x243   : > { %11561 = vsyncadd (%p14809_p5), [#allocation21], 4294959104 }
 0x244   : > { %11563 = dma.done.wait (%p14796_p0), [#allocation24], 320   ;;  %p14810_p6 = pmov %p14796_p0 }
 0x245   : > { %p14811_p9 = pmov %p14796_p0 }
 0x246   : > { %11565 = vsyncadd (%p14810_p6), [#allocation24], 4294966976 }
 0x247   : > { %11567 = dma.done.wait (%p14811_p9), [#allocation27], 12544   ;;  %p14812_p10 = pmov %p14796_p0 }
 0x248   : > { %p14813_p13 = pmov %p14796_p0 }
 0x249   : > { %11569 = vsyncadd (%p14812_p10), [#allocation27], 4294954752 }
 0x24a   : > { %11571 = dma.done.wait (%p14813_p13), [#allocation30], 6400   ;;  %p14814_p12 = pmov %p14796_p0 }
 0x24b   : > { %s7994_s12 = sshll.u32 %s14795_s1, 4  ;;  %v1133_v0 = vlaneseq  ;;  %v14688_v2 = vmov 0.0   ;;  %s14817_s10 = sld [smem:[#allocation85_spill]]  ;;  %vm14682_vm0 = vcmask 1046528   ;;  %v1667_v27 = vld [vmem:[#allocation2 + $0x8] sm:$0xff]  ;;  %v1669_v28 = vld [vmem:[#allocation2 + $0x18] sm:$0xff] }
 0x24c   : > { %11573 = vsyncadd (%p14814_p12), [#allocation30], 4294960896  ;;  %p1111_p1 = scmp.lt.s32.totalorder %s7994_s12, 31  ;;  %1791 = vmatprep.mubr.f32.mxu0 %v14688_v2  ;;  %s11618_s14 = smov 16   ;;  %v1666_v29 = vld [vmem:[#allocation2] sm:$0xff]  ;;  %v1668_v30 = vld [vmem:[#allocation2 + $0x10] sm:$0xff]  ;;  %v9566_v38 = vpack.c.bf16 %v1669_v28, %v1667_v27 }
 0x24d   : > { %v12334_v1 = vshrl.u32 %v1133_v0, 7  ;;  %s11619_s2 = smov 32   ;;  %v1671_v31 = vld [vmem:[#allocation2 + $0x28] sm:$0xff]  ;;  %v1673_v32 = vld [vmem:[#allocation2 + $0x38] sm:$0xff]  ;;  %v9568_v39 = vpack.c.bf16 %v1668_v30, %v1666_v29  ;;  %v1670_v41 = vld [vmem:[#allocation2 + $0x20] sm:$0xff]  ;;  %vm14683_vm4 = vcmask 1040384  }
 0x24e   : > { %s15182_s12 = smov (!%p1111_p1, %s7994_s12), 31  ;;  %v9570_v40 = vpack.c.bf16 %v1673_v32, %v1671_v31  ;;  %v1672_v42 = vld [vmem:[#allocation2 + $0x30] sm:$0xff]  ;;  %v1675_v44 = vld [vmem:[#allocation2 + $0x48] sm:$0xff]  ;;  %v1677_v45 = vld [vmem:[#allocation2 + $0x58] sm:$0xff]  ;;  %9567 = vmatprep.subr.bf16.mxu0 %v9566_v38  ;;  %vm1632_vm11 = vcmask 130048   ;;  %vm14718_vm12 = vcmask 261120  }
 0x24f   : > { %14815 = vst [vmem:[#allocation53_spill] sm:$0xff] %v12334_v1  ;;  %v12338_v3 = vadd.s32 8, %v12334_v1  ;;  %s7995_s6 = sshll.u32 %s15182_s12, 3  ;;  %v12356_v8 = vadd.s32 24, %v12334_v1  ;;  %v12385_v21 = vadd.s32 40, %v12334_v1  ;;  %9569 = vmatpush1.bf16.msra.mxu0 %v9568_v39  ;;  %v9572_v50 = vpack.c.bf16 %v1672_v42, %v1670_v41  ;;  %v1674_v54 = vld [vmem:[#allocation2 + $0x40] sm:$0xff] }
 0x250   : > { %v12425_v52 = vadd.s32 56, %v12334_v1  ;;  %9571 = vmatprep.subr.bf16.mxu0 %v9570_v40  ;;  %v9574_v53 = vpack.c.bf16 %v1677_v45, %v1675_v44  ;;  %v1676_v55 = vld [vmem:[#allocation2 + $0x50] sm:$0xff]  ;;  %v1145_v38 = vadd.s32 88, %v12334_v1  ;;  %vm1678_vm13 = vcmask 392192   ;;  %s14865_s11 = sld [smem:[#allocation88_spill]]  ;;  %s14867_s7 = sld [smem:[#allocation87_spill]] }
 0x251   : > { %14816 = vst [vmem:[#allocation54_spill] sm:$0xff] %v12338_v3  ;;  %s12343_s8 = scalar_lea.vmem %s14817_s10, %s7995_s6  ;;  %v1161_v4 = vand.u32 15, %v12338_v3  ;;  %14818 = vst [vmem:[#allocation55_spill] sm:$0xff] %v12356_v8  ;;  %v1175_v18 = vand.u32 15, %v12356_v8  ;;  %v1189_v33 = vand.u32 15, %v12385_v21  ;;  %s14870_s3 = sld [smem:[#allocation90_spill]] }
 0x252   : > { %v12347_v5 = vld [vmem:[%s12343_s8] sm:$0xff]  ;;  %v12350_v6 = vld [vmem:[%s12343_s8 + $0x8] sm:$0xff]  ;;  %v12353_v7 = vld [vmem:[%s12343_s8 + $0x10] sm:$0xff]  ;;  %14821 = vst [vmem:[#allocation56_spill] sm:$0xff] %v12385_v21  ;;  %s11620_s27 = smov 120   ;;  %s15031_s16 = sld [smem:[#allocation97_spill]] }
 0x253   : > { %1520 = vrot.lane.b32.xlu0 %v12347_v5, %s11618_s14  ;;  %v1456_v9 = vrot.slane %v12347_v5, 1  ;;  %1522 = vrot.lane.b32.xlu1 %v12350_v6, %s11618_s14  ;;  %v1457_v10 = vrot.slane %v12350_v6, 1  ;;  %v12365_v11 = vld [vmem:[%s12343_s8 + $0x18] sm:$0xff]  ;;  %v12368_v12 = vld [vmem:[%s12343_s8 + $0x20] sm:$0xff]  ;;  %vm12370_vm1 = vcmp.eq.s32.totalorder %v1161_v4, 15  ;;  %v1459_v14 = vrot.slane %v12353_v7, 1 }
 0x254   : > { %v1461_v16 = vrot.slane %v12365_v11, 1  ;;  %v1463_v19 = vrot.slane %v12368_v12, 1  ;;  %v12389_v23 = vld [vmem:[%s12343_s8 + $0x28] sm:$0xff]  ;;  %v12392_v24 = vld [vmem:[%s12343_s8 + $0x30] sm:$0xff]  ;;  %vm12394_vm2 = vcmp.eq.s32.totalorder %v1175_v18, 15  ;;  %v1376_v34 = vrot.slane %v12350_v6, 7  ;;  %9573 = vmatpush1.bf16.msra.mxu0 %v9572_v50 }
 0x255   : > { %v1458_v15 = vsel %vm14682_vm0, %v1456_v9, %v1457_v10  ;;  %v1460_v17 = vsel %vm14682_vm0, %v1457_v10, %v1459_v14  ;;  %v1465_v36 = vrot.slane %v12389_v23, 1  ;;  %v1467_v37 = vrot.slane %v12392_v24, 1  ;;  %v1124_v49 = vld [vmem:[%s12343_s8 + $0x38] sm:$0xff]  ;;  %14826 = vst [vmem:[#allocation57_spill] sm:$0xff] %v12425_v52  ;;  %v1125_v58 = vld [vmem:[%s12343_s8 + $0x40] sm:$0xff]  ;;  %9575 = vmatprep.subr.bf16.mxu0 %v9574_v53  ;;  %v1126_v18 = vld [vmem:[%s12343_s8 + $0x48] sm:$0xff] }
 0x256   : > { %v1505_v20 = vsel %vm12370_vm1, 0.0, %v1460_v17  ;;  %v1462_v22 = vsel %vm14682_vm0, %v1459_v14, %v1461_v16  ;;  %v1464_v26 = vsel %vm14682_vm0, %v1461_v16, %v1463_v19  ;;  %v1375_v43 = vrot.slane %v12347_v5, 7  ;;  %v1127_v27 = vld [vmem:[%s12343_s8 + $0x50] sm:$0xff]  ;;  %v1129_v40 = vld [vmem:[%s12343_s8 + $0x60] sm:$0xff]  ;;  %v1130_v53 = vld [vmem:[%s12343_s8 + $0x68] sm:$0xff]  ;;  %s11621_s18 = smov 112  }
 0x257   : > { %1584 = vrot.lane.b32.xlu0 %v1458_v15, %s11619_s2  ;;  %1586 = vrot.lane.b32.xlu1 %v1505_v20, %s11619_s2  ;;  %v1507_v35 = vsel %vm12394_vm2, 0.0, %v1464_v26  ;;  %vm12412_vm3 = vcmp.eq.s32.totalorder %v1189_v33, 15  ;;  %v1466_v47 = vsel %vm14682_vm0, %v1463_v19, %v1465_v36  ;;  %v1468_v48 = vsel %vm14682_vm0, %v1465_v36, %v1467_v37  ;;  %v1955_v21 = vld [vmem:[#allocation5 + $0x18] sm:$0xff]  ;;  %s11622_s29 = smov 96   ;;  %s15154_s6 = sld [smem:[#allocation102_spill]] }
 0x258   : > { %v12422_v51 = vsel %vm14683_vm4, %v1375_v43, %v1376_v34  ;;  %v1378_v56 = vrot.slane %v12353_v7, 7  ;;  %v1380_v57 = vrot.slane %v12365_v11, 7  ;;  %v1382_v59 = vrot.slane %v12368_v12, 7  ;;  %s15156_s4 = sld [smem:[#allocation104_spill]]  ;;  %s15157_s12 = sld [smem:[#allocation103_spill]] }
 0x259   : > { %v1384_v60 = vrot.slane %v12389_v23, 7  ;;  %v1509_v61 = vsel %vm12412_vm3, 0.0, %v1468_v48  ;;  %v1469_v62 = vrot.slane %v1124_v49, 1  ;;  %v9576_v4 = vpack.c.bf16 %v1676_v55, %v1674_v54  ;;  %s15169_s24 = sld [smem:[#allocation51_spill]] }
 0x25a   : > { %v12438_v63 = vsel %vm14683_vm4, %v1376_v34, %v1378_v56  ;;  %v12441_v0 = vsel %vm14683_vm4, %v1378_v56, %v1380_v57  ;;  %v12444_v6 = vsel %vm14683_vm4, %v1380_v57, %v1382_v59  ;;  %v1386_v9 = vrot.slane %v12392_v24, 7 }
 0x25b   : > { %1524 = vrot.lane.b32.xlu0 %v12353_v7, %s11618_s14  ;;  %1588 = vrot.lane.b32.xlu1 %v1462_v22, %s11619_s2  ;;  %v12447_v7 = vsel %vm14683_vm4, %v1382_v59, %v1384_v60  ;;  %v1203_v10 = vand.u32 15, %v12425_v52  ;;  %v1390_v15 = vrot.slane %v1125_v58, 7  ;;  %v1470_v17 = vsel %vm14682_vm0, %v1467_v37, %v1469_v62  ;;  %v2031_v52 = vld [vmem:[%s14865_s11] sm:$0xff] }
 0x25c   : > { %v12454_v14 = vsel %vm14683_vm4, %v1384_v60, %v1386_v9  ;;  %9577 = vmatpush1.bf16.msra.mxu0 %v9576_v4  ;;  %v1392_v26 = vrot.slane %v1126_v18, 7  ;;  %v1473_v30 = vrot.slane %v1126_v18, 1  ;;  %v1394_v31 = vrot.slane %v1127_v27, 7 }
 0x25d   : > { %vm12465_vm5 = vcmp.eq.s32.totalorder %v1203_v10, 15  ;;  %v1475_v33 = vrot.slane %v1127_v27, 1  ;;  %v1398_v45 = vrot.slane %v1129_v40, 7  ;;  %v1479_v48 = vrot.slane %v1129_v40, 1 }
 0x25e   : > { %v12476_v28 = vsel %vm14683_vm4, %v1390_v15, %v1392_v26  ;;  %v12482_v34 = vsel %vm14683_vm4, %v1392_v26, %v1394_v31  ;;  %v14831_v54 = vmov 0  ;;  %v1147_v56 = vadd.s32 104, %v12334_v1 }
 0x25f   : > { %1526 = vrot.lane.b32.xlu0 %v12365_v11, %s11618_s14  ;;  %1590 = vrot.lane.b32.xlu1 %v1507_v35, %s11619_s2  ;;  %v1471_v11 = vrot.slane %v1125_v58, 1  ;;  %v1128_v35 = vld [vmem:[%s12343_s8 + $0x58] sm:$0xff]  ;;  %v1476_v37 = vsel %vm14682_vm0, %v1473_v30, %v1475_v33  ;;  %v1400_v57 = vrot.slane %v1130_v53, 7  ;;  %p15171_p3 = scmp.ne.s32.totalorder %s15169_s24, 0 }
 0x260   : > { %v1396_v39 = vrot.slane %v1128_v35, 7  ;;  %v1477_v44 = vrot.slane %v1128_v35, 1  ;;  %v1245_v4 = vand.u32 15, %v1147_v56 }
 0x261   : > { %v1472_v22 = vsel %vm14682_vm0, %v1469_v62, %v1471_v11  ;;  %v12518_v59 = vsel %vm14683_vm4, %v1398_v45, %v1400_v57 }
 0x262   : > { %v1511_v29 = vsel %vm12465_vm5, 0.0, %v1472_v22  ;;  %v12497_v41 = vsel %vm14683_vm4, %v1394_v31, %v1396_v39  ;;  %v1478_v50 = vsel %vm14682_vm0, %v1475_v33, %v1477_v44  ;;  %v1480_v55 = vsel %vm14682_vm0, %v1477_v44, %v1479_v48 }
 0x263   : > { %1528 = vrot.lane.b32.xlu0 %v12368_v12, %s11618_s14  ;;  %1592 = vrot.lane.b32.xlu1 %v1466_v47, %s11619_s2  ;;  %v1388_v12 = vrot.slane %v1124_v49, 7  ;;  %v1231_v47 = vand.u32 15, %v1145_v38  ;;  %vm12529_vm8 = vcmp.eq.s32.totalorder %v1245_v4, 15  ;;  %v14835_v31 = vmov 0 }
 0x264   : > { %v1422_v38 = vsel %vm14683_vm4, 0.0, %v1375_v43 }
 0x265   : > { %v12458_v16 = vsel %vm14683_vm4, %v1386_v9, %v1388_v12  ;;  %v12463_v19 = vsel %vm14683_vm4, %v1388_v12, %v1390_v15  ;;  %vm12508_vm7 = vcmp.eq.s32.totalorder %v1231_v47, 15  ;;  %v1132_v12 = vld [vmem:[%s12343_s8 + $0x78] sm:$0xff]  ;;  %v14833_v15 = vmov 0 }
 0x266   : > { %v14832_v54 = vsel %vm12508_vm7, 4294967295, %v14831_v54  ;;  %v1515_v60 = vsel %vm12508_vm7, 0.0, %v1480_v55  ;;  %v14834_v15 = vsel %vm12529_vm8, 4294967295, %v14833_v15  ;;  %v1404_v22 = vrot.slane %v1132_v12, 7 }
 0x267   : > { %1530 = vrot.lane.b32.xlu0 %v12389_v23, %s11618_s14  ;;  %1594 = vrot.lane.b32.xlu1 %v1509_v61, %s11619_s2  ;;  %v1143_v23 = vadd.s32 72, %v12334_v1  ;;  %v1481_v61 = vrot.slane %v1130_v53, 1  ;;  %v12575_v47 = vadd.s32 32, %v12334_v1 }
 0x269   : > { %v1217_v32 = vand.u32 15, %v1143_v23  ;;  %14842 = vst [vmem:[#allocation59_spill] sm:$0xff] %v12575_v47  ;;  %v1182_v56 = vand.u32 15, %v12575_v47 }
 0x26b   : > { %1532 = vrot.lane.b32.xlu0 %v12392_v24, %s11618_s14  ;;  %1596 = vrot.lane.b32.xlu1 %v1470_v17, %s11619_s2  ;;  %v1474_v24 = vsel %vm14682_vm0, %v1471_v11, %v1473_v30  ;;  %vm12487_vm6 = vcmp.eq.s32.totalorder %v1217_v32, 15  ;;  %v1482_v11 = vsel %vm14682_vm0, %v1479_v48, %v1481_v61  ;;  %vm12592_vm15 = vcmp.eq.s32.totalorder %v1182_v56, 0 }
 0x26c   : > { %v1513_v42 = vsel %vm12487_vm6, 0.0, %v1476_v37 }
 0x26f   : > { %1534 = vrot.lane.b32.xlu0 %v1124_v49, %s11618_s14  ;;  %1598 = vrot.lane.b32.xlu1 %v1511_v29, %s11619_s2  ;;  %v12503_v49 = vsel %vm14683_vm4, %v1396_v39, %v1398_v45 }
 0x273   : > { %1536 = vrot.lane.b32.xlu0 %v1125_v58, %s11618_s14  ;;  %1600 = vrot.lane.b32.xlu1 %v1474_v24, %s11619_s2  ;;  %v1131_v58 = vld [vmem:[%s12343_s8 + $0x70] sm:$0xff]  ;;  %v1154_v24 = vand.u32 15, %v12334_v1  ;;  %s15166_s8 = sld [smem:[#allocation45_spill]] }
 0x274   : > { %v1402_v62 = vrot.slane %v1131_v58, 7  ;;  %v1483_v9 = vrot.slane %v1131_v58, 1 }
 0x275   : > { %vm12560_vm10 = vcmp.eq.s32.totalorder %v1154_v24, 0 }
 0x276   : > { %v12524_v10 = vsel %vm14683_vm4, %v1400_v57, %v1402_v62  ;;  %v1484_v17 = vsel %vm14682_vm0, %v1481_v61, %v1483_v9  ;;  %v12538_v23 = vsel %vm14683_vm4, %v1402_v62, %v1404_v22  ;;  %v1423_v44 = vsel %vm12560_vm10, 0.0, %v1422_v38 }
 0x277   : > { %1538 = vrot.lane.b32.xlu0 %v1126_v18, %s11618_s14  ;;  %1602 = vrot.lane.b32.xlu1 %v1513_v42, %s11619_s2  ;;  %v1149_v18 = vadd.s32 120, %v12334_v1  ;;  %v1517_v26 = vsel %vm12529_vm8, 0.0, %v1484_v17 }
 0x279   : > { %v1259_v29 = vand.u32 15, %v1149_v18 }
 0x27b   : > { %1540 = vrot.lane.b32.xlu0 %v1127_v27, %s11618_s14  ;;  %1604 = vrot.lane.b32.xlu1 %v1478_v50, %s11619_s2  ;;  %v1485_v27 = vrot.slane %v1132_v12, 1  ;;  %vm12545_vm9 = vcmp.eq.s32.totalorder %v1259_v29, 15 }
 0x27c   : > { %v14836_v31 = vsel %vm12545_vm9, 4294967295, %v14835_v31 }
 0x27d   : > { %v1486_v30 = vsel %vm14682_vm0, %v1483_v9, %v1485_v27  ;;  %v1503_v32 = vsel %vm14682_vm0, %v1485_v27, 0.0 }
 0x27e   : > { %v1519_v33 = vsel %vm12545_vm9, 0.0, %v1503_v32 }
 0x27f   : > { %1542 = vrot.lane.b32.xlu0 %v1128_v35, %s11618_s14  ;;  %1606 = vrot.lane.b32.xlu1 %v1515_v60, %s11619_s2  ;;  %v12558_v35 = vadd.s32 16, %v12334_v1 }
 0x281   : > { %14837 = vst [vmem:[#allocation58_spill] sm:$0xff] %v12558_v35  ;;  %v1168_v39 = vand.u32 15, %v12558_v35 }
 0x283   : > { %1544 = vrot.lane.b32.xlu0 %v1129_v40, %s11618_s14  ;;  %1608 = vrot.lane.b32.xlu1 %v1482_v11, %s11619_s2  ;;  %vm12570_vm14 = vcmp.eq.s32.totalorder %v1168_v39, 0 }
 0x284   : > { %v1425_v55 = vsel %vm12570_vm14, 0.0, %v12438_v63  ;;  %v12597_v63 = vadd.s32 48, %v12334_v1 }
 0x286   : > { %14845 = vst [vmem:[#allocation60_spill] sm:$0xff] %v12597_v63  ;;  %v1196_v18 = vand.u32 15, %v12597_v63  ;;  %v1952_v63 = vld [vmem:[#allocation5] sm:$0xff] }
 0x287   : > { %1546 = vrot.lane.b32.xlu0 %v1130_v53, %s11618_s14  ;;  %1610 = vrot.lane.b32.xlu1 %v1517_v26, %s11619_s2 }
 0x288   : > { %vm12612_vm0 = vcmp.eq.s32.totalorder %v1196_v18, 0 }
 0x289   : > { %v1429_v24 = vsel %vm12612_vm0, 0.0, %v12454_v14  ;;  %v1144_v14 = vadd.s32 80, %v12334_v1 }
 0x28b   : > { %1548 = vrot.lane.b32.xlu0 %v1131_v58, %s11618_s14  ;;  %1612 = vrot.lane.b32.xlu1 %v1486_v30, %s11619_s2  ;;  %v1224_v56 = vand.u32 15, %v1144_v14 }
 0x28d   : > { %vm12646_vm9 = vcmp.eq.s32.totalorder %v1224_v56, 0 }
 0x28f   : > { %1550 = vrot.lane.b32.xlu0 %v1132_v12, %s11618_s14  ;;  %1614 = vrot.lane.b32.xlu1 %v1519_v33, %s11619_s2  ;;  %v1427_v12 = vsel %vm12592_vm15, 0.0, %v12444_v6  ;;  %v1142_v6 = vadd.s32 64, %v12334_v1  ;;  %s15119_s14 = sld [smem:[#allocation101_spill]]  ;;  %s1107_s2 = sand.u32 1, %s15166_s8  }
 0x290   : > { %s7993_s0 = sshll.u32 %s1107_s2, 4  ;;  %s14570_s8 = scalar_lea.sflag [#allocation4], %s1107_s2 }
 0x291   : > { %v1210_v39 = vand.u32 15, %v1142_v6  ;;  %s1109_s9 = scalar_lea.vmem [#allocation32], %s7993_s0 }
 0x292   : > { %s7706_s5 = sshll.u32 %s1109_s9, 4  ;;  %s14563_s5 = int_to_ptr.vmem [resolvable:$true] %s7706_s5 }
 0x293   : > { %vm12629_vm4 = vcmp.eq.s32.totalorder %v1210_v39, 0  ;;  %s11490_s0 = scalar_lea.vmem %s14563_s5, 256 }
 0x294   : > { %p11491_p2 = scmp.ne.s32.totalorder %s14563_s5, %s11490_s0 }
 0x296   : > { %p11492_p4 = pnand %p11491_p2, %p15171_p3 }
 0x298   : > { %p11493_p7 = pneg %p11492_p4 }
 0x2c5   : > { %v1521_v40 = vpop.permute.xlu0 %1520  ;;  %v1523_v42 = vpop.permute.xlu1 %1522 }
 0x2c6   : > { %v1633_v5 = vsel %vm1632_vm11, %v1423_v44, %v1521_v40  ;;  %v1634_v53 = vsel %vm1632_vm11, %v12422_v51, %v1523_v42 }
 0x2c9   : > { %v1585_v43 = vpop.permute.xlu0 %1584  ;;  %v1587_v50 = vpop.permute.xlu1 %1586 }
 0x2ca   : > { %v1650_v48 = vsel %vm14718_vm12, %v1633_v5, %v1585_v43  ;;  %v1651_v58 = vsel %vm14718_vm12, %v1634_v53, %v1587_v50  ;;  %v1431_v53 = vsel %vm12629_vm4, 0.0, %v12463_v19  ;;  %v1146_v19 = vadd.s32 96, %v12334_v1 }
 0x2cb   : > { %7996 = vmatmul.mubr.msk.f32.vlgmr.msra.gmra.mrb[0].mxu0 %vm1678_vm13, %v1650_v48 }
 0x2cc   : > { %1797 = vmatprep.mubr.f32.mxu0 %v14688_v2 }
 0x2cd   : > { %v1525_v57 = vpop.permute.xlu0 %1524  ;;  %v1589_v61 = vpop.permute.xlu1 %1588 }
 0x2ce   : > { %v1635_v60 = vsel %vm1632_vm11, %v1425_v55, %v1525_v57 }
 0x2cf   : > { %7997 = vmatmul.mubr.msk.f32.gmra.mrb[2].mxu0 %vm1678_vm13, %v1651_v58  ;;  %v1652_v51 = vsel %vm14718_vm12, %v1635_v60, %v1589_v61 }
 0x2d0   : > { %1803 = vmatprep.mubr.f32.mxu0 %v14688_v2 }
 0x2d1   : > { %v1527_v4 = vpop.permute.xlu0 %1526  ;;  %v1591_v11 = vpop.permute.xlu1 %1590 }
 0x2d2   : > { %v1636_v9 = vsel %vm1632_vm11, %v12441_v0, %v1527_v4 }
 0x2d3   : > { %7998 = vmatmul.mubr.msk.f32.gmra.mrb[4].mxu0 %vm1678_vm13, %v1652_v51  ;;  %v1653_v17 = vsel %vm14718_vm12, %v1636_v9, %v1591_v11  ;;  %v1433_v11 = vsel %vm12646_vm9, 0.0, %v12482_v34  ;;  %v1148_v34 = vadd.s32 112, %v12334_v1 }
 0x2d4   : > { %1809 = vmatprep.mubr.f32.mxu0 %v14688_v2 }
 0x2d5   : > { %v1529_v22 = vpop.permute.xlu0 %1528  ;;  %v1593_v27 = vpop.permute.xlu1 %1592 }
 0x2d6   : > { %v1637_v26 = vsel %vm1632_vm11, %v1427_v12, %v1529_v22 }
 0x2d7   : > { %7999 = vmatmul.mubr.msk.f32.gmra.mrb[6].mxu0 %vm1678_vm13, %v1653_v17  ;;  %v1654_v0 = vsel %vm14718_vm12, %v1637_v26, %v1593_v27  ;;  %v1238_v17 = vand.u32 15, %v1146_v19 }
 0x2d8   : > { %1815 = vmatprep.mubr.f32.mxu0 %v14688_v2 }
 0x2d9   : > { %v1531_v30 = vpop.permute.xlu0 %1530  ;;  %v1595_v33 = vpop.permute.xlu1 %1594  ;;  %vm12663_vm8 = vcmp.eq.s32.totalorder %v1238_v17, 0 }
 0x2da   : > { %v1638_v32 = vsel %vm1632_vm11, %v12447_v7, %v1531_v30 }
 0x2db   : > { %8000 = vmatmul.mubr.msk.f32.gmra.mrb[8].mxu0 %vm1678_vm13, %v1654_v0  ;;  %v1655_v38 = vsel %vm14718_vm12, %v1638_v32, %v1595_v33  ;;  %v1435_v32 = vsel %vm12663_vm8, 0.0, %v12503_v49 }
 0x2dc   : > { %1821 = vmatprep.mubr.f32.mxu0 %v14688_v2 }
 0x2dd   : > { %v1533_v40 = vpop.permute.xlu0 %1532  ;;  %v1597_v44 = vpop.permute.xlu1 %1596 }
 0x2de   : > { %v1639_v42 = vsel %vm1632_vm11, %v1429_v24, %v1533_v40  ;;  %v1252_v24 = vand.u32 15, %v1148_v34 }
 0x2df   : > { %8001 = vmatmul.mubr.msk.f32.gmra.mrb[10].mxu0 %vm1678_vm13, %v1655_v38  ;;  %v1656_v7 = vsel %vm14718_vm12, %v1639_v42, %v1597_v44  ;;  %v14854_v42 = vmov 0 }
 0x2e0   : > { %1827 = vmatprep.mubr.f32.mxu0 %v14688_v2  ;;  %vm12680_vm7 = vcmp.eq.s32.totalorder %v1252_v24, 0 }
 0x2e1   : > { %v1535_v43 = vpop.permute.xlu0 %1534  ;;  %v1599_v50 = vpop.permute.xlu1 %1598  ;;  %v14855_v42 = vsel %vm12680_vm7, 4294967295, %v14854_v42  ;;  %v1437_v14 = vsel %vm12680_vm7, 0.0, %v12524_v10 }
 0x2e2   : > { %v1640_v48 = vsel %vm1632_vm11, %v12458_v16, %v1535_v43 }
 0x2e3   : > { %8002 = vmatmul.mubr.msk.f32.gmra.mrb[12].mxu0 %vm1678_vm13, %v1656_v7  ;;  %v1657_v55 = vsel %vm14718_vm12, %v1640_v48, %v1599_v50 }
 0x2e4   : > { %1833 = vmatprep.mubr.f32.mxu0 %v14688_v2 }
 0x2e5   : > { %v1537_v57 = vpop.permute.xlu0 %1536  ;;  %v1601_v60 = vpop.permute.xlu1 %1600 }
 0x2e6   : > { %v1641_v58 = vsel %vm1632_vm11, %v1431_v53, %v1537_v57 }
 0x2e7   : > { %8003 = vmatmul.mubr.msk.f32.gmra.mrb[14].mxu0 %vm1678_vm13, %v1657_v55  ;;  %v1658_v16 = vsel %vm14718_vm12, %v1641_v58, %v1601_v60  ;;  %v1953_v58 = vld [vmem:[#allocation5 + $0x8] sm:$0xff] }
 0x2e8   : > { %1839 = vmatprep.mubr.f32.mxu0 %v14688_v2  ;;  %2020 = vmatprep.mubr.f32.mxu1 %v1953_v58 }
 0x2e9   : > { %v1539_v51 = vpop.permute.xlu0 %1538  ;;  %v1603_v9 = vpop.permute.xlu1 %1602 }
 0x2ea   : > { %v1642_v4 = vsel %vm1632_vm11, %v12476_v28, %v1539_v51 }
 0x2eb   : > { %8004 = vmatmul.mubr.msk.f32.gmra.mrb[16].mxu0 %vm1678_vm13, %v1658_v16  ;;  %v1659_v12 = vsel %vm14718_vm12, %v1642_v4, %v1603_v9 }
 0x2ec   : > { %1845 = vmatprep.mubr.f32.mxu0 %v14688_v2 }
 0x2ed   : > { %v1541_v18 = vpop.permute.xlu0 %1540  ;;  %v1605_v26 = vpop.permute.xlu1 %1604 }
 0x2ee   : > { %v1643_v22 = vsel %vm1632_vm11, %v1433_v11, %v1541_v18 }
 0x2ef   : > { %8005 = vmatmul.mubr.msk.f32.gmra.mrb[18].mxu0 %vm1678_vm13, %v1659_v12  ;;  %v1660_v28 = vsel %vm14718_vm12, %v1643_v22, %v1605_v26 }
 0x2f0   : > { %1851 = vmatprep.mubr.f32.mxu0 %v14688_v2 }
 0x2f1   : > { %v1543_v0 = vpop.permute.xlu0 %1542  ;;  %v1607_v30 = vpop.permute.xlu1 %1606 }
 0x2f2   : > { %v1644_v6 = vsel %vm1632_vm11, %v12497_v41, %v1543_v0 }
 0x2f3   : > { %8006 = vmatmul.mubr.msk.f32.gmra.mrb[20].mxu0 %vm1678_vm13, %v1660_v28  ;;  %v1661_v33 = vsel %vm14718_vm12, %v1644_v6, %v1607_v30 }
 0x2f4   : > { %1857 = vmatprep.mubr.f32.mxu0 %v14688_v2 }
 0x2f5   : > { %v1545_v38 = vpop.permute.xlu0 %1544  ;;  %v1609_v40 = vpop.permute.xlu1 %1608 }
 0x2f6   : > { %v1645_v39 = vsel %vm1632_vm11, %v1435_v32, %v1545_v38 }
 0x2f7   : > { %8007 = vmatmul.mubr.msk.f32.gmra.mrb[22].mxu0 %vm1678_vm13, %v1661_v33  ;;  %v1662_v41 = vsel %vm14718_vm12, %v1645_v39, %v1609_v40 }
 0x2f8   : > { %1863 = vmatprep.mubr.f32.mxu0 %v14688_v2 }
 0x2f9   : > { %v1547_v49 = vpop.permute.xlu0 %1546  ;;  %v1611_v7 = vpop.permute.xlu1 %1610 }
 0x2fa   : > { %v1646_v44 = vsel %vm1632_vm11, %v12518_v59, %v1547_v49 }
 0x2fb   : > { %8008 = vmatmul.mubr.msk.f32.gmra.mrb[24].mxu0 %vm1678_vm13, %v1662_v41  ;;  %v1663_v43 = vsel %vm14718_vm12, %v1646_v44, %v1611_v7 }
 0x2fc   : > { %1869 = vmatprep.mubr.f32.mxu0 %v14688_v2 }
 0x2fd   : > { %v1549_v48 = vpop.permute.xlu0 %1548  ;;  %v1613_v53 = vpop.permute.xlu1 %1612 }
 0x2fe   : > { %v1647_v50 = vsel %vm1632_vm11, %v1437_v14, %v1549_v48 }
 0x2ff   : > { %8009 = vmatmul.mubr.msk.f32.gmra.mrb[26].mxu0 %vm1678_vm13, %v1663_v43  ;;  %v1664_v55 = vsel %vm14718_vm12, %v1647_v50, %v1613_v53 }
 0x300   : > { %1875 = vmatprep.mubr.f32.mxu0 %v14688_v2 }
 0x301   : > { %v1551_v59 = vpop.permute.xlu0 %1550  ;;  %v1615_v57 = vpop.permute.xlu1 %1614 }
 0x302   : > { %v1648_v56 = vsel %vm1632_vm11, %v12538_v23, %v1551_v59 }
 0x303   : > { %8010 = vmatmul.mubr.msk.f32.gmra.mrb[28].mxu0 %vm1678_vm13, %v1664_v55  ;;  %v1665_v10 = vsel %vm14718_vm12, %v1648_v56, %v1615_v57 }
 0x304   : > { %1881 = vmatprep.mubr.f32.mxu0 %v14688_v2 }
 0x307   : > { %8011 = vmatmul.mubr.msk.f32.gmra.mrb[30].mxu0 %vm1678_vm13, %v1665_v10 }
 0x39e   : > { %v1793_v60 = vpop.f32.mrb[0].mxu0 }
 0x39f   : > { %v1904_v16 = vmul.f32 0.01, %v1793_v60  ;;  %v12702_v19 = vpop.f32.mrb[1].mxu0  ;;  %vm1888_vm7 = vcmp.ge.f32.partialorder %v1793_v60, 0.0 }
 0x3a1   : > { %v12704_v4 = vsel %vm1888_vm7, %v1793_v60, %v1904_v16 }
 0x3a2   : > { %v1799_v51 = vpop.f32.mrb[2].mxu0  ;;  %v1936_v17 = vmul.f32 %v12704_v4, %v12704_v4 }
 0x3a3   : > { %vm1889_vm11 = vcmp.ge.f32.partialorder %v1799_v51, 0.0  ;;  %v1905_v23 = vmul.f32 0.01, %v1799_v51  ;;  %v12706_v9 = vpop.f32.mrb[3].mxu0 }
 0x3a5   : > { %v12708_v11 = vsel %vm1889_vm11, %v1799_v51, %v1905_v23 }
 0x3a6   : > { %v1805_v12 = vpop.f32.mrb[4].mxu0  ;;  %v1937_v18 = vmul.f32 %v12708_v11, %v12708_v11  ;;  %v9580_v34 = vpack.c.bf16 %v12708_v11, %v12704_v4 }
 0x3a7   : > { %v1906_v22 = vmul.f32 0.01, %v1805_v12  ;;  %v12714_v26 = vpop.f32.mrb[5].mxu0  ;;  %vm1890_vm13 = vcmp.ge.f32.partialorder %v1805_v12, 0.0 }
 0x3a8   : > { %v9578_v28 = vpack.c.bf16 %v1937_v18, %v1936_v17 }
 0x3a9   : > { %v12718_v6 = vsel %vm1890_vm13, %v1805_v12, %v1906_v22 }
 0x3aa   : > { %v1811_v0 = vpop.f32.mrb[6].mxu0  ;;  %9579 = vmatprep.subr.bf16.mxu1 %v9578_v28  ;;  %v1938_v24 = vmul.f32 %v12718_v6, %v12718_v6 }
 0x3ab   : > { %vm1891_vm7 = vcmp.ge.f32.partialorder %v1811_v0, 0.0  ;;  %v1907_v30 = vmul.f32 0.01, %v1811_v0  ;;  %v12720_v32 = vpop.f32.mrb[7].mxu0  ;;  %9581 = vmatpush3.bf16.msra.mxu1 %v9580_v34 }
 0x3ad   : > { %v12722_v33 = vsel %vm1891_vm7, %v1811_v0, %v1907_v30 }
 0x3ae   : > { %v1939_v38 = vmul.f32 %v12722_v33, %v12722_v33  ;;  %v1817_v39 = vpop.f32.mrb[8].mxu0  ;;  %v9584_v44 = vpack.c.bf16 %v12722_v33, %v12718_v6 }
 0x3af   : > { %v1908_v40 = vmul.f32 0.01, %v1817_v39  ;;  %v12728_v41 = vpop.f32.mrb[9].mxu0  ;;  %vm1892_vm11 = vcmp.ge.f32.partialorder %v1817_v39, 0.0 }
 0x3b0   : > { %v9582_v49 = vpack.c.bf16 %v1939_v38, %v1938_v24 }
 0x3b1   : > { %v12732_v14 = vsel %vm1892_vm11, %v1817_v39, %v1908_v40 }
 0x3b2   : > { %v1823_v7 = vpop.f32.mrb[10].mxu0  ;;  %9583 = vmatprep.subr.bf16.mxu1 %v9582_v49  ;;  %v1940_v53 = vmul.f32 %v12732_v14, %v12732_v14 }
 0x3b3   : > { %vm1893_vm13 = vcmp.ge.f32.partialorder %v1823_v7, 0.0  ;;  %v1909_v43 = vmul.f32 0.01, %v1823_v7  ;;  %v12734_v48 = vpop.f32.mrb[11].mxu0  ;;  %9585 = vmatpush3.bf16.msra.mxu1 %v9584_v44 }
 0x3b5   : > { %v12736_v50 = vsel %vm1893_vm13, %v1823_v7, %v1909_v43 }
 0x3b6   : > { %v1941_v55 = vmul.f32 %v12736_v50, %v12736_v50  ;;  %v1829_v59 = vpop.f32.mrb[12].mxu0  ;;  %v9588_v58 = vpack.c.bf16 %v12736_v50, %v12732_v14 }
 0x3b7   : > { %v1910_v56 = vmul.f32 0.01, %v1829_v59  ;;  %v12742_v57 = vpop.f32.mrb[13].mxu0  ;;  %vm1894_vm7 = vcmp.ge.f32.partialorder %v1829_v59, 0.0 }
 0x3b8   : > { %v9586_v10 = vpack.c.bf16 %v1941_v55, %v1940_v53 }
 0x3b9   : > { %v12746_v16 = vsel %vm1894_vm7, %v1829_v59, %v1910_v56 }
 0x3ba   : > { %v1835_v60 = vpop.f32.mrb[14].mxu0  ;;  %9587 = vmatprep.subr.bf16.mxu1 %v9586_v10  ;;  %v1942_v17 = vmul.f32 %v12746_v16, %v12746_v16 }
 0x3bb   : > { %vm1895_vm11 = vcmp.ge.f32.partialorder %v1835_v60, 0.0  ;;  %v1911_v51 = vmul.f32 0.01, %v1835_v60  ;;  %v12748_v23 = vpop.f32.mrb[15].mxu0  ;;  %9589 = vmatpush3.bf16.msra.mxu1 %v9588_v58 }
 0x3bc   : > { %14856 = vst [vmem:[#allocation61_spill] sm:$0xff] %v12748_v23 }
 0x3bd   : > { %v12750_v12 = vsel %vm1895_vm11, %v1835_v60, %v1911_v51 }
 0x3be   : > { %v1943_v18 = vmul.f32 %v12750_v12, %v12750_v12  ;;  %v1841_v22 = vpop.f32.mrb[16].mxu0  ;;  %v9592_v30 = vpack.c.bf16 %v12750_v12, %v12746_v16 }
 0x3bf   : > { %v1912_v28 = vmul.f32 0.01, %v1841_v22  ;;  %v12756_v34 = vpop.f32.mrb[17].mxu0  ;;  %vm1896_vm13 = vcmp.ge.f32.partialorder %v1841_v22, 0.0 }
 0x3c0   : > { %14857 = vst [vmem:[#allocation62_spill] sm:$0xff] %v12756_v34  ;;  %v9590_v0 = vpack.c.bf16 %v1943_v18, %v1942_v17 }
 0x3c1   : > { %v12760_v38 = vsel %vm1896_vm13, %v1841_v22, %v1912_v28 }
 0x3c2   : > { %v1847_v24 = vpop.f32.mrb[18].mxu0  ;;  %9591 = vmatprep.subr.bf16.mxu1 %v9590_v0  ;;  %v1944_v44 = vmul.f32 %v12760_v38, %v12760_v38 }
 0x3c3   : > { %vm1897_vm7 = vcmp.ge.f32.partialorder %v1847_v24, 0.0  ;;  %v1913_v39 = vmul.f32 0.01, %v1847_v24  ;;  %v12762_v40 = vpop.f32.mrb[19].mxu0  ;;  %9593 = vmatpush3.bf16.msra.mxu1 %v9592_v30 }
 0x3c4   : > { %14858 = vst [vmem:[#allocation63_spill] sm:$0xff] %v12762_v40 }
 0x3c5   : > { %v12764_v49 = vsel %vm1897_vm7, %v1847_v24, %v1913_v39 }
 0x3c6   : > { %v1945_v7 = vmul.f32 %v12764_v49, %v12764_v49  ;;  %v1853_v43 = vpop.f32.mrb[20].mxu0  ;;  %v9596_v56 = vpack.c.bf16 %v12764_v49, %v12760_v38 }
 0x3c7   : > { %v1914_v53 = vmul.f32 0.01, %v1853_v43  ;;  %v12770_v55 = vpop.f32.mrb[21].mxu0  ;;  %vm1898_vm11 = vcmp.ge.f32.partialorder %v1853_v43, 0.0 }
 0x3c8   : > { %14859 = vst [vmem:[#allocation64_spill] sm:$0xff] %v12770_v55  ;;  %v9594_v59 = vpack.c.bf16 %v1945_v7, %v1944_v44  ;;  %v2563_v55 = vld [vmem:[%s14867_s7 + $0xb8] sm:$0xff] }
 0x3c9   : > { %v12774_v58 = vsel %vm1898_vm11, %v1853_v43, %v1914_v53 }
 0x3ca   : > { %v1859_v10 = vpop.f32.mrb[22].mxu0  ;;  %9595 = vmatprep.subr.bf16.mxu1 %v9594_v59  ;;  %v1946_v18 = vmul.f32 %v12774_v58, %v12774_v58 }
 0x3cb   : > { %vm1899_vm13 = vcmp.ge.f32.partialorder %v1859_v10, 0.0  ;;  %v1915_v60 = vmul.f32 0.01, %v1859_v10  ;;  %v12776_v51 = vpop.f32.mrb[23].mxu0  ;;  %9597 = vmatpush3.bf16.msra.mxu1 %v9596_v56 }
 0x3cc   : > { %14860 = vst [vmem:[#allocation65_spill] sm:$0xff] %v12776_v51  ;;  %v2561_v51 = vld [vmem:[%s14867_s7 + $0xa8] sm:$0xff] }
 0x3cd   : > { %v12778_v17 = vsel %vm1899_vm13, %v1859_v10, %v1915_v60 }
 0x3ce   : > { %v1947_v22 = vmul.f32 %v12778_v17, %v12778_v17  ;;  %v1865_v28 = vpop.f32.mrb[24].mxu0  ;;  %v9600_v39 = vpack.c.bf16 %v12778_v17, %v12774_v58 }
 0x3cf   : > { %v1916_v0 = vmul.f32 0.01, %v1865_v28  ;;  %v12784_v30 = vpop.f32.mrb[25].mxu0  ;;  %vm1900_vm7 = vcmp.ge.f32.partialorder %v1865_v28, 0.0 }
 0x3d0   : > { %14861 = vst [vmem:[#allocation66_spill] sm:$0xff] %v12784_v30  ;;  %v9598_v24 = vpack.c.bf16 %v1947_v22, %v1946_v18  ;;  %v2542_v30 = vld [vmem:[%s14867_s7 + $0x10] sm:$0xff] }
 0x3d1   : > { %v12788_v7 = vsel %vm1900_vm7, %v1865_v28, %v1916_v0 }
 0x3d2   : > { %v1871_v44 = vpop.f32.mrb[26].mxu0  ;;  %9599 = vmatprep.subr.bf16.mxu1 %v9598_v24  ;;  %v1948_v56 = vmul.f32 %v12788_v7, %v12788_v7 }
 0x3d3   : > { %vm1901_vm11 = vcmp.ge.f32.partialorder %v1871_v44, 0.0  ;;  %v1917_v43 = vmul.f32 0.01, %v1871_v44  ;;  %v12790_v53 = vpop.f32.mrb[27].mxu0  ;;  %9601 = vmatpush3.bf16.msra.mxu1 %v9600_v39 }
 0x3d4   : > { %14862 = vst [vmem:[#allocation67_spill] sm:$0xff] %v12790_v53  ;;  %v2556_v53 = vld [vmem:[%s14867_s7 + $0x80] sm:$0xff] }
 0x3d5   : > { %v12792_v59 = vsel %vm1901_vm11, %v1871_v44, %v1917_v43  ;;  %vm14719_vm11 = vcmask 64512  }
 0x3d6   : > { %v1949_v10 = vmul.f32 %v12792_v59, %v12792_v59  ;;  %v1877_v60 = vpop.f32.mrb[28].mxu0  ;;  %v9604_v0 = vpack.c.bf16 %v12792_v59, %v12788_v7 }
 0x3d7   : > { %v1918_v18 = vmul.f32 0.01, %v1877_v60  ;;  %v12798_v22 = vpop.f32.mrb[29].mxu0  ;;  %vm1902_vm13 = vcmp.ge.f32.partialorder %v1877_v60, 0.0 }
 0x3d8   : > { %14863 = vst [vmem:[#allocation68_spill] sm:$0xff] %v12798_v22  ;;  %v9602_v28 = vpack.c.bf16 %v1949_v10, %v1948_v56  ;;  %v2032_v56 = vld [vmem:[%s14865_s11 + $0x8] sm:$0xff]  ;;  %v14866_v22 = vmov 0.0  }
 0x3d9   : > { %v12802_v39 = vsel %vm1902_vm13, %v1877_v60, %v1918_v18  ;;  %vm8028_vm13 = vmneg %vm12560_vm10  ;;  %vm14886_vm10 = vcmask 1046528  }
 0x3da   : > { %v1883_v24 = vpop.f32.mrb[30].mxu0  ;;  %9603 = vmatprep.subr.bf16.mxu1 %v9602_v28  ;;  %v1950_v10 = vmul.f32 %v12802_v39, %v12802_v39  ;;  %v12818_v28 = vpack.c.bf16 %v2032_v56, %v2031_v52  ;;  %v2035_v52 = vld [vmem:[%s14865_s11 + $0x20] sm:$0xff]  ;;  %v2036_v56 = vld [vmem:[%s14865_s11 + $0x28] sm:$0xff] }
 0x3db   : > { %vm1903_vm7 = vcmp.ge.f32.partialorder %v1883_v24, 0.0  ;;  %v1919_v44 = vmul.f32 0.01, %v1883_v24  ;;  %v12804_v43 = vpop.f32.mrb[31].mxu0  ;;  %9605 = vmatpush3.bf16.msra.mxu1 %v9604_v0 }
 0x3dc   : > { %14864 = vst [vmem:[#allocation69_spill] sm:$0xff] %v12804_v43 }
 0x3dd   : > { %v12806_v2 = vsel %vm1903_vm7, %v1883_v24, %v1919_v44  ;;  %v2033_v24 = vld [vmem:[%s14865_s11 + $0x10] sm:$0xff]  ;;  %v2034_v44 = vld [vmem:[%s14865_s11 + $0x18] sm:$0xff]  ;;  %vm14884_vm7 = vcmask 1040384  }
 0x3de   : > { %v1951_v60 = vmul.f32 %v12806_v2, %v12806_v2  ;;  %v9608_v0 = vpack.c.bf16 %v12806_v2, %v12802_v39  ;;  %vm14885_vm12 = vmmov %vm14884_vm7 }
 0x3e0   : > { %v9606_v18 = vpack.c.bf16 %v1951_v60, %v1950_v10  ;;  %v12829_v10 = vpack.c.bf16 %v2034_v44, %v2033_v24  ;;  %v1954_v60 = vld [vmem:[#allocation5 + $0x10] sm:$0xff]  ;;  %v2038_v24 = vld [vmem:[%s14865_s11 + $0x38] sm:$0xff]  ;;  %v2040_v44 = vld [vmem:[%s14865_s11 + $0x48] sm:$0xff] }
 0x3e2   : > { %9607 = vmatprep.subr.bf16.mxu1 %v9606_v18  ;;  %v12839_v18 = vpack.c.bf16 %v2036_v56, %v2035_v52  ;;  %v2041_v56 = vld [vmem:[%s14865_s11 + $0x50] sm:$0xff] }
 0x3e3   : > { %9609 = vmatpush3.bf16.msra.mxu1 %v9608_v0  ;;  %v2037_v0 = vld [vmem:[%s14865_s11 + $0x30] sm:$0xff] }
 0x3e4   : > { %9611 = vmatprep.subr.bf16.mxu1 %v12818_v28 }
 0x3e6   : > { %2021 = vmatmul.mubr.f32.vlgmr.msra.gmra.mrb[0].mxu1 %v1952_v63  ;;  %v2039_v63 = vld [vmem:[%s14865_s11 + $0x40] sm:$0xff] }
 0x3e7   : > { %2025 = vmatprep.mubr.f32.mxu1 %v1955_v21  ;;  %9613 = vmatpush3.bf16.msra.mxu1 %v12818_v28  ;;  %v12849_v21 = vpack.c.bf16 %v2038_v24, %v2037_v0  ;;  %v12859_v52 = vpack.c.bf16 %v2040_v44, %v2039_v63  ;;  %v2043_v24 = vld [vmem:[%s14865_s11 + $0x60] sm:$0xff]  ;;  %v2044_v63 = vld [vmem:[%s14865_s11 + $0x68] sm:$0xff] }
 0x3e8   : > { %9615 = vmatprep.subr.bf16.mxu1 %v12829_v10  ;;  %v12880_v44 = vpack.c.bf16 %v2044_v63, %v2043_v24 }
 0x3ea   : > { %2026 = vmatmul.mubr.f32.gmra.mrb[2].mxu1 %v1954_v60  ;;  %v2042_v60 = vld [vmem:[%s14865_s11 + $0x58] sm:$0xff] }
 0x3eb   : > { %9617 = vmatpush3.bf16.msra.mxu1 %v12829_v10  ;;  %v12869_v0 = vpack.c.bf16 %v2042_v60, %v2041_v56  ;;  %v2045_v56 = vld [vmem:[%s14865_s11 + $0x70] sm:$0xff]  ;;  %v2046_v60 = vld [vmem:[%s14865_s11 + $0x78] sm:$0xff] }
 0x3ec   : > { %9619 = vmatprep.subr.bf16.mxu1 %v12839_v18  ;;  %v12890_v47 = vpack.c.bf16 %v2046_v60, %v2045_v56  ;;  %v2557_v56 = vld [vmem:[%s14867_s7 + $0x88] sm:$0xff]  ;;  %v2540_v60 = vld [vmem:[%s14867_s7] sm:$0xff] }
 0x3ef   : > { %9621 = vmatpush3.bf16.msra.mxu1 %v12839_v18 }
 0x3f0   : > { %9623 = vmatprep.subr.bf16.mxu1 %v12849_v21 }
 0x3f3   : > { %9625 = vmatpush3.bf16.msra.mxu1 %v12849_v21 }
 0x3f4   : > { %9627 = vmatprep.subr.bf16.mxu1 %v12859_v52 }
 0x3f7   : > { %9629 = vmatpush3.bf16.msra.mxu1 %v12859_v52 }
 0x3f8   : > { %9631 = vmatprep.subr.bf16.mxu1 %v12869_v0 }
 0x3fb   : > { %9633 = vmatpush3.bf16.msra.mxu1 %v12869_v0 }
 0x3fc   : > { %9635 = vmatprep.subr.bf16.mxu1 %v12880_v44 }
 0x3ff   : > { %9637 = vmatpush3.bf16.msra.mxu1 %v12880_v44 }
 0x400   : > { %9639 = vmatprep.subr.bf16.mxu1 %v12890_v47 }
 0x403   : > { %9641 = vmatpush3.bf16.msra.mxu1 %v12890_v47 }
 0x4b9   : > { %v8296_v24 = vpop.f32.mrb[0].mxu1 }
 0x4ba   : > { %v8297_v63 = vpop.f32.mrb[1].mxu1 }
 0x4bb   : > { %v8298_v8 = vadd.f32 %v8297_v63, %v8296_v24  ;;  %v9642_v24 = vpack.c.bf16 %v2557_v56, %v2556_v53  ;;  %v2543_v53 = vld [vmem:[%s14867_s7 + $0x18] sm:$0xff]  ;;  %v2560_v56 = vld [vmem:[%s14867_s7 + $0xa0] sm:$0xff] }
 0x4bd   : > { %v8299_v35 = vpop.f32.mrb[2].mxu1  ;;  %8938 = vmatprep.mubr.f32.mxu1 %v8298_v8  ;;  %v2558_v8 = vld [vmem:[%s14867_s7 + $0x90] sm:$0xff]  ;;  %9643 = vmatprep.subr.bf16.mxu0 %v9642_v24 }
 0x4be   : > { %v8300_v3 = vpop.f32.mrb[3].mxu1  ;;  %v2562_v24 = vld [vmem:[%s14867_s7 + $0xb0] sm:$0xff] }
 0x4bf   : > { %v8301_v43 = vadd.f32 %v8300_v3, %v8299_v35  ;;  %v2541_v3 = vld [vmem:[%s14867_s7 + $0x8] sm:$0xff]  ;;  %v2559_v35 = vld [vmem:[%s14867_s7 + $0x98] sm:$0xff] }
 0x4c0   : > { %v9646_v63 = vpack.c.bf16 %v2559_v35, %v2558_v8  ;;  %v2544_v8 = vld [vmem:[%s14867_s7 + $0x20] sm:$0xff]  ;;  %v2545_v35 = vld [vmem:[%s14867_s7 + $0x28] sm:$0xff] }
 0x4c1   : > { %8939 = vmatmul.mubr.f32.vlgmr.msra.gmra.mrb[4].mxu1 %v8301_v43  ;;  %v9644_v43 = vpack.c.bf16 %v2541_v3, %v2540_v60  ;;  %v9648_v60 = vpack.c.bf16 %v2543_v53, %v2542_v30  ;;  %v9650_v3 = vpack.c.bf16 %v2561_v51, %v2560_v56  ;;  %v9652_v30 = vpack.c.bf16 %v2545_v35, %v2544_v8  ;;  %v2564_v53 = vld [vmem:[%s14867_s7 + $0xc0] sm:$0xff]  ;;  %v2565_v56 = vld [vmem:[%s14867_s7 + $0xc8] sm:$0xff]  ;;  %v2566_v35 = vld [vmem:[%s14867_s7 + $0xd0] sm:$0xff] }
 0x4c2   : > { %2267 = vmatprep.mubr.f32.mxu1 %v14866_v22  ;;  %v9654_v51 = vpack.c.bf16 %v2563_v55, %v2562_v24  ;;  %v9658_v55 = vpack.c.bf16 %v2565_v56, %v2564_v53  ;;  %v2549_v8 = vld [vmem:[%s14867_s7 + $0x48] sm:$0xff]  ;;  %v2567_v24 = vld [vmem:[%s14867_s7 + $0xd8] sm:$0xff]  ;;  %v2568_v53 = vld [vmem:[%s14867_s7 + $0xe0] sm:$0xff] }
 0x4c3   : > { %9645 = vmatpush3.bf16.msra.mxu0 %v9644_v43  ;;  %v2546_v43 = vld [vmem:[%s14867_s7 + $0x30] sm:$0xff]  ;;  %v2569_v56 = vld [vmem:[%s14867_s7 + $0xe8] sm:$0xff] }
 0x4c4   : > { %9647 = vmatprep.subr.bf16.mxu0 %v9646_v63  ;;  %v2547_v63 = vld [vmem:[%s14867_s7 + $0x38] sm:$0xff] }
 0x4c7   : > { %9649 = vmatpush3.bf16.msra.mxu0 %v9648_v60  ;;  %v9656_v60 = vpack.c.bf16 %v2547_v63, %v2546_v43  ;;  %v2550_v43 = vld [vmem:[%s14867_s7 + $0x50] sm:$0xff]  ;;  %v2551_v63 = vld [vmem:[%s14867_s7 + $0x58] sm:$0xff] }
 0x4c8   : > { %9651 = vmatprep.subr.bf16.mxu0 %v9650_v3  ;;  %v2548_v3 = vld [vmem:[%s14867_s7 + $0x40] sm:$0xff] }
 0x4cb   : > { %9653 = vmatpush3.bf16.msra.mxu0 %v9652_v30  ;;  %v9660_v30 = vpack.c.bf16 %v2549_v8, %v2548_v3  ;;  %v2552_v3 = vld [vmem:[%s14867_s7 + $0x60] sm:$0xff]  ;;  %v2553_v8 = vld [vmem:[%s14867_s7 + $0x68] sm:$0xff] }
 0x4cc   : > { %9655 = vmatprep.subr.bf16.mxu0 %v9654_v51  ;;  %v9662_v51 = vpack.c.bf16 %v2567_v24, %v2566_v35  ;;  %v9668_v35 = vpack.c.bf16 %v2553_v8, %v2552_v3  ;;  %v2572_v3 = vld [vmem:[%s14867_s7 + $0x100] sm:$0xff]  ;;  %v2574_v8 = vld [vmem:[%s14867_s7 + $0x110] sm:$0xff] }
 0x4cf   : > { %9657 = vmatpush3.bf16.msra.mxu0 %v9656_v60  ;;  %v9664_v60 = vpack.c.bf16 %v2551_v63, %v2550_v43  ;;  %v2122_v43 = vld [vmem:[#allocation7] sm:$0xf] }
 0x4d0   : > { %9659 = vmatprep.subr.bf16.mxu0 %v9658_v55  ;;  %v9666_v55 = vpack.c.bf16 %v2569_v56, %v2568_v53  ;;  %v12984_v53 = vsub.s32 1, %v12334_v1 }
 0x4d2   : > { %14869 = vst [vmem:[#allocation71_spill] sm:$0xff] %v12984_v53 }
 0x4d3   : > { %9661 = vmatpush3.bf16.msra.mxu0 %v9660_v30 }
 0x4d4   : > { %9663 = vmatprep.subr.bf16.mxu0 %v9662_v51  ;;  %v12980_v51 = vsub.s32 0, %v12334_v1 }
 0x4d6   : > { %14868 = vst [vmem:[#allocation70_spill] sm:$0xff] %v12980_v51  ;;  %v2130_v63 = vrot.slane %v2122_v43, %v12980_v51  ;;  %v2580_v51 = vld [vmem:[%s14867_s7 + $0x140] sm:$0xff] }
 0x4d7   : > { %9665 = vmatpush3.bf16.msra.mxu0 %v9664_v60 }
 0x4d8   : > { %9667 = vmatprep.subr.bf16.mxu0 %v9666_v55  ;;  %v2136_v55 = vrot.slane %v2122_v43, %v12984_v53  ;;  %v2138_v43 = vld [vmem:[%s14870_s3] sm:$0xff]  ;;  %v13128_v53 = vld [vmem:[%s14870_s3 + $0x78] sm:$0xff] }
 0x4d9   : > { %14883 = vst [vmem:[#allocation84_spill] sm:$0xff] %v13128_v53 }
 0x4db   : > { %9669 = vmatpush3.bf16.msra.mxu0 %v9668_v35  ;;  %v2575_v35 = vld [vmem:[%s14867_s7 + $0x118] sm:$0xff] }
 0x594   : > { %v8940_v24 = vpop.f32.mrb[4].mxu1 }
 0x595   : > { %v2113_v40 = vpop.f32.mrb[5].mxu1 }
 0x596   : > { %v2123_v34 = vmul.f32 %v2113_v40, %v2113_v40 }
 0x598   : > { %v2124_v23 = vsub.f32 %v8940_v24, %v2123_v34 }
 0x59a   : > { %v2125_v30 = vadd.f32 1e-05, %v2124_v23  ;;  %v2573_v23 = vld [vmem:[%s14867_s7 + $0x108] sm:$0xff] }
 0x59c   : > { %10935 = vrsqrt.f32 %v2125_v30  ;;  %v9674_v30 = vpack.c.bf16 %v2573_v23, %v2572_v3  ;;  %v2578_v3 = vld [vmem:[%s14867_s7 + $0x130] sm:$0xff]  ;;  %v2579_v23 = vld [vmem:[%s14867_s7 + $0x138] sm:$0xff] }
 0x5a6   : > { %v10936_v56 = vpop.eup %10935 }
 0x5a7   : > { %v2131_v60 = vmul.f32 %v10936_v56, %v2130_v63  ;;  %v9678_v63 = vpack.c.bf16 %v2575_v35, %v2574_v8  ;;  %v2577_v56 = vld [vmem:[%s14867_s7 + $0x128] sm:$0xff]  ;;  %v9686_v8 = vpack.c.bf16 %v2579_v23, %v2578_v3  ;;  %v13032_v35 = vld [vmem:[%s14870_s3 + $0x18] sm:$0xff]  ;;  %v13104_v3 = vld [vmem:[%s14870_s3 + $0x60] sm:$0xff] }
 0x5a8   : > { %14871 = vst [vmem:[#allocation72_spill] sm:$0xff] %v13032_v35  ;;  %14880 = vst [vmem:[#allocation81_spill] sm:$0xff] %v13104_v3  ;;  %v13112_v23 = vld [vmem:[%s14870_s3 + $0x68] sm:$0xff] }
 0x5a9   : > { %v2132_v34 = vmul.f32 %v2131_v60, %v2113_v40  ;;  %v2576_v40 = vld [vmem:[%s14867_s7 + $0x120] sm:$0xff]  ;;  %14881 = vst [vmem:[#allocation82_spill] sm:$0xff] %v13112_v23 }
 0x5ab   : > { %v2137_v24 = vsub.f32 %v2136_v55, %v2132_v34  ;;  %v2139_v55 = vld [vmem:[%s14870_s3 + $0x8] sm:$0xff]  ;;  %v13024_v34 = vld [vmem:[%s14870_s3 + $0x10] sm:$0xff] }
 0x5ad   : > { %2203 = vmatprep.subr.mxu1 %v2137_v24  ;;  %v13040_v24 = vld [vmem:[%s14870_s3 + $0x20] sm:$0xff] }
 0x5ae   : > { %2204 = vmatpush1.msra.mxu1 %v2131_v60  ;;  %v9682_v60 = vpack.c.bf16 %v2577_v56, %v2576_v40  ;;  %14872 = vst [vmem:[#allocation73_spill] sm:$0xff] %v13040_v24  ;;  %v13072_v40 = vld [vmem:[%s14870_s3 + $0x40] sm:$0xff]  ;;  %v13080_v56 = vld [vmem:[%s14870_s3 + $0x48] sm:$0xff] }
 0x5af   : > { %8012 = vmatmul.mubr.msk.f32.vlgmr.msra.gmra.mrb[6].mxu1 %vm14719_vm11, %v2138_v43  ;;  %9675 = vmatprep.subr.bf16.mxu1 %v9674_v30  ;;  %v13056_v43 = vld [vmem:[%s14870_s3 + $0x30] sm:$0xff]  ;;  %14876 = vst [vmem:[#allocation77_spill] sm:$0xff] %v13072_v40  ;;  %14877 = vst [vmem:[#allocation78_spill] sm:$0xff] %v13080_v56 }
 0x5b0   : > { %2273 = vmatprep.mubr.f32.mxu1 %v14866_v22  ;;  %9677 = vmatpush3.bf16.msra.mxu1 %v9674_v30  ;;  %v13048_v30 = vld [vmem:[%s14870_s3 + $0x28] sm:$0xff]  ;;  %14874 = vst [vmem:[#allocation75_spill] sm:$0xff] %v13056_v43 }
 0x5b1   : > { %9679 = vmatprep.subr.bf16.mxu1 %v9678_v63  ;;  %14873 = vst [vmem:[#allocation74_spill] sm:$0xff] %v13048_v30 }
 0x5b3   : > { %8013 = vmatmul.mubr.msk.f32.gmra.mrb[8].mxu1 %vm14719_vm11, %v2139_v55  ;;  %v13088_v55 = vld [vmem:[%s14870_s3 + $0x50] sm:$0xff] }
 0x5b4   : > { %2279 = vmatprep.mubr.f32.mxu1 %v14866_v22  ;;  %9681 = vmatpush3.bf16.msra.mxu1 %v9678_v63  ;;  %v13064_v63 = vld [vmem:[%s14870_s3 + $0x38] sm:$0xff]  ;;  %14878 = vst [vmem:[#allocation79_spill] sm:$0xff] %v13088_v55 }
 0x5b5   : > { %9683 = vmatprep.subr.bf16.mxu1 %v9682_v60  ;;  %14875 = vst [vmem:[#allocation76_spill] sm:$0xff] %v13064_v63 }
 0x5b7   : > { %8014 = vmatmul.mubr.msk.f32.gmra.mrb[10].mxu1 %vm14719_vm11, %v13024_v34 }
 0x5b8   : > { %2285 = vmatprep.mubr.f32.mxu1 %v14866_v22  ;;  %9685 = vmatpush3.bf16.msra.mxu1 %v9682_v60  ;;  %v13096_v60 = vld [vmem:[%s14870_s3 + $0x58] sm:$0xff] }
 0x5b9   : > { %9687 = vmatprep.subr.bf16.mxu1 %v9686_v8  ;;  %14879 = vst [vmem:[#allocation80_spill] sm:$0xff] %v13096_v60 }
 0x5bb   : > { %8015 = vmatmul.mubr.msk.f32.gmra.mrb[12].mxu1 %vm14719_vm11, %v13032_v35 }
 0x5bc   : > { %2291 = vmatprep.mubr.f32.mxu1 %v14866_v22  ;;  %9689 = vmatpush3.bf16.msra.mxu1 %v9686_v8  ;;  %v13120_v8 = vld [vmem:[%s14870_s3 + $0x70] sm:$0xff] }
 0x5bd   : > { %14882 = vst [vmem:[#allocation83_spill] sm:$0xff] %v13120_v8 }
 0x5bf   : > { %8016 = vmatmul.mubr.msk.f32.gmra.mrb[14].mxu1 %vm14719_vm11, %v13040_v24 }
 0x5c0   : > { %2297 = vmatprep.mubr.f32.mxu1 %v14866_v22 }
 0x5c3   : > { %8017 = vmatmul.mubr.msk.f32.gmra.mrb[16].mxu1 %vm14719_vm11, %v13048_v30 }
 0x5c4   : > { %2303 = vmatprep.mubr.f32.mxu1 %v14866_v22 }
 0x5c7   : > { %8018 = vmatmul.mubr.msk.f32.gmra.mrb[18].mxu1 %vm14719_vm11, %v13056_v43  ;;  %v2586_v43 = vld [vmem:[%s14867_s7 + $0x170] sm:$0xff] }
 0x5c8   : > { %2309 = vmatprep.mubr.f32.mxu1 %v14866_v22 }
 0x5cb   : > { %8019 = vmatmul.mubr.msk.f32.gmra.mrb[20].mxu1 %vm14719_vm11, %v13064_v63 }
 0x5cc   : > { %2315 = vmatprep.mubr.f32.mxu1 %v14866_v22 }
 0x5cf   : > { %8020 = vmatmul.mubr.msk.f32.gmra.mrb[22].mxu1 %vm14719_vm11, %v13072_v40 }
 0x5d0   : > { %2321 = vmatprep.mubr.f32.mxu1 %v14866_v22 }
 0x5d3   : > { %8021 = vmatmul.mubr.msk.f32.gmra.mrb[24].mxu1 %vm14719_vm11, %v13080_v56  ;;  %v2583_v56 = vld [vmem:[%s14867_s7 + $0x158] sm:$0xff] }
 0x5d4   : > { %2327 = vmatprep.mubr.f32.mxu1 %v14866_v22 }
 0x5d7   : > { %8022 = vmatmul.mubr.msk.f32.gmra.mrb[26].mxu1 %vm14719_vm11, %v13088_v55 }
 0x5d8   : > { %2333 = vmatprep.mubr.f32.mxu1 %v14866_v22 }
 0x5db   : > { %8023 = vmatmul.mubr.msk.f32.gmra.mrb[28].mxu1 %vm14719_vm11, %v13096_v60  ;;  %v2571_v60 = vld [vmem:[%s14867_s7 + $0xf8] sm:$0xff] }
 0x5dc   : > { %2339 = vmatprep.mubr.f32.mxu1 %v14866_v22 }
 0x5df   : > { %8024 = vmatmul.mubr.msk.f32.gmra.mrb[30].mxu1 %vm14719_vm11, %v13104_v3 }
 0x5e0   : > { %2345 = vmatprep.mubr.f32.mxu1 %v14866_v22 }
 0x5e3   : > { %8025 = vmatmul.mubr.msk.f32.gmra.mrb[32].mxu1 %vm14719_vm11, %v13112_v23  ;;  %v2581_v23 = vld [vmem:[%s14867_s7 + $0x148] sm:$0xff] }
 0x5e4   : > { %2351 = vmatprep.mubr.f32.mxu1 %v14866_v22  ;;  %v9690_v3 = vpack.c.bf16 %v2581_v23, %v2580_v51  ;;  %v2554_v51 = vld [vmem:[%s14867_s7 + $0x70] sm:$0xff] }
 0x5e6   : > { %9691 = vmatprep.subr.bf16.mxu1 %v9690_v3 }
 0x5e7   : > { %8026 = vmatmul.mubr.msk.f32.gmra.mrb[34].mxu1 %vm14719_vm11, %v13120_v8  ;;  %v2570_v8 = vld [vmem:[%s14867_s7 + $0xf0] sm:$0xff] }
 0x5e8   : > { %2357 = vmatprep.mubr.f32.mxu1 %v14866_v22  ;;  %9693 = vmatpush3.bf16.msra.mxu1 %v9690_v3  ;;  %v9670_v55 = vpack.c.bf16 %v2571_v60, %v2570_v8  ;;  %v2555_v3 = vld [vmem:[%s14867_s7 + $0x78] sm:$0xff]  ;;  %v2584_v60 = vld [vmem:[%s14867_s7 + $0x160] sm:$0xff]  ;;  %v2585_v8 = vld [vmem:[%s14867_s7 + $0x168] sm:$0xff] }
 0x5e9   : > { %v9672_v40 = vpack.c.bf16 %v2555_v3, %v2554_v51  ;;  %v9698_v63 = vpack.c.bf16 %v2585_v8, %v2584_v60 }
 0x5ea   : > { %9671 = vmatprep.subr.bf16.mxu0 %v9670_v55 }
 0x5eb   : > { %8027 = vmatmul.mubr.msk.f32.gmra.mrb[36].mxu1 %vm14719_vm11, %v13128_v53  ;;  %v2582_v53 = vld [vmem:[%s14867_s7 + $0x150] sm:$0xff]  ;;  %9673 = vmatpush3.bf16.msra.mxu0 %v9672_v40  ;;  %vm8044_vm11 = vmneg %vm12370_vm1 }
 0x5ec   : > { %v9694_v23 = vpack.c.bf16 %v2583_v56, %v2582_v53  ;;  %v2587_v53 = vld [vmem:[%s14867_s7 + $0x178] sm:$0xff]  ;;  %vm14888_vm1 = vmmov %vm14884_vm7 }
 0x5ed   : > { %v9702_v40 = vpack.c.bf16 %v2587_v53, %v2586_v43 }
 0x5ee   : > { %9695 = vmatprep.subr.bf16.mxu1 %v9694_v23 }
 0x5ef   : > { %9697 = vmatpush3.bf16.msra.mxu1 %v9694_v23 }
 0x5f0   : > { %9699 = vmatprep.subr.bf16.mxu1 %v9698_v63 }
 0x5f3   : > { %9701 = vmatpush3.bf16.msra.mxu1 %v9698_v63 }
 0x5f4   : > { %9703 = vmatprep.subr.bf16.mxu1 %v9702_v40 }
 0x5f7   : > { %9705 = vmatpush3.bf16.msra.mxu1 %v9702_v40 }
 0x5f8   : > { %9739 = vmatprep.subr.bf16.mxu1 %v12818_v28 }
 0x682   : > { %v2269_v56 = vpop.f32.mrb[6].mxu1 }
 0x683   : > { %v2364_v55 = vmul.f32 %v2269_v56, %v12704_v4  ;;  %v2271_v51 = vpop.f32.mrb[7].mxu1 }
 0x685   : > { %v2380_v3 = vadd.f32 %v2364_v55, %v2271_v51 }
 0x686   : > { %v2275_v23 = vpop.f32.mrb[8].mxu1 }
 0x687   : > { %v2412_v60 = vrot.slane %v2380_v3, 7  ;;  %v2365_v8 = vmul.f32 %v2275_v23, %v12708_v11  ;;  %v2277_v30 = vpop.f32.mrb[9].mxu1  ;;  %2652 = vmatprep.mubr.f32.mxu0 %v2380_v3  ;;  %v2476_v40 = vrot.slane %v2380_v3, 1 }
 0x689   : > { %v2459_v43 = vsel %vm14884_vm7, 0.0, %v2412_v60  ;;  %v2381_v63 = vadd.f32 %v2365_v8, %v2277_v30 }
 0x68a   : > { %v2281_v53 = vpop.f32.mrb[10].mxu1  ;;  %8029 = vmatmul.mubr.msk.f32.vlgmr.msra.gmra.mrb[32].mxu0 %vm8028_vm13, %v2459_v43  ;;  %vm8030_vm13 = vmneg %vm12570_vm14 }
 0x68b   : > { %v2413_v24 = vrot.slane %v2381_v63, 7  ;;  %v2477_v35 = vrot.slane %v2381_v63, 1  ;;  %v2366_v4 = vmul.f32 %v2281_v53, %v12718_v6  ;;  %v2283_v56 = vpop.f32.mrb[11].mxu1  ;;  %2657 = vmatprep.mubr.f32.mxu0 %v2381_v63  ;;  %vm14889_vm14 = vmmov %vm14886_vm10 }
 0x68d   : > { %v2382_v55 = vadd.f32 %v2366_v4, %v2283_v56  ;;  %v2414_v37 = vsel %vm14885_vm12, %v2412_v60, %v2413_v24  ;;  %v2478_v51 = vsel %vm14886_vm10, %v2476_v40, %v2477_v35  ;;  %vm14887_vm12 = vmmov %vm14886_vm10 }
 0x68e   : > { %v2287_v11 = vpop.f32.mrb[12].mxu1  ;;  %2658 = vmatmul.mubr.f32.gmra.mrb[34].mxu0 %v2414_v37  ;;  %8973 = vmatprep.mubr.f32.mxu1 %v2478_v51  ;;  %vm8046_vm10 = vmneg %vm12394_vm2 }
 0x68f   : > { %v2415_v30 = vrot.slane %v2382_v55, 7  ;;  %v2479_v23 = vrot.slane %v2382_v55, 1  ;;  %v2367_v3 = vmul.f32 %v2287_v11, %v12722_v33  ;;  %v2289_v8 = vpop.f32.mrb[13].mxu1  ;;  %2662 = vmatprep.mubr.f32.mxu0 %v2382_v55  ;;  %vm14892_vm2 = vmmov %vm14888_vm1 }
 0x691   : > { %v2383_v6 = vadd.f32 %v2367_v3, %v2289_v8  ;;  %v2416_v60 = vsel %vm14884_vm7, %v2413_v24, %v2415_v30  ;;  %v2480_v43 = vsel %vm14887_vm12, %v2477_v35, %v2479_v23  ;;  %vm14891_vm7 = vmmov %vm14887_vm12 }
 0x692   : > { %v2293_v63 = vpop.f32.mrb[14].mxu1  ;;  %8031 = vmatmul.mubr.msk.f32.gmra.mrb[36].mxu0 %vm8030_vm13, %v2416_v60  ;;  %8974 = vmatmul.mubr.msk.f32.vlgmr.msra.gmra.mrb[38].mxu1 %vm8044_vm11, %v2480_v43  ;;  %vm8032_vm11 = vmneg %vm12592_vm15 }
 0x693   : > { %v2417_v13 = vrot.slane %v2383_v6, 7  ;;  %v2481_v53 = vrot.slane %v2383_v6, 1  ;;  %v2368_v40 = vmul.f32 %v2293_v63, %v12732_v14  ;;  %v2295_v4 = vpop.f32.mrb[15].mxu1  ;;  %2667 = vmatprep.mubr.f32.mxu0 %v2383_v6  ;;  %9741 = vmatpush3.bf16.msra.mxu1 %v12818_v28  ;;  %vm14890_vm13 = vmmov %vm14888_vm1 }
 0x694   : > { %9743 = vmatprep.subr.bf16.mxu1 %v12829_v10  ;;  %vm14893_vm15 = vmmov %vm14891_vm7 }
 0x695   : > { %v2384_v45 = vadd.f32 %v2368_v40, %v2295_v4  ;;  %v2418_v33 = vsel %vm14888_vm1, %v2415_v30, %v2417_v13  ;;  %v2482_v24 = vsel %vm14889_vm14, %v2479_v23, %v2481_v53  ;;  %vm8034_vm12 = vmneg %vm12612_vm0 }
 0x696   : > { %v2299_v56 = vpop.f32.mrb[16].mxu1  ;;  %2668 = vmatmul.mubr.f32.gmra.mrb[38].mxu0 %v2418_v33  ;;  %8976 = vmatprep.mubr.f32.mxu1 %v2482_v24  ;;  %vm8048_vm1 = vmneg %vm12412_vm3 }
 0x697   : > { %v2419_v35 = vrot.slane %v2384_v45, 7  ;;  %v2483_v55 = vrot.slane %v2384_v45, 1  ;;  %v2369_v14 = vmul.f32 %v2299_v56, %v12736_v50  ;;  %v2301_v37 = vpop.f32.mrb[17].mxu1  ;;  %2672 = vmatprep.mubr.f32.mxu0 %v2384_v45  ;;  %9745 = vmatpush3.bf16.msra.mxu1 %v12829_v10  ;;  %vm14894_vm14 = vmmov %vm14892_vm2 }
 0x698   : > { %9747 = vmatprep.subr.bf16.mxu1 %v12839_v18  ;;  %vm14896_vm0 = vmmov %vm14892_vm2 }
 0x699   : > { %v2385_v28 = vadd.f32 %v2369_v14, %v2301_v37  ;;  %v2420_v51 = vsel %vm14890_vm13, %v2417_v13, %v2419_v35  ;;  %v2484_v11 = vsel %vm14891_vm7, %v2481_v53, %v2483_v55  ;;  %vm14897_vm3 = vmmov %vm14891_vm7 }
 0x69a   : > { %v2305_v62 = vpop.f32.mrb[18].mxu1  ;;  %8033 = vmatmul.mubr.msk.f32.gmra.mrb[40].mxu0 %vm8032_vm11, %v2420_v51  ;;  %8977 = vmatmul.mubr.msk.f32.gmra.mrb[40].mxu1 %vm8046_vm10, %v2484_v11  ;;  %vm14895_vm11 = vmmov %vm14891_vm7 }
 0x69b   : > { %v2421_v30 = vrot.slane %v2385_v28, 7  ;;  %v2485_v23 = vrot.slane %v2385_v28, 1  ;;  %v2370_v50 = vmul.f32 %v2305_v62, %v12746_v16  ;;  %v2307_v3 = vpop.f32.mrb[19].mxu1  ;;  %2677 = vmatprep.mubr.f32.mxu0 %v2385_v28  ;;  %9749 = vmatpush3.bf16.msra.mxu1 %v12839_v18  ;;  %vm8036_vm10 = vmneg %vm12629_vm4 }
 0x69c   : > { %9751 = vmatprep.subr.bf16.mxu1 %v12849_v21  ;;  %vm8050_vm13 = vmneg %vm12465_vm5 }
 0x69d   : > { %v2386_v25 = vadd.f32 %v2370_v50, %v2307_v3  ;;  %v2422_v10 = vsel %vm14892_vm2, %v2419_v35, %v2421_v30  ;;  %v2486_v8 = vsel %vm14893_vm15, %v2483_v55, %v2485_v23  ;;  %vm14898_vm7 = vmmov %vm14896_vm0 }
 0x69e   : > { %v2311_v6 = vpop.f32.mrb[20].mxu1  ;;  %2678 = vmatmul.mubr.f32.gmra.mrb[42].mxu0 %v2422_v10  ;;  %8979 = vmatprep.mubr.f32.mxu1 %v2486_v8  ;;  %vm14899_vm2 = vmmov %vm14897_vm3 }
 0x69f   : > { %v2423_v60 = vrot.slane %v2386_v25, 7  ;;  %v2487_v43 = vrot.slane %v2386_v25, 1  ;;  %v2371_v16 = vmul.f32 %v2311_v6, %v12750_v12  ;;  %v2313_v63 = vpop.f32.mrb[21].mxu1  ;;  %2682 = vmatprep.mubr.f32.mxu0 %v2386_v25  ;;  %9753 = vmatpush3.bf16.msra.mxu1 %v12849_v21  ;;  %vm14900_vm4 = vmmov %vm14896_vm0 }
 0x6a0   : > { %9755 = vmatprep.subr.bf16.mxu1 %v12859_v52  ;;  %vm14901_vm5 = vmmov %vm14899_vm2 }
 0x6a1   : > { %v2387_v18 = vadd.f32 %v2371_v16, %v2313_v63  ;;  %v2424_v13 = vsel %vm14894_vm14, %v2421_v30, %v2423_v60  ;;  %v2488_v53 = vsel %vm14895_vm11, %v2485_v23, %v2487_v43  ;;  %vm8038_vm15 = vmneg %vm12646_vm9 }
 0x6a2   : > { %v2317_v29 = vpop.f32.mrb[22].mxu1  ;;  %8035 = vmatmul.mubr.msk.f32.gmra.mrb[44].mxu0 %vm8034_vm12, %v2424_v13  ;;  %8980 = vmatmul.mubr.msk.f32.gmra.mrb[42].mxu1 %vm8048_vm1, %v2488_v53  ;;  %vm8052_vm12 = vmneg %vm12487_vm6 }
 0x6a3   : > { %v2425_v40 = vrot.slane %v2387_v18, 7  ;;  %v2489_v4 = vrot.slane %v2387_v18, 1  ;;  %v2372_v12 = vmul.f32 %v2317_v29, %v12760_v38  ;;  %v2319_v45 = vpop.f32.mrb[23].mxu1  ;;  %2687 = vmatprep.mubr.f32.mxu0 %v2387_v18  ;;  %9757 = vmatpush3.bf16.msra.mxu1 %v12859_v52  ;;  %vm14902_vm1 = vmmov %vm14896_vm0 }
 0x6a4   : > { %9759 = vmatprep.subr.bf16.mxu1 %v12869_v0  ;;  %vm14903_vm14 = vmmov %vm14899_vm2 }
 0x6a5   : > { %v2388_v46 = vadd.f32 %v2372_v12, %v2319_v45  ;;  %v2426_v21 = vsel %vm14896_vm0, %v2423_v60, %v2425_v40  ;;  %v2490_v33 = vsel %vm14897_vm3, %v2487_v43, %v2489_v4  ;;  %vm14904_vm9 = vmmov %vm14896_vm0  ;;  %vm14906_vm0 = vnez %v14832_v54 }
 0x6a6   : > { %v2323_v24 = vpop.f32.mrb[24].mxu1  ;;  %2688 = vmatmul.mubr.f32.gmra.mrb[46].mxu0 %v2426_v21  ;;  %8982 = vmatprep.mubr.f32.mxu1 %v2490_v33  ;;  %vm14905_vm6 = vmmov %vm14899_vm2 }
 0x6a7   : > { %v2427_v56 = vrot.slane %v2388_v46, 7  ;;  %v2491_v35 = vrot.slane %v2388_v46, 1  ;;  %v2373_v38 = vmul.f32 %v2323_v24, %v12764_v49  ;;  %v2325_v55 = vpop.f32.mrb[25].mxu1  ;;  %2692 = vmatprep.mubr.f32.mxu0 %v2388_v46  ;;  %9761 = vmatpush3.bf16.msra.mxu1 %v12869_v0  ;;  %vm8040_vm11 = vmneg %vm12663_vm8 }
 0x6a8   : > { %9763 = vmatprep.subr.bf16.mxu1 %v12880_v44  ;;  %vm8054_vm3 = vmneg %vm14906_vm0 }
 0x6a9   : > { %v2389_v52 = vadd.f32 %v2373_v38, %v2325_v55  ;;  %v2428_v14 = vsel %vm14898_vm7, %v2425_v40, %v2427_v56  ;;  %v2492_v37 = vsel %vm14899_vm2, %v2489_v4, %v2491_v35  ;;  %vm14909_vm8 = vmmov %vm14902_vm1 }
 0x6aa   : > { %v2329_v5 = vpop.f32.mrb[26].mxu1  ;;  %8037 = vmatmul.mubr.msk.f32.gmra.mrb[48].mxu0 %vm8036_vm10, %v2428_v14  ;;  %8983 = vmatmul.mubr.msk.f32.gmra.mrb[44].mxu1 %vm8050_vm13, %v2492_v37  ;;  %vm14907_vm10 = vmmov %vm14902_vm1 }
 0x6ab   : > { %v2429_v28 = vrot.slane %v2389_v52, 7  ;;  %v2493_v51 = vrot.slane %v2389_v52, 1  ;;  %v2374_v49 = vmul.f32 %v2329_v5, %v12774_v58  ;;  %v2331_v11 = vpop.f32.mrb[27].mxu1  ;;  %2697 = vmatprep.mubr.f32.mxu0 %v2389_v52  ;;  %9765 = vmatpush3.bf16.msra.mxu1 %v12880_v44  ;;  %vm14908_vm13 = vmmov %vm14899_vm2  ;;  %v10951_v5 = vld [vmem:[#allocation5 + $0x8] sm:$0xff] }
 0x6ac   : > { %9767 = vmatprep.subr.bf16.mxu1 %v12890_v47  ;;  %vm14910_vm7 = vmmov %vm14899_vm2  ;;  %vm14911_vm2 = vnez %v14855_v42 }
 0x6ad   : > { %v2390_v20 = vadd.f32 %v2374_v49, %v2331_v11  ;;  %v2430_v0 = vsel %vm14900_vm4, %v2427_v56, %v2429_v28  ;;  %v2494_v62 = vsel %vm14901_vm5, %v2491_v35, %v2493_v51  ;;  %vm8042_vm4 = vmneg %vm14911_vm2  ;;  %vm14912_vm5 = vnez %v14834_v15 }
 0x6ae   : > { %v2335_v30 = vpop.f32.mrb[28].mxu1  ;;  %2698 = vmatmul.mubr.f32.gmra.mrb[50].mxu0 %v2430_v0  ;;  %8985 = vmatprep.mubr.f32.mxu1 %v2494_v62 }
 0x6af   : > { %v2431_v23 = vrot.slane %v2390_v20, 7  ;;  %v2495_v50 = vrot.slane %v2390_v20, 1  ;;  %v2375_v58 = vmul.f32 %v2335_v30, %v12778_v17  ;;  %v2337_v3 = vpop.f32.mrb[29].mxu1  ;;  %2702 = vmatprep.mubr.f32.mxu0 %v2390_v20  ;;  %9769 = vmatpush3.bf16.msra.mxu1 %v12890_v47 }
 0x6b1   : > { %v2391_v44 = vadd.f32 %v2375_v58, %v2337_v3  ;;  %v2432_v25 = vsel %vm14902_vm1, %v2429_v28, %v2431_v23  ;;  %v2496_v10 = vsel %vm14903_vm14, %v2493_v51, %v2495_v50  ;;  %vm14915_vm14 = vnez %v14836_v31 }
 0x6b2   : > { %v2341_v8 = vpop.f32.mrb[30].mxu1  ;;  %8039 = vmatmul.mubr.msk.f32.gmra.mrb[52].mxu0 %vm8038_vm15, %v2432_v25  ;;  %8986 = vmatmul.mubr.msk.f32.gmra.mrb[46].mxu1 %vm8052_vm12, %v2496_v10  ;;  %vm8056_vm15 = vmneg %vm14912_vm5 }
 0x6b3   : > { %v2433_v61 = vrot.slane %v2391_v44, 7  ;;  %v2497_v6 = vrot.slane %v2391_v44, 1  ;;  %v2376_v60 = vmul.f32 %v2341_v8, %v12788_v7  ;;  %v2343_v17 = vpop.f32.mrb[31].mxu1  ;;  %2707 = vmatprep.mubr.f32.mxu0 %v2391_v44  ;;  %vm14913_vm12 = vmmov %vm14902_vm1 }
 0x6b4   : > { %vm14914_vm1 = vmmov %vm14905_vm6 }
 0x6b5   : > { %v2392_v43 = vadd.f32 %v2376_v60, %v2343_v17  ;;  %v2434_v36 = vsel %vm14904_vm9, %v2431_v23, %v2433_v61  ;;  %v2498_v16 = vsel %vm14905_vm6, %v2495_v50, %v2497_v6  ;;  %vm8058_vm9 = vmneg %vm14915_vm14 }
 0x6b6   : > { %v2347_v47 = vpop.f32.mrb[32].mxu1  ;;  %2708 = vmatmul.mubr.f32.gmra.mrb[54].mxu0 %v2434_v36  ;;  %8988 = vmatprep.mubr.f32.mxu1 %v2498_v16  ;;  %vm14916_vm6 = vmmov %vm14909_vm8 }
 0x6b7   : > { %v2435_v63 = vrot.slane %v2392_v43, 7  ;;  %v2499_v18 = vrot.slane %v2392_v43, 1  ;;  %v2377_v13 = vmul.f32 %v2347_v47, %v12792_v59  ;;  %v2349_v53 = vpop.f32.mrb[33].mxu1  ;;  %2712 = vmatprep.mubr.f32.mxu0 %v2392_v43  ;;  %vm14918_vm0 = vmmov %vm14914_vm1 }
 0x6b9   : > { %v2393_v7 = vadd.f32 %v2377_v13, %v2349_v53  ;;  %v2436_v29 = vsel %vm14907_vm10, %v2433_v61, %v2435_v63  ;;  %v2500_v40 = vsel %vm14908_vm13, %v2497_v6, %v2499_v18 }
 0x6ba   : > { %v2353_v4 = vpop.f32.mrb[34].mxu1  ;;  %8041 = vmatmul.mubr.msk.f32.gmra.mrb[56].mxu0 %vm8040_vm11, %v2436_v29  ;;  %8989 = vmatmul.mubr.msk.f32.gmra.mrb[48].mxu1 %vm8054_vm3, %v2500_v40  ;;  %vm14917_vm11 = vmmov %vm14914_vm1 }
 0x6bb   : > { %v2437_v12 = vrot.slane %v2393_v7, 7  ;;  %v2501_v27 = vrot.slane %v2393_v7, 1  ;;  %v2378_v45 = vmul.f32 %v2353_v4, %v12802_v39  ;;  %v2355_v46 = vpop.f32.mrb[35].mxu1  ;;  %2717 = vmatprep.mubr.f32.mxu0 %v2393_v7 }
 0x6bd   : > { %v2394_v59 = vadd.f32 %v2378_v45, %v2355_v46  ;;  %v2438_v21 = vsel %vm14909_vm8, %v2435_v63, %v2437_v12  ;;  %v2502_v54 = vsel %vm14910_vm7, %v2499_v18, %v2501_v27 }
 0x6be   : > { %v2359_v33 = vpop.f32.mrb[36].mxu1  ;;  %2718 = vmatmul.mubr.f32.gmra.mrb[58].mxu0 %v2438_v21  ;;  %8991 = vmatprep.mubr.f32.mxu1 %v2502_v54 }
 0x6bf   : > { %v2439_v24 = vrot.slane %v2394_v59, 7  ;;  %v2503_v56 = vrot.slane %v2394_v59, 1  ;;  %v2379_v35 = vmul.f32 %v2359_v33, %v12806_v2  ;;  %v2361_v38 = vpop.f32.mrb[37].mxu1  ;;  %2722 = vmatprep.mubr.f32.mxu0 %v2394_v59 }
 0x6c1   : > { %v2395_v39 = vadd.f32 %v2379_v35, %v2361_v38  ;;  %v2440_v55 = vsel %vm14913_vm12, %v2437_v12, %v2439_v24  ;;  %v2504_v52 = vsel %vm14914_vm1, %v2501_v27, %v2503_v56 }
 0x6c2   : > { %8043 = vmatmul.mubr.msk.f32.gmra.mrb[60].mxu0 %vm8042_vm4, %v2440_v55  ;;  %8992 = vmatmul.mubr.msk.f32.gmra.mrb[50].mxu1 %vm8056_vm15, %v2504_v52 }
 0x6c3   : > { %v2441_v14 = vrot.slane %v2395_v39, 7  ;;  %v2505_v37 = vrot.slane %v2395_v39, 1  ;;  %2727 = vmatprep.mubr.f32.mxu0 %v2395_v39 }
 0x6c5   : > { %v2442_v2 = vsel %vm14916_vm6, %v2439_v24, %v2441_v14  ;;  %v2506_v42 = vsel %vm14917_vm11, %v2503_v56, %v2505_v37  ;;  %v2523_v15 = vsel %vm14918_vm0, %v2505_v37, 0.0 }
 0x6c6   : > { %2728 = vmatmul.mubr.f32.gmra.mrb[62].mxu0 %v2442_v2  ;;  %8994 = vmatprep.mubr.f32.mxu1 %v2506_v42 }
 0x6c7   : > { %8995 = vmatmul.mubr.msk.f32.gmra.mrb[52].mxu1 %vm8058_vm9, %v2523_v15  ;;  %3006 = vmatprep.mubr.f32.mxu0 %v10951_v5 }
 0x75d   : > { %v8352_v28 = vpop.f32.mrb[32].mxu0 }
 0x75e   : > { %v8353_v51 = vpop.f32.mrb[33].mxu0 }
 0x75f   : > { %v8354_v49 = vadd.f32 %v8353_v51, %v8352_v28 }
 0x761   : > { %v8355_v11 = vpop.f32.mrb[34].mxu0  ;;  %v2655_v20 = vadd.f32 %v8354_v49, %v12702_v19 }
 0x762   : > { %v8356_v0 = vpop.f32.mrb[35].mxu0 }
 0x763   : > { %v8357_v31 = vadd.f32 %v8356_v0, %v8355_v11 }
 0x765   : > { %v8358_v62 = vpop.f32.mrb[36].mxu0  ;;  %v2660_v30 = vadd.f32 %v8357_v31, %v12706_v9  ;;  %v8975_v23 = vpop.f32.mrb[38].mxu1 }
 0x766   : > { %v8359_v50 = vpop.f32.mrb[37].mxu0  ;;  %v2799_v58 = vpop.f32.mrb[39].mxu1 }
 0x767   : > { %v2805_v3 = vadd.f32 %v8975_v23, %v2660_v30  ;;  %v8360_v44 = vadd.f32 %v8359_v50, %v8358_v62  ;;  %v2800_v25 = vadd.f32 %v2799_v58, %v2655_v20  ;;  %v14919_v62 = vld [vmem:[#allocation61_spill] sm:$0xff] }
 0x769   : > { %vm2879_vm3 = vcmp.ge.f32.partialorder %v2805_v3, 0.0  ;;  %v2895_v10 = vmul.f32 0.01, %v2805_v3  ;;  %vm2878_vm10 = vcmp.ge.f32.partialorder %v2800_v25, 0.0  ;;  %v2894_v8 = vmul.f32 0.01, %v2800_v25 }
 0x76a   : > { %v8361_v61 = vpop.f32.mrb[38].mxu0  ;;  %v2665_v6 = vadd.f32 %v8360_v44, %v12714_v26 }
 0x76b   : > { %v13267_v60 = vsel %vm2879_vm3, %v2805_v3, %v2895_v10  ;;  %v13269_v19 = vsel %vm2878_vm10, %v2800_v25, %v2894_v8  ;;  %v8362_v17 = vpop.f32.mrb[39].mxu0  ;;  %vm14929_vm3 = vcmask 64512  }
 0x76c   : > { %v8363_v43 = vadd.f32 %v8362_v17, %v8361_v61  ;;  %v2926_v9 = vmul.f32 %v13269_v19, %v13269_v19  ;;  %v2927_v36 = vmul.f32 %v13267_v60, %v13267_v60  ;;  %v9708_v26 = vpack.c.bf16 %v13267_v60, %v13269_v19  ;;  %v14920_v61 = vld [vmem:[#allocation62_spill] sm:$0xff]  ;;  %vm14930_vm10 = vmmov %vm14929_vm3 }
 0x76d   : > { %v8364_v16 = vpop.f32.mrb[40].mxu0  ;;  %v8978_v47 = vpop.f32.mrb[40].mxu1 }
 0x76e   : > { %v2670_v63 = vadd.f32 %v8363_v43, %v12720_v32  ;;  %v8365_v18 = vpop.f32.mrb[41].mxu0  ;;  %v2809_v13 = vpop.f32.mrb[41].mxu1  ;;  %v9706_v53 = vpack.c.bf16 %v2927_v36, %v2926_v9 }
 0x76f   : > { %v8366_v7 = vadd.f32 %v8365_v18, %v8364_v16  ;;  %v2810_v29 = vadd.f32 %v2809_v13, %v2665_v6  ;;  %v14921_v18 = vld [vmem:[#allocation63_spill] sm:$0xff] }
 0x770   : > { %v2815_v40 = vadd.f32 %v8978_v47, %v2670_v63  ;;  %9707 = vmatprep.subr.bf16.mxu0 %v9706_v53 }
 0x771   : > { %vm2880_vm13 = vcmp.ge.f32.partialorder %v2810_v29, 0.0  ;;  %v2896_v4 = vmul.f32 0.01, %v2810_v29  ;;  %v8367_v12 = vpop.f32.mrb[42].mxu0  ;;  %9709 = vmatpush3.bf16.msra.mxu0 %v9708_v26  ;;  %v2675_v27 = vadd.f32 %v8366_v7, %v12728_v41 }
 0x772   : > { %vm2881_vm8 = vcmp.ge.f32.partialorder %v2815_v40, 0.0  ;;  %v2897_v45 = vmul.f32 0.01, %v2815_v40  ;;  %v8368_v46 = vpop.f32.mrb[43].mxu0 }
 0x773   : > { %v13279_v32 = vsel %vm2880_vm13, %v2810_v29, %v2896_v4  ;;  %v8369_v59 = vadd.f32 %v8368_v46, %v8367_v12  ;;  %vm14931_vm13 = vmmov %vm14929_vm3 }
 0x774   : > { %v13281_v21 = vsel %vm2881_vm8, %v2815_v40, %v2897_v45  ;;  %v2928_v54 = vmul.f32 %v13279_v32, %v13279_v32  ;;  %vm14933_vm8 = vmmov %vm14929_vm3 }
 0x775   : > { %v8370_v33 = vpop.f32.mrb[44].mxu0  ;;  %v2680_v24 = vadd.f32 %v8369_v59, %v12734_v48  ;;  %v8981_v56 = vpop.f32.mrb[42].mxu1  ;;  %v2929_v35 = vmul.f32 %v13281_v21, %v13281_v21  ;;  %v9712_v37 = vpack.c.bf16 %v13281_v21, %v13279_v32 }
 0x776   : > { %v8371_v38 = vpop.f32.mrb[45].mxu0  ;;  %v2819_v41 = vpop.f32.mrb[43].mxu1 }
 0x777   : > { %v2825_v39 = vadd.f32 %v8981_v56, %v2680_v24  ;;  %v8372_v55 = vadd.f32 %v8371_v38, %v8370_v33  ;;  %v2820_v52 = vadd.f32 %v2819_v41, %v2675_v27  ;;  %v9710_v14 = vpack.c.bf16 %v2929_v35, %v2928_v54  ;;  %v14922_v33 = vld [vmem:[#allocation64_spill] sm:$0xff] }
 0x779   : > { %vm2883_vm7 = vcmp.ge.f32.partialorder %v2825_v39, 0.0  ;;  %v2899_v2 = vmul.f32 0.01, %v2825_v39  ;;  %vm2882_vm2 = vcmp.ge.f32.partialorder %v2820_v52, 0.0  ;;  %v2898_v42 = vmul.f32 0.01, %v2820_v52  ;;  %9711 = vmatprep.subr.bf16.mxu0 %v9710_v14 }
 0x77a   : > { %v8373_v15 = vpop.f32.mrb[46].mxu0  ;;  %9713 = vmatpush3.bf16.msra.mxu0 %v9712_v37  ;;  %v2685_v48 = vadd.f32 %v8372_v55, %v12742_v57  ;;  %v14923_v37 = vld [vmem:[#allocation65_spill] sm:$0xff] }
 0x77b   : > { %v13291_v5 = vsel %vm2883_vm7, %v2825_v39, %v2899_v2  ;;  %v13293_v28 = vsel %vm2882_vm2, %v2820_v52, %v2898_v42  ;;  %v8374_v51 = vpop.f32.mrb[47].mxu0  ;;  %vm14935_vm7 = vmmov %vm14929_vm3 }
 0x77c   : > { %v8375_v49 = vadd.f32 %v8374_v51, %v8373_v15  ;;  %v2930_v11 = vmul.f32 %v13293_v28, %v13293_v28  ;;  %v2931_v20 = vmul.f32 %v13291_v5, %v13291_v5  ;;  %v9716_v57 = vpack.c.bf16 %v13291_v5, %v13293_v28  ;;  %vm14937_vm2 = vmmov %vm14929_vm3 }
 0x77d   : > { %v8376_v0 = vpop.f32.mrb[48].mxu0  ;;  %v8984_v31 = vpop.f32.mrb[44].mxu1 }
 0x77e   : > { %v2690_v30 = vadd.f32 %v8375_v49, %v14919_v62  ;;  %v8377_v23 = vpop.f32.mrb[49].mxu0  ;;  %v2829_v50 = vpop.f32.mrb[45].mxu1  ;;  %v9714_v58 = vpack.c.bf16 %v2931_v20, %v2930_v11  ;;  %v14924_v62 = vld [vmem:[#allocation66_spill] sm:$0xff] }
 0x77f   : > { %v8378_v3 = vadd.f32 %v8377_v23, %v8376_v0  ;;  %v2830_v44 = vadd.f32 %v2829_v50, %v2685_v48 }
 0x780   : > { %v2835_v25 = vadd.f32 %v8984_v31, %v2690_v30  ;;  %9715 = vmatprep.subr.bf16.mxu0 %v9714_v58 }
 0x781   : > { %vm2884_vm4 = vcmp.ge.f32.partialorder %v2830_v44, 0.0  ;;  %v2900_v10 = vmul.f32 0.01, %v2830_v44  ;;  %v8379_v8 = vpop.f32.mrb[50].mxu0  ;;  %9717 = vmatpush3.bf16.msra.mxu0 %v9716_v57  ;;  %v2695_v6 = vadd.f32 %v8378_v3, %v14920_v61 }
 0x782   : > { %vm2885_vm5 = vcmp.ge.f32.partialorder %v2835_v25, 0.0  ;;  %v2901_v17 = vmul.f32 0.01, %v2835_v25  ;;  %v8380_v43 = vpop.f32.mrb[51].mxu0 }
 0x783   : > { %v13303_v9 = vsel %vm2884_vm4, %v2830_v44, %v2900_v10  ;;  %v8381_v36 = vadd.f32 %v8380_v43, %v8379_v8  ;;  %v14925_v10 = vld [vmem:[#allocation67_spill] sm:$0xff]  ;;  %vm14939_vm4 = vmmov %vm14937_vm2 }
 0x784   : > { %v13305_v16 = vsel %vm2885_vm5, %v2835_v25, %v2901_v17  ;;  %v2932_v47 = vmul.f32 %v13303_v9, %v13303_v9  ;;  %vm14941_vm5 = vmmov %vm14937_vm2 }
 0x785   : > { %v8382_v63 = vpop.f32.mrb[52].mxu0  ;;  %v2700_v13 = vadd.f32 %v8381_v36, %v14921_v18  ;;  %v8987_v53 = vpop.f32.mrb[46].mxu1  ;;  %v2933_v26 = vmul.f32 %v13305_v16, %v13305_v16  ;;  %v9720_v45 = vpack.c.bf16 %v13305_v16, %v13303_v9 }
 0x786   : > { %v8383_v7 = vpop.f32.mrb[53].mxu0  ;;  %v2839_v29 = vpop.f32.mrb[47].mxu1 }
 0x787   : > { %v2845_v40 = vadd.f32 %v8987_v53, %v2700_v13  ;;  %v8384_v4 = vadd.f32 %v8383_v7, %v8382_v63  ;;  %v2840_v12 = vadd.f32 %v2839_v29, %v2695_v6  ;;  %v9718_v27 = vpack.c.bf16 %v2933_v26, %v2932_v47 }
 0x789   : > { %vm2887_vm15 = vcmp.ge.f32.partialorder %v2845_v40, 0.0  ;;  %v2903_v46 = vmul.f32 0.01, %v2845_v40  ;;  %vm2886_vm12 = vcmp.ge.f32.partialorder %v2840_v12, 0.0  ;;  %v2902_v59 = vmul.f32 0.01, %v2840_v12  ;;  %9719 = vmatprep.subr.bf16.mxu0 %v9718_v27 }
 0x78a   : > { %v8385_v54 = vpop.f32.mrb[54].mxu0  ;;  %9721 = vmatpush3.bf16.msra.mxu0 %v9720_v45  ;;  %v2705_v24 = vadd.f32 %v8384_v4, %v14922_v33 }
 0x78b   : > { %v13315_v56 = vsel %vm2887_vm15, %v2845_v40, %v2903_v46  ;;  %v13317_v35 = vsel %vm2886_vm12, %v2840_v12, %v2902_v59  ;;  %v8386_v38 = vpop.f32.mrb[55].mxu0  ;;  %v14926_v40 = vld [vmem:[#allocation68_spill] sm:$0xff]  ;;  %vm14943_vm15 = vmmov %vm14937_vm2 }
 0x78c   : > { %v8387_v41 = vadd.f32 %v8386_v38, %v8385_v54  ;;  %v2934_v39 = vmul.f32 %v13317_v35, %v13317_v35  ;;  %v2935_v55 = vmul.f32 %v13315_v56, %v13315_v56  ;;  %v9724_v51 = vpack.c.bf16 %v13315_v56, %v13317_v35  ;;  %v14927_v38 = vld [vmem:[#allocation69_spill] sm:$0xff]  ;;  %vm14945_vm12 = vmmov %vm14937_vm2 }
 0x78d   : > { %v8388_v52 = vpop.f32.mrb[56].mxu0  ;;  %v8990_v14 = vpop.f32.mrb[48].mxu1 }
 0x78e   : > { %v2710_v2 = vadd.f32 %v8387_v41, %v14923_v37  ;;  %v8389_v42 = vpop.f32.mrb[57].mxu0  ;;  %v2849_v15 = vpop.f32.mrb[49].mxu1  ;;  %v9722_v48 = vpack.c.bf16 %v2935_v55, %v2934_v39 }
 0x78f   : > { %v8390_v49 = vadd.f32 %v8389_v42, %v8388_v52  ;;  %v2850_v11 = vadd.f32 %v2849_v15, %v2705_v24 }
 0x790   : > { %v2855_v20 = vadd.f32 %v8990_v14, %v2710_v2  ;;  %9723 = vmatprep.subr.bf16.mxu0 %v9722_v48 }
 0x791   : > { %vm2888_vm1 = vcmp.ge.f32.partialorder %v2850_v11, 0.0  ;;  %v2904_v0 = vmul.f32 0.01, %v2850_v11  ;;  %v8391_v31 = vpop.f32.mrb[58].mxu0  ;;  %9725 = vmatpush3.bf16.msra.mxu0 %v9724_v51  ;;  %v2715_v30 = vadd.f32 %v8390_v49, %v14924_v62 }
 0x792   : > { %vm2889_vm14 = vcmp.ge.f32.partialorder %v2855_v20, 0.0  ;;  %v2905_v23 = vmul.f32 0.01, %v2855_v20  ;;  %v8392_v50 = vpop.f32.mrb[59].mxu0 }
 0x793   : > { %v13327_v58 = vsel %vm2888_vm1, %v2850_v11, %v2904_v0  ;;  %v8393_v57 = vadd.f32 %v8392_v50, %v8391_v31  ;;  %v10952_v11 = vld [vmem:[#allocation5] sm:$0xff]  ;;  %v10954_v0 = vld [vmem:[#allocation5 + $0x10] sm:$0xff]  ;;  %vm14947_vm1 = vmmov %vm14937_vm2 }
 0x794   : > { %v13329_v3 = vsel %vm2889_vm14, %v2855_v20, %v2905_v23  ;;  %v2936_v44 = vmul.f32 %v13327_v58, %v13327_v58  ;;  %v10953_v20 = vld [vmem:[#allocation5 + $0x18] sm:$0xff]  ;;  %vm14949_vm14 = vmmov %vm14947_vm1 }
 0x795   : > { %v8394_v25 = vpop.f32.mrb[60].mxu0  ;;  %v2720_v8 = vadd.f32 %v8393_v57, %v14925_v10  ;;  %v8993_v61 = vpop.f32.mrb[50].mxu1  ;;  %v2937_v6 = vmul.f32 %v13329_v3, %v13329_v3  ;;  %v9728_v13 = vpack.c.bf16 %v13329_v3, %v13327_v58 }
 0x796   : > { %v8395_v17 = vpop.f32.mrb[61].mxu0  ;;  %v2859_v43 = vpop.f32.mrb[51].mxu1 }
 0x797   : > { %v2865_v36 = vadd.f32 %v8993_v61, %v2720_v8  ;;  %v8396_v47 = vadd.f32 %v8395_v17, %v8394_v25  ;;  %v2860_v63 = vadd.f32 %v2859_v43, %v2715_v30  ;;  %v9726_v18 = vpack.c.bf16 %v2937_v6, %v2936_v44  ;;  %v10955_v17 = vld [vmem:[#allocation7] sm:$0xf] }
 0x798   : > { %v13362_v6 = vsub.s32 2, %v12334_v1 }
 0x799   : > { %vm2891_vm9 = vcmp.ge.f32.partialorder %v2865_v36, 0.0  ;;  %v2907_v53 = vmul.f32 0.01, %v2865_v36  ;;  %vm2890_vm6 = vcmp.ge.f32.partialorder %v2860_v63, 0.0  ;;  %v2906_v26 = vmul.f32 0.01, %v2860_v63  ;;  %9727 = vmatprep.subr.bf16.mxu0 %v9726_v18 }
 0x79a   : > { %v8397_v7 = vpop.f32.mrb[62].mxu0  ;;  %9729 = vmatpush3.bf16.msra.mxu0 %v9728_v13  ;;  %v8996_v29 = vpop.f32.mrb[52].mxu1  ;;  %v2725_v4 = vadd.f32 %v8396_v47, %v14926_v40  ;;  %v3099_v43 = vrot.slane %v10955_v17, %v13362_v6  ;;  %v14934_v40 = vld [vmem:[#allocation73_spill] sm:$0xff] }
 0x79b   : > { %v13339_v12 = vsel %vm2891_vm9, %v2865_v36, %v2907_v53  ;;  %v13341_v27 = vsel %vm2890_vm6, %v2860_v63, %v2906_v26  ;;  %v8398_v45 = vpop.f32.mrb[63].mxu0  ;;  %v2869_v46 = vpop.f32.mrb[53].mxu1  ;;  %v13366_v36 = vsub.s32 3, %v12334_v1  ;;  %v10956_v26 = vld [vmem:[%s14870_s3] sm:$0xff]  ;;  %vm14951_vm9 = vmmov %vm14947_vm1 }
 0x79c   : > { %v8399_v59 = vadd.f32 %v8398_v45, %v8397_v7  ;;  %v2870_v54 = vadd.f32 %v2869_v46, %v2725_v4  ;;  %v2938_v33 = vmul.f32 %v13341_v27, %v13341_v27  ;;  %v2939_v24 = vmul.f32 %v13339_v12, %v13339_v12  ;;  %v10957_v7 = vld [vmem:[%s14870_s3 + $0x8] sm:$0xff]  ;;  %v14936_v4 = vld [vmem:[#allocation74_spill] sm:$0xff]  ;;  %v14938_v45 = vld [vmem:[#allocation75_spill] sm:$0xff] }
 0x79d   : > { %v9732_v52 = vpack.c.bf16 %v13339_v12, %v13341_v27  ;;  %14928 = vst [vmem:[#allocation61_spill] sm:$0xff] %v13366_v36  ;;  %v3105_v18 = vrot.slane %v10955_v17, %v13366_v36  ;;  %v14942_v46 = vld [vmem:[#allocation77_spill] sm:$0xff]  ;;  %vm14953_vm6 = vmmov %vm14947_vm1  ;;  %v4535_v36 = vld [vmem:[#allocation11 + $0x30] sm:$0xff] }
 0x79e   : > { %v2730_v41 = vadd.f32 %v8399_v59, %v14927_v38  ;;  %v2908_v39 = vmul.f32 0.01, %v2870_v54  ;;  %vm2892_vm11 = vcmp.ge.f32.partialorder %v2870_v54, 0.0  ;;  %v9730_v55 = vpack.c.bf16 %v2939_v24, %v2938_v33  ;;  %v14944_v59 = vld [vmem:[#allocation78_spill] sm:$0xff]  ;;  %v14948_v33 = vld [vmem:[#allocation80_spill] sm:$0xff]  ;;  %v14950_v24 = vld [vmem:[#allocation81_spill] sm:$0xff] }
 0x79f   : > { %v14952_v38 = vld [vmem:[#allocation82_spill] sm:$0xff] }
 0x7a0   : > { %v2875_v14 = vadd.f32 %v8996_v29, %v2730_v41  ;;  %9731 = vmatprep.subr.bf16.mxu0 %v9730_v55  ;;  %v13350_v2 = vsel %vm2892_vm11, %v2870_v54, %v2908_v39  ;;  %v14932_v29 = vld [vmem:[#allocation72_spill] sm:$0xff]  ;;  %v14946_v54 = vld [vmem:[#allocation79_spill] sm:$0xff]  ;;  %vm14955_vm11 = vmmov %vm14947_vm1 }
 0x7a1   : > { %9733 = vmatpush3.bf16.msra.mxu0 %v9732_v52  ;;  %v2940_v15 = vmul.f32 %v13350_v2, %v13350_v2  ;;  %v14954_v41 = vld [vmem:[#allocation83_spill] sm:$0xff]  ;;  %v14956_v39 = vld [vmem:[#allocation84_spill] sm:$0xff] }
 0x7a2   : > { %vm2893_vm0 = vcmp.ge.f32.partialorder %v2875_v14, 0.0  ;;  %v2909_v37 = vmul.f32 0.01, %v2875_v14 }
 0x7a4   : > { %v13352_v42 = vsel %vm2893_vm0, %v2875_v14, %v2909_v37  ;;  %vm14957_vm0 = vmmov %vm14947_vm1 }
 0x7a5   : > { %v2941_v48 = vmul.f32 %v13352_v42, %v13352_v42  ;;  %v9736_v49 = vpack.c.bf16 %v13352_v42, %v13350_v2 }
 0x7a7   : > { %v9734_v51 = vpack.c.bf16 %v2941_v48, %v2940_v15 }
 0x7a9   : > { %9735 = vmatprep.subr.bf16.mxu0 %v9734_v51 }
 0x7aa   : > { %9737 = vmatpush3.bf16.msra.mxu0 %v9736_v49 }
 0x7ad   : > { %3007 = vmatmul.mubr.f32.vlgmr.msra.gmra.mrb[64].mxu0 %v10952_v11 }
 0x7ae   : > { %3011 = vmatprep.mubr.f32.mxu0 %v10953_v20 }
 0x7b1   : > { %3012 = vmatmul.mubr.f32.gmra.mrb[66].mxu0 %v10954_v0 }
 0x7b2   : > { %3171 = vmatprep.mubr.f32.mxu0 %v14866_v22 }
 0x880   : > { %v8464_v31 = vpop.f32.mrb[64].mxu0 }
 0x881   : > { %v8465_v62 = vpop.f32.mrb[65].mxu0 }
 0x882   : > { %v8466_v30 = vadd.f32 %v8465_v62, %v8464_v31 }
 0x884   : > { %v8467_v23 = vpop.f32.mrb[66].mxu0  ;;  %9029 = vmatprep.mubr.f32.mxu1 %v8466_v30 }
 0x885   : > { %v8468_v50 = vpop.f32.mrb[67].mxu0 }
 0x886   : > { %v8469_v57 = vadd.f32 %v8468_v50, %v8467_v23 }
 0x888   : > { %9030 = vmatmul.mubr.f32.vlgmr.msra.gmra.mrb[54].mxu1 %v8469_v57 }
 0x95b   : > { %v9031_v44 = vpop.f32.mrb[54].mxu1 }
 0x95c   : > { %v3083_v25 = vpop.f32.mrb[55].mxu1 }
 0x95d   : > { %v3092_v10 = vmul.f32 %v3083_v25, %v3083_v25 }
 0x95f   : > { %v3093_v8 = vsub.f32 %v9031_v44, %v3092_v10 }
 0x961   : > { %v3094_v61 = vadd.f32 1e-05, %v3093_v8 }
 0x963   : > { %10937 = vrsqrt.f32 %v3094_v61 }
 0x96d   : > { %v10938_v47 = vpop.eup %10937 }
 0x96e   : > { %v3100_v63 = vmul.f32 %v10938_v47, %v3099_v43 }
 0x970   : > { %v3101_v13 = vmul.f32 %v3100_v63, %v3083_v25 }
 0x972   : > { %v3106_v53 = vsub.f32 %v3105_v18, %v3101_v13 }
 0x974   : > { %3107 = vmatprep.subr.mxu0 %v3106_v53 }
 0x975   : > { %3108 = vmatpush1.msra.mxu0 %v3100_v63 }
 0x976   : > { %8060 = vmatmul.mubr.msk.f32.vlgmr.msra.gmra.mrb[68].mxu0 %vm14929_vm3, %v10956_v26  ;;  %vm14958_vm3 = vcmask 1046528  }
 0x977   : > { %3177 = vmatprep.mubr.f32.mxu0 %v14866_v22 }
 0x97a   : > { %8061 = vmatmul.mubr.msk.f32.gmra.mrb[70].mxu0 %vm14930_vm10, %v10957_v7  ;;  %vm14959_vm10 = vmmov %vm14958_vm3 }
 0x97b   : > { %3183 = vmatprep.mubr.f32.mxu0 %v14866_v22 }
 0x97e   : > { %8062 = vmatmul.mubr.msk.f32.gmra.mrb[72].mxu0 %vm14931_vm13, %v13024_v34  ;;  %v14940_v34 = vld [vmem:[#allocation76_spill] sm:$0xff]  ;;  %vm14960_vm13 = vmmov %vm14958_vm3 }
 0x97f   : > { %3189 = vmatprep.mubr.f32.mxu0 %v14866_v22 }
 0x982   : > { %8063 = vmatmul.mubr.msk.f32.gmra.mrb[74].mxu0 %vm14933_vm8, %v14932_v29  ;;  %vm14961_vm8 = vmmov %vm14958_vm3 }
 0x983   : > { %3195 = vmatprep.mubr.f32.mxu0 %v14866_v22 }
 0x986   : > { %8064 = vmatmul.mubr.msk.f32.gmra.mrb[76].mxu0 %vm14935_vm7, %v14934_v40  ;;  %vm14962_vm7 = vmmov %vm14958_vm3 }
 0x987   : > { %3201 = vmatprep.mubr.f32.mxu0 %v14866_v22 }
 0x98a   : > { %8065 = vmatmul.mubr.msk.f32.gmra.mrb[78].mxu0 %vm14937_vm2, %v14936_v4  ;;  %vm14963_vm2 = vmmov %vm14958_vm3 }
 0x98b   : > { %3207 = vmatprep.mubr.f32.mxu0 %v14866_v22 }
 0x98e   : > { %8066 = vmatmul.mubr.msk.f32.gmra.mrb[80].mxu0 %vm14939_vm4, %v14938_v45  ;;  %vm14964_vm4 = vmmov %vm14963_vm2 }
 0x98f   : > { %3213 = vmatprep.mubr.f32.mxu0 %v14866_v22 }
 0x992   : > { %8067 = vmatmul.mubr.msk.f32.gmra.mrb[82].mxu0 %vm14941_vm5, %v14940_v34  ;;  %vm14965_vm5 = vmmov %vm14963_vm2 }
 0x993   : > { %3219 = vmatprep.mubr.f32.mxu0 %v14866_v22 }
 0x996   : > { %8068 = vmatmul.mubr.msk.f32.gmra.mrb[84].mxu0 %vm14943_vm15, %v14942_v46  ;;  %vm14966_vm15 = vmmov %vm14963_vm2 }
 0x997   : > { %3225 = vmatprep.mubr.f32.mxu0 %v14866_v22 }
 0x99a   : > { %8069 = vmatmul.mubr.msk.f32.gmra.mrb[86].mxu0 %vm14945_vm12, %v14944_v59  ;;  %vm14967_vm12 = vmmov %vm14963_vm2 }
 0x99b   : > { %3231 = vmatprep.mubr.f32.mxu0 %v14866_v22 }
 0x99e   : > { %8070 = vmatmul.mubr.msk.f32.gmra.mrb[88].mxu0 %vm14947_vm1, %v14946_v54  ;;  %vm14968_vm1 = vmmov %vm14963_vm2 }
 0x99f   : > { %3237 = vmatprep.mubr.f32.mxu0 %v14866_v22 }
 0x9a2   : > { %8071 = vmatmul.mubr.msk.f32.gmra.mrb[90].mxu0 %vm14949_vm14, %v14948_v33  ;;  %vm14969_vm14 = vmmov %vm14968_vm1 }
 0x9a3   : > { %3243 = vmatprep.mubr.f32.mxu0 %v14866_v22 }
 0x9a6   : > { %8072 = vmatmul.mubr.msk.f32.gmra.mrb[92].mxu0 %vm14951_vm9, %v14950_v24  ;;  %vm14970_vm9 = vmmov %vm14968_vm1 }
 0x9a7   : > { %3249 = vmatprep.mubr.f32.mxu0 %v14866_v22 }
 0x9aa   : > { %8073 = vmatmul.mubr.msk.f32.gmra.mrb[94].mxu0 %vm14953_vm6, %v14952_v38  ;;  %vm14971_vm6 = vmmov %vm14968_vm1 }
 0x9ab   : > { %3255 = vmatprep.mubr.f32.mxu0 %v14866_v22 }
 0x9ae   : > { %8074 = vmatmul.mubr.msk.f32.gmra.mrb[96].mxu0 %vm14955_vm11, %v14954_v41  ;;  %vm14972_vm11 = vmmov %vm14968_vm1 }
 0x9af   : > { %3261 = vmatprep.mubr.f32.mxu0 %v14866_v22 }
 0x9b2   : > { %8075 = vmatmul.mubr.msk.f32.gmra.mrb[98].mxu0 %vm14957_vm0, %v14956_v39  ;;  %vm14973_vm0 = vmmov %vm14968_vm1 }
 0xa49   : > { %v3173_v55 = vpop.f32.mrb[68].mxu0 }
 0xa4a   : > { %v3268_v52 = vmul.f32 %v3173_v55, %v13269_v19  ;;  %v3175_v14 = vpop.f32.mrb[69].mxu0 }
 0xa4c   : > { %v13421_v37 = vadd.f32 %v3268_v52, %v3175_v14 }
 0xa4d   : > { %v3179_v15 = vpop.f32.mrb[70].mxu0 }
 0xa4e   : > { %v3269_v48 = vmul.f32 %v3179_v15, %v13267_v60  ;;  %v3181_v51 = vpop.f32.mrb[71].mxu0 }
 0xa50   : > { %v13424_v49 = vadd.f32 %v3269_v48, %v3181_v51 }
 0xa51   : > { %v3185_v11 = vpop.f32.mrb[72].mxu0 }
 0xa52   : > { %v10880_v20 = vpack.i.bf16 %v13424_v49, %v13421_v37  ;;  %v3270_v0 = vmul.f32 %v3185_v11, %v13279_v32  ;;  %v3187_v31 = vpop.f32.mrb[73].mxu0 }
 0xa54   : > { %v13429_v62 = vadd.f32 %v3270_v0, %v3187_v31  ;;  %10881 = vrot.lane.b32.xlu0 %v10880_v20, %s11620_s27 }
 0xa55   : > { %v3191_v19 = vpop.f32.mrb[74].mxu0 }
 0xa56   : > { %v3271_v30 = vmul.f32 %v3191_v19, %v13281_v21  ;;  %3320 = vrot.lane.b32.xlu1 %v13429_v62, %s11620_s27  ;;  %v3193_v60 = vpop.f32.mrb[75].mxu0 }
 0xa58   : > { %v13435_v23 = vadd.f32 %v3271_v30, %v3193_v60 }
 0xa59   : > { %v3197_v50 = vpop.f32.mrb[76].mxu0 }
 0xa5a   : > { %v3272_v57 = vmul.f32 %v3197_v50, %v13293_v28  ;;  %v3199_v44 = vpop.f32.mrb[77].mxu0 }
 0xa5c   : > { %v13438_v32 = vadd.f32 %v3272_v57, %v3199_v44  ;;  %v3761_v57 = vld [vmem:[#allocation10 + $0x18] sm:$0xff]  ;;  %v3758_v44 = vld [vmem:[#allocation10] sm:$0xff] }
 0xa5d   : > { %v3203_v25 = vpop.f32.mrb[78].mxu0 }
 0xa5e   : > { %v10885_v10 = vpack.i.bf16 %v13438_v32, %v13435_v23  ;;  %v3273_v8 = vmul.f32 %v3203_v25, %v13291_v5  ;;  %v3205_v61 = vpop.f32.mrb[79].mxu0 }
 0xa60   : > { %v13443_v21 = vadd.f32 %v3273_v8, %v3205_v61  ;;  %10886 = vrot.lane.b32.xlu0 %v10885_v10, %s11620_s27  ;;  %v3760_v10 = vld [vmem:[#allocation10 + $0x10] sm:$0xff]  ;;  %v3763_v8 = vld [vmem:[#allocation10 + $0x28] sm:$0xff]  ;;  %v3765_v61 = vld [vmem:[#allocation10 + $0x38] sm:$0xff] }
 0xa61   : > { %v3209_v17 = vpop.f32.mrb[80].mxu0 }
 0xa62   : > { %v3274_v43 = vmul.f32 %v3209_v17, %v13303_v9  ;;  %v3211_v47 = vpop.f32.mrb[81].mxu0  ;;  %v9804_v17 = vpack.c.bf16 %v3760_v10, %v3758_v44  ;;  %v3788_v44 = vld [vmem:[#allocation10 + $0xf0] sm:$0xff]  ;;  %v3793_v10 = vld [vmem:[#allocation10 + $0x118] sm:$0xff] }
 0xa64   : > { %v13447_v63 = vadd.f32 %v3274_v43, %v3211_v47  ;;  %v9806_v43 = vpack.c.bf16 %v3765_v61, %v3763_v8  ;;  %v3764_v47 = vld [vmem:[#allocation10 + $0x30] sm:$0xff] }
 0xa65   : > { %v3215_v28 = vpop.f32.mrb[82].mxu0 }
 0xa66   : > { %v10890_v18 = vpack.i.bf16 %v13447_v63, %v13443_v21  ;;  %v3275_v13 = vmul.f32 %v3215_v28, %v13305_v16  ;;  %v3217_v53 = vpop.f32.mrb[83].mxu0  ;;  %v3767_v28 = vld [vmem:[#allocation10 + $0x48] sm:$0xff] }
 0xa68   : > { %v13452_v26 = vadd.f32 %v3275_v13, %v3217_v53  ;;  %10891 = vrot.lane.b32.xlu1 %v10890_v18, %s11620_s27  ;;  %v3769_v18 = vld [vmem:[#allocation10 + $0x58] sm:$0xff] }
 0xa69   : > { %v3221_v5 = vpop.f32.mrb[84].mxu0  ;;  %v9810_v53 = vpack.c.bf16 %v3769_v18, %v3767_v28 }
 0xa6a   : > { %v3276_v7 = vmul.f32 %v3221_v5, %v13317_v35  ;;  %v3223_v29 = vpop.f32.mrb[85].mxu0  ;;  %v3766_v5 = vld [vmem:[#allocation10 + $0x40] sm:$0xff] }
 0xa6c   : > { %v13456_v40 = vadd.f32 %v3276_v7, %v3223_v29  ;;  %v3768_v7 = vld [vmem:[#allocation10 + $0x50] sm:$0xff]  ;;  %v3771_v29 = vld [vmem:[#allocation10 + $0x68] sm:$0xff] }
 0xa6d   : > { %v3227_v9 = vpop.f32.mrb[86].mxu0 }
 0xa6e   : > { %v10895_v4 = vpack.i.bf16 %v13456_v40, %v13452_v26  ;;  %v3277_v45 = vmul.f32 %v3227_v9, %v13315_v56  ;;  %v3229_v34 = vpop.f32.mrb[87].mxu0  ;;  %v3773_v9 = vld [vmem:[#allocation10 + $0x78] sm:$0xff] }
 0xa70   : > { %v13461_v46 = vadd.f32 %v3277_v45, %v3229_v34  ;;  %10896 = vrot.lane.b32.xlu0 %v10895_v4, %s11620_s27  ;;  %v9812_v4 = vpack.c.bf16 %v3768_v7, %v3766_v5  ;;  %v9814_v45 = vpack.c.bf16 %v3773_v9, %v3771_v29  ;;  %v3770_v34 = vld [vmem:[#allocation10 + $0x60] sm:$0xff]  ;;  %v3799_v5 = vld [vmem:[#allocation10 + $0x148] sm:$0xff]  ;;  %v3801_v7 = vld [vmem:[#allocation10 + $0x158] sm:$0xff] }
 0xa71   : > { %v3233_v16 = vpop.f32.mrb[88].mxu0  ;;  %v9842_v9 = vpack.c.bf16 %v3801_v7, %v3799_v5 }
 0xa72   : > { %v3278_v59 = vmul.f32 %v3233_v16, %v13327_v58  ;;  %v3235_v54 = vpop.f32.mrb[89].mxu0  ;;  %v3772_v16 = vld [vmem:[#allocation10 + $0x70] sm:$0xff] }
 0xa74   : > { %v13465_v33 = vadd.f32 %v3278_v59, %v3235_v54  ;;  %v3775_v59 = vld [vmem:[#allocation10 + $0x88] sm:$0xff]  ;;  %v3777_v54 = vld [vmem:[#allocation10 + $0x98] sm:$0xff] }
 0xa75   : > { %v3239_v35 = vpop.f32.mrb[90].mxu0 }
 0xa76   : > { %v10900_v24 = vpack.i.bf16 %v13465_v33, %v13461_v46  ;;  %v3279_v38 = vmul.f32 %v3239_v35, %v13329_v3  ;;  %v3241_v41 = vpop.f32.mrb[91].mxu0  ;;  %v9816_v35 = vpack.c.bf16 %v3772_v16, %v3770_v34  ;;  %v3803_v34 = vld [vmem:[#allocation10 + $0x168] sm:$0xff]  ;;  %v3805_v16 = vld [vmem:[#allocation10 + $0x178] sm:$0xff] }
 0xa78   : > { %v13470_v39 = vadd.f32 %v3279_v38, %v3241_v41  ;;  %10901 = vrot.lane.b32.xlu1 %v10900_v24, %s11620_s27  ;;  %v9818_v24 = vpack.c.bf16 %v3777_v54, %v3775_v59  ;;  %v3774_v38 = vld [vmem:[#allocation10 + $0x80] sm:$0xff]  ;;  %v3776_v41 = vld [vmem:[#allocation10 + $0x90] sm:$0xff]  ;;  %v9846_v54 = vpack.c.bf16 %v3805_v16, %v3803_v34 }
 0xa79   : > { %v3245_v56 = vpop.f32.mrb[92].mxu0 }
 0xa7a   : > { %v3280_v55 = vmul.f32 %v3245_v56, %v13341_v27  ;;  %v3247_v52 = vpop.f32.mrb[93].mxu0  ;;  %v3779_v56 = vld [vmem:[#allocation10 + $0xa8] sm:$0xff] }
 0xa7c   : > { %v13474_v14 = vadd.f32 %v3280_v55, %v3247_v52  ;;  %v3781_v55 = vld [vmem:[#allocation10 + $0xb8] sm:$0xff]  ;;  %v9820_v52 = vpack.c.bf16 %v3776_v41, %v3774_v38  ;;  %v3807_v38 = vld [vmem:[#allocation10 + $0x188] sm:$0xff] }
 0xa7d   : > { %v3251_v58 = vpop.f32.mrb[94].mxu0  ;;  %v3809_v41 = vld [vmem:[#allocation10 + $0x198] sm:$0xff] }
 0xa7e   : > { %v10905_v15 = vpack.i.bf16 %v13474_v14, %v13470_v39  ;;  %v3281_v48 = vmul.f32 %v3251_v58, %v13339_v12  ;;  %v3253_v51 = vpop.f32.mrb[95].mxu0  ;;  %v3461_v12 = vld [vmem:[#allocation8] sm:$0xff]  ;;  %v9822_v58 = vpack.c.bf16 %v3781_v55, %v3779_v56 }
 0xa7f   : > { %9064 = vmatprep.mubr.f32.mxu1 %v3461_v12 }
 0xa80   : > { %v13479_v11 = vadd.f32 %v3281_v48, %v3253_v51  ;;  %10906 = vrot.lane.b32.xlu0 %v10905_v15, %s11620_s27  ;;  %v3778_v15 = vld [vmem:[#allocation10 + $0xa0] sm:$0xff]  ;;  %v3780_v48 = vld [vmem:[#allocation10 + $0xb0] sm:$0xff]  ;;  %v3783_v51 = vld [vmem:[#allocation10 + $0xc8] sm:$0xff] }
 0xa81   : > { %v3257_v3 = vpop.f32.mrb[96].mxu0 }
 0xa82   : > { %v3282_v20 = vmul.f32 %v3257_v3, %v13350_v2  ;;  %v3259_v0 = vpop.f32.mrb[97].mxu0  ;;  %v3759_v2 = vld [vmem:[#allocation10 + $0x8] sm:$0xff]  ;;  %v3785_v3 = vld [vmem:[#allocation10 + $0xd8] sm:$0xff] }
 0xa83   : > { %v9802_v25 = vpack.c.bf16 %v3761_v57, %v3759_v2  ;;  %v3786_v57 = vld [vmem:[#allocation10 + $0xe0] sm:$0xff] }
 0xa84   : > { %v13483_v31 = vadd.f32 %v3282_v20, %v3259_v0  ;;  %v9824_v20 = vpack.c.bf16 %v3780_v48, %v3778_v15  ;;  %v9826_v0 = vpack.c.bf16 %v3785_v3, %v3783_v51  ;;  %v9832_v8 = vpack.c.bf16 %v3788_v44, %v3786_v57  ;;  %v3806_v48 = vld [vmem:[#allocation10 + $0x180] sm:$0xff]  ;;  %v3808_v51 = vld [vmem:[#allocation10 + $0x190] sm:$0xff] }
 0xa85   : > { %v3263_v27 = vpop.f32.mrb[98].mxu0  ;;  %9803 = vmatprep.subr.bf16.mxu0 %v9802_v25  ;;  %v3791_v25 = vld [vmem:[#allocation10 + $0x108] sm:$0xff]  ;;  %v9850_v15 = vpack.c.bf16 %v3809_v41, %v3807_v38 }
 0xa86   : > { %v10910_v19 = vpack.i.bf16 %v13483_v31, %v13479_v11  ;;  %v3283_v30 = vmul.f32 %v3263_v27, %v13352_v42  ;;  %v3265_v60 = vpop.f32.mrb[99].mxu0  ;;  %v3762_v42 = vld [vmem:[#allocation10 + $0x20] sm:$0xff]  ;;  %9805 = vmatpush1.bf16.msra.mxu0 %v9804_v17  ;;  %v9834_v61 = vpack.c.bf16 %v3793_v10, %v3791_v25  ;;  %v3812_v10 = vld [vmem:[#allocation10 + $0x1b0] sm:$0xff] }
 0xa87   : > { %v9808_v13 = vpack.c.bf16 %v3764_v47, %v3762_v42  ;;  %9807 = vmatprep.subr.bf16.mxu0 %v9806_v43  ;;  %v3782_v27 = vld [vmem:[#allocation10 + $0xc0] sm:$0xff]  ;;  %v3792_v43 = vld [vmem:[#allocation10 + $0x110] sm:$0xff]  ;;  %v3795_v42 = vld [vmem:[#allocation10 + $0x128] sm:$0xff] }
 0xa88   : > { %v13488_v50 = vadd.f32 %v3283_v30, %v3265_v60  ;;  %10911 = vrot.lane.b32.xlu1 %v10910_v19, %s11620_s27  ;;  %v3784_v19 = vld [vmem:[#allocation10 + $0xd0] sm:$0xff]  ;;  %v3787_v30 = vld [vmem:[#allocation10 + $0xe8] sm:$0xff]  ;;  %v3789_v60 = vld [vmem:[#allocation10 + $0xf8] sm:$0xff] }
 0xa89   : > { %v9828_v12 = vpack.c.bf16 %v3784_v19, %v3782_v27  ;;  %v9830_v2 = vpack.c.bf16 %v3789_v60, %v3787_v30  ;;  %v3790_v17 = vld [vmem:[#allocation10 + $0x100] sm:$0xff]  ;;  %v3797_v47 = vld [vmem:[#allocation10 + $0x138] sm:$0xff]  ;;  %v9852_v60 = vpack.c.bf16 %v3808_v51, %v3806_v48 }
 0xa8a   : > { %3346 = vrot.lane.b32.xlu0 %v13488_v50, %s11620_s27  ;;  %9809 = vmatpush1.bf16.msra.mxu0 %v9808_v13  ;;  %v9836_v28 = vpack.c.bf16 %v3792_v43, %v3790_v17  ;;  %v9838_v18 = vpack.c.bf16 %v3797_v47, %v3795_v42  ;;  %v3794_v13 = vld [vmem:[#allocation10 + $0x120] sm:$0xff] }
 0xa8b   : > { %9811 = vmatprep.subr.bf16.mxu0 %v9810_v53  ;;  %v3796_v53 = vld [vmem:[#allocation10 + $0x130] sm:$0xff]  ;;  %v3810_v25 = vld [vmem:[#allocation10 + $0x1a0] sm:$0xff] }
 0xa8c   : > { %v9840_v29 = vpack.c.bf16 %v3796_v53, %v3794_v13  ;;  %v9856_v43 = vpack.c.bf16 %v3812_v10, %v3810_v25  ;;  %v3814_v47 = vld [vmem:[#allocation10 + $0x1c0] sm:$0xff] }
 0xa8e   : > { %9813 = vmatpush1.bf16.msra.mxu0 %v9812_v4  ;;  %v3798_v4 = vld [vmem:[#allocation10 + $0x140] sm:$0xff] }
 0xa8f   : > { %9815 = vmatprep.subr.bf16.mxu0 %v9814_v45  ;;  %v3800_v45 = vld [vmem:[#allocation10 + $0x150] sm:$0xff] }
 0xa90   : > { %v9844_v59 = vpack.c.bf16 %v3800_v45, %v3798_v4 }
 0xa92   : > { %9817 = vmatpush1.bf16.msra.mxu0 %v9816_v35  ;;  %v3802_v35 = vld [vmem:[#allocation10 + $0x160] sm:$0xff] }
 0xa93   : > { %9819 = vmatprep.subr.bf16.mxu0 %v9818_v24  ;;  %v3804_v24 = vld [vmem:[#allocation10 + $0x170] sm:$0xff] }
 0xa94   : > { %v9848_v55 = vpack.c.bf16 %v3804_v24, %v3802_v35 }
 0xa96   : > { %9821 = vmatpush1.bf16.msra.mxu0 %v9820_v52 }
 0xa97   : > { %9823 = vmatprep.subr.bf16.mxu0 %v9822_v58 }
 0xa9a   : > { %9825 = vmatpush1.bf16.msra.mxu0 %v9824_v20  ;;  %v3811_v20 = vld [vmem:[#allocation10 + $0x1a8] sm:$0xff] }
 0xa9b   : > { %9827 = vmatprep.subr.bf16.mxu0 %v9826_v0  ;;  %v3813_v0 = vld [vmem:[#allocation10 + $0x1b8] sm:$0xff] }
 0xa9c   : > { %v9854_v44 = vpack.c.bf16 %v3813_v0, %v3811_v20 }
 0xa9e   : > { %9829 = vmatpush1.bf16.msra.mxu0 %v9828_v12 }
 0xa9f   : > { %9831 = vmatprep.subr.bf16.mxu0 %v9830_v2 }
 0xaa2   : > { %9833 = vmatpush1.bf16.msra.mxu0 %v9832_v8  ;;  %v3815_v8 = vld [vmem:[#allocation10 + $0x1c8] sm:$0xff] }
 0xaa3   : > { %9835 = vmatprep.subr.bf16.mxu0 %v9834_v61  ;;  %v3817_v61 = vld [vmem:[#allocation10 + $0x1d8] sm:$0xff] }
 0xaa4   : > { %v9858_v42 = vpack.c.bf16 %v3817_v61, %v3815_v8 }
 0xaa6   : > { %9837 = vmatpush1.bf16.msra.mxu0 %v9836_v28  ;;  %v3816_v28 = vld [vmem:[#allocation10 + $0x1d0] sm:$0xff] }
 0xaa7   : > { %9839 = vmatprep.subr.bf16.mxu0 %v9838_v18  ;;  %v9860_v53 = vpack.c.bf16 %v3816_v28, %v3814_v47 }
 0xaaa   : > { %9841 = vmatpush1.bf16.msra.mxu0 %v9840_v29 }
 0xaab   : > { %9843 = vmatprep.subr.bf16.mxu0 %v9842_v9 }
 0xaae   : > { %9845 = vmatpush1.bf16.msra.mxu0 %v9844_v59 }
 0xaaf   : > { %9847 = vmatprep.subr.bf16.mxu0 %v9846_v54 }
 0xab2   : > { %9849 = vmatpush1.bf16.msra.mxu0 %v9848_v55 }
 0xab3   : > { %9851 = vmatprep.subr.bf16.mxu0 %v9850_v15 }
 0xab6   : > { %9853 = vmatpush1.bf16.msra.mxu0 %v9852_v60 }
 0xab7   : > { %9855 = vmatprep.subr.bf16.mxu0 %v9854_v44 }
 0xaba   : > { %9857 = vmatpush1.bf16.msra.mxu0 %v9856_v43 }
 0xabb   : > { %9859 = vmatprep.subr.bf16.mxu0 %v9858_v42 }
 0xabe   : > { %9861 = vmatpush1.bf16.msra.mxu0 %v9860_v53 }
 0xac6   : > { %v10882_v56 = vpop.permute.xlu0 %10881 }
 0xac7   : > { %v10884_v52 = vunpack.i.h.bf16 %v10882_v56  ;;  %v10883_v58 = vunpack.i.l.bf16 %v10882_v56 }
 0xac8   : > { %v3321_v3 = vpop.permute.xlu1 %3320 }
 0xac9   : > { %v3365_v27 = vmax.f32 %v13424_v49, %v10884_v52  ;;  %v13495_v19 = vmax.f32 %v13421_v37, %v10883_v58  ;;  %v3366_v30 = vmax.f32 %v13429_v62, %v3321_v3 }
 0xacb   : > { %v3397_v12 = vrot.slane %v3365_v27, 1  ;;  %v3396_v2 = vrot.slane %v13495_v19, 1  ;;  %v3399_v57 = vrot.slane %v3366_v30, 1 }
 0xacd   : > { %v3398_v49 = vsel %vm14958_vm3, %v3396_v2, %v3397_v12  ;;  %v3400_v37 = vsel %vm14959_vm10, %v3397_v12, %v3399_v57  ;;  %vm14977_vm10 = vcmask 1040384  }
 0xace   : > { %v3445_v62 = vmax.f32 %v13495_v19, %v3398_v49  ;;  %v3446_v17 = vmax.f32 %v3365_v27, %v3400_v37  ;;  %v3464_v19 = vld [vmem:[#allocation8 + $0x18] sm:$0xff] }
 0xad0   : > { %v9770_v18 = vpack.c.bf16 %v3446_v17, %v3445_v62 }
 0xad2   : > { %9771 = vmatprep.subr.bf16.mxu1 %v9770_v18  ;;  %v10887_v13 = vpop.permute.xlu0 %10886 }
 0xad3   : > { %v10889_v5 = vunpack.i.h.bf16 %v10887_v13  ;;  %v10888_v7 = vunpack.i.l.bf16 %v10887_v13  ;;  %9773 = vmatpush3.bf16.msra.mxu1 %v9770_v18 }
 0xad5   : > { %v3368_v29 = vmax.f32 %v13438_v32, %v10889_v5  ;;  %v3367_v9 = vmax.f32 %v13435_v23, %v10888_v7 }
 0xad7   : > { %v3403_v4 = vrot.slane %v3368_v29, 1  ;;  %v3401_v45 = vrot.slane %v3367_v9, 1 }
 0xad9   : > { %v3404_v34 = vsel %vm14960_vm13, %v3401_v45, %v3403_v4  ;;  %v3402_v16 = vsel %vm14961_vm8, %v3399_v57, %v3401_v45  ;;  %vm14978_vm13 = vmmov %vm14973_vm0 }
 0xada   : > { %v3448_v59 = vmax.f32 %v3367_v9, %v3404_v34  ;;  %v10892_v54 = vpop.permute.xlu1 %10891  ;;  %v3447_v35 = vmax.f32 %v3366_v30, %v3402_v16  ;;  %vm14979_vm8 = vmmov %vm14977_vm10 }
 0xadb   : > { %v10894_v24 = vunpack.i.h.bf16 %v10892_v54  ;;  %v10893_v38 = vunpack.i.l.bf16 %v10892_v54 }
 0xadc   : > { %v9774_v41 = vpack.c.bf16 %v3448_v59, %v3447_v35 }
 0xadd   : > { %v3370_v56 = vmax.f32 %v13447_v63, %v10894_v24  ;;  %v3369_v55 = vmax.f32 %v13443_v21, %v10893_v38 }
 0xade   : > { %9775 = vmatprep.subr.bf16.mxu1 %v9774_v41 }
 0xadf   : > { %v3407_v32 = vrot.slane %v3370_v56, 1  ;;  %v3405_v23 = vrot.slane %v3369_v55, 1  ;;  %9777 = vmatpush3.bf16.msra.mxu1 %v9774_v41 }
 0xae1   : > { %v3408_v52 = vsel %vm14962_vm7, %v3405_v23, %v3407_v32  ;;  %v3406_v58 = vsel %vm14963_vm2, %v3403_v4, %v3405_v23  ;;  %vm14983_vm2 = vmmov %vm14979_vm8 }
 0xae2   : > { %v3450_v15 = vmax.f32 %v3369_v55, %v3408_v52  ;;  %v10897_v48 = vpop.permute.xlu0 %10896  ;;  %v3449_v51 = vmax.f32 %v3368_v29, %v3406_v58 }
 0xae3   : > { %v10899_v3 = vunpack.i.h.bf16 %v10897_v48  ;;  %v10898_v20 = vunpack.i.l.bf16 %v10897_v48  ;;  %v3462_v48 = vld [vmem:[#allocation8 + $0x8] sm:$0xff] }
 0xae4   : > { %v9778_v0 = vpack.c.bf16 %v3450_v15, %v3449_v51  ;;  %v3463_v51 = vld [vmem:[#allocation8 + $0x10] sm:$0xff] }
 0xae5   : > { %v3372_v27 = vmax.f32 %v13456_v40, %v10899_v3  ;;  %v3371_v63 = vmax.f32 %v13452_v26, %v10898_v20  ;;  %v3466_v3 = vld [vmem:[#allocation8 + $0x28] sm:$0xff]  ;;  %v3467_v20 = vld [vmem:[#allocation8 + $0x30] sm:$0xff] }
 0xae6   : > { %9779 = vmatprep.subr.bf16.mxu1 %v9778_v0 }
 0xae7   : > { %v3411_v21 = vrot.slane %v3372_v27, 1  ;;  %v3409_v30 = vrot.slane %v3371_v63, 1  ;;  %9781 = vmatpush3.bf16.msra.mxu1 %v9778_v0  ;;  %v3468_v0 = vld [vmem:[#allocation8 + $0x38] sm:$0xff] }
 0xae9   : > { %v3412_v60 = vsel %vm14964_vm4, %v3409_v30, %v3411_v21  ;;  %v3410_v12 = vsel %vm14965_vm5, %v3407_v32, %v3409_v30  ;;  %v3818_v30 = vld [vmem:[#allocation10 + $0x1e0] sm:$0xff]  ;;  %vm14984_vm4 = vmmov %vm14983_vm2 }
 0xaea   : > { %v3452_v57 = vmax.f32 %v3371_v63, %v3412_v60  ;;  %v10902_v44 = vpop.permute.xlu1 %10901  ;;  %v3451_v25 = vmax.f32 %v3370_v56, %v3410_v12  ;;  %v3821_v63 = vld [vmem:[#allocation10 + $0x1f8] sm:$0xff]  ;;  %v3820_v60 = vld [vmem:[#allocation10 + $0x1f0] sm:$0xff]  ;;  %vm14985_vm5 = vmmov %vm14973_vm0 }
 0xaeb   : > { %v10904_v10 = vunpack.i.h.bf16 %v10902_v44  ;;  %v10903_v8 = vunpack.i.l.bf16 %v10902_v44  ;;  %v9864_v12 = vpack.c.bf16 %v3820_v60, %v3818_v30  ;;  %v3825_v44 = vld [vmem:[#allocation10 + $0x218] sm:$0xff]  ;;  %v3836_v30 = vld [vmem:[#allocation10 + $0x270] sm:$0xff] }
 0xaec   : > { %v9782_v61 = vpack.c.bf16 %v3452_v57, %v3451_v25  ;;  %v3823_v57 = vld [vmem:[#allocation10 + $0x208] sm:$0xff] }
 0xaed   : > { %v3374_v49 = vmax.f32 %v13465_v33, %v10904_v10  ;;  %v3373_v40 = vmax.f32 %v13461_v46, %v10903_v8  ;;  %v9866_v25 = vpack.c.bf16 %v3825_v44, %v3823_v57  ;;  %v3578_v10 = vand.u32 7, %v12334_v1  ;;  %v3822_v8 = vld [vmem:[#allocation10 + $0x200] sm:$0xff]  ;;  %v3839_v57 = vld [vmem:[#allocation10 + $0x288] sm:$0xff]  ;;  %v3841_v44 = vld [vmem:[#allocation10 + $0x298] sm:$0xff] }
 0xaee   : > { %9783 = vmatprep.subr.bf16.mxu1 %v9782_v61  ;;  %v4552_v1 = vld [vmem:[#allocation11 + $0xb8] sm:$0xff] }
 0xaef   : > { %v3415_v26 = vrot.slane %v3374_v49, 1  ;;  %v3413_v37 = vrot.slane %v3373_v40, 1  ;;  %9785 = vmatpush3.bf16.msra.mxu1 %v9782_v61  ;;  %v3824_v61 = vld [vmem:[#allocation10 + $0x210] sm:$0xff]  ;;  %vm13537_vm3 = vcmp.ne.s32.totalorder %v3578_v10, 0 }
 0xaf1   : > { %v3416_v62 = vsel %vm14966_vm15, %v3413_v37, %v3415_v26  ;;  %v3414_v17 = vsel %vm14967_vm12, %v3411_v21, %v3413_v37  ;;  %vm14986_vm15 = vmmov %vm14973_vm0 }
 0xaf2   : > { %v3454_v43 = vmax.f32 %v3373_v40, %v3416_v62  ;;  %v10907_v42 = vpop.permute.xlu0 %10906  ;;  %v3453_v47 = vmax.f32 %v3372_v27, %v3414_v17  ;;  %v3819_v27 = vld [vmem:[#allocation10 + $0x1e8] sm:$0xff] }
 0xaf3   : > { %v10909_v28 = vunpack.i.h.bf16 %v10907_v42  ;;  %v10908_v18 = vunpack.i.l.bf16 %v10907_v42  ;;  %v9862_v21 = vpack.c.bf16 %v3821_v63, %v3819_v27  ;;  %v3827_v40 = vld [vmem:[#allocation10 + $0x228] sm:$0xff] }
 0xaf4   : > { %v9786_v13 = vpack.c.bf16 %v3454_v43, %v3453_v47  ;;  %v14974_v43 = vld [vmem:[#allocation54_spill] sm:$0xff] }
 0xaf5   : > { %v3376_v53 = vmax.f32 %v13474_v14, %v10909_v28  ;;  %v3375_v33 = vmax.f32 %v13470_v39, %v10908_v18  ;;  %9863 = vmatprep.subr.bf16.mxu0 %v9862_v21  ;;  %v3585_v42 = vand.u32 7, %v14974_v43  ;;  %v3834_v21 = vld [vmem:[#allocation10 + $0x260] sm:$0xff]  ;;  %v4551_v43 = vld [vmem:[#allocation11 + $0xb0] sm:$0xff] }
 0xaf6   : > { %9787 = vmatprep.subr.bf16.mxu1 %v9786_v13  ;;  %9865 = vmatpush1.bf16.msra.mxu0 %v9864_v12 }
 0xaf7   : > { %v3419_v46 = vrot.slane %v3376_v53, 1  ;;  %v3417_v5 = vrot.slane %v3375_v33, 1  ;;  %9789 = vmatpush3.bf16.msra.mxu1 %v9786_v13  ;;  %9867 = vmatprep.subr.bf16.mxu0 %v9866_v25  ;;  %v9868_v13 = vpack.c.bf16 %v3824_v61, %v3822_v8  ;;  %vm13550_vm7 = vcmp.ne.s32.totalorder %v3585_v42, 0 }
 0xaf9   : > { %v3420_v7 = vsel %vm14968_vm1, %v3417_v5, %v3419_v46  ;;  %v3418_v29 = vsel %vm14969_vm14, %v3415_v26, %v3417_v5  ;;  %v3829_v26 = vld [vmem:[#allocation10 + $0x238] sm:$0xff]  ;;  %vm14990_vm1 = vmmov %vm14983_vm2 }
 0xafa   : > { %v3456_v9 = vmax.f32 %v3375_v33, %v3420_v7  ;;  %v10912_v4 = vpop.permute.xlu1 %10911  ;;  %v3455_v45 = vmax.f32 %v3374_v49, %v3418_v29  ;;  %v3826_v33 = vld [vmem:[#allocation10 + $0x220] sm:$0xff]  ;;  %vm14991_vm14 = vmmov %vm14990_vm1 }
 0xafb   : > { %v10914_v34 = vunpack.i.h.bf16 %v10912_v4  ;;  %v10913_v16 = vunpack.i.l.bf16 %v10912_v4  ;;  %v3831_v4 = vld [vmem:[#allocation10 + $0x248] sm:$0xff] }
 0xafc   : > { %v3347_v59 = vpop.permute.xlu0 %3346  ;;  %v9790_v54 = vpack.c.bf16 %v3456_v9, %v3455_v45  ;;  %v3833_v45 = vld [vmem:[#allocation10 + $0x258] sm:$0xff] }
 0xafd   : > { %v3378_v35 = vmax.f32 %v13483_v31, %v10914_v34  ;;  %v3377_v14 = vmax.f32 %v13479_v11, %v10913_v16  ;;  %v3379_v39 = vmax.f32 %v13488_v50, %v3347_v59 }
 0xafe   : > { %9791 = vmatprep.subr.bf16.mxu1 %v9790_v54 }
 0xaff   : > { %v3423_v24 = vrot.slane %v3378_v35, 1  ;;  %v3421_v38 = vrot.slane %v3377_v14, 1  ;;  %v3425_v41 = vrot.slane %v3379_v39, 1  ;;  %9793 = vmatpush3.bf16.msra.mxu1 %v9790_v54 }
 0xb01   : > { %v3424_v56 = vsel %vm14970_vm9, %v3421_v38, %v3423_v24  ;;  %v3444_v55 = vsel %vm14971_vm6, %v3425_v41, %v3396_v2  ;;  %v3422_v32 = vsel %vm14972_vm11, %v3419_v46, %v3421_v38  ;;  %v3426_v23 = vsel %vm14973_vm0, %v3423_v24, %v3425_v41  ;;  %v3465_v2 = vld [vmem:[#allocation8 + $0x20] sm:$0xff]  ;;  %v3828_v46 = vld [vmem:[#allocation10 + $0x230] sm:$0xff]  ;;  %vm14992_vm9 = vmmov %vm14973_vm0 }
 0xb02   : > { %v3458_v31 = vmax.f32 %v3377_v14, %v3424_v56  ;;  %v3460_v52 = vmax.f32 %v3379_v39, %v3444_v55  ;;  %v3457_v11 = vmax.f32 %v3376_v53, %v3422_v32  ;;  %v3459_v58 = vmax.f32 %v3378_v35, %v3426_v23  ;;  %v14982_v24 = vld [vmem:[#allocation58_spill] sm:$0xff]  ;;  %v3830_v56 = vld [vmem:[#allocation10 + $0x240] sm:$0xff]  ;;  %vm14993_vm6 = vmmov %vm14973_vm0 }
 0xb03   : > { %v9870_v53 = vpack.c.bf16 %v3829_v26, %v3827_v40  ;;  %v9872_v39 = vpack.c.bf16 %v3828_v46, %v3826_v33  ;;  %v3592_v38 = vand.u32 7, %v14982_v24  ;;  %v9874_v41 = vpack.c.bf16 %v3833_v45, %v3831_v4  ;;  %v3832_v55 = vld [vmem:[#allocation10 + $0x250] sm:$0xff]  ;;  %v3838_v33 = vld [vmem:[#allocation10 + $0x280] sm:$0xff]  ;;  %vm14997_vm0 = vmmov %vm14990_vm1 }
 0xb04   : > { %v9794_v50 = vpack.c.bf16 %v3458_v31, %v3457_v11  ;;  %v9798_v15 = vpack.c.bf16 %v3460_v52, %v3459_v58  ;;  %v3835_v52 = vld [vmem:[#allocation10 + $0x268] sm:$0xff]  ;;  %v3837_v11 = vld [vmem:[#allocation10 + $0x278] sm:$0xff]  ;;  %v9876_v27 = vpack.c.bf16 %v3832_v55, %v3830_v56  ;;  %v3840_v46 = vld [vmem:[#allocation10 + $0x290] sm:$0xff] }
 0xb05   : > { %vm13572_vm12 = vcmp.ne.s32.totalorder %v3592_v38, 0  ;;  %v9878_v63 = vpack.c.bf16 %v3837_v11, %v3835_v52  ;;  %v3844_v56 = vld [vmem:[#allocation10 + $0x2b0] sm:$0xff]  ;;  %v3847_v55 = vld [vmem:[#allocation10 + $0x2c8] sm:$0xff]  ;;  %v15006_v11 = vld [vmem:[#allocation60_spill] sm:$0xff] }
 0xb06   : > { %9795 = vmatprep.subr.bf16.mxu1 %v9794_v50  ;;  %v4534_v24 = vld [vmem:[#allocation11 + $0x28] sm:$0xff] }
 0xb07   : > { %9797 = vmatpush3.bf16.msra.mxu1 %v9794_v50 }
 0xb08   : > { %9799 = vmatprep.subr.bf16.mxu1 %v9798_v15 }
 0xb0b   : > { %9801 = vmatpush3.bf16.msra.mxu1 %v9798_v15 }
 0xb0e   : > { %9065 = vmatmul.mubr.f32.vlgmr.msra.gmra.mrb[56].mxu1 %v3462_v48 }
 0xb0f   : > { %9067 = vmatprep.mubr.f32.mxu1 %v3463_v51 }
 0xb12   : > { %9068 = vmatmul.mubr.f32.gmra.mrb[58].mxu1 %v3464_v19  ;;  %v14987_v19 = vld [vmem:[#allocation55_spill] sm:$0xff] }
 0xb13   : > { %9070 = vmatprep.mubr.f32.mxu1 %v3465_v2  ;;  %v3599_v2 = vand.u32 7, %v14987_v19 }
 0xb15   : > { %vm13590_vm11 = vcmp.ne.s32.totalorder %v3599_v2, 0 }
 0xb16   : > { %9071 = vmatmul.mubr.f32.gmra.mrb[60].mxu1 %v3466_v3 }
 0xb17   : > { %9073 = vmatprep.mubr.f32.mxu1 %v3467_v20 }
 0xb1a   : > { %9074 = vmatmul.mubr.f32.gmra.mrb[62].mxu1 %v3468_v0 }
 0xbe1   : > { %v9066_v49 = vpop.f32.mrb[56].mxu1 }
 0xbe2   : > { %v3687_v37 = vrot.slane %v9066_v49, 7  ;;  %v3727_v62 = vrot.slane %v9066_v49, 1  ;;  %v3535_v17 = vpop.f32.mrb[57].mxu1 }
 0xbe3   : > { %v3686_v47 = vrot.slane %v3535_v17, 7  ;;  %v3726_v28 = vrot.slane %v3535_v17, 1  ;;  %3918 = vmatprep.mubr.f32.mxu0 %v3535_v17 }
 0xbe5   : > { %v3709_v5 = vsel %vm14977_vm10, 0.0, %v3686_v47  ;;  %v13543_v7 = vsel %vm14978_vm13, %v3726_v28, %v3727_v62  ;;  %v9069_v29 = vpop.f32.mrb[58].mxu1  ;;  %v3688_v9 = vsel %vm14979_vm8, %v3686_v47, %v3687_v37  ;;  %v14996_v28 = vld [vmem:[#allocation59_spill] sm:$0xff]  ;;  %vm14998_vm10 = vmmov %vm14997_vm0 }
 0xbe6   : > { %v3691_v34 = vrot.slane %v9069_v29, 7  ;;  %v3731_v16 = vrot.slane %v9069_v29, 1  ;;  %v3545_v59 = vpop.f32.mrb[59].mxu1  ;;  %8077 = vmatmul.mubr.msk.f32.vlgmr.msra.gmra.mrb[100].mxu0 %vm13537_vm3, %v3709_v5  ;;  %v3843_v5 = vld [vmem:[#allocation10 + $0x2a8] sm:$0xff]  ;;  %vm14999_vm13 = vmmov %vm14985_vm5 }
 0xbe7   : > { %v3689_v35 = vrot.slane %v3545_v59, 7  ;;  %v3729_v14 = vrot.slane %v3545_v59, 1  ;;  %3924 = vmatprep.mubr.f32.mxu0 %v9066_v49  ;;  %9869 = vmatpush1.bf16.msra.mxu0 %v9868_v13  ;;  %v3606_v13 = vand.u32 7, %v14996_v28  ;;  %vm15000_vm8 = vmmov %vm14985_vm5 }
 0xbe8   : > { %9871 = vmatprep.subr.bf16.mxu0 %v9870_v53  ;;  %v9882_v53 = vpack.c.bf16 %v3841_v44, %v3839_v57  ;;  %v3850_v57 = vld [vmem:[#allocation10 + $0x2e0] sm:$0xff]  ;;  %v3852_v44 = vld [vmem:[#allocation10 + $0x2f0] sm:$0xff] }
 0xbe9   : > { %v13555_v32 = vpop.f32.mrb[60].mxu1  ;;  %v3690_v23 = vsel %vm14983_vm2, %v3687_v37, %v3689_v35  ;;  %v3692_v31 = vsel %vm14984_vm4, %v3689_v35, %v3691_v34  ;;  %v13560_v58 = vsel %vm14985_vm5, %v3727_v62, %v3729_v14  ;;  %v13563_v50 = vsel %vm14986_vm15, %v3729_v14, %v3731_v16  ;;  %v15003_v35 = vld [vmem:[#allocation56_spill] sm:$0xff] }
 0xbea   : > { %8079 = vmatmul.mubr.msk.f32.gmra.mrb[102].mxu0 %vm13550_vm7, %v3688_v9  ;;  %v3695_v15 = vrot.slane %v13555_v32, 7  ;;  %v3735_v48 = vrot.slane %v13555_v32, 1  ;;  %v3555_v51 = vpop.f32.mrb[61].mxu1  ;;  %v9880_v62 = vpack.c.bf16 %v3836_v30, %v3834_v21  ;;  %v3845_v9 = vld [vmem:[#allocation10 + $0x2b8] sm:$0xff]  ;;  %vm13609_vm2 = vcmp.ne.s32.totalorder %v3606_v13, 0  ;;  %v15009_v21 = vld [vmem:[#allocation57_spill] sm:$0xff] }
 0xbeb   : > { %9873 = vmatpush1.bf16.msra.mxu0 %v9872_v39  ;;  %v3693_v3 = vrot.slane %v3555_v51, 7  ;;  %v3733_v20 = vrot.slane %v3555_v51, 1  ;;  %3930 = vmatprep.mubr.f32.mxu0 %v3545_v59  ;;  %v9884_v59 = vpack.c.bf16 %v3840_v46, %v3838_v33  ;;  %v3613_v14 = vand.u32 7, %v15003_v35 }
 0xbec   : > { %9875 = vmatprep.subr.bf16.mxu0 %v9874_v41  ;;  %v9886_v39 = vpack.c.bf16 %v3845_v9, %v3843_v5  ;;  %v3842_v41 = vld [vmem:[#allocation10 + $0x2a0] sm:$0xff]  ;;  %v3627_v30 = vand.u32 7, %v15009_v21 }
 0xbed   : > { %v13576_v60 = vpop.f32.mrb[62].mxu1  ;;  %v3694_v12 = vsel %vm14990_vm1, %v3691_v34, %v3693_v3  ;;  %v3696_v25 = vsel %vm14991_vm14, %v3693_v3, %v3695_v15  ;;  %v13581_v8 = vsel %vm14992_vm9, %v3731_v16, %v3733_v20  ;;  %v13584_v61 = vsel %vm14993_vm6, %v3733_v20, %v3735_v48  ;;  %v3848_v3 = vld [vmem:[#allocation10 + $0x2d0] sm:$0xff]  ;;  %v3851_v20 = vld [vmem:[#allocation10 + $0x2e8] sm:$0xff] }
 0xbee   : > { %8081 = vmatmul.mubr.msk.f32.gmra.mrb[104].mxu0 %vm13572_vm12, %v3690_v23  ;;  %v3699_v40 = vrot.slane %v13576_v60, 7  ;;  %v3739_v26 = vrot.slane %v13576_v60, 1  ;;  %v3565_v37 = vpop.f32.mrb[63].mxu1  ;;  %v3849_v23 = vld [vmem:[#allocation10 + $0x2d8] sm:$0xff]  ;;  %vm13617_vm4 = vcmp.ne.s32.totalorder %v3613_v14, 0  ;;  %v9888_v52 = vpack.c.bf16 %v3844_v56, %v3842_v41 }
 0xbef   : > { %3936 = vmatprep.mubr.f32.mxu0 %v9069_v29  ;;  %9877 = vmatpush1.bf16.msra.mxu0 %v9876_v27  ;;  %v3697_v17 = vrot.slane %v3565_v37, 7  ;;  %v3737_v47 = vrot.slane %v3565_v37, 1  ;;  %v3853_v27 = vld [vmem:[#allocation10 + $0x2f8] sm:$0xff]  ;;  %vm13632_vm15 = vcmp.ne.s32.totalorder %v3627_v30, 0  ;;  %vm13641_vm1 = vcmp.ne.s32.totalorder %v3578_v10, 7 }
 0xbf0   : > { %9879 = vmatprep.subr.bf16.mxu0 %v9878_v63  ;;  %vm13651_vm14 = vcmp.ne.s32.totalorder %v3585_v42, 7  ;;  %vm13661_vm9 = vcmp.ne.s32.totalorder %v3592_v38, 7  ;;  %vm13671_vm6 = vcmp.ne.s32.totalorder %v3599_v2, 7  ;;  %v15022_v38 = vmov 0 }
 0xbf1   : > { %v3698_v4 = vsel %vm14997_vm0, %v3695_v15, %v3697_v17  ;;  %v3700_v45 = vsel %vm14998_vm10, %v3697_v17, %v3699_v40  ;;  %v3738_v34 = vsel %vm14999_vm13, %v3735_v48, %v3737_v47  ;;  %v13603_v29 = vsel %vm15000_vm8, %v3737_v47, %v3739_v26 }
 0xbf2   : > { %8083 = vmatmul.mubr.msk.f32.gmra.mrb[106].mxu0 %vm13590_vm11, %v3692_v31  ;;  %v3620_v15 = vand.u32 7, %v15006_v11  ;;  %v9890_v48 = vpack.c.bf16 %v3849_v23, %v3847_v55  ;;  %v9896_v40 = vpack.c.bf16 %v3852_v44, %v3850_v57  ;;  %vm13681_vm0 = vcmp.ne.s32.totalorder %v3606_v13, 7 }
 0xbf3   : > { %9881 = vmatpush1.bf16.msra.mxu0 %v9880_v62  ;;  %3942 = vmatprep.mubr.f32.mxu0 %v3555_v51  ;;  %v3846_v51 = vld [vmem:[#allocation10 + $0x2c0] sm:$0xff]  ;;  %vm13689_vm10 = vcmp.ne.s32.totalorder %v3613_v14, 7  ;;  %vm13704_vm8 = vcmp.ne.s32.totalorder %v3627_v30, 7 }
 0xbf4   : > { %9883 = vmatprep.subr.bf16.mxu0 %v9882_v53  ;;  %vm13624_vm5 = vcmp.ne.s32.totalorder %v3620_v15, 0  ;;  %v9892_v63 = vpack.c.bf16 %v3848_v3, %v3846_v51  ;;  %v15023_v38 = vsel %vm13689_vm10, 4294967295, %v15022_v38  ;;  %vm13696_vm13 = vcmp.ne.s32.totalorder %v3620_v15, 7 }
 0xbf6   : > { %8085 = vmatmul.mubr.msk.f32.gmra.mrb[108].mxu0 %vm13609_vm2, %v3694_v12  ;;  %v9894_v12 = vpack.c.bf16 %v3853_v27, %v3851_v20 }
 0xbf7   : > { %3948 = vmatprep.mubr.f32.mxu0 %v13555_v32  ;;  %9885 = vmatpush1.bf16.msra.mxu0 %v9884_v59 }
 0xbf8   : > { %9887 = vmatprep.subr.bf16.mxu0 %v9886_v39 }
 0xbfa   : > { %8087 = vmatmul.mubr.msk.f32.gmra.mrb[110].mxu0 %vm13617_vm4, %v3696_v25  ;;  %v15010_v25 = vmov 0 }
 0xbfb   : > { %9889 = vmatpush1.bf16.msra.mxu0 %v9888_v52  ;;  %3954 = vmatprep.mubr.f32.mxu0 %v3565_v37  ;;  %v15011_v25 = vsel %vm13632_vm15, 4294967295, %v15010_v25 }
 0xbfc   : > { %9891 = vmatprep.subr.bf16.mxu0 %v9890_v48 }
 0xbfe   : > { %8089 = vmatmul.mubr.msk.f32.gmra.mrb[112].mxu0 %vm13624_vm5, %v3698_v4 }
 0xbff   : > { %3960 = vmatprep.mubr.f32.mxu0 %v13576_v60  ;;  %9893 = vmatpush1.bf16.msra.mxu0 %v9892_v63 }
 0xc00   : > { %9895 = vmatprep.subr.bf16.mxu0 %v9894_v12 }
 0xc02   : > { %8091 = vmatmul.mubr.msk.f32.gmra.mrb[114].mxu0 %vm13632_vm15, %v3700_v45  ;;  %vm15028_vm15 = vcmask 1046528  }
 0xc03   : > { %9897 = vmatpush1.bf16.msra.mxu0 %v9896_v40  ;;  %4031 = vmatprep.mubr.f32.mxu0 %v14866_v22  ;;  %v3749_v2 = vsel %vm15028_vm15, %v3739_v26, 0.0 }
 0xc06   : > { %8093 = vmatmul.mubr.msk.f32.vlgmr.msra.gmra.mrb[100].mxu0 %vm13641_vm1, %v13543_v7 }
 0xc07   : > { %4037 = vmatprep.mubr.f32.mxu0 %v14866_v22 }
 0xc0a   : > { %8095 = vmatmul.mubr.msk.f32.gmra.mrb[102].mxu0 %vm13651_vm14, %v13560_v58  ;;  %v15024_v58 = vmov 0 }
 0xc0b   : > { %4043 = vmatprep.mubr.f32.mxu0 %v14866_v22  ;;  %v15025_v58 = vsel %vm13696_vm13, 4294967295, %v15024_v58 }
 0xc0e   : > { %8097 = vmatmul.mubr.msk.f32.gmra.mrb[104].mxu0 %vm13661_vm9, %v13563_v50  ;;  %v15026_v50 = vmov 0 }
 0xc0f   : > { %4049 = vmatprep.mubr.f32.mxu0 %v14866_v22  ;;  %v15027_v50 = vsel %vm13704_vm8, 4294967295, %v15026_v50 }
 0xc12   : > { %8099 = vmatmul.mubr.msk.f32.gmra.mrb[106].mxu0 %vm13671_vm6, %v13581_v8  ;;  %v13713_v8 = vld [vmem:[#allocation14] sm:$0xff] }
 0xc13   : > { %4055 = vmatprep.mubr.f32.mxu0 %v14866_v22  ;;  %9108 = vmatprep.mubr.f32.mxu1 %v13713_v8 }
 0xc16   : > { %8101 = vmatmul.mubr.msk.f32.gmra.mrb[108].mxu0 %vm13681_vm0, %v13584_v61 }
 0xc17   : > { %4061 = vmatprep.mubr.f32.mxu0 %v14866_v22 }
 0xc1a   : > { %8103 = vmatmul.mubr.msk.f32.gmra.mrb[110].mxu0 %vm13689_vm10, %v3738_v34 }
 0xc1b   : > { %4067 = vmatprep.mubr.f32.mxu0 %v14866_v22 }
 0xc1e   : > { %8105 = vmatmul.mubr.msk.f32.gmra.mrb[112].mxu0 %vm13696_vm13, %v13603_v29 }
 0xc1f   : > { %4073 = vmatprep.mubr.f32.mxu0 %v14866_v22 }
 0xc22   : > { %8107 = vmatmul.mubr.msk.f32.gmra.mrb[114].mxu0 %vm13704_vm8, %v3749_v2 }
 0xcd9   : > { %v4033_v61 = vpop.f32.mrb[100].mxu0 }
 0xcda   : > { %v13716_v17 = vpop.f32.mrb[101].mxu0  ;;  %v4088_v47 = vmul.f32 0.01, %v4033_v61  ;;  %vm4080_vm13 = vcmp.ge.f32.partialorder %v4033_v61, 0.0 }
 0xcdc   : > { %v13720_v60 = vsel %vm4080_vm13, %v4033_v61, %v4088_v47 }
 0xcdd   : > { %v4039_v28 = vpop.f32.mrb[102].mxu0  ;;  %v4104_v57 = vmul.f32 %v13720_v60, %v13720_v60 }
 0xcde   : > { %vm4081_vm10 = vcmp.ge.f32.partialorder %v4039_v28, 0.0  ;;  %v4089_v13 = vmul.f32 0.01, %v4039_v28  ;;  %v13718_v53 = vpop.f32.mrb[103].mxu0 }
 0xce0   : > { %v13722_v26 = vsel %vm4081_vm10, %v4039_v28, %v4089_v13 }
 0xce1   : > { %v4045_v33 = vpop.f32.mrb[104].mxu0  ;;  %v9898_v46 = vpack.c.bf16 %v13722_v26, %v13720_v60  ;;  %v4105_v21 = vmul.f32 %v13722_v26, %v13722_v26 }
 0xce2   : > { %v13726_v5 = vpop.f32.mrb[105].mxu0  ;;  %v4090_v9 = vmul.f32 0.01, %v4045_v33  ;;  %vm4082_vm15 = vcmp.ge.f32.partialorder %v4045_v33, 0.0 }
 0xce3   : > { %9899 = vmatprep.subr.bf16.mxu1 %v9898_v46  ;;  %v9914_v2 = vpack.c.bf16 %v4105_v21, %v4104_v57  ;;  %v4196_v21 = vld [vmem:[#allocation13 + $0x38] sm:$0xff] }
 0xce4   : > { %9901 = vmatpush3.bf16.msra.mxu1 %v9898_v46  ;;  %v13730_v29 = vsel %vm4082_vm15, %v4045_v33, %v4090_v9 }
 0xce5   : > { %v4051_v4 = vpop.f32.mrb[106].mxu0  ;;  %v4106_v61 = vmul.f32 %v13730_v29, %v13730_v29 }
 0xce6   : > { %vm4083_vm8 = vcmp.ge.f32.partialorder %v4051_v4, 0.0  ;;  %v4091_v45 = vmul.f32 0.01, %v4051_v4  ;;  %v13728_v34 = vpop.f32.mrb[107].mxu0 }
 0xce8   : > { %v13732_v59 = vsel %vm4083_vm8, %v4051_v4, %v4091_v45  ;;  %v4189_v4 = vld [vmem:[#allocation13] sm:$0xff]  ;;  %v4190_v45 = vld [vmem:[#allocation13 + $0x8] sm:$0xff] }
 0xce9   : > { %v4057_v35 = vpop.f32.mrb[108].mxu0  ;;  %v9902_v14 = vpack.c.bf16 %v13732_v59, %v13730_v29  ;;  %v4107_v40 = vmul.f32 %v13732_v59, %v13732_v59 }
 0xcea   : > { %v13736_v39 = vpop.f32.mrb[109].mxu0  ;;  %v4092_v41 = vmul.f32 0.01, %v4057_v35  ;;  %vm4084_vm10 = vcmp.ge.f32.partialorder %v4057_v35, 0.0 }
 0xceb   : > { %9903 = vmatprep.subr.bf16.mxu1 %v9902_v14  ;;  %v9918_v28 = vpack.c.bf16 %v4107_v40, %v4106_v61  ;;  %v4198_v40 = vld [vmem:[#allocation13 + $0x48] sm:$0xff]  ;;  %v4199_v61 = vld [vmem:[#allocation13 + $0x50] sm:$0xff] }
 0xcec   : > { %9905 = vmatpush3.bf16.msra.mxu1 %v9902_v14  ;;  %v13740_v52 = vsel %vm4084_vm10, %v4057_v35, %v4092_v41  ;;  %v13772_v14 = vpack.c.bf16 %v4190_v45, %v4189_v4  ;;  %v4191_v41 = vld [vmem:[#allocation13 + $0x10] sm:$0xff]  ;;  %v4204_v4 = vld [vmem:[#allocation13 + $0x78] sm:$0xff]  ;;  %vm15032_vm10 = vcmask 64512  }
 0xced   : > { %v4063_v56 = vpop.f32.mrb[110].mxu0  ;;  %v4108_v13 = vmul.f32 %v13740_v52, %v13740_v52 }
 0xcee   : > { %vm4085_vm13 = vcmp.ge.f32.partialorder %v4063_v56, 0.0  ;;  %v4093_v55 = vmul.f32 0.01, %v4063_v56  ;;  %v13738_v23 = vpop.f32.mrb[111].mxu0 }
 0xcf0   : > { %v13742_v11 = vsel %vm4085_vm13, %v4063_v56, %v4093_v55  ;;  %v4192_v56 = vld [vmem:[#allocation13 + $0x18] sm:$0xff]  ;;  %v13774_v55 = vld [vmem:[#allocation14 + $0x8] sm:$0xff]  ;;  %vm15034_vm13 = vmmov %vm15032_vm10 }
 0xcf1   : > { %v4069_v15 = vpop.f32.mrb[112].mxu0  ;;  %v9906_v48 = vpack.c.bf16 %v13742_v11, %v13740_v52  ;;  %v4109_v47 = vmul.f32 %v13742_v11, %v13742_v11 }
 0xcf2   : > { %v13746_v51 = vpop.f32.mrb[113].mxu0  ;;  %v4094_v3 = vmul.f32 0.01, %v4069_v15  ;;  %vm4086_vm8 = vcmp.ge.f32.partialorder %v4069_v15, 0.0 }
 0xcf3   : > { %9907 = vmatprep.subr.bf16.mxu1 %v9906_v48  ;;  %v9922_v46 = vpack.c.bf16 %v4109_v47, %v4108_v13  ;;  %v4200_v47 = vld [vmem:[#allocation13 + $0x58] sm:$0xff]  ;;  %v4201_v13 = vld [vmem:[#allocation13 + $0x60] sm:$0xff] }
 0xcf4   : > { %9909 = vmatpush3.bf16.msra.mxu1 %v9906_v48  ;;  %v13752_v30 = vsel %vm4086_vm8, %v4069_v15, %v4094_v3  ;;  %v13777_v15 = vpack.c.bf16 %v4192_v56, %v4191_v41  ;;  %v4193_v48 = vld [vmem:[#allocation13 + $0x20] sm:$0xff]  ;;  %v4194_v3 = vld [vmem:[#allocation13 + $0x28] sm:$0xff]  ;;  %vm15036_vm8 = vmmov %vm15032_vm10 }
 0xcf5   : > { %v4075_v20 = vpop.f32.mrb[114].mxu0  ;;  %v4110_v9 = vmul.f32 %v13752_v30, %v13752_v30  ;;  %v4545_v56 = vld [vmem:[#allocation11 + $0x80] sm:$0xff] }
 0xcf6   : > { %vm4087_vm15 = vcmp.ge.f32.partialorder %v4075_v20, 0.0  ;;  %v4095_v27 = vmul.f32 0.01, %v4075_v20  ;;  %v13748_v63 = vpop.f32.mrb[115].mxu0 }
 0xcf8   : > { %v13754_v12 = vsel %vm4087_vm15, %v4075_v20, %v4095_v27  ;;  %v13782_v20 = vpack.c.bf16 %v4194_v3, %v4193_v48  ;;  %v4195_v27 = vld [vmem:[#allocation13 + $0x30] sm:$0xff]  ;;  %v4546_v48 = vld [vmem:[#allocation11 + $0x88] sm:$0xff]  ;;  %v4529_v3 = vld [vmem:[#allocation11] sm:$0xff] }
 0xcf9   : > { %v9910_v44 = vpack.c.bf16 %v13754_v12, %v13752_v30  ;;  %v4111_v33 = vmul.f32 %v13754_v12, %v13754_v12  ;;  %v13786_v57 = vpack.c.bf16 %v4196_v21, %v4195_v27  ;;  %v9962_v27 = vpack.c.bf16 %v4546_v48, %v4545_v56  ;;  %v4530_v21 = vld [vmem:[#allocation11 + $0x8] sm:$0xff]  ;;  %vm15038_vm15 = vmmov %vm15036_vm8 }
 0xcfa   : > { %v9974_v48 = vpack.c.bf16 %v4552_v1, %v4551_v43 }
 0xcfb   : > { %9911 = vmatprep.subr.bf16.mxu1 %v9910_v44  ;;  %v9926_v35 = vpack.c.bf16 %v4111_v33, %v4110_v9  ;;  %v4202_v33 = vld [vmem:[#allocation13 + $0x68] sm:$0xff]  ;;  %v4203_v9 = vld [vmem:[#allocation13 + $0x70] sm:$0xff]  ;;  %9963 = vmatprep.subr.bf16.mxu0 %v9962_v27 }
 0xcfc   : > { %9913 = vmatpush3.bf16.msra.mxu1 %v9910_v44  ;;  %v4197_v44 = vld [vmem:[#allocation13 + $0x40] sm:$0xff]  ;;  %v13802_v45 = vpack.c.bf16 %v4204_v4, %v4203_v9  ;;  %v4550_v4 = vld [vmem:[#allocation11 + $0xa8] sm:$0xff] }
 0xcfd   : > { %9915 = vmatprep.subr.bf16.mxu1 %v9914_v2  ;;  %v4549_v9 = vld [vmem:[#allocation11 + $0xa0] sm:$0xff] }
 0xd00   : > { %9917 = vmatpush3.bf16.msra.mxu1 %v9914_v2  ;;  %v13790_v2 = vpack.c.bf16 %v4198_v40, %v4197_v44  ;;  %v4547_v44 = vld [vmem:[#allocation11 + $0x90] sm:$0xff]  ;;  %v4548_v40 = vld [vmem:[#allocation11 + $0x98] sm:$0xff] }
 0xd01   : > { %9919 = vmatprep.subr.bf16.mxu1 %v9918_v28 }
 0xd04   : > { %9921 = vmatpush3.bf16.msra.mxu1 %v9918_v28  ;;  %v13794_v28 = vpack.c.bf16 %v4200_v47, %v4199_v61  ;;  %v9964_v61 = vpack.c.bf16 %v4530_v21, %v4529_v3  ;;  %v9966_v47 = vpack.c.bf16 %v4548_v40, %v4547_v44  ;;  %v4536_v3 = vld [vmem:[#allocation11 + $0x38] sm:$0xff]  ;;  %v4553_v21 = vld [vmem:[#allocation11 + $0xc0] sm:$0xff]  ;;  %v4554_v44 = vld [vmem:[#allocation11 + $0xc8] sm:$0xff] }
 0xd05   : > { %9923 = vmatprep.subr.bf16.mxu1 %v9922_v46  ;;  %v9976_v40 = vpack.c.bf16 %v4536_v3, %v4535_v36  ;;  %v9978_v27 = vpack.c.bf16 %v4554_v44, %v4553_v21  ;;  %v15029_v3 = vld [vmem:[#allocation70_spill] sm:$0xff] }
 0xd06   : > { %9965 = vmatpush3.bf16.msra.mxu0 %v9964_v61  ;;  %v4537_v61 = vld [vmem:[#allocation11 + $0x40] sm:$0xff] }
 0xd07   : > { %9967 = vmatprep.subr.bf16.mxu0 %v9966_v47  ;;  %v4555_v47 = vld [vmem:[#allocation11 + $0xd0] sm:$0xff] }
 0xd08   : > { %9925 = vmatpush3.bf16.msra.mxu1 %v9922_v46  ;;  %v13798_v46 = vpack.c.bf16 %v4202_v33, %v4201_v13  ;;  %v4531_v13 = vld [vmem:[#allocation11 + $0x10] sm:$0xff]  ;;  %v4532_v33 = vld [vmem:[#allocation11 + $0x18] sm:$0xff] }
 0xd09   : > { %9927 = vmatprep.subr.bf16.mxu1 %v9926_v35  ;;  %v9968_v19 = vpack.c.bf16 %v4532_v33, %v4531_v13  ;;  %v4538_v13 = vld [vmem:[#allocation11 + $0x48] sm:$0xff]  ;;  %v4556_v33 = vld [vmem:[#allocation11 + $0xd8] sm:$0xff] }
 0xd0b   : > { %9969 = vmatpush3.bf16.msra.mxu0 %v9968_v19  ;;  %v4539_v19 = vld [vmem:[#allocation11 + $0x50] sm:$0xff] }
 0xd0c   : > { %9929 = vmatpush3.bf16.msra.mxu1 %v9926_v35 }
 0xd0d   : > { %9931 = vmatprep.subr.bf16.mxu1 %v13772_v14 }
 0xd0f   : > { %9109 = vmatmul.mubr.f32.vlgmr.msra.gmra.mrb[64].mxu1 %v13774_v55 }
 0xd10   : > { %9933 = vmatpush3.bf16.msra.mxu1 %v13772_v14 }
 0xd11   : > { %9935 = vmatprep.subr.bf16.mxu1 %v13777_v15 }
 0xd14   : > { %9937 = vmatpush3.bf16.msra.mxu1 %v13777_v15 }
 0xd15   : > { %9939 = vmatprep.subr.bf16.mxu1 %v13782_v20 }
 0xd18   : > { %9941 = vmatpush3.bf16.msra.mxu1 %v13782_v20 }
 0xd19   : > { %9943 = vmatprep.subr.bf16.mxu1 %v13786_v57 }
 0xd1c   : > { %9945 = vmatpush3.bf16.msra.mxu1 %v13786_v57 }
 0xd1d   : > { %9947 = vmatprep.subr.bf16.mxu1 %v13790_v2 }
 0xd20   : > { %9949 = vmatpush3.bf16.msra.mxu1 %v13790_v2 }
 0xd21   : > { %9951 = vmatprep.subr.bf16.mxu1 %v13794_v28 }
 0xd24   : > { %9953 = vmatpush3.bf16.msra.mxu1 %v13794_v28 }
 0xd25   : > { %9955 = vmatprep.subr.bf16.mxu1 %v13798_v46 }
 0xd28   : > { %9957 = vmatpush3.bf16.msra.mxu1 %v13798_v46 }
 0xd29   : > { %9959 = vmatprep.subr.bf16.mxu1 %v13802_v45 }
 0xd2c   : > { %9961 = vmatpush3.bf16.msra.mxu1 %v13802_v45 }
 0xde2   : > { %v9110_v35 = vpop.f32.mrb[64].mxu1 }
 0xde3   : > { %v4180_v41 = vpop.f32.mrb[65].mxu1 }
 0xde4   : > { %9143 = vmatprep.mubr.f32.mxu1 %v4180_v41  ;;  %v4533_v41 = vld [vmem:[#allocation11 + $0x20] sm:$0xff] }
 0xde5   : > { %9144 = vmatmul.mubr.f32.vlgmr.msra.gmra.mrb[66].mxu1 %v9110_v35  ;;  %v9970_v35 = vpack.c.bf16 %v4550_v4, %v4549_v9  ;;  %v9972_v56 = vpack.c.bf16 %v4534_v24, %v4533_v41  ;;  %v9980_v9 = vpack.c.bf16 %v4538_v13, %v4537_v61  ;;  %v9982_v4 = vpack.c.bf16 %v4556_v33, %v4555_v47  ;;  %v4540_v24 = vld [vmem:[#allocation11 + $0x58] sm:$0xff]  ;;  %v4561_v13 = vld [vmem:[#allocation11 + $0x100] sm:$0xff]  ;;  %v4562_v47 = vld [vmem:[#allocation11 + $0x108] sm:$0xff] }
 0xde6   : > { %4392 = vmatprep.mubr.f32.mxu1 %v14866_v22  ;;  %v9984_v1 = vpack.c.bf16 %v4540_v24, %v4539_v19  ;;  %v9994_v24 = vpack.c.bf16 %v4562_v47, %v4561_v13  ;;  %v13841_v13 = vld [vmem:[%s15031_s16 + $0x18] sm:$0xff]  ;;  %v13849_v47 = vld [vmem:[%s15031_s16 + $0x20] sm:$0xff] }
 0xde7   : > { %9971 = vmatprep.subr.bf16.mxu0 %v9970_v35  ;;  %15037 = vst [vmem:[#allocation64_spill] sm:$0xff] %v13841_v13  ;;  %15039 = vst [vmem:[#allocation65_spill] sm:$0xff] %v13849_v47 }
 0xde8   : > { %9973 = vmatpush3.bf16.msra.mxu0 %v9972_v56 }
 0xde9   : > { %9975 = vmatprep.subr.bf16.mxu0 %v9974_v48  ;;  %v13808_v48 = vld [vmem:[#allocation16] sm:$0xf] }
 0xdea   : > { %v4288_v21 = vrot.slane %v13808_v48, %v15029_v3  ;;  %v4560_v3 = vld [vmem:[#allocation11 + $0xf8] sm:$0xff] }
 0xdec   : > { %9977 = vmatpush3.bf16.msra.mxu0 %v9976_v40 }
 0xded   : > { %9979 = vmatprep.subr.bf16.mxu0 %v9978_v27  ;;  %v15030_v27 = vld [vmem:[#allocation71_spill] sm:$0xff] }
 0xdee   : > { %v4294_v61 = vrot.slane %v13808_v48, %v15030_v27  ;;  %v4559_v27 = vld [vmem:[#allocation11 + $0xf0] sm:$0xff] }
 0xdf0   : > { %9981 = vmatpush3.bf16.msra.mxu0 %v9980_v9  ;;  %v4563_v9 = vld [vmem:[#allocation11 + $0x110] sm:$0xff] }
 0xdf1   : > { %9983 = vmatprep.subr.bf16.mxu0 %v9982_v4  ;;  %v4564_v4 = vld [vmem:[#allocation11 + $0x118] sm:$0xff] }
 0xdf4   : > { %9985 = vmatpush3.bf16.msra.mxu0 %v9984_v1  ;;  %v13817_v1 = vld [vmem:[%s15031_s16] sm:$0xff] }
 0xeb8   : > { %v9145_v43 = vpop.f32.mrb[66].mxu1 }
 0xeb9   : > { %v4271_v35 = vpop.f32.mrb[67].mxu1 }
 0xeba   : > { %v4281_v41 = vmul.f32 %v4271_v35, %v4271_v35 }
 0xebc   : > { %v4282_v36 = vsub.f32 %v9145_v43, %v4281_v41  ;;  %v9998_v43 = vpack.c.bf16 %v4564_v4, %v4563_v9  ;;  %v4565_v41 = vld [vmem:[#allocation11 + $0x120] sm:$0xff]  ;;  %v13865_v9 = vld [vmem:[%s15031_s16 + $0x30] sm:$0xff]  ;;  %v13873_v4 = vld [vmem:[%s15031_s16 + $0x38] sm:$0xff] }
 0xebd   : > { %15043 = vst [vmem:[#allocation67_spill] sm:$0xff] %v13865_v9  ;;  %15044 = vst [vmem:[#allocation68_spill] sm:$0xff] %v13873_v4 }
 0xebe   : > { %v4283_v56 = vadd.f32 1e-05, %v4282_v36  ;;  %v4566_v36 = vld [vmem:[#allocation11 + $0x128] sm:$0xff] }
 0xec0   : > { %10939 = vrsqrt.f32 %v4283_v56  ;;  %v10002_v56 = vpack.c.bf16 %v4566_v36, %v4565_v41  ;;  %v4570_v36 = vld [vmem:[#allocation11 + $0x148] sm:$0xff] }
 0xeca   : > { %v10940_v44 = vpop.eup %10939 }
 0xecb   : > { %v4289_v40 = vmul.f32 %v10940_v44, %v4288_v21  ;;  %v4567_v21 = vld [vmem:[#allocation11 + $0x130] sm:$0xff]  ;;  %v4568_v44 = vld [vmem:[#allocation11 + $0x138] sm:$0xff] }
 0xecd   : > { %v4290_v33 = vmul.f32 %v4289_v40, %v4271_v35  ;;  %v13825_v35 = vld [vmem:[%s15031_s16 + $0x8] sm:$0xff] }
 0xece   : > { %15033 = vst [vmem:[#allocation62_spill] sm:$0xff] %v13825_v35 }
 0xecf   : > { %v4295_v19 = vsub.f32 %v4294_v61, %v4290_v33  ;;  %v10006_v61 = vpack.c.bf16 %v4568_v44, %v4567_v21  ;;  %v13857_v33 = vld [vmem:[%s15031_s16 + $0x28] sm:$0xff] }
 0xed0   : > { %15041 = vst [vmem:[#allocation66_spill] sm:$0xff] %v13857_v33  ;;  %v4542_v21 = vld [vmem:[#allocation11 + $0x68] sm:$0xff] }
 0xed1   : > { %4328 = vmatprep.subr.mxu1 %v4295_v19  ;;  %v4557_v19 = vld [vmem:[#allocation11 + $0xe0] sm:$0xff] }
 0xed2   : > { %4329 = vmatpush1.msra.mxu1 %v4289_v40  ;;  %v13833_v40 = vld [vmem:[%s15031_s16 + $0x10] sm:$0xff] }
 0xed3   : > { %8108 = vmatmul.mubr.msk.f32.vlgmr.msra.gmra.mrb[68].mxu1 %vm15032_vm10, %v13817_v1  ;;  %9995 = vmatprep.subr.bf16.mxu1 %v9994_v24  ;;  %15035 = vst [vmem:[#allocation63_spill] sm:$0xff] %v13833_v40  ;;  %vm15040_vm10 = vmmov %vm15036_vm8 }
 0xed4   : > { %4398 = vmatprep.mubr.f32.mxu1 %v14866_v22  ;;  %9997 = vmatpush3.bf16.msra.mxu1 %v9994_v24  ;;  %v4558_v24 = vld [vmem:[#allocation11 + $0xe8] sm:$0xff] }
 0xed5   : > { %9999 = vmatprep.subr.bf16.mxu1 %v9998_v43  ;;  %v9986_v41 = vpack.c.bf16 %v4558_v24, %v4557_v19  ;;  %v4573_v19 = vld [vmem:[#allocation11 + $0x160] sm:$0xff]  ;;  %v4574_v24 = vld [vmem:[#allocation11 + $0x168] sm:$0xff] }
 0xed7   : > { %8109 = vmatmul.mubr.msk.f32.gmra.mrb[70].mxu1 %vm15034_vm13, %v13825_v35  ;;  %vm15042_vm13 = vmmov %vm15036_vm8  ;;  %9987 = vmatprep.subr.bf16.mxu0 %v9986_v41  ;;  %v4575_v41 = vld [vmem:[#allocation11 + $0x170] sm:$0xff] }
 0xed8   : > { %4404 = vmatprep.mubr.f32.mxu1 %v14866_v22  ;;  %10001 = vmatpush3.bf16.msra.mxu1 %v9998_v43  ;;  %v4569_v43 = vld [vmem:[#allocation11 + $0x140] sm:$0xff] }
 0xed9   : > { %10003 = vmatprep.subr.bf16.mxu1 %v10002_v56  ;;  %v10010_v44 = vpack.c.bf16 %v4570_v36, %v4569_v43  ;;  %v10018_v43 = vpack.c.bf16 %v4574_v24, %v4573_v19  ;;  %v4576_v36 = vld [vmem:[#allocation11 + $0x178] sm:$0xff] }
 0xedb   : > { %8110 = vmatmul.mubr.msk.f32.gmra.mrb[72].mxu1 %vm15036_vm8, %v13833_v40 }
 0xedc   : > { %4410 = vmatprep.mubr.f32.mxu1 %v14866_v22  ;;  %10005 = vmatpush3.bf16.msra.mxu1 %v10002_v56  ;;  %v4541_v56 = vld [vmem:[#allocation11 + $0x60] sm:$0xff] }
 0xedd   : > { %10007 = vmatprep.subr.bf16.mxu1 %v10006_v61 }
 0xedf   : > { %8111 = vmatmul.mubr.msk.f32.gmra.mrb[74].mxu1 %vm15038_vm15, %v13841_v13  ;;  %vm15045_vm15 = vmmov %vm15036_vm8  ;;  %v4543_v13 = vld [vmem:[#allocation11 + $0x70] sm:$0xff] }
 0xee0   : > { %4416 = vmatprep.mubr.f32.mxu1 %v14866_v22  ;;  %10009 = vmatpush3.bf16.msra.mxu1 %v10006_v61  ;;  %v9988_v61 = vpack.c.bf16 %v4542_v21, %v4541_v56  ;;  %v10022_v56 = vpack.c.bf16 %v4576_v36, %v4575_v41 }
 0xee1   : > { %10011 = vmatprep.subr.bf16.mxu1 %v10010_v44 }
 0xee2   : > { %9989 = vmatpush3.bf16.msra.mxu0 %v9988_v61 }
 0xee3   : > { %8112 = vmatmul.mubr.msk.f32.gmra.mrb[76].mxu1 %vm15040_vm10, %v13849_v47  ;;  %v4572_v47 = vld [vmem:[#allocation11 + $0x158] sm:$0xff]  ;;  %vm15046_vm10 = vcmask 1040384  }
 0xee4   : > { %4422 = vmatprep.mubr.f32.mxu1 %v14866_v22  ;;  %10013 = vmatpush3.bf16.msra.mxu1 %v10010_v44 }
 0xee7   : > { %8113 = vmatmul.mubr.msk.f32.gmra.mrb[78].mxu1 %vm15042_vm13, %v13857_v33  ;;  %v9990_v33 = vpack.c.bf16 %v4560_v3, %v4559_v27  ;;  %vm15047_vm13 = vmmov %vm15046_vm10 }
 0xee8   : > { %4428 = vmatprep.mubr.f32.mxu1 %v14866_v22 }
 0xee9   : > { %9991 = vmatprep.subr.bf16.mxu0 %v9990_v33 }
 0xeeb   : > { %8114 = vmatmul.mubr.msk.f32.gmra.mrb[80].mxu1 %vm15036_vm8, %v13865_v9  ;;  %v4571_v9 = vld [vmem:[#allocation11 + $0x150] sm:$0xff]  ;;  %vm15048_vm8 = vcmask 1046528  }
 0xeec   : > { %4434 = vmatprep.mubr.f32.mxu1 %v14866_v22  ;;  %v10014_v40 = vpack.c.bf16 %v4572_v47, %v4571_v9 }
 0xeee   : > { %10015 = vmatprep.subr.bf16.mxu1 %v10014_v40 }
 0xeef   : > { %8115 = vmatmul.mubr.msk.f32.gmra.mrb[82].mxu1 %vm15045_vm15, %v13873_v4  ;;  %v4544_v4 = vld [vmem:[#allocation11 + $0x78] sm:$0xff]  ;;  %vm15050_vm15 = vmmov %vm15048_vm8 }
 0xef0   : > { %v9992_v35 = vpack.c.bf16 %v4544_v4, %v4543_v13  ;;  %10017 = vmatpush3.bf16.msra.mxu1 %v10014_v40 }
 0xef1   : > { %10019 = vmatprep.subr.bf16.mxu1 %v10018_v43 }
 0xef2   : > { %9993 = vmatpush3.bf16.msra.mxu0 %v9992_v35 }
 0xef4   : > { %10021 = vmatpush3.bf16.msra.mxu1 %v10018_v43 }
 0xef5   : > { %10023 = vmatprep.subr.bf16.mxu1 %v10022_v56 }
 0xef8   : > { %10025 = vmatpush3.bf16.msra.mxu1 %v10022_v56 }
 0xef9   : > { %10059 = vmatprep.subr.bf16.mxu1 %v13772_v14 }
 0xfa6   : > { %v4394_v3 = vpop.f32.mrb[68].mxu1 }
 0xfa7   : > { %v4441_v27 = vmul.f32 %v4394_v3, %v13720_v60  ;;  %v4396_v13 = vpop.f32.mrb[69].mxu1 }
 0xfa9   : > { %v4449_v47 = vadd.f32 %v4441_v27, %v4396_v13 }
 0xfaa   : > { %v4400_v33 = vpop.f32.mrb[70].mxu1 }
 0xfab   : > { %v4465_v35 = vrot.slane %v4449_v47, 7  ;;  %v4442_v9 = vmul.f32 %v4400_v33, %v13722_v26  ;;  %4641 = vmatprep.mubr.f32.mxu0 %v4449_v47  ;;  %v4402_v40 = vpop.f32.mrb[71].mxu1  ;;  %v4497_v61 = vrot.slane %v4449_v47, 1 }
 0xfad   : > { %v4488_v4 = vsel %vm15046_vm10, 0.0, %v4465_v35  ;;  %v4450_v21 = vadd.f32 %v4442_v9, %v4402_v40 }
 0xfae   : > { %v4406_v44 = vpop.f32.mrb[72].mxu1  ;;  %8117 = vmatmul.mubr.msk.f32.vlgmr.msra.gmra.mrb[116].mxu0 %vm13537_vm3, %v4488_v4  ;;  %vm15049_vm3 = vmmov %vm15046_vm10 }
 0xfaf   : > { %v4466_v19 = vrot.slane %v4450_v21, 7  ;;  %v4498_v24 = vrot.slane %v4450_v21, 1  ;;  %v4443_v60 = vmul.f32 %v4406_v44, %v13730_v29  ;;  %4646 = vmatprep.mubr.f32.mxu0 %v4450_v21  ;;  %v4408_v43 = vpop.f32.mrb[73].mxu1 }
 0xfb1   : > { %v4451_v41 = vadd.f32 %v4443_v60, %v4408_v43  ;;  %v4467_v36 = vsel %vm15047_vm13, %v4465_v35, %v4466_v19  ;;  %v4499_v26 = vsel %vm15048_vm8, %v4497_v61, %v4498_v24 }
 0xfb2   : > { %v4412_v56 = vpop.f32.mrb[74].mxu1  ;;  %8119 = vmatmul.mubr.msk.f32.gmra.mrb[118].mxu0 %vm13550_vm7, %v4467_v36  ;;  %9178 = vmatprep.mubr.msk.f32.mxu1 %vm13641_vm1, %v4499_v26  ;;  %vm15051_vm7 = vmmov %vm15049_vm3 }
 0xfb3   : > { %v4468_v18 = vrot.slane %v4451_v41, 7  ;;  %v4500_v3 = vrot.slane %v4451_v41, 1  ;;  %v4444_v27 = vmul.f32 %v4412_v56, %v13732_v59  ;;  %4651 = vmatprep.mubr.f32.mxu0 %v4451_v41  ;;  %v4414_v29 = vpop.f32.mrb[75].mxu1  ;;  %vm15052_vm1 = vmmov %vm15048_vm8  ;;  %vm15063_vm8 = vnez %v15011_v25 }
 0xfb4   : > { %vm15061_vm10 = vmmov %vm15052_vm1 }
 0xfb5   : > { %v4452_v13 = vadd.f32 %v4444_v27, %v4414_v29  ;;  %v4469_v47 = vsel %vm15049_vm3, %v4466_v19, %v4468_v18  ;;  %v4501_v33 = vsel %vm15050_vm15, %v4498_v24, %v4500_v3  ;;  %vm15062_vm13 = vmmov %vm15052_vm1 }
 0xfb6   : > { %v4418_v35 = vpop.f32.mrb[76].mxu1  ;;  %8121 = vmatmul.mubr.msk.f32.gmra.mrb[120].mxu0 %vm13572_vm12, %v4469_v47  ;;  %9179 = vmatmul.mubr.msk.f32.vlgmr.msra.gmra.mrb[84].mxu1 %vm13651_vm14, %v4501_v33  ;;  %vm15053_vm12 = vmmov %vm15049_vm3 }
 0xfb7   : > { %v4470_v54 = vrot.slane %v4452_v13, 7  ;;  %v4502_v37 = vrot.slane %v4452_v13, 1  ;;  %v4445_v9 = vmul.f32 %v4418_v35, %v13740_v52  ;;  %4656 = vmatprep.mubr.f32.mxu0 %v4452_v13  ;;  %v4420_v59 = vpop.f32.mrb[77].mxu1  ;;  %10061 = vmatpush3.bf16.msra.mxu1 %v13772_v14  ;;  %vm15054_vm14 = vmmov %vm15052_vm1 }
 0xfb8   : > { %10063 = vmatprep.subr.bf16.mxu1 %v13777_v15 }
 0xfb9   : > { %v4453_v40 = vadd.f32 %v4445_v9, %v4420_v59  ;;  %v4471_v4 = vsel %vm15051_vm7, %v4468_v18, %v4470_v54  ;;  %v4503_v21 = vsel %vm15052_vm1, %v4500_v3, %v4502_v37 }
 0xfba   : > { %v4424_v0 = vpop.f32.mrb[78].mxu1  ;;  %8123 = vmatmul.mubr.msk.f32.gmra.mrb[122].mxu0 %vm13590_vm11, %v4471_v4  ;;  %9181 = vmatprep.mubr.msk.f32.mxu1 %vm13661_vm9, %v4503_v21  ;;  %vm15055_vm11 = vmmov %vm15049_vm3 }
 0xfbb   : > { %v4472_v62 = vrot.slane %v4453_v40, 7  ;;  %v4504_v52 = vrot.slane %v4453_v40, 1  ;;  %v4446_v44 = vmul.f32 %v4424_v0, %v13742_v11  ;;  %4661 = vmatprep.mubr.f32.mxu0 %v4453_v40  ;;  %v4426_v14 = vpop.f32.mrb[79].mxu1  ;;  %10065 = vmatpush3.bf16.msra.mxu1 %v13777_v15  ;;  %vm15056_vm9 = vmmov %vm15052_vm1 }
 0xfbc   : > { %10067 = vmatprep.subr.bf16.mxu1 %v13782_v20 }
 0xfbd   : > { %v4454_v61 = vadd.f32 %v4446_v44, %v4426_v14  ;;  %v4473_v19 = vsel %vm15053_vm12, %v4470_v54, %v4472_v62  ;;  %v4505_v24 = vsel %vm15054_vm14, %v4502_v37, %v4504_v52 }
 0xfbe   : > { %v4430_v49 = vpop.f32.mrb[80].mxu1  ;;  %8125 = vmatmul.mubr.msk.f32.gmra.mrb[124].mxu0 %vm13609_vm2, %v4473_v19  ;;  %9182 = vmatmul.mubr.msk.f32.gmra.mrb[86].mxu1 %vm13671_vm6, %v4505_v24  ;;  %vm15057_vm2 = vmmov %vm15049_vm3  ;;  %vm15065_vm3 = vnez %v15027_v50 }
 0xfbf   : > { %v4474_v10 = vrot.slane %v4454_v61, 7  ;;  %v4506_v11 = vrot.slane %v4454_v61, 1  ;;  %v4447_v60 = vmul.f32 %v4430_v49, %v13752_v30  ;;  %4666 = vmatprep.mubr.f32.mxu0 %v4454_v61  ;;  %v4432_v15 = vpop.f32.mrb[81].mxu1  ;;  %10069 = vmatpush3.bf16.msra.mxu1 %v13782_v20  ;;  %vm15058_vm6 = vmmov %vm15052_vm1 }
 0xfc0   : > { %10071 = vmatprep.subr.bf16.mxu1 %v13786_v57 }
 0xfc1   : > { %v4455_v43 = vadd.f32 %v4447_v60, %v4432_v15  ;;  %v4475_v41 = vsel %vm15055_vm11, %v4472_v62, %v4474_v10  ;;  %v4507_v36 = vsel %vm15056_vm9, %v4504_v52, %v4506_v11 }
 0xfc2   : > { %v4436_v16 = vpop.f32.mrb[82].mxu1  ;;  %8127 = vmatmul.mubr.msk.f32.gmra.mrb[126].mxu0 %vm13617_vm4, %v4475_v41  ;;  %9184 = vmatprep.mubr.msk.f32.mxu1 %vm13681_vm0, %v4507_v36  ;;  %vm15059_vm4 = vnez %v15023_v38  ;;  %vm15060_vm0 = vmmov %vm15057_vm2 }
 0xfc3   : > { %v4476_v42 = vrot.slane %v4455_v43, 7  ;;  %v4508_v30 = vrot.slane %v4455_v43, 1  ;;  %v4448_v26 = vmul.f32 %v4436_v16, %v13754_v12  ;;  %4671 = vmatprep.mubr.f32.mxu0 %v4455_v43  ;;  %v4438_v20 = vpop.f32.mrb[83].mxu1  ;;  %10073 = vmatpush3.bf16.msra.mxu1 %v13786_v57 }
 0xfc4   : > { %10075 = vmatprep.subr.bf16.mxu1 %v13790_v2 }
 0xfc5   : > { %v4456_v56 = vadd.f32 %v4448_v26, %v4438_v20  ;;  %v4477_v18 = vsel %vm15057_vm2, %v4474_v10, %v4476_v42  ;;  %v4509_v3 = vsel %vm15058_vm6, %v4506_v11, %v4508_v30  ;;  %vm15067_vm6 = vcmask 64512  }
 0xfc6   : > { %8129 = vmatmul.mubr.msk.f32.gmra.mrb[128].mxu0 %vm13624_vm5, %v4477_v18  ;;  %9185 = vmatmul.mubr.msk.f32.gmra.mrb[88].mxu1 %vm15059_vm4, %v4509_v3  ;;  %vm15064_vm5 = vnez %v15025_v58  ;;  %vm15069_vm4 = vmmov %vm15067_vm6 }
 0xfc7   : > { %v4478_v31 = vrot.slane %v4456_v56, 7  ;;  %v4510_v7 = vrot.slane %v4456_v56, 1  ;;  %4676 = vmatprep.mubr.f32.mxu0 %v4456_v56  ;;  %10077 = vmatpush3.bf16.msra.mxu1 %v13790_v2 }
 0xfc8   : > { %10079 = vmatprep.subr.bf16.mxu1 %v13794_v28 }
 0xfc9   : > { %v4479_v12 = vsel %vm15060_vm0, %v4476_v42, %v4478_v31  ;;  %v4511_v57 = vsel %vm15061_vm10, %v4508_v30, %v4510_v7  ;;  %v4520_v27 = vsel %vm15062_vm13, %v4510_v7, 0.0  ;;  %vm15071_vm0 = vmmov %vm15069_vm4 }
 0xfca   : > { %8131 = vmatmul.mubr.msk.f32.gmra.mrb[130].mxu0 %vm15063_vm8, %v4479_v12  ;;  %9187 = vmatprep.mubr.msk.f32.mxu1 %vm15064_vm5, %v4511_v57  ;;  %vm15073_vm10 = vmmov %vm15071_vm0 }
 0xfcb   : > { %9188 = vmatmul.mubr.msk.f32.gmra.mrb[90].mxu1 %vm15065_vm3, %v4520_v27  ;;  %9222 = vmatprep.mubr.f32.mxu0 %v13713_v8  ;;  %vm15075_vm13 = vmmov %vm15071_vm0 }
 0xfcc   : > { %10081 = vmatpush3.bf16.msra.mxu1 %v13794_v28  ;;  %vm15077_vm8 = vmmov %vm15071_vm0 }
 0xfcd   : > { %10083 = vmatprep.subr.bf16.mxu1 %v13798_v46  ;;  %vm15079_vm5 = vmmov %vm15071_vm0 }
 0xfce   : > { %vm15081_vm3 = vmmov %vm15071_vm0 }
 0xfd0   : > { %10085 = vmatpush3.bf16.msra.mxu1 %v13798_v46 }
 0xfd1   : > { %10087 = vmatprep.subr.bf16.mxu1 %v13802_v45 }
 0xfd4   : > { %10089 = vmatpush3.bf16.msra.mxu1 %v13802_v45 }
0x1081   : > { %v8580_v32 = vpop.f32.mrb[116].mxu0 }
0x1082   : > { %v8581_v25 = vpop.f32.mrb[117].mxu0 }
0x1083   : > { %v8582_v38 = vadd.f32 %v8581_v25, %v8580_v32 }
0x1085   : > { %v8583_v58 = vpop.f32.mrb[118].mxu0  ;;  %v4644_v2 = vadd.f32 %v8582_v38, %v13716_v17 }
0x1086   : > { %v8584_v50 = vpop.f32.mrb[119].mxu0 }
0x1087   : > { %v8585_v29 = vadd.f32 %v8584_v50, %v8583_v58 }
0x1089   : > { %v8586_v13 = vpop.f32.mrb[120].mxu0  ;;  %v4649_v8 = vadd.f32 %v8585_v29, %v13718_v53  ;;  %v9180_v28 = vpop.f32.mrb[84].mxu1 }
0x108a   : > { %v8587_v47 = vpop.f32.mrb[121].mxu0  ;;  %v4748_v33 = vpop.f32.mrb[85].mxu1 }
0x108b   : > { %v4754_v35 = vadd.f32 %v9180_v28, %v4649_v8  ;;  %v8588_v46 = vadd.f32 %v8587_v47, %v8586_v13  ;;  %v4749_v54 = vadd.f32 %v4748_v33, %v4644_v2 }
0x108d   : > { %vm4788_vm15 = vcmp.ge.f32.partialorder %v4754_v35, 0.0  ;;  %v4796_v37 = vmul.f32 0.01, %v4754_v35  ;;  %vm4787_vm7 = vcmp.ge.f32.partialorder %v4749_v54, 0.0  ;;  %v4795_v45 = vmul.f32 0.01, %v4749_v54 }
0x108e   : > { %v8589_v9 = vpop.f32.mrb[122].mxu0  ;;  %v4654_v59 = vadd.f32 %v8588_v46, %v13726_v5 }
0x108f   : > { %v13953_v40 = vsel %vm4788_vm15, %v4754_v35, %v4796_v37  ;;  %v13955_v17 = vsel %vm4787_vm7, %v4749_v54, %v4795_v45  ;;  %v8590_v4 = vpop.f32.mrb[123].mxu0  ;;  %vm5198_vm15 = vcmask 523264   ;;  %vm15082_vm7 = vcmask 1046528  }
0x1090   : > { %v8591_v21 = vadd.f32 %v8590_v4, %v8589_v9  ;;  %v10026_v53 = vpack.c.bf16 %v13953_v40, %v13955_v17  ;;  %v4811_v13 = vmul.f32 %v13955_v17, %v13955_v17  ;;  %v4812_v8 = vmul.f32 %v13953_v40, %v13953_v40 }
0x1091   : > { %v8592_v0 = vpop.f32.mrb[124].mxu0  ;;  %v9183_v62 = vpop.f32.mrb[86].mxu1 }
0x1092   : > { %v4659_v52 = vadd.f32 %v8591_v21, %v13728_v34  ;;  %v8593_v44 = vpop.f32.mrb[125].mxu0  ;;  %v4758_v14 = vpop.f32.mrb[87].mxu1  ;;  %10027 = vmatprep.subr.bf16.mxu0 %v10026_v53  ;;  %v10042_v33 = vpack.c.bf16 %v4812_v8, %v4811_v13 }
0x1093   : > { %v8594_v61 = vadd.f32 %v8593_v44, %v8592_v0  ;;  %v4759_v19 = vadd.f32 %v4758_v14, %v4654_v59  ;;  %10029 = vmatpush3.bf16.msra.mxu0 %v10026_v53 }
0x1094   : > { %v4764_v5 = vadd.f32 %v9183_v62, %v4659_v52 }
0x1095   : > { %vm4789_vm1 = vcmp.ge.f32.partialorder %v4759_v19, 0.0  ;;  %v4797_v24 = vmul.f32 0.01, %v4759_v19  ;;  %v8595_v49 = vpop.f32.mrb[126].mxu0  ;;  %v4664_v10 = vadd.f32 %v8594_v61, %v13736_v39 }
0x1096   : > { %vm4790_vm12 = vcmp.ge.f32.partialorder %v4764_v5, 0.0  ;;  %v4798_v11 = vmul.f32 0.01, %v4764_v5  ;;  %v8596_v60 = vpop.f32.mrb[127].mxu0 }
0x1097   : > { %v13961_v15 = vsel %vm4789_vm1, %v4759_v19, %v4797_v24  ;;  %v8597_v43 = vadd.f32 %v8596_v60, %v8595_v49  ;;  %v4976_v19 = vrot.slane %v13808_v48, %v13362_v6  ;;  %v15066_v49 = vld [vmem:[#allocation61_spill] sm:$0xff]  ;;  %v15068_v60 = vld [vmem:[#allocation62_spill] sm:$0xff]  ;;  %vm15083_vm1 = vmmov %vm15082_vm7 }
0x1098   : > { %v13963_v41 = vsel %vm4790_vm12, %v4764_v5, %v4798_v11  ;;  %v4813_v35 = vmul.f32 %v13961_v15, %v13961_v15  ;;  %vm15084_vm12 = vmmov %vm15083_vm1 }
0x1099   : > { %v8598_v34 = vpop.f32.mrb[128].mxu0  ;;  %v4669_v36 = vadd.f32 %v8597_v43, %v13738_v23  ;;  %v9186_v16 = vpop.f32.mrb[88].mxu1  ;;  %v10030_v42 = vpack.c.bf16 %v13963_v41, %v13961_v15  ;;  %v4814_v46 = vmul.f32 %v13963_v41, %v13963_v41  ;;  %v15070_v43 = vld [vmem:[#allocation63_spill] sm:$0xff] }
0x109a   : > { %v8599_v30 = vpop.f32.mrb[129].mxu0  ;;  %v4768_v26 = vpop.f32.mrb[89].mxu1 }
0x109b   : > { %v4774_v20 = vadd.f32 %v9186_v16, %v4669_v36  ;;  %v8600_v56 = vadd.f32 %v8599_v30, %v8598_v34  ;;  %v4769_v39 = vadd.f32 %v4768_v26, %v4664_v10  ;;  %10031 = vmatprep.subr.bf16.mxu0 %v10030_v42  ;;  %v10046_v54 = vpack.c.bf16 %v4814_v46, %v4813_v35  ;;  %v15074_v34 = vld [vmem:[#allocation65_spill] sm:$0xff]  ;;  %v15078_v36 = vld [vmem:[#allocation67_spill] sm:$0xff]  ;;  %v15080_v16 = vld [vmem:[#allocation68_spill] sm:$0xff] }
0x109c   : > { %10033 = vmatpush3.bf16.msra.mxu0 %v10030_v42 }
0x109d   : > { %vm4792_vm14 = vcmp.ge.f32.partialorder %v4774_v20, 0.0  ;;  %v4800_v18 = vmul.f32 0.01, %v4774_v20  ;;  %vm4791_vm11 = vcmp.ge.f32.partialorder %v4769_v39, 0.0  ;;  %v4799_v3 = vmul.f32 0.01, %v4769_v39 }
0x109e   : > { %v8601_v31 = vpop.f32.mrb[130].mxu0  ;;  %v9189_v7 = vpop.f32.mrb[90].mxu1  ;;  %v4674_v12 = vadd.f32 %v8600_v56, %v13746_v51 }
0x109f   : > { %v13969_v23 = vsel %vm4792_vm14, %v4774_v20, %v4800_v18  ;;  %v13971_v57 = vsel %vm4791_vm11, %v4769_v39, %v4799_v3  ;;  %v8602_v27 = vpop.f32.mrb[131].mxu0  ;;  %v4778_v32 = vpop.f32.mrb[91].mxu1  ;;  %vm15085_vm14 = vmmov %vm15083_vm1 }
0x10a0   : > { %v8603_v25 = vadd.f32 %v8602_v27, %v8601_v31  ;;  %v4779_v38 = vadd.f32 %v4778_v32, %v4674_v12  ;;  %v10034_v58 = vpack.c.bf16 %v13969_v23, %v13971_v57  ;;  %v4815_v37 = vmul.f32 %v13971_v57, %v13971_v57  ;;  %vm15086_vm11 = vmmov %vm15083_vm1 }
0x10a1   : > { %v4816_v45 = vmul.f32 %v13969_v23, %v13969_v23 }
0x10a2   : > { %v4679_v2 = vadd.f32 %v8603_v25, %v13748_v63  ;;  %10035 = vmatprep.subr.bf16.mxu0 %v10034_v58  ;;  %v4801_v29 = vmul.f32 0.01, %v4779_v38  ;;  %vm4793_vm9 = vcmp.ge.f32.partialorder %v4779_v38, 0.0 }
0x10a3   : > { %10037 = vmatpush3.bf16.msra.mxu0 %v10034_v58  ;;  %v10050_v9 = vpack.c.bf16 %v4816_v45, %v4815_v37 }
0x10a4   : > { %v4784_v50 = vadd.f32 %v9189_v7, %v4679_v2  ;;  %v13982_v47 = vsel %vm4793_vm9, %v4779_v38, %v4801_v29  ;;  %vm15087_vm9 = vmmov %vm15083_vm1 }
0x10a5   : > { %v4817_v4 = vmul.f32 %v13982_v47, %v13982_v47 }
0x10a6   : > { %vm4794_vm2 = vcmp.ge.f32.partialorder %v4784_v50, 0.0  ;;  %v4802_v51 = vmul.f32 0.01, %v4784_v50 }
0x10a8   : > { %v13980_v28 = vsel %vm4794_vm2, %v4784_v50, %v4802_v51  ;;  %vm15088_vm2 = vmmov %vm15083_vm1 }
0x10a9   : > { %v10038_v63 = vpack.c.bf16 %v13980_v28, %v13982_v47  ;;  %v4818_v59 = vmul.f32 %v13980_v28, %v13980_v28 }
0x10ab   : > { %10039 = vmatprep.subr.bf16.mxu0 %v10038_v63  ;;  %v10054_v21 = vpack.c.bf16 %v4818_v59, %v4817_v4  ;;  %v5391_v59 = vld [vmem:[#allocation19 + $0x18] sm:$0xff]  ;;  %v5388_v4 = vld [vmem:[#allocation19] sm:$0xff] }
0x10ac   : > { %10041 = vmatpush3.bf16.msra.mxu0 %v10038_v63 }
0x10ad   : > { %10043 = vmatprep.subr.bf16.mxu0 %v10042_v33 }
0x10b0   : > { %10045 = vmatpush3.bf16.msra.mxu0 %v10042_v33 }
0x10b1   : > { %10047 = vmatprep.subr.bf16.mxu0 %v10046_v54 }
0x10b4   : > { %10049 = vmatpush3.bf16.msra.mxu0 %v10046_v54 }
0x10b5   : > { %10051 = vmatprep.subr.bf16.mxu0 %v10050_v9 }
0x10b8   : > { %10053 = vmatpush3.bf16.msra.mxu0 %v10050_v9 }
0x10b9   : > { %10055 = vmatprep.subr.bf16.mxu0 %v10054_v21 }
0x10bc   : > { %10057 = vmatpush3.bf16.msra.mxu0 %v10054_v21 }
0x10bf   : > { %9223 = vmatmul.mubr.f32.vlgmr.msra.gmra.mrb[132].mxu0 %v13774_v55  ;;  %v4982_v55 = vrot.slane %v13808_v48, %v15066_v49  ;;  %v15072_v48 = vld [vmem:[#allocation64_spill] sm:$0xff] }
0x1192   : > { %v9224_v53 = vpop.f32.mrb[132].mxu0 }
0x1193   : > { %v4885_v0 = vpop.f32.mrb[133].mxu0 }
0x1194   : > { %9257 = vmatprep.mubr.f32.mxu1 %v4885_v0  ;;  %v5393_v0 = vld [vmem:[#allocation19 + $0x28] sm:$0xff] }
0x1195   : > { %9258 = vmatmul.mubr.f32.vlgmr.msra.gmra.mrb[92].mxu1 %v9224_v53  ;;  %v5390_v53 = vld [vmem:[#allocation19 + $0x10] sm:$0xff] }
0x1196   : > { %5048 = vmatprep.mubr.f32.mxu1 %v14866_v22 }
0x1268   : > { %v9259_v62 = vpop.f32.mrb[92].mxu1 }
0x1269   : > { %v4960_v52 = vpop.f32.mrb[93].mxu1 }
0x126a   : > { %v4969_v44 = vmul.f32 %v4960_v52, %v4960_v52 }
0x126c   : > { %v4970_v14 = vsub.f32 %v9259_v62, %v4969_v44  ;;  %v5395_v62 = vld [vmem:[#allocation19 + $0x38] sm:$0xff] }
0x126d   : > { %v10110_v44 = vpack.c.bf16 %v5395_v62, %v5393_v0  ;;  %v5426_v0 = vld [vmem:[#allocation19 + $0x130] sm:$0xff]  ;;  %v5429_v62 = vld [vmem:[#allocation19 + $0x148] sm:$0xff] }
0x126e   : > { %v4971_v61 = vadd.f32 1e-05, %v4970_v14  ;;  %v5394_v14 = vld [vmem:[#allocation19 + $0x30] sm:$0xff] }
0x1270   : > { %10941 = vrsqrt.f32 %v4971_v61  ;;  %v5397_v61 = vld [vmem:[#allocation19 + $0x48] sm:$0xff] }
0x127a   : > { %v10942_v5 = vpop.eup %10941 }
0x127b   : > { %v4977_v24 = vmul.f32 %v10942_v5, %v4976_v19  ;;  %v5399_v19 = vld [vmem:[#allocation19 + $0x58] sm:$0xff] }
0x127d   : > { %v4978_v10 = vmul.f32 %v4977_v24, %v4960_v52  ;;  %v10108_v52 = vpack.c.bf16 %v5390_v53, %v5388_v4  ;;  %v5424_v53 = vld [vmem:[#allocation19 + $0x120] sm:$0xff] }
0x127f   : > { %v4983_v11 = vsub.f32 %v4982_v55, %v4978_v10  ;;  %v5396_v55 = vld [vmem:[#allocation19 + $0x40] sm:$0xff]  ;;  %v5398_v10 = vld [vmem:[#allocation19 + $0x50] sm:$0xff] }
0x1281   : > { %4984 = vmatprep.subr.mxu1 %v4983_v11  ;;  %v5401_v11 = vld [vmem:[#allocation19 + $0x68] sm:$0xff] }
0x1282   : > { %4985 = vmatpush1.msra.mxu1 %v4977_v24  ;;  %v10114_v24 = vpack.c.bf16 %v5399_v19, %v5397_v61  ;;  %v5430_v61 = vld [vmem:[#allocation19 + $0x150] sm:$0xff]  ;;  %v5433_v19 = vld [vmem:[#allocation19 + $0x168] sm:$0xff] }
0x1283   : > { %8148 = vmatmul.mubr.msk.f32.vlgmr.msra.gmra.mrb[94].mxu1 %vm15067_vm6, %v13817_v1  ;;  %v15076_v1 = vld [vmem:[#allocation66_spill] sm:$0xff]  ;;  %vm15089_vm6 = vmmov %vm15083_vm1 }
0x1284   : > { %5054 = vmatprep.mubr.f32.mxu1 %v14866_v22 }
0x1287   : > { %8149 = vmatmul.mubr.msk.f32.gmra.mrb[96].mxu1 %vm15069_vm4, %v15068_v60  ;;  %v5403_v60 = vld [vmem:[#allocation19 + $0x78] sm:$0xff] }
0x1288   : > { %5060 = vmatprep.mubr.f32.mxu1 %v14866_v22 }
0x128b   : > { %8150 = vmatmul.mubr.msk.f32.gmra.mrb[98].mxu1 %vm15071_vm0, %v15070_v43  ;;  %v10116_v43 = vpack.c.bf16 %v5398_v10, %v5396_v55  ;;  %v5432_v10 = vld [vmem:[#allocation19 + $0x160] sm:$0xff]  ;;  %vm15094_vm0 = vcmask 1040384  }
0x128c   : > { %5066 = vmatprep.mubr.f32.mxu1 %v14866_v22 }
0x128f   : > { %8151 = vmatmul.mubr.msk.f32.gmra.mrb[100].mxu1 %vm15073_vm10, %v15072_v48  ;;  %v10118_v48 = vpack.c.bf16 %v5403_v60, %v5401_v11  ;;  %v5434_v11 = vld [vmem:[#allocation19 + $0x170] sm:$0xff]  ;;  %v5437_v60 = vld [vmem:[#allocation19 + $0x188] sm:$0xff]  ;;  %vm15095_vm10 = vmmov %vm15083_vm1 }
0x1290   : > { %5072 = vmatprep.mubr.f32.mxu1 %v14866_v22 }
0x1293   : > { %8152 = vmatmul.mubr.msk.f32.gmra.mrb[102].mxu1 %vm15075_vm13, %v15074_v34  ;;  %v5400_v34 = vld [vmem:[#allocation19 + $0x60] sm:$0xff]  ;;  %vm15096_vm13 = vmmov %vm15094_vm0 }
0x1294   : > { %5078 = vmatprep.mubr.f32.mxu1 %v14866_v22 }
0x1297   : > { %8153 = vmatmul.mubr.msk.f32.gmra.mrb[104].mxu1 %vm15077_vm8, %v15076_v1  ;;  %v5402_v1 = vld [vmem:[#allocation19 + $0x70] sm:$0xff] }
0x1298   : > { %5084 = vmatprep.mubr.f32.mxu1 %v14866_v22 }
0x129b   : > { %8154 = vmatmul.mubr.msk.f32.gmra.mrb[106].mxu1 %vm15079_vm5, %v15078_v36  ;;  %v5405_v36 = vld [vmem:[#allocation19 + $0x88] sm:$0xff]  ;;  %vm15100_vm5 = vmmov %vm15094_vm0 }
0x129c   : > { %5090 = vmatprep.mubr.f32.mxu1 %v14866_v22 }
0x129f   : > { %8155 = vmatmul.mubr.msk.f32.gmra.mrb[108].mxu1 %vm15081_vm3, %v15080_v16  ;;  %v5407_v16 = vld [vmem:[#allocation19 + $0x98] sm:$0xff]  ;;  %vm15101_vm3 = vmmov %vm15094_vm0 }
0x1356   : > { %v5050_v42 = vpop.f32.mrb[94].mxu1 }
0x1357   : > { %v5097_v30 = vmul.f32 %v5050_v42, %v13955_v17  ;;  %v5052_v26 = vpop.f32.mrb[95].mxu1  ;;  %v10120_v42 = vpack.c.bf16 %v5402_v1, %v5400_v34  ;;  %v5436_v1 = vld [vmem:[#allocation19 + $0x180] sm:$0xff] }
0x1359   : > { %v14028_v20 = vadd.f32 %v5097_v30, %v5052_v26  ;;  %v10122_v30 = vpack.c.bf16 %v5407_v16, %v5405_v36  ;;  %v5404_v26 = vld [vmem:[#allocation19 + $0x80] sm:$0xff]  ;;  %v5438_v36 = vld [vmem:[#allocation19 + $0x190] sm:$0xff]  ;;  %v5441_v16 = vld [vmem:[#allocation19 + $0x1a8] sm:$0xff] }
0x135a   : > { %v5056_v56 = vpop.f32.mrb[96].mxu1 }
0x135b   : > { %v5098_v39 = vmul.f32 %v5056_v56, %v13953_v40  ;;  %v5058_v18 = vpop.f32.mrb[97].mxu1  ;;  %v5406_v56 = vld [vmem:[#allocation19 + $0x90] sm:$0xff] }
0x135d   : > { %v14031_v3 = vadd.f32 %v5098_v39, %v5058_v18  ;;  %v5409_v39 = vld [vmem:[#allocation19 + $0xa8] sm:$0xff]  ;;  %v5411_v18 = vld [vmem:[#allocation19 + $0xb8] sm:$0xff] }
0x135e   : > { %v5062_v31 = vpop.f32.mrb[98].mxu1 }
0x135f   : > { %v10915_v7 = vpack.i.bf16 %v14031_v3, %v14028_v20  ;;  %v5099_v12 = vmul.f32 %v5062_v31, %v13961_v15  ;;  %v5064_v27 = vpop.f32.mrb[99].mxu1  ;;  %v10124_v31 = vpack.c.bf16 %v5406_v56, %v5404_v26  ;;  %v5440_v56 = vld [vmem:[#allocation19 + $0x1a0] sm:$0xff] }
0x1361   : > { %v14036_v32 = vadd.f32 %v5099_v12, %v5064_v27  ;;  %10916 = vrot.lane.b32.xlu1 %v10915_v7, %s11621_s18  ;;  %v10126_v7 = vpack.c.bf16 %v5411_v18, %v5409_v39  ;;  %v5408_v12 = vld [vmem:[#allocation19 + $0xa0] sm:$0xff]  ;;  %v5410_v27 = vld [vmem:[#allocation19 + $0xb0] sm:$0xff]  ;;  %v5445_v18 = vld [vmem:[#allocation19 + $0x1c8] sm:$0xff] }
0x1362   : > { %v5068_v17 = vpop.f32.mrb[100].mxu1  ;;  %v5442_v39 = vld [vmem:[#allocation19 + $0x1b0] sm:$0xff] }
0x1363   : > { %v5100_v25 = vmul.f32 %v5068_v17, %v13963_v41  ;;  %5125 = vrot.lane.b32.xlu0 %v14036_v32, %s11621_s18  ;;  %v5070_v40 = vpop.f32.mrb[101].mxu1  ;;  %v5413_v17 = vld [vmem:[#allocation19 + $0xc8] sm:$0xff] }
0x1365   : > { %v14040_v38 = vadd.f32 %v5100_v25, %v5070_v40  ;;  %v5415_v25 = vld [vmem:[#allocation19 + $0xd8] sm:$0xff]  ;;  %v10128_v40 = vpack.c.bf16 %v5410_v27, %v5408_v12  ;;  %v5444_v27 = vld [vmem:[#allocation19 + $0x1c0] sm:$0xff] }
0x1366   : > { %v5074_v58 = vpop.f32.mrb[102].mxu1 }
0x1367   : > { %v5101_v2 = vmul.f32 %v5074_v58, %v13971_v57  ;;  %v5076_v50 = vpop.f32.mrb[103].mxu1  ;;  %v10130_v58 = vpack.c.bf16 %v5415_v25, %v5413_v17  ;;  %v5446_v17 = vld [vmem:[#allocation19 + $0x1d0] sm:$0xff] }
0x1368   : > { %v10164_v25 = vpack.c.bf16 %v5446_v17, %v5444_v27  ;;  %v15090_v17 = vld [vmem:[#allocation53_spill] sm:$0xff] }
0x1369   : > { %v14043_v29 = vadd.f32 %v5101_v2, %v5076_v50  ;;  %v5412_v2 = vld [vmem:[#allocation19 + $0xc0] sm:$0xff]  ;;  %v5414_v50 = vld [vmem:[#allocation19 + $0xd0] sm:$0xff] }
0x136a   : > { %v5080_v15 = vpop.f32.mrb[104].mxu1 }
0x136b   : > { %v10920_v51 = vpack.i.bf16 %v14043_v29, %v14040_v38  ;;  %v5102_v13 = vmul.f32 %v5080_v15, %v13969_v23  ;;  %v5082_v8 = vpop.f32.mrb[105].mxu1  ;;  %v5194_v23 = vld [vmem:[#allocation17] sm:$0xff]  ;;  %v5417_v15 = vld [vmem:[#allocation19 + $0xe8] sm:$0xff] }
0x136c   : > { %9276 = vmatprep.mubr.msk.f32.mxu0 %vm5198_vm15, %v5194_v23  ;;  %v5422_v23 = vld [vmem:[#allocation19 + $0x110] sm:$0xff] }
0x136d   : > { %v14048_v63 = vadd.f32 %v5102_v13, %v5082_v8  ;;  %10921 = vrot.lane.b32.xlu1 %v10920_v51, %s11621_s18  ;;  %v5419_v51 = vld [vmem:[#allocation19 + $0xf8] sm:$0xff]  ;;  %v10132_v13 = vpack.c.bf16 %v5414_v50, %v5412_v2 }
0x136e   : > { %v5086_v41 = vpop.f32.mrb[106].mxu1  ;;  %v10134_v8 = vpack.c.bf16 %v5419_v51, %v5417_v15 }
0x136f   : > { %v5103_v33 = vmul.f32 %v5086_v41, %v13982_v47  ;;  %v5088_v35 = vpop.f32.mrb[107].mxu1  ;;  %v5389_v47 = vld [vmem:[#allocation19 + $0x8] sm:$0xff]  ;;  %v5416_v41 = vld [vmem:[#allocation19 + $0xe0] sm:$0xff] }
0x1370   : > { %v10106_v21 = vpack.c.bf16 %v5391_v59, %v5389_v47  ;;  %v5425_v47 = vld [vmem:[#allocation19 + $0x128] sm:$0xff]  ;;  %v5427_v59 = vld [vmem:[#allocation19 + $0x138] sm:$0xff] }
0x1371   : > { %v14051_v46 = vadd.f32 %v5103_v33, %v5088_v35  ;;  %v5418_v33 = vld [vmem:[#allocation19 + $0xf0] sm:$0xff]  ;;  %v5421_v35 = vld [vmem:[#allocation19 + $0x108] sm:$0xff] }
0x1372   : > { %v5092_v57 = vpop.f32.mrb[108].mxu1  ;;  %10107 = vmatprep.subr.bf16.mxu1 %v10106_v21  ;;  %v10142_v21 = vpack.c.bf16 %v5427_v59, %v5425_v47 }
0x1373   : > { %v10925_v54 = vpack.i.bf16 %v14051_v46, %v14048_v63  ;;  %v5104_v37 = vmul.f32 %v5092_v57, %v13980_v28  ;;  %v5094_v45 = vpop.f32.mrb[109].mxu1  ;;  %v5392_v28 = vld [vmem:[#allocation19 + $0x20] sm:$0xff]  ;;  %10109 = vmatpush1.bf16.msra.mxu1 %v10108_v52  ;;  %v5423_v57 = vld [vmem:[#allocation19 + $0x118] sm:$0xff] }
0x1374   : > { %v10112_v5 = vpack.c.bf16 %v5394_v14, %v5392_v28  ;;  %10111 = vmatprep.subr.bf16.mxu1 %v10110_v44  ;;  %v5431_v52 = vld [vmem:[#allocation19 + $0x158] sm:$0xff]  ;;  %v10144_v44 = vpack.c.bf16 %v5426_v0, %v5424_v53  ;;  %v5428_v14 = vld [vmem:[#allocation19 + $0x140] sm:$0xff] }
0x1375   : > { %v14056_v9 = vadd.f32 %v5104_v37, %v5094_v45  ;;  %10926 = vrot.lane.b32.xlu0 %v10925_v54, %s11621_s18  ;;  %v10136_v54 = vpack.c.bf16 %v5418_v33, %v5416_v41  ;;  %v10138_v37 = vpack.c.bf16 %v5423_v57, %v5421_v35  ;;  %v5420_v45 = vld [vmem:[#allocation19 + $0x100] sm:$0xff]  ;;  %v10146_v28 = vpack.c.bf16 %v5431_v52, %v5429_v62 }
0x1376   : > { %v10140_v4 = vpack.c.bf16 %v5422_v23, %v5420_v45 }
0x1377   : > { %5135 = vrot.lane.b32.xlu1 %v14056_v9, %s11621_s18  ;;  %10113 = vmatpush1.bf16.msra.mxu1 %v10112_v5  ;;  %v5435_v5 = vld [vmem:[#allocation19 + $0x178] sm:$0xff]  ;;  %s15170_s18 = sld [smem:[#allocation105_spill]] }
0x1378   : > { %10115 = vmatprep.subr.bf16.mxu1 %v10114_v24  ;;  %v10148_v24 = vpack.c.bf16 %v5430_v61, %v5428_v14  ;;  %v10150_v55 = vpack.c.bf16 %v5435_v5, %v5433_v19 }
0x137b   : > { %10117 = vmatpush1.bf16.msra.mxu1 %v10116_v43  ;;  %v5439_v43 = vld [vmem:[#allocation19 + $0x198] sm:$0xff] }
0x137c   : > { %10119 = vmatprep.subr.bf16.mxu1 %v10118_v48  ;;  %v10152_v48 = vpack.c.bf16 %v5434_v11, %v5432_v10  ;;  %v10154_v34 = vpack.c.bf16 %v5439_v43, %v5437_v60 }
0x137f   : > { %10121 = vmatpush1.bf16.msra.mxu1 %v10120_v42  ;;  %v5443_v42 = vld [vmem:[#allocation19 + $0x1b8] sm:$0xff] }
0x1380   : > { %10123 = vmatprep.subr.bf16.mxu1 %v10122_v30  ;;  %v10156_v30 = vpack.c.bf16 %v5438_v36, %v5436_v1  ;;  %v10158_v26 = vpack.c.bf16 %v5443_v42, %v5441_v16  ;;  %v5195_v36 = vld [vmem:[#allocation17 + $0x8] sm:$0xff]  ;;  %v5196_v16 = vld [vmem:[#allocation17 + $0x10] sm:$0xff]  ;;  %v5197_v42 = vld [vmem:[#allocation17 + $0x18] sm:$0xff] }
0x1383   : > { %10125 = vmatpush1.bf16.msra.mxu1 %v10124_v31  ;;  %v5447_v31 = vld [vmem:[#allocation19 + $0x1d8] sm:$0xff] }
0x1384   : > { %10127 = vmatprep.subr.bf16.mxu1 %v10126_v7  ;;  %v10160_v7 = vpack.c.bf16 %v5442_v39, %v5440_v56  ;;  %v10162_v12 = vpack.c.bf16 %v5447_v31, %v5445_v18  ;;  %v5448_v39 = vld [vmem:[#allocation19 + $0x1e0] sm:$0xff]  ;;  %v5450_v18 = vld [vmem:[#allocation19 + $0x1f0] sm:$0xff] }
0x1385   : > { %v10168_v31 = vpack.c.bf16 %v5450_v18, %v5448_v39  ;;  %v5468_v39 = vld [vmem:[#allocation19 + $0x280] sm:$0xff]  ;;  %v5470_v18 = vld [vmem:[#allocation19 + $0x290] sm:$0xff] }
0x1387   : > { %10129 = vmatpush1.bf16.msra.mxu1 %v10128_v40 }
0x1388   : > { %10131 = vmatprep.subr.bf16.mxu1 %v10130_v58 }
0x138b   : > { %10133 = vmatpush1.bf16.msra.mxu1 %v10132_v13 }
0x138c   : > { %10135 = vmatprep.subr.bf16.mxu1 %v10134_v8 }
0x138f   : > { %10137 = vmatpush1.bf16.msra.mxu1 %v10136_v54 }
0x1390   : > { %10139 = vmatprep.subr.bf16.mxu1 %v10138_v37 }
0x1393   : > { %10141 = vmatpush1.bf16.msra.mxu1 %v10140_v4 }
0x1394   : > { %10143 = vmatprep.subr.bf16.mxu1 %v10142_v21 }
0x1397   : > { %10145 = vmatpush1.bf16.msra.mxu1 %v10144_v44 }
0x1398   : > { %10147 = vmatprep.subr.bf16.mxu1 %v10146_v28 }
0x139b   : > { %10149 = vmatpush1.bf16.msra.mxu1 %v10148_v24 }
0x139c   : > { %10151 = vmatprep.subr.bf16.mxu1 %v10150_v55 }
0x139f   : > { %10153 = vmatpush1.bf16.msra.mxu1 %v10152_v48 }
0x13a0   : > { %10155 = vmatprep.subr.bf16.mxu1 %v10154_v34 }
0x13a3   : > { %10157 = vmatpush1.bf16.msra.mxu1 %v10156_v30  ;;  %v5449_v30 = vld [vmem:[#allocation19 + $0x1e8] sm:$0xff] }
0x13a4   : > { %10159 = vmatprep.subr.bf16.mxu1 %v10158_v26  ;;  %v5451_v26 = vld [vmem:[#allocation19 + $0x1f8] sm:$0xff] }
0x13a5   : > { %v10166_v56 = vpack.c.bf16 %v5451_v26, %v5449_v30 }
0x13a7   : > { %10161 = vmatpush1.bf16.msra.mxu1 %v10160_v7  ;;  %v5453_v7 = vld [vmem:[#allocation19 + $0x208] sm:$0xff] }
0x13a8   : > { %10163 = vmatprep.subr.bf16.mxu1 %v10162_v12  ;;  %v5455_v12 = vld [vmem:[#allocation19 + $0x218] sm:$0xff] }
0x13a9   : > { %v10170_v27 = vpack.c.bf16 %v5455_v12, %v5453_v7  ;;  %v5475_v7 = vld [vmem:[#allocation19 + $0x2b8] sm:$0xff]  ;;  %v10188_v12 = vpack.c.bf16 %v5470_v18, %v5468_v39  ;;  %v14201_v18 = vld [vmem:[#allocation23 + $0x8] sm:$0xff] }
0x13aa   : > { %v5764_v39 = vld [vmem:[#allocation22 + $0x18] sm:$0xff] }
0x13ab   : > { %10165 = vmatpush1.bf16.msra.mxu1 %v10164_v25  ;;  %v5300_v25 = vand.u32 3, %v15090_v17 }
0x13ac   : > { %10167 = vmatprep.subr.bf16.mxu1 %v10166_v56 }
0x13ad   : > { %vm14082_vm4 = vcmp.ne.s32.totalorder %v5300_v25, 0 }
0x13af   : > { %10169 = vmatpush1.bf16.msra.mxu1 %v10168_v31  ;;  %v5473_v31 = vld [vmem:[#allocation19 + $0x2a8] sm:$0xff] }
0x13b0   : > { %10171 = vmatprep.subr.bf16.mxu1 %v10170_v27  ;;  %v10190_v27 = vpack.c.bf16 %v5475_v7, %v5473_v31  ;;  %v5765_v7 = vld [vmem:[#allocation22 + $0x20] sm:$0xff] }
0x13d3   : > { %v10917_v40 = vpop.permute.xlu1 %10916 }
0x13d4   : > { %v10919_v58 = vunpack.i.h.bf16 %v10917_v40  ;;  %v10918_v2 = vunpack.i.l.bf16 %v10917_v40  ;;  %v5452_v40 = vld [vmem:[#allocation19 + $0x200] sm:$0xff] }
0x13d5   : > { %v5126_v50 = vpop.permute.xlu0 %5125 }
0x13d6   : > { %v5146_v15 = vmax.f32 %v14031_v3, %v10919_v58  ;;  %v5145_v51 = vmax.f32 %v14028_v20, %v10918_v2  ;;  %v5147_v13 = vmax.f32 %v14036_v32, %v5126_v50  ;;  %v5454_v58 = vld [vmem:[#allocation19 + $0x210] sm:$0xff]  ;;  %v5457_v50 = vld [vmem:[#allocation19 + $0x228] sm:$0xff] }
0x13d8   : > { %v5162_v8 = vrot.slane %v5146_v15, 1  ;;  %v5161_v41 = vrot.slane %v5145_v51, 1  ;;  %v5164_v33 = vrot.slane %v5147_v13, 1 }
0x13da   : > { %v5163_v35 = vsel %vm15082_vm7, %v5161_v41, %v5162_v8  ;;  %v5165_v57 = vsel %vm15083_vm1, %v5162_v8, %v5164_v33  ;;  %vm15102_vm7 = vmmov %vm15083_vm1 }
0x13db   : > { %v5186_v54 = vmax.f32 %v5145_v51, %v5163_v35  ;;  %v5187_v37 = vmax.f32 %v5146_v15, %v5165_v57  ;;  %v5459_v15 = vld [vmem:[#allocation19 + $0x238] sm:$0xff] }
0x13dd   : > { %v10090_v45 = vpack.c.bf16 %v5187_v37, %v5186_v54  ;;  %v15093_v54 = vld [vmem:[#allocation54_spill] sm:$0xff] }
0x13de   : > { %v5307_v37 = vand.u32 3, %v15093_v54 }
0x13df   : > { %10091 = vmatprep.subr.bf16.mxu0 %v10090_v45  ;;  %v10922_v23 = vpop.permute.xlu1 %10921 }
0x13e0   : > { %v10924_v47 = vunpack.i.h.bf16 %v10922_v23  ;;  %v10923_v59 = vunpack.i.l.bf16 %v10922_v23  ;;  %10093 = vmatpush3.bf16.msra.mxu0 %v10090_v45  ;;  %v5456_v45 = vld [vmem:[#allocation19 + $0x220] sm:$0xff]  ;;  %v5458_v23 = vld [vmem:[#allocation19 + $0x230] sm:$0xff]  ;;  %vm14100_vm8 = vcmp.ne.s32.totalorder %v5307_v37, 0 }
0x13e2   : > { %v5149_v3 = vmax.f32 %v14043_v29, %v10924_v47  ;;  %v5148_v20 = vmax.f32 %v14040_v38, %v10923_v59  ;;  %v10174_v47 = vpack.c.bf16 %v5459_v15, %v5457_v50  ;;  %v5479_v50 = vld [vmem:[#allocation19 + $0x2d8] sm:$0xff] }
0x13e4   : > { %v5168_v32 = vrot.slane %v5149_v3, 1  ;;  %v5166_v4 = vrot.slane %v5148_v20, 1 }
0x13e6   : > { %v5169_v21 = vsel %vm15084_vm12, %v5166_v4, %v5168_v32  ;;  %v5167_v53 = vsel %vm15085_vm14, %v5164_v33, %v5166_v4  ;;  %v5461_v4 = vld [vmem:[#allocation19 + $0x248] sm:$0xff] }
0x13e7   : > { %v5189_v0 = vmax.f32 %v5148_v20, %v5169_v21  ;;  %v10927_v62 = vpop.permute.xlu0 %10926  ;;  %v5188_v52 = vmax.f32 %v5147_v13, %v5167_v53  ;;  %v5463_v21 = vld [vmem:[#allocation19 + $0x258] sm:$0xff] }
0x13e8   : > { %v10929_v44 = vunpack.i.h.bf16 %v10927_v62  ;;  %v10928_v28 = vunpack.i.l.bf16 %v10927_v62 }
0x13e9   : > { %v5136_v14 = vpop.permute.xlu1 %5135  ;;  %v10094_v61 = vpack.c.bf16 %v5189_v0, %v5188_v52  ;;  %v10176_v52 = vpack.c.bf16 %v5458_v23, %v5456_v45  ;;  %v5480_v23 = vld [vmem:[#allocation19 + $0x2e0] sm:$0xff] }
0x13ea   : > { %v5151_v19 = vmax.f32 %v14051_v46, %v10929_v44  ;;  %v5150_v5 = vmax.f32 %v14048_v63, %v10928_v28  ;;  %v5152_v29 = vmax.f32 %v14056_v9, %v5136_v14 }
0x13eb   : > { %10095 = vmatprep.subr.bf16.mxu0 %v10094_v61 }
0x13ec   : > { %v5172_v38 = vrot.slane %v5151_v19, 1  ;;  %v5170_v24 = vrot.slane %v5150_v5, 1  ;;  %v5174_v55 = vrot.slane %v5152_v29, 1  ;;  %10097 = vmatpush3.bf16.msra.mxu0 %v10094_v61  ;;  %v15099_v61 = vld [vmem:[#allocation58_spill] sm:$0xff] }
0x13ee   : > { %v5173_v10 = vsel %vm15086_vm11, %v5170_v24, %v5172_v38  ;;  %v5185_v11 = vsel %vm15087_vm9, %v5174_v55, %v5161_v41  ;;  %v5171_v60 = vsel %vm15088_vm2, %v5168_v32, %v5170_v24  ;;  %v5175_v43 = vsel %vm15089_vm6, %v5172_v38, %v5174_v55  ;;  %v5462_v38 = vld [vmem:[#allocation19 + $0x250] sm:$0xff]  ;;  %v5465_v55 = vld [vmem:[#allocation19 + $0x268] sm:$0xff] }
0x13ef   : > { %v5191_v48 = vmax.f32 %v5150_v5, %v5173_v10  ;;  %v5193_v34 = vmax.f32 %v5152_v29, %v5185_v11  ;;  %v5190_v46 = vmax.f32 %v5149_v3, %v5171_v60  ;;  %v5192_v1 = vmax.f32 %v5151_v19, %v5175_v43  ;;  %v5460_v29 = vld [vmem:[#allocation19 + $0x240] sm:$0xff]  ;;  %v5467_v10 = vld [vmem:[#allocation19 + $0x278] sm:$0xff] }
0x13f0   : > { %v10172_v41 = vpack.c.bf16 %v5454_v58, %v5452_v40  ;;  %v5314_v19 = vand.u32 3, %v15099_v61  ;;  %v10178_v5 = vpack.c.bf16 %v5463_v21, %v5461_v4  ;;  %v5472_v40 = vld [vmem:[#allocation19 + $0x2a0] sm:$0xff]  ;;  %v5474_v58 = vld [vmem:[#allocation19 + $0x2b0] sm:$0xff]  ;;  %vm14132_vm11 = vcmp.ne.s32.totalorder %v5300_v25, 3 }
0x13f1   : > { %v10098_v63 = vpack.c.bf16 %v5191_v48, %v5190_v46  ;;  %v10102_v9 = vpack.c.bf16 %v5193_v34, %v5192_v1  ;;  %v10180_v34 = vpack.c.bf16 %v5462_v38, %v5460_v29  ;;  %v15105_v46 = vld [vmem:[#allocation55_spill] sm:$0xff]  ;;  %v10192_v15 = vpack.c.bf16 %v5474_v58, %v5472_v40  ;;  %v5767_v40 = vld [vmem:[#allocation22 + $0x30] sm:$0xff]  ;;  %v5768_v58 = vld [vmem:[#allocation22 + $0x38] sm:$0xff] }
0x13f2   : > { %vm14115_vm12 = vcmp.ne.s32.totalorder %v5314_v19, 0  ;;  %v5321_v1 = vand.u32 3, %v15105_v46  ;;  %vm14142_vm9 = vcmp.ne.s32.totalorder %v5307_v37, 3  ;;  %vm14151_vm2 = vcmp.ne.s32.totalorder %v5314_v19, 3  ;;  %v14167_v21 = vld [vmem:[#allocation23] sm:$0xff] }
0x13f3   : > { %10099 = vmatprep.subr.bf16.mxu0 %v10098_v63 }
0x13f4   : > { %10101 = vmatpush3.bf16.msra.mxu0 %v10098_v63  ;;  %v10182_v63 = vpack.c.bf16 %v5467_v10, %v5465_v55  ;;  %vm14123_vm14 = vcmp.ne.s32.totalorder %v5321_v1, 0  ;;  %vm14158_vm6 = vcmp.ne.s32.totalorder %v5321_v1, 3 }
0x13f5   : > { %10103 = vmatprep.subr.bf16.mxu0 %v10102_v9 }
0x13f8   : > { %10105 = vmatpush3.bf16.msra.mxu0 %v10102_v9  ;;  %v5464_v9 = vld [vmem:[#allocation19 + $0x260] sm:$0xff] }
0x13fb   : > { %9277 = vmatmul.mubr.msk.f32.vlgmr.msra.gmra.mrb[134].mxu0 %vm5198_vm15, %v5195_v36  ;;  %v5466_v36 = vld [vmem:[#allocation19 + $0x270] sm:$0xff] }
0x13fc   : > { %9279 = vmatprep.mubr.msk.f32.mxu0 %vm5198_vm15, %v5196_v16  ;;  %v5469_v16 = vld [vmem:[#allocation19 + $0x288] sm:$0xff]  ;;  %v10184_v30 = vpack.c.bf16 %v5466_v36, %v5464_v9  ;;  %v5761_v36 = vld [vmem:[#allocation22] sm:$0xff] }
0x13ff   : > { %9280 = vmatmul.mubr.msk.f32.gmra.mrb[136].mxu0 %vm5198_vm15, %v5197_v42  ;;  %v5471_v42 = vld [vmem:[#allocation19 + $0x298] sm:$0xff] }
0x1400   : > { %v10186_v56 = vpack.c.bf16 %v5471_v42, %v5469_v16  ;;  %9298 = vmatprep.mubr.msk.f32.mxu0 %vm5198_vm15, %v14167_v21  ;;  %v5762_v16 = vld [vmem:[#allocation22 + $0x8] sm:$0xff] }
0x14ce   : > { %v9278_v2 = vpop.f32.mrb[134].mxu0 }
0x14cf   : > { %v5353_v51 = vrot.slane %v9278_v2, 7  ;;  %v5373_v13 = vrot.slane %v9278_v2, 1  ;;  %v5277_v8 = vpop.f32.mrb[135].mxu0 }
0x14d0   : > { %v5352_v33 = vrot.slane %v5277_v8, 7  ;;  %v5372_v35 = vrot.slane %v5277_v8, 1  ;;  %5548 = vmatprep.mubr.f32.mxu1 %v5277_v8  ;;  %v5478_v8 = vld [vmem:[#allocation19 + $0x2d0] sm:$0xff] }
0x14d2   : > { %v5363_v59 = vsel %vm15094_vm0, 0.0, %v5352_v33  ;;  %v14089_v3 = vsel %vm15095_vm10, %v5372_v35, %v5373_v13  ;;  %v14091_v20 = vpop.f32.mrb[136].mxu0  ;;  %v5354_v32 = vsel %vm15096_vm13, %v5352_v33, %v5353_v51  ;;  %v5483_v33 = vld [vmem:[#allocation19 + $0x2f8] sm:$0xff]  ;;  %vm15116_vm0 = vmmov %vm15083_vm1 }
0x14d3   : > { %v5357_v53 = vrot.slane %v14091_v20, 7  ;;  %v5377_v0 = vrot.slane %v14091_v20, 1  ;;  %v5287_v62 = vpop.f32.mrb[137].mxu0  ;;  %8161 = vmatmul.mubr.msk.f32.vlgmr.msra.gmra.mrb[110].mxu1 %vm14082_vm4, %v5363_v59 }
0x14d4   : > { %v5355_v44 = vrot.slane %v5287_v62, 7  ;;  %v5375_v28 = vrot.slane %v5287_v62, 1  ;;  %10173 = vmatpush1.bf16.msra.mxu1 %v10172_v41  ;;  %5554 = vmatprep.mubr.f32.mxu1 %v9278_v2  ;;  %v5477_v2 = vld [vmem:[#allocation19 + $0x2c8] sm:$0xff] }
0x14d5   : > { %10175 = vmatprep.subr.bf16.mxu1 %v10174_v47  ;;  %v5481_v41 = vld [vmem:[#allocation19 + $0x2e8] sm:$0xff]  ;;  %v5482_v47 = vld [vmem:[#allocation19 + $0x2f0] sm:$0xff] }
0x14d6   : > { %v5356_v24 = vsel %vm15100_vm5, %v5353_v51, %v5355_v44  ;;  %v5358_v11 = vsel %vm15101_vm3, %v5355_v44, %v5357_v53  ;;  %v5376_v60 = vsel %vm15102_vm7, %v5373_v13, %v5375_v28  ;;  %v5378_v43 = vsel %vm15083_vm1, %v5375_v28, %v5377_v0  ;;  %v5476_v13 = vld [vmem:[#allocation19 + $0x2c0] sm:$0xff] }
0x14d7   : > { %8163 = vmatmul.mubr.msk.f32.gmra.mrb[112].mxu1 %vm14100_vm8, %v5354_v32  ;;  %v10194_v51 = vpack.c.bf16 %v5479_v50, %v5477_v2  ;;  %v10196_v35 = vpack.c.bf16 %v5478_v8, %v5476_v13  ;;  %v10198_v45 = vpack.c.bf16 %v5483_v33, %v5481_v41  ;;  %v10200_v59 = vpack.c.bf16 %v5482_v47, %v5480_v23  ;;  %v5769_v50 = vld [vmem:[#allocation22 + $0x40] sm:$0xff]  ;;  %v5771_v13 = vld [vmem:[#allocation22 + $0x50] sm:$0xff]  ;;  %v5772_v8 = vld [vmem:[#allocation22 + $0x58] sm:$0xff] }
0x14d8   : > { %10177 = vmatpush1.bf16.msra.mxu1 %v10176_v52  ;;  %5560 = vmatprep.mubr.f32.mxu1 %v5287_v62  ;;  %v14214_v2 = vpack.c.bf16 %v5768_v58, %v5767_v40  ;;  %v14222_v41 = vpack.c.bf16 %v5772_v8, %v5771_v13  ;;  %v5773_v33 = vld [vmem:[#allocation22 + $0x60] sm:$0xff]  ;;  %v5775_v23 = vld [vmem:[#allocation22 + $0x70] sm:$0xff]  ;;  %v5776_v47 = vld [vmem:[#allocation22 + $0x78] sm:$0xff]  ;;  %vm15120_vm7 = vcmask 64512  }
0x14d9   : > { %10179 = vmatprep.subr.bf16.mxu1 %v10178_v5  ;;  %v15118_v58 = vld [vmem:[#allocation71_spill] sm:$0xff]  ;;  %vm15121_vm1 = vmmov %vm15120_vm7 }
0x14da   : > { %v6034_v13 = vld [vmem:[#allocation20 + $0x88] sm:$0xff] }
0x14db   : > { %8165 = vmatmul.mubr.msk.f32.gmra.mrb[114].mxu1 %vm14115_vm12, %v5356_v24 }
0x14dc   : > { %10181 = vmatpush1.bf16.msra.mxu1 %v10180_v34  ;;  %5566 = vmatprep.mubr.f32.mxu1 %v14091_v20 }
0x14dd   : > { %10183 = vmatprep.subr.bf16.mxu1 %v10182_v63 }
0x14df   : > { %8167 = vmatmul.mubr.msk.f32.gmra.mrb[116].mxu1 %vm14123_vm14, %v5358_v11 }
0x14e0   : > { %10185 = vmatpush1.bf16.msra.mxu1 %v10184_v30  ;;  %5637 = vmatprep.mubr.f32.mxu1 %v14866_v22  ;;  %v14199_v30 = vpack.c.bf16 %v5762_v16, %v5761_v36 }
0x14e1   : > { %10187 = vmatprep.subr.bf16.mxu1 %v10186_v56  ;;  %v5763_v56 = vld [vmem:[#allocation22 + $0x10] sm:$0xff] }
0x14e2   : > { %v14204_v31 = vpack.c.bf16 %v5764_v39, %v5763_v56  ;;  %v14236_v56 = vld [vmem:[#allocation25] sm:$0xf]  ;;  %v15117_v39 = vld [vmem:[#allocation70_spill] sm:$0xff] }
0x14e4   : > { %10189 = vmatpush1.bf16.msra.mxu1 %v10188_v12  ;;  %v5766_v12 = vld [vmem:[#allocation22 + $0x28] sm:$0xff] }
0x14e5   : > { %10191 = vmatprep.subr.bf16.mxu1 %v10190_v27  ;;  %v14210_v27 = vpack.c.bf16 %v5766_v12, %v5765_v7  ;;  %v5860_v7 = vrot.slane %v14236_v56, %v15117_v39 }
0x14e8   : > { %10193 = vmatpush1.bf16.msra.mxu1 %v10192_v15  ;;  %v5770_v15 = vld [vmem:[#allocation22 + $0x48] sm:$0xff] }
0x14e9   : > { %10195 = vmatprep.subr.bf16.mxu1 %v10194_v51  ;;  %v14218_v51 = vpack.c.bf16 %v5770_v15, %v5769_v50  ;;  %v5866_v50 = vrot.slane %v14236_v56, %v15118_v58  ;;  %v6033_v15 = vld [vmem:[#allocation20 + $0x80] sm:$0xff] }
0x14ec   : > { %10197 = vmatpush1.bf16.msra.mxu1 %v10196_v35  ;;  %v5774_v35 = vld [vmem:[#allocation22 + $0x68] sm:$0xff] }
0x14ed   : > { %10199 = vmatprep.subr.bf16.mxu1 %v10198_v45  ;;  %v14226_v45 = vpack.c.bf16 %v5774_v35, %v5773_v33  ;;  %v6017_v33 = vld [vmem:[#allocation20] sm:$0xff]  ;;  %v6018_v35 = vld [vmem:[#allocation20 + $0x8] sm:$0xff] }
0x14f0   : > { %10201 = vmatpush1.bf16.msra.mxu1 %v10200_v59  ;;  %v14230_v59 = vpack.c.bf16 %v5776_v47, %v5775_v23  ;;  %v6035_v23 = vld [vmem:[#allocation20 + $0x90] sm:$0xff]  ;;  %v6036_v47 = vld [vmem:[#allocation20 + $0x98] sm:$0xff] }
0x14f3   : > { %8169 = vmatmul.mubr.msk.f32.vlgmr.msra.gmra.mrb[110].mxu1 %vm14132_vm11, %v14089_v3  ;;  %v5383_v3 = vsel %vm15116_vm0, %v5377_v0, 0.0  ;;  %vm15122_vm0 = vmmov %vm15121_vm1 }
0x14f4   : > { %5643 = vmatprep.mubr.f32.mxu1 %v14866_v22 }
0x14f7   : > { %8171 = vmatmul.mubr.msk.f32.gmra.mrb[112].mxu1 %vm14142_vm9, %v5376_v60 }
0x14f8   : > { %5649 = vmatprep.mubr.f32.mxu1 %v14866_v22 }
0x14fb   : > { %8173 = vmatmul.mubr.msk.f32.gmra.mrb[114].mxu1 %vm14151_vm2, %v5378_v43 }
0x14fc   : > { %5655 = vmatprep.mubr.f32.mxu1 %v14866_v22 }
0x14ff   : > { %8175 = vmatmul.mubr.msk.f32.gmra.mrb[116].mxu1 %vm14158_vm6, %v5383_v3 }
0x15c6   : > { %v5639_v53 = vpop.f32.mrb[110].mxu1 }
0x15c7   : > { %v14171_v62 = vpop.f32.mrb[111].mxu1  ;;  %v5666_v52 = vmul.f32 0.01, %v5639_v53  ;;  %vm5662_vm10 = vcmp.ge.f32.partialorder %v5639_v53, 0.0 }
0x15c9   : > { %v14175_v20 = vsel %vm5662_vm10, %v5639_v53, %v5666_v52  ;;  %v6049_v52 = vld [vmem:[#allocation20 + $0x100] sm:$0xff]  ;;  %vm15123_vm10 = vmmov %vm15122_vm0 }
0x15ca   : > { %v5645_v44 = vpop.f32.mrb[112].mxu1  ;;  %v5674_v34 = vmul.f32 %v14175_v20, %v14175_v20 }
0x15cb   : > { %vm5663_vm13 = vcmp.ge.f32.partialorder %v5645_v44, 0.0  ;;  %v5667_v28 = vmul.f32 0.01, %v5645_v44  ;;  %v14173_v61 = vpop.f32.mrb[113].mxu1 }
0x15cd   : > { %v14177_v0 = vsel %vm5663_vm13, %v5645_v44, %v5667_v28  ;;  %v6050_v44 = vld [vmem:[#allocation20 + $0x108] sm:$0xff]  ;;  %vm15124_vm13 = vcmask 1040384  }
0x15ce   : > { %v5651_v19 = vpop.f32.mrb[114].mxu1  ;;  %v10202_v5 = vpack.c.bf16 %v14177_v0, %v14175_v20  ;;  %v5675_v11 = vmul.f32 %v14177_v0, %v14177_v0  ;;  %v10282_v28 = vpack.c.bf16 %v6050_v44, %v6049_v52  ;;  %v14245_v52 = vld [vmem:[%s15119_s14] sm:$0xff]  ;;  %v10252_v44 = vpack.c.bf16 %v6018_v35, %v6017_v33  ;;  %v6025_v33 = vld [vmem:[#allocation20 + $0x40] sm:$0xff] }
0x15cf   : > { %v14181_v29 = vpop.f32.mrb[115].mxu1  ;;  %v5668_v38 = vmul.f32 0.01, %v5651_v19  ;;  %vm5664_vm5 = vcmp.ge.f32.partialorder %v5651_v19, 0.0  ;;  %v6026_v35 = vld [vmem:[#allocation20 + $0x48] sm:$0xff] }
0x15d0   : > { %10203 = vmatprep.subr.bf16.mxu0 %v10202_v5  ;;  %v10210_v63 = vpack.c.bf16 %v5675_v11, %v5674_v34  ;;  %10283 = vmatprep.subr.bf16.mxu1 %v10282_v28  ;;  %v6055_v34 = vld [vmem:[#allocation20 + $0x130] sm:$0xff] }
0x15d1   : > { %10205 = vmatpush3.bf16.msra.mxu0 %v10202_v5  ;;  %v14187_v60 = vsel %vm5664_vm5, %v5651_v19, %v5668_v38  ;;  %v6051_v19 = vld [vmem:[#allocation20 + $0x110] sm:$0xff]  ;;  %v6052_v5 = vld [vmem:[#allocation20 + $0x118] sm:$0xff]  ;;  %10285 = vmatpush3.bf16.msra.mxu1 %v10282_v28  ;;  %v10254_v28 = vpack.c.bf16 %v6036_v47, %v6035_v23  ;;  %vm15125_vm5 = vmmov %vm15124_vm13 }
0x15d2   : > { %v5657_v24 = vpop.f32.mrb[116].mxu1  ;;  %v5676_v9 = vmul.f32 %v14187_v60, %v14187_v60  ;;  %v10286_v38 = vpack.c.bf16 %v6052_v5, %v6051_v19  ;;  %v6019_v19 = vld [vmem:[#allocation20 + $0x10] sm:$0xff]  ;;  %v6020_v5 = vld [vmem:[#allocation20 + $0x18] sm:$0xff] }
0x15d3   : > { %vm5665_vm3 = vcmp.ge.f32.partialorder %v5657_v24, 0.0  ;;  %v5669_v55 = vmul.f32 0.01, %v5657_v24  ;;  %v14183_v10 = vpop.f32.mrb[117].mxu1  ;;  %v6043_v23 = vld [vmem:[#allocation20 + $0xd0] sm:$0xff]  ;;  %v6044_v47 = vld [vmem:[#allocation20 + $0xd8] sm:$0xff] }
0x15d4   : > { %10287 = vmatprep.subr.bf16.mxu1 %v10286_v38 }
0x15d5   : > { %v14189_v43 = vsel %vm5665_vm3, %v5657_v24, %v5669_v55  ;;  %v6053_v24 = vld [vmem:[#allocation20 + $0x120] sm:$0xff]  ;;  %v6054_v55 = vld [vmem:[#allocation20 + $0x128] sm:$0xff]  ;;  %10289 = vmatpush3.bf16.msra.mxu1 %v10286_v38  ;;  %vm15126_vm3 = vcmask 1046528  }
0x15d6   : > { %v10206_v46 = vpack.c.bf16 %v14189_v43, %v14187_v60  ;;  %v5677_v1 = vmul.f32 %v14189_v43, %v14189_v43  ;;  %v10290_v11 = vpack.c.bf16 %v6054_v55, %v6053_v24  ;;  %v6037_v38 = vld [vmem:[#allocation20 + $0xa0] sm:$0xff]  ;;  %v6038_v24 = vld [vmem:[#allocation20 + $0xa8] sm:$0xff]  ;;  %v14253_v55 = vld [vmem:[%s15119_s14 + $0x8] sm:$0xff] }
0x15d8   : > { %10207 = vmatprep.subr.bf16.mxu0 %v10206_v46  ;;  %v10214_v42 = vpack.c.bf16 %v5677_v1, %v5676_v9  ;;  %10291 = vmatprep.subr.bf16.mxu1 %v10290_v11 }
0x15d9   : > { %10209 = vmatpush3.bf16.msra.mxu0 %v10206_v46  ;;  %v6056_v46 = vld [vmem:[#allocation20 + $0x138] sm:$0xff]  ;;  %10293 = vmatpush3.bf16.msra.mxu1 %v10290_v11  ;;  %v10256_v11 = vpack.c.bf16 %v6020_v5, %v6019_v19  ;;  %v6045_v5 = vld [vmem:[#allocation20 + $0xe0] sm:$0xff] }
0x15da   : > { %10211 = vmatprep.subr.bf16.mxu0 %v10210_v63  ;;  %v10294_v1 = vpack.c.bf16 %v6056_v46, %v6055_v34  ;;  %v10258_v34 = vpack.c.bf16 %v6038_v24, %v6037_v38  ;;  %v6021_v46 = vld [vmem:[#allocation20 + $0x20] sm:$0xff]  ;;  %v6046_v38 = vld [vmem:[#allocation20 + $0xe8] sm:$0xff] }
0x15db   : > { %v6057_v24 = vld [vmem:[#allocation20 + $0x140] sm:$0xff] }
0x15dc   : > { %10295 = vmatprep.subr.bf16.mxu1 %v10294_v1 }
0x15dd   : > { %10213 = vmatpush3.bf16.msra.mxu0 %v10210_v63  ;;  %10297 = vmatpush3.bf16.msra.mxu1 %v10294_v1  ;;  %v6022_v1 = vld [vmem:[#allocation20 + $0x28] sm:$0xff] }
0x15de   : > { %10215 = vmatprep.subr.bf16.mxu0 %v10214_v42 }
0x15e1   : > { %10217 = vmatpush3.bf16.msra.mxu0 %v10214_v42 }
0x15e2   : > { %10219 = vmatprep.subr.bf16.mxu0 %v14199_v30 }
0x15e4   : > { %9299 = vmatmul.mubr.msk.f32.vlgmr.msra.gmra.mrb[138].mxu0 %vm5198_vm15, %v14201_v18 }
0x15e5   : > { %10221 = vmatpush3.bf16.msra.mxu0 %v14199_v30 }
0x15e6   : > { %10223 = vmatprep.subr.bf16.mxu0 %v14204_v31 }
0x15e9   : > { %10225 = vmatpush3.bf16.msra.mxu0 %v14204_v31 }
0x15ea   : > { %10227 = vmatprep.subr.bf16.mxu0 %v14210_v27 }
0x15ed   : > { %10229 = vmatpush3.bf16.msra.mxu0 %v14210_v27 }
0x15ee   : > { %10231 = vmatprep.subr.bf16.mxu0 %v14214_v2 }
0x15f1   : > { %10233 = vmatpush3.bf16.msra.mxu0 %v14214_v2 }
0x15f2   : > { %10235 = vmatprep.subr.bf16.mxu0 %v14218_v51 }
0x15f5   : > { %10237 = vmatpush3.bf16.msra.mxu0 %v14218_v51 }
0x15f6   : > { %10239 = vmatprep.subr.bf16.mxu0 %v14222_v41 }
0x15f9   : > { %10241 = vmatpush3.bf16.msra.mxu0 %v14222_v41 }
0x15fa   : > { %10243 = vmatprep.subr.bf16.mxu0 %v14226_v45 }
0x15fd   : > { %10245 = vmatpush3.bf16.msra.mxu0 %v14226_v45 }
0x15fe   : > { %10247 = vmatprep.subr.bf16.mxu0 %v14230_v59 }
0x1601   : > { %10249 = vmatpush3.bf16.msra.mxu0 %v14230_v59 }
0x16b7   : > { %v9300_v3 = vpop.f32.mrb[138].mxu0 }
0x16b8   : > { %v5752_v53 = vpop.f32.mrb[139].mxu0 }
0x16b9   : > { %9333 = vmatprep.mubr.f32.mxu0 %v5752_v53  ;;  %v10250_v53 = vpack.c.bf16 %v6034_v13, %v6033_v15  ;;  %v14269_v15 = vld [vmem:[%s15119_s14 + $0x18] sm:$0xff] }
0x16ba   : > { %9334 = vmatmul.mubr.f32.vlgmr.msra.gmra.mrb[140].mxu0 %v9300_v3 }
0x16bb   : > { %5948 = vmatprep.mubr.f32.mxu0 %v14866_v22 }
0x178d   : > { %v9335_v63 = vpop.f32.mrb[140].mxu0 }
0x178e   : > { %v5843_v9 = vpop.f32.mrb[141].mxu0 }
0x178f   : > { %v5853_v36 = vmul.f32 %v5843_v9, %v5843_v9 }
0x1791   : > { %v5854_v16 = vsub.f32 %v9335_v63, %v5853_v36  ;;  %v6039_v63 = vld [vmem:[#allocation20 + $0xb0] sm:$0xff]  ;;  %v14261_v36 = vld [vmem:[%s15119_s14 + $0x10] sm:$0xff] }
0x1793   : > { %v5855_v42 = vadd.f32 1e-05, %v5854_v16  ;;  %v10260_v16 = vpack.c.bf16 %v6022_v1, %v6021_v46  ;;  %v6029_v46 = vld [vmem:[#allocation20 + $0x60] sm:$0xff]  ;;  %v6030_v1 = vld [vmem:[#allocation20 + $0x68] sm:$0xff] }
0x1795   : > { %10943 = vrsqrt.f32 %v5855_v42 }
0x179f   : > { %v10944_v12 = vpop.eup %10943 }
0x17a0   : > { %v5861_v40 = vmul.f32 %v10944_v12, %v5860_v7  ;;  %v6023_v7 = vld [vmem:[#allocation20 + $0x30] sm:$0xff]  ;;  %v6024_v12 = vld [vmem:[#allocation20 + $0x38] sm:$0xff] }
0x17a1   : > { %v10264_v13 = vpack.c.bf16 %v6024_v12, %v6023_v7  ;;  %v6059_v7 = vld [vmem:[#allocation20 + $0x150] sm:$0xff] }
0x17a2   : > { %v5862_v8 = vmul.f32 %v5861_v40, %v5843_v9  ;;  %v6040_v9 = vld [vmem:[#allocation20 + $0xb8] sm:$0xff] }
0x17a3   : > { %v10262_v42 = vpack.c.bf16 %v6040_v9, %v6039_v63  ;;  %v10276_v9 = vpack.c.bf16 %v6030_v1, %v6029_v46 }
0x17a4   : > { %v5867_v3 = vsub.f32 %v5866_v50, %v5862_v8  ;;  %v6042_v50 = vld [vmem:[#allocation20 + $0xc8] sm:$0xff] }
0x17a6   : > { %5884 = vmatprep.subr.mxu0 %v5867_v3  ;;  %v10268_v3 = vpack.c.bf16 %v6026_v35, %v6025_v33  ;;  %v6061_v35 = vld [vmem:[#allocation20 + $0x160] sm:$0xff] }
0x17a7   : > { %5885 = vmatpush1.msra.mxu0 %v5861_v40  ;;  %v6041_v40 = vld [vmem:[#allocation20 + $0xc0] sm:$0xff] }
0x17a8   : > { %8178 = vmatmul.mubr.msk.f32.vlgmr.msra.gmra.mrb[142].mxu0 %vm15120_vm7, %v14245_v52  ;;  %10251 = vmatprep.subr.bf16.mxu0 %v10250_v53  ;;  %v10266_v8 = vpack.c.bf16 %v6042_v50, %v6041_v40  ;;  %v10270_v53 = vpack.c.bf16 %v6044_v47, %v6043_v23  ;;  %v6060_v40 = vld [vmem:[#allocation20 + $0x158] sm:$0xff]  ;;  %v6031_v50 = vld [vmem:[#allocation20 + $0x70] sm:$0xff]  ;;  %v6062_v23 = vld [vmem:[#allocation20 + $0x168] sm:$0xff] }
0x17a9   : > { %5954 = vmatprep.mubr.f32.mxu0 %v14866_v22  ;;  %10253 = vmatpush3.bf16.msra.mxu0 %v10252_v44  ;;  %v6027_v44 = vld [vmem:[#allocation20 + $0x50] sm:$0xff]  ;;  %v10306_v47 = vpack.c.bf16 %v6062_v23, %v6061_v35  ;;  %vm15128_vm7 = vmmov %vm15126_vm3 }
0x17aa   : > { %10255 = vmatprep.subr.bf16.mxu0 %v10254_v28  ;;  %v6028_v28 = vld [vmem:[#allocation20 + $0x58] sm:$0xff] }
0x17ab   : > { %v10272_v19 = vpack.c.bf16 %v6028_v28, %v6027_v44 }
0x17ac   : > { %8179 = vmatmul.mubr.msk.f32.gmra.mrb[144].mxu0 %vm15121_vm1, %v14253_v55  ;;  %vm15131_vm1 = vmmov %vm15126_vm3 }
0x17ad   : > { %5960 = vmatprep.mubr.f32.mxu0 %v14866_v22  ;;  %10257 = vmatpush3.bf16.msra.mxu0 %v10256_v11  ;;  %v10274_v11 = vpack.c.bf16 %v6046_v38, %v6045_v5 }
0x17ae   : > { %10259 = vmatprep.subr.bf16.mxu0 %v10258_v34  ;;  %v6058_v34 = vld [vmem:[#allocation20 + $0x148] sm:$0xff] }
0x17af   : > { %v10298_v63 = vpack.c.bf16 %v6058_v34, %v6057_v24 }
0x17b0   : > { %8180 = vmatmul.mubr.msk.f32.gmra.mrb[146].mxu0 %vm15122_vm0, %v14261_v36 }
0x17b1   : > { %5966 = vmatprep.mubr.f32.mxu0 %v14866_v22  ;;  %10261 = vmatpush3.bf16.msra.mxu0 %v10260_v16  ;;  %v6047_v16 = vld [vmem:[#allocation20 + $0xf0] sm:$0xff] }
0x17b2   : > { %10263 = vmatprep.subr.bf16.mxu0 %v10262_v42  ;;  %10299 = vmatprep.subr.bf16.mxu1 %v10298_v63  ;;  %v6048_v42 = vld [vmem:[#allocation20 + $0xf8] sm:$0xff] }
0x17b3   : > { %10301 = vmatpush3.bf16.msra.mxu1 %v10298_v63  ;;  %v10278_v12 = vpack.c.bf16 %v6048_v42, %v6047_v16 }
0x17b4   : > { %8181 = vmatmul.mubr.msk.f32.gmra.mrb[148].mxu0 %vm15123_vm10, %v14269_v15  ;;  %vm15134_vm10 = vmmov %vm15122_vm0 }
0x17b5   : > { %10265 = vmatpush3.bf16.msra.mxu0 %v10264_v13  ;;  %v6032_v13 = vld [vmem:[#allocation20 + $0x78] sm:$0xff] }
0x17b6   : > { %10267 = vmatprep.subr.bf16.mxu0 %v10266_v8  ;;  %v10302_v8 = vpack.c.bf16 %v6060_v40, %v6059_v7  ;;  %v10280_v33 = vpack.c.bf16 %v6032_v13, %v6031_v50 }
0x17b8   : > { %10303 = vmatprep.subr.bf16.mxu1 %v10302_v8 }
0x17b9   : > { %10269 = vmatpush3.bf16.msra.mxu0 %v10268_v3  ;;  %10305 = vmatpush3.bf16.msra.mxu1 %v10302_v8  ;;  %v6063_v3 = vld [vmem:[#allocation20 + $0x170] sm:$0xff] }
0x17ba   : > { %10271 = vmatprep.subr.bf16.mxu0 %v10270_v53  ;;  %10307 = vmatprep.subr.bf16.mxu1 %v10306_v47  ;;  %v6064_v53 = vld [vmem:[#allocation20 + $0x178] sm:$0xff] }
0x17bb   : > { %v10310_v44 = vpack.c.bf16 %v6064_v53, %v6063_v3 }
0x17bd   : > { %10273 = vmatpush3.bf16.msra.mxu0 %v10272_v19  ;;  %10309 = vmatpush3.bf16.msra.mxu1 %v10306_v47 }
0x17be   : > { %10275 = vmatprep.subr.bf16.mxu0 %v10274_v11  ;;  %10311 = vmatprep.subr.bf16.mxu1 %v10310_v44 }
0x17c1   : > { %10277 = vmatpush3.bf16.msra.mxu0 %v10276_v9  ;;  %10313 = vmatpush3.bf16.msra.mxu1 %v10310_v44 }
0x17c2   : > { %10279 = vmatprep.subr.bf16.mxu0 %v10278_v12 }
0x17c5   : > { %10281 = vmatpush3.bf16.msra.mxu0 %v10280_v33 }
0x187b   : > { %v5950_v28 = vpop.f32.mrb[142].mxu0 }
0x187c   : > { %v5973_v19 = vmul.f32 %v5950_v28, %v14175_v20  ;;  %v5952_v5 = vpop.f32.mrb[143].mxu0 }
0x187e   : > { %v5977_v38 = vadd.f32 %v5973_v19, %v5952_v5 }
0x187f   : > { %v5956_v24 = vpop.f32.mrb[144].mxu0 }
0x1880   : > { %v5985_v11 = vrot.slane %v5977_v38, 7  ;;  %v5974_v34 = vmul.f32 %v5956_v24, %v14177_v0  ;;  %6129 = vmatprep.mubr.f32.mxu0 %v5977_v38  ;;  %v5958_v46 = vpop.f32.mrb[145].mxu0  ;;  %v6001_v16 = vrot.slane %v5977_v38, 1 }
0x1882   : > { %v5996_v1 = vsel %vm15124_vm13, 0.0, %v5985_v11  ;;  %v5978_v63 = vadd.f32 %v5974_v34, %v5958_v46  ;;  %vm15135_vm13 = vcmask 261120  }
0x1883   : > { %v5962_v9 = vpop.f32.mrb[146].mxu0  ;;  %8183 = vmatmul.mubr.msk.f32.vlgmr.msra.gmra.mrb[150].mxu0 %vm14082_vm4, %v5996_v1  ;;  %vm15127_vm4 = vmmov %vm15125_vm5 }
0x1884   : > { %v5986_v42 = vrot.slane %v5978_v63, 7  ;;  %v6002_v7 = vrot.slane %v5978_v63, 1  ;;  %v5975_v20 = vmul.f32 %v5962_v9, %v14187_v60  ;;  %6134 = vmatprep.mubr.f32.mxu0 %v5978_v63  ;;  %v5964_v12 = vpop.f32.mrb[147].mxu0 }
0x1886   : > { %v5979_v40 = vadd.f32 %v5975_v20, %v5964_v12  ;;  %v5987_v50 = vsel %vm15125_vm5, %v5985_v11, %v5986_v42  ;;  %v6003_v0 = vsel %vm15126_vm3, %v6001_v16, %v6002_v7  ;;  %vm15136_vm5 = vmmov %vm15131_vm1 }
0x1887   : > { %v5968_v13 = vpop.f32.mrb[148].mxu0  ;;  %8185 = vmatmul.mubr.msk.f32.gmra.mrb[152].mxu0 %vm14100_vm8, %v5987_v50  ;;  %9368 = vmatprep.mubr.msk.f32.mxu1 %vm14132_vm11, %v6003_v0  ;;  %vm15129_vm8 = vmmov %vm15127_vm4 }
0x1888   : > { %v5988_v57 = vrot.slane %v5979_v40, 7  ;;  %v6004_v8 = vrot.slane %v5979_v40, 1  ;;  %v5976_v33 = vmul.f32 %v5968_v13, %v14189_v43  ;;  %6139 = vmatprep.mubr.f32.mxu0 %v5979_v40  ;;  %v5970_v60 = vpop.f32.mrb[149].mxu0  ;;  %vm15130_vm11 = vmmov %vm15126_vm3 }
0x1889   : > { %vm15137_vm3 = vmmov %vm15131_vm1 }
0x188a   : > { %v5980_v35 = vadd.f32 %v5976_v33, %v5970_v60  ;;  %v5989_v23 = vsel %vm15127_vm4, %v5986_v42, %v5988_v57  ;;  %v6005_v47 = vsel %vm15128_vm7, %v6002_v7, %v6004_v8  ;;  %vm15138_vm4 = vmmov %vm15131_vm1 }
0x188b   : > { %8187 = vmatmul.mubr.msk.f32.gmra.mrb[154].mxu0 %vm14115_vm12, %v5989_v23  ;;  %9369 = vmatmul.mubr.msk.f32.vlgmr.msra.gmra.mrb[118].mxu1 %vm14142_vm9, %v6005_v47  ;;  %vm15139_vm7 = vmmov %vm15131_vm1 }
0x188c   : > { %v5990_v14 = vrot.slane %v5980_v35, 7  ;;  %v6006_v32 = vrot.slane %v5980_v35, 1  ;;  %6144 = vmatprep.mubr.f32.mxu0 %v5980_v35 }
0x188e   : > { %v5991_v3 = vsel %vm15129_vm8, %v5988_v57, %v5990_v14  ;;  %v6007_v43 = vsel %vm15130_vm11, %v6004_v8, %v6006_v32  ;;  %v6012_v53 = vsel %vm15131_vm1, %v6006_v32, 0.0  ;;  %vm15140_vm8 = vmmov %vm15135_vm13  ;;  %vm15143_vm1 = vcmask 1040384  }
0x188f   : > { %8189 = vmatmul.mubr.msk.f32.gmra.mrb[156].mxu0 %vm14123_vm14, %v5991_v3  ;;  %9371 = vmatprep.mubr.msk.f32.mxu1 %vm14151_vm2, %v6007_v43 }
0x1890   : > { %9372 = vmatmul.mubr.msk.f32.gmra.mrb[120].mxu1 %vm14158_vm6, %v6012_v53  ;;  %9390 = vmatprep.mubr.msk.f32.mxu0 %vm5198_vm15, %v14167_v21  ;;  %vm15133_vm6 = vmmov %vm15122_vm0 }
0x1956   : > { %v8736_v48 = vpop.f32.mrb[150].mxu0 }
0x1957   : > { %v8737_v4 = vpop.f32.mrb[151].mxu0 }
0x1958   : > { %v8738_v44 = vadd.f32 %v8737_v4, %v8736_v48 }
0x195a   : > { %v8739_v28 = vpop.f32.mrb[152].mxu0  ;;  %v6132_v19 = vadd.f32 %v8738_v44, %v14171_v62 }
0x195b   : > { %v8740_v5 = vpop.f32.mrb[153].mxu0 }
0x195c   : > { %v8741_v38 = vadd.f32 %v8740_v5, %v8739_v28 }
0x195e   : > { %v8742_v24 = vpop.f32.mrb[154].mxu0  ;;  %v6137_v26 = vadd.f32 %v8741_v38, %v14173_v61  ;;  %v9370_v11 = vpop.f32.mrb[118].mxu1 }
0x195f   : > { %v8743_v25 = vpop.f32.mrb[155].mxu0  ;;  %v6216_v34 = vpop.f32.mrb[119].mxu1 }
0x1960   : > { %v6222_v46 = vadd.f32 %v9370_v11, %v6137_v26  ;;  %v8744_v37 = vadd.f32 %v8743_v25, %v8742_v24  ;;  %v6217_v1 = vadd.f32 %v6216_v34, %v6132_v19 }
0x1962   : > { %vm6236_vm12 = vcmp.ge.f32.partialorder %v6222_v46, 0.0  ;;  %v6240_v63 = vmul.f32 0.01, %v6222_v46  ;;  %vm6235_vm14 = vcmp.ge.f32.partialorder %v6217_v1, 0.0  ;;  %v6239_v21 = vmul.f32 0.01, %v6217_v1 }
0x1963   : > { %v8745_v9 = vpop.f32.mrb[156].mxu0  ;;  %v9373_v16 = vpop.f32.mrb[120].mxu1  ;;  %v6142_v42 = vadd.f32 %v8744_v37, %v14181_v29 }
0x1964   : > { %v14306_v62 = vsel %vm6236_vm12, %v6222_v46, %v6240_v63  ;;  %v14308_v7 = vsel %vm6235_vm14, %v6217_v1, %v6239_v21  ;;  %v8746_v20 = vpop.f32.mrb[157].mxu0  ;;  %v6226_v61 = vpop.f32.mrb[121].mxu1  ;;  %v6554_v46 = vld [vmem:[#allocation26] sm:$0xff]  ;;  %v6684_v1 = vld [vmem:[#allocation28 + $0x8] sm:$0xff]  ;;  %v6686_v63 = vld [vmem:[#allocation28 + $0x18] sm:$0xff] }
0x1965   : > { %v8747_v12 = vadd.f32 %v8746_v20, %v8745_v9  ;;  %v6227_v40 = vadd.f32 %v6226_v61, %v6142_v42  ;;  %v10314_v50 = vpack.c.bf16 %v14306_v62, %v14308_v7  ;;  %v6247_v8 = vmul.f32 %v14308_v7, %v14308_v7  ;;  %9436 = vmatprep.mubr.msk.f32.mxu1 %vm15135_vm13, %v6554_v46  ;;  %v6683_v21 = vld [vmem:[#allocation28] sm:$0xff]  ;;  %v6688_v42 = vld [vmem:[#allocation28 + $0x28] sm:$0xff]  ;;  %v6717_v46 = vld [vmem:[#allocation28 + $0x110] sm:$0xff] }
0x1966   : > { %v6248_v33 = vmul.f32 %v14306_v62, %v14306_v62  ;;  %v10370_v9 = vpack.c.bf16 %v6686_v63, %v6684_v1  ;;  %v6687_v61 = vld [vmem:[#allocation28 + $0x20] sm:$0xff]  ;;  %v6720_v1 = vld [vmem:[#allocation28 + $0x128] sm:$0xff]  ;;  %v6722_v63 = vld [vmem:[#allocation28 + $0x138] sm:$0xff] }
0x1967   : > { %v6147_v0 = vadd.f32 %v8747_v12, %v14183_v10  ;;  %10315 = vmatprep.subr.bf16.mxu0 %v10314_v50  ;;  %v6241_v57 = vmul.f32 0.01, %v6227_v40  ;;  %vm6237_vm9 = vcmp.ge.f32.partialorder %v6227_v40, 0.0  ;;  %v6689_v12 = vld [vmem:[#allocation28 + $0x30] sm:$0xff]  ;;  %vm15144_vm12 = vmmov %vm15137_vm3 }
0x1968   : > { %10317 = vmatpush3.bf16.msra.mxu0 %v10314_v50  ;;  %v10322_v23 = vpack.c.bf16 %v6248_v33, %v6247_v8  ;;  %v6694_v50 = vld [vmem:[#allocation28 + $0x58] sm:$0xff]  ;;  %v6696_v8 = vld [vmem:[#allocation28 + $0x68] sm:$0xff]  ;;  %vm15145_vm14 = vmmov %vm15143_vm1 }
0x1969   : > { %v6232_v13 = vadd.f32 %v9373_v16, %v6147_v0  ;;  %v14319_v35 = vsel %vm6237_vm9, %v6227_v40, %v6241_v57  ;;  %v6685_v16 = vld [vmem:[#allocation28 + $0x10] sm:$0xff]  ;;  %v6692_v40 = vld [vmem:[#allocation28 + $0x48] sm:$0xff]  ;;  %v10376_v0 = vpack.c.bf16 %v6689_v12, %v6687_v61  ;;  %v6691_v57 = vld [vmem:[#allocation28 + $0x40] sm:$0xff] }
0x196a   : > { %v6249_v14 = vmul.f32 %v14319_v35, %v14319_v35  ;;  %v6698_v33 = vld [vmem:[#allocation28 + $0x78] sm:$0xff]  ;;  %v6723_v12 = vld [vmem:[#allocation28 + $0x140] sm:$0xff] }
0x196b   : > { %vm6238_vm2 = vcmp.ge.f32.partialorder %v6232_v13, 0.0  ;;  %v6242_v29 = vmul.f32 0.01, %v6232_v13 }
0x196d   : > { %v14317_v60 = vsel %vm6238_vm2, %v6232_v13, %v6242_v29  ;;  %v10378_v13 = vpack.c.bf16 %v6694_v50, %v6692_v40  ;;  %v6693_v29 = vld [vmem:[#allocation28 + $0x50] sm:$0xff]  ;;  %v6728_v50 = vld [vmem:[#allocation28 + $0x168] sm:$0xff] }
0x196e   : > { %v10318_v10 = vpack.c.bf16 %v14317_v60, %v14319_v35  ;;  %v6250_v47 = vmul.f32 %v14317_v60, %v14317_v60  ;;  %v6725_v40 = vld [vmem:[#allocation28 + $0x150] sm:$0xff] }
0x1970   : > { %10319 = vmatprep.subr.bf16.mxu0 %v10318_v10  ;;  %v10326_v32 = vpack.c.bf16 %v6250_v47, %v6249_v14  ;;  %v6700_v47 = vld [vmem:[#allocation28 + $0x88] sm:$0xff]  ;;  %v6702_v14 = vld [vmem:[#allocation28 + $0x98] sm:$0xff] }
0x1971   : > { %10321 = vmatpush3.bf16.msra.mxu0 %v10318_v10  ;;  %v6695_v10 = vld [vmem:[#allocation28 + $0x60] sm:$0xff] }
0x1972   : > { %10323 = vmatprep.subr.bf16.mxu0 %v10322_v23 }
0x1975   : > { %10325 = vmatpush3.bf16.msra.mxu0 %v10322_v23  ;;  %v6697_v23 = vld [vmem:[#allocation28 + $0x70] sm:$0xff] }
0x1976   : > { %10327 = vmatprep.subr.bf16.mxu0 %v10326_v32 }
0x1979   : > { %10329 = vmatpush3.bf16.msra.mxu0 %v10326_v32  ;;  %v10384_v32 = vpack.c.bf16 %v6697_v23, %v6695_v10  ;;  %v6731_v23 = vld [vmem:[#allocation28 + $0x180] sm:$0xff] }
0x197a   : > { %10331 = vmatprep.subr.bf16.mxu0 %v14199_v30 }
0x197c   : > { %9391 = vmatmul.mubr.msk.f32.vlgmr.msra.gmra.mrb[158].mxu0 %vm5198_vm15, %v14201_v18  ;;  %vm15132_vm15 = vmmov %vm15122_vm0 }
0x197d   : > { %10333 = vmatpush3.bf16.msra.mxu0 %v14199_v30 }
0x197e   : > { %10335 = vmatprep.subr.bf16.mxu0 %v14204_v31 }
0x1981   : > { %10337 = vmatpush3.bf16.msra.mxu0 %v14204_v31 }
0x1982   : > { %10339 = vmatprep.subr.bf16.mxu0 %v14210_v27 }
0x1985   : > { %10341 = vmatpush3.bf16.msra.mxu0 %v14210_v27 }
0x1986   : > { %10343 = vmatprep.subr.bf16.mxu0 %v14214_v2 }
0x1989   : > { %10345 = vmatpush3.bf16.msra.mxu0 %v14214_v2 }
0x198a   : > { %10347 = vmatprep.subr.bf16.mxu0 %v14218_v51 }
0x198d   : > { %10349 = vmatpush3.bf16.msra.mxu0 %v14218_v51 }
0x198e   : > { %10351 = vmatprep.subr.bf16.mxu0 %v14222_v41 }
0x1991   : > { %10353 = vmatpush3.bf16.msra.mxu0 %v14222_v41  ;;  %v6408_v41 = vrot.slane %v14236_v56, %v13362_v6 }
0x1992   : > { %10355 = vmatprep.subr.bf16.mxu0 %v14226_v45 }
0x1995   : > { %10357 = vmatpush3.bf16.msra.mxu0 %v14226_v45 }
0x1996   : > { %10359 = vmatprep.subr.bf16.mxu0 %v14230_v59 }
0x1999   : > { %10361 = vmatpush3.bf16.msra.mxu0 %v14230_v59  ;;  %v6414_v59 = vrot.slane %v14236_v56, %v15066_v49 }
0x1a4f   : > { %v9392_v30 = vpop.f32.mrb[158].mxu0 }
0x1a50   : > { %v6317_v18 = vpop.f32.mrb[159].mxu0 }
0x1a51   : > { %9425 = vmatprep.mubr.f32.mxu0 %v6317_v18  ;;  %v6699_v18 = vld [vmem:[#allocation28 + $0x80] sm:$0xff] }
0x1a52   : > { %9426 = vmatmul.mubr.f32.vlgmr.msra.gmra.mrb[160].mxu0 %v9392_v30  ;;  %v10386_v30 = vpack.c.bf16 %v6702_v14, %v6700_v47  ;;  %v6733_v47 = vld [vmem:[#allocation28 + $0x190] sm:$0xff]  ;;  %v6736_v14 = vld [vmem:[#allocation28 + $0x1a8] sm:$0xff] }
0x1a53   : > { %6480 = vmatprep.mubr.f32.mxu0 %v14866_v22 }
0x1b25   : > { %v9427_v31 = vpop.f32.mrb[160].mxu0 }
0x1b26   : > { %v6392_v27 = vpop.f32.mrb[161].mxu0 }
0x1b27   : > { %v6401_v2 = vmul.f32 %v6392_v27, %v6392_v27 }
0x1b29   : > { %v6402_v51 = vsub.f32 %v9427_v31, %v6401_v2  ;;  %v6701_v31 = vld [vmem:[#allocation28 + $0x90] sm:$0xff]  ;;  %v6706_v2 = vld [vmem:[#allocation28 + $0xb8] sm:$0xff] }
0x1b2b   : > { %v6403_v3 = vadd.f32 1e-05, %v6402_v51  ;;  %v10388_v51 = vpack.c.bf16 %v6701_v31, %v6699_v18  ;;  %v6735_v31 = vld [vmem:[#allocation28 + $0x1a0] sm:$0xff] }
0x1b2d   : > { %10945 = vrsqrt.f32 %v6403_v3 }
0x1b37   : > { %v10946_v45 = vpop.eup %10945 }
0x1b38   : > { %v6409_v43 = vmul.f32 %v10946_v45, %v6408_v41  ;;  %v6703_v41 = vld [vmem:[#allocation28 + $0xa0] sm:$0xff]  ;;  %v6705_v45 = vld [vmem:[#allocation28 + $0xb0] sm:$0xff] }
0x1b3a   : > { %v6410_v53 = vmul.f32 %v6409_v43, %v6392_v27  ;;  %v6704_v27 = vld [vmem:[#allocation28 + $0xa8] sm:$0xff] }
0x1b3b   : > { %v10390_v3 = vpack.c.bf16 %v6706_v2, %v6704_v27  ;;  %v6737_v27 = vld [vmem:[#allocation28 + $0x1b0] sm:$0xff]  ;;  %v6740_v2 = vld [vmem:[#allocation28 + $0x1c8] sm:$0xff] }
0x1b3c   : > { %v6415_v48 = vsub.f32 %v6414_v59, %v6410_v53  ;;  %v6710_v59 = vld [vmem:[#allocation28 + $0xd8] sm:$0xff]  ;;  %v10392_v53 = vpack.c.bf16 %v6705_v45, %v6703_v41  ;;  %v6739_v45 = vld [vmem:[#allocation28 + $0x1c0] sm:$0xff] }
0x1b3e   : > { %6416 = vmatprep.subr.mxu0 %v6415_v48 }
0x1b3f   : > { %6417 = vmatpush1.msra.mxu0 %v6409_v43  ;;  %v6708_v43 = vld [vmem:[#allocation28 + $0xc8] sm:$0xff] }
0x1b40   : > { %8200 = vmatmul.mubr.msk.f32.vlgmr.msra.gmra.mrb[162].mxu0 %vm15132_vm15, %v14245_v52  ;;  %10371 = vmatprep.subr.bf16.mxu0 %v10370_v9  ;;  %v10394_v48 = vpack.c.bf16 %v6710_v59, %v6708_v43  ;;  %v10406_v9 = vpack.c.bf16 %v6722_v63, %v6720_v1  ;;  %v6741_v43 = vld [vmem:[#allocation28 + $0x1d0] sm:$0xff] }
0x1b41   : > { %6486 = vmatprep.mubr.f32.mxu0 %v14866_v22  ;;  %v10428_v59 = vpack.c.bf16 %v6741_v43, %v6739_v45  ;;  %v6758_v45 = vld [vmem:[#allocation28 + $0x258] sm:$0xff] }
0x1b44   : > { %8201 = vmatmul.mubr.msk.f32.gmra.mrb[164].mxu0 %vm15133_vm6, %v14253_v55  ;;  %vm15152_vm6 = vmmov %vm15137_vm3 }
0x1b45   : > { %6492 = vmatprep.mubr.f32.mxu0 %v14866_v22 }
0x1b48   : > { %8202 = vmatmul.mubr.msk.f32.gmra.mrb[166].mxu0 %vm15122_vm0, %v14261_v36  ;;  %vm15153_vm0 = vmmov %vm15140_vm8 }
0x1b49   : > { %6498 = vmatprep.mubr.f32.mxu0 %v14866_v22 }
0x1b4c   : > { %8203 = vmatmul.mubr.msk.f32.gmra.mrb[168].mxu0 %vm15134_vm10, %v14269_v15 }
0x1c13   : > { %v6482_v56 = vpop.f32.mrb[162].mxu0 }
0x1c14   : > { %v6505_v4 = vmul.f32 %v6482_v56, %v14308_v7  ;;  %v6484_v44 = vpop.f32.mrb[163].mxu0  ;;  %v10372_v7 = vpack.c.bf16 %v6685_v16, %v6683_v21  ;;  %v6707_v56 = vld [vmem:[#allocation28 + $0xc0] sm:$0xff] }
0x1c15   : > { %v6719_v16 = vld [vmem:[#allocation28 + $0x120] sm:$0xff] }
0x1c16   : > { %v14362_v52 = vadd.f32 %v6505_v4, %v6484_v44  ;;  %10373 = vmatpush1.bf16.msra.mxu0 %v10372_v7  ;;  %v6709_v4 = vld [vmem:[#allocation28 + $0xd0] sm:$0xff]  ;;  %v6712_v44 = vld [vmem:[#allocation28 + $0xe8] sm:$0xff]  ;;  %v6726_v7 = vld [vmem:[#allocation28 + $0x158] sm:$0xff] }
0x1c17   : > { %v6488_v28 = vpop.f32.mrb[164].mxu0 }
0x1c18   : > { %v6506_v19 = vmul.f32 %v6488_v28, %v14306_v62  ;;  %v6490_v55 = vpop.f32.mrb[165].mxu0  ;;  %v6690_v62 = vld [vmem:[#allocation28 + $0x38] sm:$0xff] }
0x1c19   : > { %v10374_v20 = vpack.c.bf16 %v6690_v62, %v6688_v42  ;;  %v6714_v28 = vld [vmem:[#allocation28 + $0xf8] sm:$0xff]  ;;  %v6721_v42 = vld [vmem:[#allocation28 + $0x130] sm:$0xff]  ;;  %v6724_v62 = vld [vmem:[#allocation28 + $0x148] sm:$0xff] }
0x1c1a   : > { %v14365_v5 = vadd.f32 %v6506_v19, %v6490_v55  ;;  %v10396_v19 = vpack.c.bf16 %v6709_v4, %v6707_v56  ;;  %v10398_v55 = vpack.c.bf16 %v6714_v28, %v6712_v44  ;;  %v10410_v61 = vpack.c.bf16 %v6726_v7, %v6724_v62  ;;  %v6743_v7 = vld [vmem:[#allocation28 + $0x1e0] sm:$0xff] }
0x1c1b   : > { %v6494_v38 = vpop.f32.mrb[166].mxu0  ;;  %10375 = vmatprep.subr.bf16.mxu0 %v10374_v20  ;;  %v10408_v20 = vpack.c.bf16 %v6721_v42, %v6719_v16  ;;  %v6555_v16 = vld [vmem:[#allocation26 + $0x8] sm:$0xff] }
0x1c1c   : > { %v10930_v36 = vpack.i.bf16 %v14365_v5, %v14362_v52  ;;  %v6507_v24 = vmul.f32 %v6494_v38, %v14319_v35  ;;  %v6496_v26 = vpop.f32.mrb[167].mxu0  ;;  %10377 = vmatpush1.bf16.msra.mxu0 %v10376_v0  ;;  %v10382_v35 = vpack.c.bf16 %v6698_v33, %v6696_v8  ;;  %v6711_v38 = vld [vmem:[#allocation28 + $0xe0] sm:$0xff]  ;;  %v6730_v0 = vld [vmem:[#allocation28 + $0x178] sm:$0xff]  ;;  %v6729_v8 = vld [vmem:[#allocation28 + $0x170] sm:$0xff] }
0x1c1d   : > { %10379 = vmatprep.subr.bf16.mxu0 %v10378_v13  ;;  %v10412_v13 = vpack.c.bf16 %v6725_v40, %v6723_v12  ;;  %v6732_v33 = vld [vmem:[#allocation28 + $0x188] sm:$0xff]  ;;  %v6746_v42 = vld [vmem:[#allocation28 + $0x1f8] sm:$0xff] }
0x1c1e   : > { %v14370_v15 = vadd.f32 %v6507_v24, %v6496_v26  ;;  %10931 = vrot.lane.b32.xlu0 %v10930_v36, %s11622_s29  ;;  %v6713_v36 = vld [vmem:[#allocation28 + $0xf0] sm:$0xff]  ;;  %v6716_v24 = vld [vmem:[#allocation28 + $0x108] sm:$0xff]  ;;  %v6718_v26 = vld [vmem:[#allocation28 + $0x118] sm:$0xff] }
0x1c1f   : > { %v6500_v11 = vpop.f32.mrb[168].mxu0  ;;  %v6748_v12 = vld [vmem:[#allocation28 + $0x208] sm:$0xff]  ;;  %v6750_v40 = vld [vmem:[#allocation28 + $0x218] sm:$0xff] }
0x1c20   : > { %v6508_v25 = vmul.f32 %v6500_v11, %v14317_v60  ;;  %6521 = vrot.lane.b32.xlu1 %v14370_v15, %s11622_s29  ;;  %v6502_v34 = vpop.f32.mrb[169].mxu0  ;;  %v10380_v60 = vpack.c.bf16 %v6693_v29, %v6691_v57  ;;  %v10400_v11 = vpack.c.bf16 %v6713_v36, %v6711_v38  ;;  %v10414_v57 = vpack.c.bf16 %v6730_v0, %v6728_v50  ;;  %v6727_v29 = vld [vmem:[#allocation28 + $0x160] sm:$0xff] }
0x1c21   : > { %v10434_v50 = vpack.c.bf16 %v6750_v40, %v6748_v12  ;;  %v6641_v0 = vand.u32 1, %v15090_v17  ;;  %v6775_v40 = vld [vmem:[#allocation28 + $0x2e0] sm:$0xff] }
0x1c22   : > { %v14374_v37 = vadd.f32 %v6508_v25, %v6502_v34  ;;  %10381 = vmatpush1.bf16.msra.mxu0 %v10380_v60  ;;  %v10402_v25 = vpack.c.bf16 %v6718_v26, %v6716_v24  ;;  %v6715_v34 = vld [vmem:[#allocation28 + $0x100] sm:$0xff]  ;;  %v6734_v60 = vld [vmem:[#allocation28 + $0x198] sm:$0xff] }
0x1c23   : > { %10383 = vmatprep.subr.bf16.mxu0 %v10382_v35  ;;  %v10404_v21 = vpack.c.bf16 %v6717_v46, %v6715_v34  ;;  %v10416_v35 = vpack.c.bf16 %v6729_v8, %v6727_v29  ;;  %v10418_v10 = vpack.c.bf16 %v6734_v60, %v6732_v33  ;;  %v6752_v8 = vld [vmem:[#allocation28 + $0x228] sm:$0xff]  ;;  %v6754_v33 = vld [vmem:[#allocation28 + $0x238] sm:$0xff]  ;;  %vm14394_vm11 = vcmp.ne.s32.totalorder %v6641_v0, 0  ;;  %v14436_v17 = vld [vmem:[#allocation31] sm:$0xff] }
0x1c24   : > { %6523 = vrot.lane.b32.xlu0 %v14374_v37, %s11622_s29  ;;  %vm14418_vm2 = vcmp.ne.s32.totalorder %v6641_v0, 1  ;;  %v7025_v0 = vld [vmem:[%s15154_s6 + $0x8] sm:$0xff] }
0x1c26   : > { %10385 = vmatpush1.bf16.msra.mxu0 %v10384_v32  ;;  %v6738_v32 = vld [vmem:[#allocation28 + $0x1b8] sm:$0xff] }
0x1c27   : > { %10387 = vmatprep.subr.bf16.mxu0 %v10386_v30  ;;  %v10420_v30 = vpack.c.bf16 %v6733_v47, %v6731_v23  ;;  %v10422_v18 = vpack.c.bf16 %v6738_v32, %v6736_v14 }
0x1c2a   : > { %10389 = vmatpush1.bf16.msra.mxu0 %v10388_v51  ;;  %v6742_v51 = vld [vmem:[#allocation28 + $0x1d8] sm:$0xff] }
0x1c2b   : > { %10391 = vmatprep.subr.bf16.mxu0 %v10390_v3  ;;  %v10424_v3 = vpack.c.bf16 %v6737_v27, %v6735_v31  ;;  %v10426_v41 = vpack.c.bf16 %v6742_v51, %v6740_v2  ;;  %v6751_v31 = vld [vmem:[#allocation28 + $0x220] sm:$0xff]  ;;  %v6753_v27 = vld [vmem:[#allocation28 + $0x230] sm:$0xff] }
0x1c2e   : > { %10393 = vmatpush1.bf16.msra.mxu0 %v10392_v53 }
0x1c2f   : > { %10395 = vmatprep.subr.bf16.mxu0 %v10394_v48 }
0x1c32   : > { %10397 = vmatpush1.bf16.msra.mxu0 %v10396_v19 }
0x1c33   : > { %10399 = vmatprep.subr.bf16.mxu0 %v10398_v55 }
0x1c36   : > { %10401 = vmatpush1.bf16.msra.mxu0 %v10400_v11 }
0x1c37   : > { %10403 = vmatprep.subr.bf16.mxu0 %v10402_v25 }
0x1c3a   : > { %10405 = vmatpush1.bf16.msra.mxu0 %v10404_v21 }
0x1c3b   : > { %10407 = vmatprep.subr.bf16.mxu0 %v10406_v9 }
0x1c3e   : > { %10409 = vmatpush1.bf16.msra.mxu0 %v10408_v20  ;;  %v6745_v20 = vld [vmem:[#allocation28 + $0x1f0] sm:$0xff] }
0x1c3f   : > { %10411 = vmatprep.subr.bf16.mxu0 %v10410_v61  ;;  %v10432_v61 = vpack.c.bf16 %v6745_v20, %v6743_v7  ;;  %v6776_v7 = vld [vmem:[#allocation28 + $0x2e8] sm:$0xff]  ;;  %v6778_v20 = vld [vmem:[#allocation28 + $0x2f8] sm:$0xff] }
0x1c40   : > { %v10462_v12 = vpack.c.bf16 %v6778_v20, %v6776_v7 }
0x1c42   : > { %10413 = vmatpush1.bf16.msra.mxu0 %v10412_v13  ;;  %v6747_v13 = vld [vmem:[#allocation28 + $0x200] sm:$0xff] }
0x1c43   : > { %10415 = vmatprep.subr.bf16.mxu0 %v10414_v57  ;;  %v6749_v57 = vld [vmem:[#allocation28 + $0x210] sm:$0xff] }
0x1c44   : > { %v10436_v23 = vpack.c.bf16 %v6749_v57, %v6747_v13  ;;  %v7285_v57 = vld [vmem:[#allocation29 + $0x178] sm:$0xff] }
0x1c46   : > { %10417 = vmatpush1.bf16.msra.mxu0 %v10416_v35 }
0x1c47   : > { %10419 = vmatprep.subr.bf16.mxu0 %v10418_v10 }
0x1c4a   : > { %10421 = vmatpush1.bf16.msra.mxu0 %v10420_v30  ;;  %v6648_v30 = vand.u32 1, %v15093_v54  ;;  %v7024_v54 = vld [vmem:[%s15154_s6] sm:$0xff] }
0x1c4b   : > { %10423 = vmatprep.subr.bf16.mxu0 %v10422_v18  ;;  %v10438_v18 = vpack.c.bf16 %v6754_v33, %v6752_v8 }
0x1c4c   : > { %vm14409_vm9 = vcmp.ne.s32.totalorder %v6648_v30, 0  ;;  %vm14427_vm15 = vcmp.ne.s32.totalorder %v6648_v30, 1  ;;  %v7030_v30 = vld [vmem:[%s15154_s6 + $0x30] sm:$0xff] }
0x1c4e   : > { %10425 = vmatpush1.bf16.msra.mxu0 %v10424_v3 }
0x1c4f   : > { %10427 = vmatprep.subr.bf16.mxu0 %v10426_v41  ;;  %v6756_v41 = vld [vmem:[#allocation28 + $0x248] sm:$0xff] }
0x1c52   : > { %10429 = vmatpush1.bf16.msra.mxu0 %v10428_v59  ;;  %v10440_v59 = vpack.c.bf16 %v6753_v27, %v6751_v31  ;;  %v7032_v27 = vld [vmem:[%s15154_s6 + $0x40] sm:$0xff] }
0x1c90   : > { %v10932_v53 = vpop.permute.xlu0 %10931 }
0x1c91   : > { %v10934_v48 = vunpack.i.h.bf16 %v10932_v53  ;;  %v10933_v56 = vunpack.i.l.bf16 %v10932_v53  ;;  %v10442_v53 = vpack.c.bf16 %v6758_v45, %v6756_v41  ;;  %v7035_v41 = vld [vmem:[%s15154_s6 + $0x58] sm:$0xff] }
0x1c92   : > { %v6522_v4 = vpop.permute.xlu1 %6521 }
0x1c93   : > { %v6530_v44 = vmax.f32 %v14365_v5, %v10934_v48  ;;  %v6529_v28 = vmax.f32 %v14362_v52, %v10933_v56  ;;  %v6531_v19 = vmax.f32 %v14370_v15, %v6522_v4  ;;  %v6755_v48 = vld [vmem:[#allocation28 + $0x240] sm:$0xff]  ;;  %v6757_v56 = vld [vmem:[#allocation28 + $0x250] sm:$0xff]  ;;  %v6760_v4 = vld [vmem:[#allocation28 + $0x268] sm:$0xff] }
0x1c95   : > { %v6538_v55 = vrot.slane %v6530_v44, 1  ;;  %v6537_v38 = vrot.slane %v6529_v28, 1  ;;  %v6540_v36 = vrot.slane %v6531_v19, 1 }
0x1c96   : > { %v6524_v24 = vpop.permute.xlu0 %6523 }
0x1c97   : > { %v6539_v26 = vsel %vm15136_vm5, %v6537_v38, %v6538_v55  ;;  %v6532_v11 = vmax.f32 %v14374_v37, %v6524_v24  ;;  %v6541_v25 = vsel %vm15137_vm3, %v6538_v55, %v6540_v36  ;;  %v6744_v37 = vld [vmem:[#allocation28 + $0x1e8] sm:$0xff]  ;;  %v6759_v55 = vld [vmem:[#allocation28 + $0x260] sm:$0xff]  ;;  %v6766_v24 = vld [vmem:[#allocation28 + $0x298] sm:$0xff]  ;;  %vm15158_vm3 = vcmask 64512  }
0x1c98   : > { %v6550_v34 = vmax.f32 %v6529_v28, %v6539_v26  ;;  %v6551_v46 = vmax.f32 %v6530_v44, %v6541_v25  ;;  %v10430_v62 = vpack.c.bf16 %v6746_v42, %v6744_v37  ;;  %v6762_v44 = vld [vmem:[#allocation28 + $0x278] sm:$0xff]  ;;  %v10444_v28 = vpack.c.bf16 %v6757_v56, %v6755_v48  ;;  %v6763_v25 = vld [vmem:[#allocation28 + $0x280] sm:$0xff]  ;;  %vm15155_vm5 = vmmov %vm15153_vm0 }
0x1c99   : > { %v6542_v1 = vrot.slane %v6532_v11, 1  ;;  %v6771_v42 = vld [vmem:[#allocation28 + $0x2c0] sm:$0xff]  ;;  %v7038_v56 = vld [vmem:[%s15154_s6 + $0x70] sm:$0xff] }
0x1c9a   : > { %v10362_v63 = vpack.c.bf16 %v6551_v46, %v6550_v34  ;;  %10431 = vmatprep.subr.bf16.mxu0 %v10430_v62  ;;  %v6765_v34 = vld [vmem:[#allocation28 + $0x290] sm:$0xff]  ;;  %v6768_v46 = vld [vmem:[#allocation28 + $0x2a8] sm:$0xff] }
0x1c9b   : > { %v6549_v5 = vsel %vm15138_vm4, %v6542_v1, %v6537_v38  ;;  %v6543_v52 = vsel %vm15139_vm7, %v6540_v36, %v6542_v1  ;;  %10433 = vmatpush1.bf16.msra.mxu0 %v10432_v61  ;;  %v6761_v38 = vld [vmem:[#allocation28 + $0x270] sm:$0xff]  ;;  %v6764_v36 = vld [vmem:[#allocation28 + $0x288] sm:$0xff]  ;;  %v6770_v1 = vld [vmem:[#allocation28 + $0x2b8] sm:$0xff] }
0x1c9c   : > { %v6553_v21 = vmax.f32 %v6532_v11, %v6549_v5  ;;  %10363 = vmatprep.subr.bf16.mxu1 %v10362_v63  ;;  %v6552_v15 = vmax.f32 %v6531_v19, %v6543_v52  ;;  %10435 = vmatprep.subr.bf16.mxu0 %v10434_v50  ;;  %v10446_v19 = vpack.c.bf16 %v6762_v44, %v6760_v4  ;;  %v6767_v52 = vld [vmem:[#allocation28 + $0x2a0] sm:$0xff]  ;;  %v6773_v62 = vld [vmem:[#allocation28 + $0x2d0] sm:$0xff]  ;;  %vm15159_vm4 = vmmov %vm15158_vm3 }
0x1c9d   : > { %10365 = vmatpush3.bf16.msra.mxu1 %v10362_v63  ;;  %v10448_v26 = vpack.c.bf16 %v6761_v38, %v6759_v55  ;;  %v10450_v11 = vpack.c.bf16 %v6766_v24, %v6764_v36  ;;  %v10452_v63 = vpack.c.bf16 %v6765_v34, %v6763_v25  ;;  %v10454_v5 = vpack.c.bf16 %v6770_v1, %v6768_v46  ;;  %v6777_v50 = vld [vmem:[#allocation28 + $0x2f0] sm:$0xff]  ;;  %v7039_v4 = vld [vmem:[%s15154_s6 + $0x78] sm:$0xff]  ;;  %vm15160_vm7 = vmmov %vm15143_vm1 }
0x1c9e   : > { %v10366_v9 = vpack.c.bf16 %v6553_v21, %v6552_v15  ;;  %v6769_v21 = vld [vmem:[#allocation28 + $0x2b0] sm:$0xff]  ;;  %v6772_v15 = vld [vmem:[#allocation28 + $0x2c8] sm:$0xff]  ;;  %v10460_v61 = vpack.c.bf16 %v6773_v62, %v6771_v42  ;;  %v10464_v13 = vpack.c.bf16 %v6777_v50, %v6775_v40  ;;  %v10502_v44 = vpack.c.bf16 %v7039_v4, %v7038_v56  ;;  %v14510_v42 = vld [vmem:[%s15156_s4] sm:$0xf]  ;;  %s8235_s4 = sshll.u32 %s14795_s1, 8  ;;  %s11623_s1 = smov [#allocation32]  }
0x1c9f   : > { %v7123_v62 = vrot.slane %v14510_v42, %v15117_v39  ;;  %v7255_v40 = vld [vmem:[#allocation29 + $0x88] sm:$0xff]  ;;  %s14568_s10 = scalar_lea.hbm %s15170_s18, %s8235_s4  ;;  %s11494_s3 = sshll.u32 %s11623_s1, 4  ;;  %s11495_s3 = int_to_ptr.vmem [resolvable:$false] %s11494_s3 }
0x1ca0   : > { %10367 = vmatprep.subr.bf16.mxu1 %v10366_v9  ;;  %v7263_v56 = vld [vmem:[#allocation29 + $0xc8] sm:$0xff]  ;;  %p11497_p8 = scmp.lt.s32.totalorder %s14563_s5, %s11495_s3 }
0x1ca1   : > { %10369 = vmatpush3.bf16.msra.mxu1 %v10366_v9  ;;  %v6774_v9 = vld [vmem:[#allocation28 + $0x2d8] sm:$0xff] }
0x1ca2   : > { %v10458_v37 = vpack.c.bf16 %v6774_v9, %v6772_v15 }
0x1ca4   : > { %9437 = vmatmul.mubr.msk.f32.vlgmr.msra.gmra.mrb[122].mxu1 %vm15140_vm8, %v6555_v16  ;;  %v10456_v16 = vpack.c.bf16 %v6769_v21, %v6767_v52  ;;  %vm15161_vm8 = vmmov %vm15143_vm1 }
0x1ca5   : > { %9447 = vmatprep.mubr.msk.f32.mxu1 %vm15153_vm0, %v14436_v17 }
0x1d77   : > { %v14388_v29 = vpop.f32.mrb[122].mxu1 }
0x1d78   : > { %v6666_v60 = vrot.slane %v14388_v29, 7  ;;  %v6676_v35 = vrot.slane %v14388_v29, 1  ;;  %v6628_v10 = vpop.f32.mrb[123].mxu1 }
0x1d79   : > { %v6665_v47 = vrot.slane %v6628_v10, 7  ;;  %v6675_v14 = vrot.slane %v6628_v10, 1  ;;  %6843 = vmatprep.mubr.f32.mxu0 %v6628_v10 }
0x1d7a   : > { %v6680_v33 = vsel %vm15152_vm6, %v6676_v35, 0.0 }
0x1d7b   : > { %v6670_v2 = vsel %vm15143_vm1, 0.0, %v6665_v47  ;;  %v6677_v51 = vsel %vm15144_vm12, %v6675_v14, %v6676_v35  ;;  %v6667_v3 = vsel %vm15145_vm14, %v6665_v47, %v6666_v60  ;;  %v10474_v60 = vpack.c.bf16 %v7025_v0, %v7024_v54  ;;  %v7027_v35 = vld [vmem:[%s15154_s6 + $0x18] sm:$0xff]  ;;  %v7029_v47 = vld [vmem:[%s15154_s6 + $0x28] sm:$0xff]  ;;  %vm15162_vm1 = vmmov %vm15152_vm6 }
0x1d7c   : > { %8207 = vmatmul.mubr.msk.f32.vlgmr.msra.gmra.mrb[170].mxu0 %vm14394_vm11, %v6670_v2  ;;  %v7033_v2 = vld [vmem:[%s15154_s6 + $0x48] sm:$0xff]  ;;  %v7257_v0 = vld [vmem:[#allocation29 + $0x98] sm:$0xff]  ;;  %vm15164_vm12 = vmmov %vm15153_vm0 }
0x1d7d   : > { %10437 = vmatpush1.bf16.msra.mxu0 %v10436_v23  ;;  %6849 = vmatprep.mubr.f32.mxu0 %v14388_v29  ;;  %v7026_v29 = vld [vmem:[%s15154_s6 + $0x10] sm:$0xff]  ;;  %v7028_v23 = vld [vmem:[%s15154_s6 + $0x20] sm:$0xff]  ;;  %vm15168_vm6 = vmmov %vm15158_vm3 }
0x1d7e   : > { %10439 = vmatprep.subr.bf16.mxu0 %v10438_v18  ;;  %v10478_v10 = vpack.c.bf16 %v7027_v35, %v7026_v29  ;;  %v10482_v14 = vpack.c.bf16 %v7029_v47, %v7028_v23  ;;  %v7031_v18 = vld [vmem:[%s15154_s6 + $0x38] sm:$0xff]  ;;  %v7256_v54 = vld [vmem:[#allocation29 + $0x90] sm:$0xff]  ;;  %v14519_v35 = vld [vmem:[%s15157_s12] sm:$0xff] }
0x1d7f   : > { %v10486_v31 = vpack.c.bf16 %v7031_v18, %v7030_v30  ;;  %v7240_v23 = vld [vmem:[#allocation29 + $0x10] sm:$0xff]  ;;  %v7241_v47 = vld [vmem:[#allocation29 + $0x18] sm:$0xff] }
0x1d80   : > { %8209 = vmatmul.mubr.msk.f32.gmra.mrb[172].mxu0 %vm14409_vm9, %v6667_v3  ;;  %v7034_v3 = vld [vmem:[%s15154_s6 + $0x50] sm:$0xff]  ;;  %v14527_v30 = vld [vmem:[%s15157_s12 + $0x8] sm:$0xff]  ;;  %v10512_v18 = vpack.c.bf16 %v7241_v47, %v7240_v23 }
0x1d81   : > { %10441 = vmatpush1.bf16.msra.mxu0 %v10440_v59  ;;  %6920 = vmatprep.mubr.f32.mxu0 %v14866_v22  ;;  %v10494_v45 = vpack.c.bf16 %v7035_v41, %v7034_v3  ;;  %v7036_v59 = vld [vmem:[%s15154_s6 + $0x60] sm:$0xff]  ;;  %v7261_v3 = vld [vmem:[#allocation29 + $0xb8] sm:$0xff] }
0x1d82   : > { %10443 = vmatprep.subr.bf16.mxu0 %v10442_v53  ;;  %v7037_v53 = vld [vmem:[%s15154_s6 + $0x68] sm:$0xff]  ;;  %s11496_s6 = scalar_lea.vmem %s11495_s3, 512 }
0x1d83   : > { %v10498_v48 = vpack.c.bf16 %v7037_v53, %v7036_v59  ;;  %v7244_v59 = vld [vmem:[#allocation29 + $0x30] sm:$0xff]  ;;  %v7245_v53 = vld [vmem:[#allocation29 + $0x38] sm:$0xff]  ;;  %p11498_p11 = scmp.lt.s32.totalorder %s11496_s6, %s11490_s0 }
0x1d84   : > { %v10520_v4 = vpack.c.bf16 %v7245_v53, %v7244_v59  ;;  %v7276_v53 = vld [vmem:[#allocation29 + $0x130] sm:$0xff] }
0x1d85   : > { %10445 = vmatpush1.bf16.msra.mxu0 %v10444_v28  ;;  %p11499_p5 = por %p11498_p11, %p11497_p8 }
0x1d86   : > { %10447 = vmatprep.subr.bf16.mxu0 %v10446_v19 }
0x1d87   : > { %p11500_p0 = pnand %p11499_p5, %p11493_p7 }
0x1d89   : > { %10449 = vmatpush1.bf16.msra.mxu0 %v10448_v26 }
0x1d8a   : > { %10451 = vmatprep.subr.bf16.mxu0 %v10450_v11 }
0x1d8d   : > { %10453 = vmatpush1.bf16.msra.mxu0 %v10452_v63  ;;  %v14502_v63 = vld [vmem:[#allocation31 + $0x8] sm:$0xff] }
0x1d8e   : > { %10455 = vmatprep.subr.bf16.mxu0 %v10454_v5 }
0x1d91   : > { %10457 = vmatpush1.bf16.msra.mxu0 %v10456_v16 }
0x1d92   : > { %10459 = vmatprep.subr.bf16.mxu0 %v10458_v37 }
0x1d95   : > { %10461 = vmatpush1.bf16.msra.mxu0 %v10460_v61  ;;  %v7129_v61 = vrot.slane %v14510_v42, %v15118_v58  ;;  %v7258_v58 = vld [vmem:[#allocation29 + $0xa0] sm:$0xff] }
0x1d96   : > { %10463 = vmatprep.subr.bf16.mxu0 %v10462_v12  ;;  %v7254_v12 = vld [vmem:[#allocation29 + $0x80] sm:$0xff] }
0x1d97   : > { %v10506_v29 = vpack.c.bf16 %v7255_v40, %v7254_v12  ;;  %v7253_v12 = vld [vmem:[#allocation29 + $0x78] sm:$0xff] }
0x1d99   : > { %10465 = vmatpush1.bf16.msra.mxu0 %v10464_v13  ;;  %v7238_v13 = vld [vmem:[#allocation29] sm:$0xff] }
0x1d9a   : > { %10579 = vmatprep.subr.bf16.mxu0 %v10474_v60 }
0x1d9c   : > { %8211 = vmatmul.mubr.msk.f32.vlgmr.msra.gmra.mrb[170].mxu0 %vm14418_vm2, %v6677_v51  ;;  %v10490_v51 = vpack.c.bf16 %v7033_v2, %v7032_v27  ;;  %v7242_v27 = vld [vmem:[#allocation29 + $0x20] sm:$0xff]  ;;  %v7243_v2 = vld [vmem:[#allocation29 + $0x28] sm:$0xff] }
0x1d9d   : > { %6926 = vmatprep.mubr.f32.mxu0 %v14866_v22  ;;  %10581 = vmatpush3.bf16.msra.mxu0 %v10474_v60  ;;  %v10516_v41 = vpack.c.bf16 %v7243_v2, %v7242_v27  ;;  %v7274_v2 = vld [vmem:[#allocation29 + $0x120] sm:$0xff] }
0x1d9e   : > { %10583 = vmatprep.subr.bf16.mxu0 %v10478_v10 }
0x1da0   : > { %8213 = vmatmul.mubr.msk.f32.gmra.mrb[172].mxu0 %vm14427_vm15, %v6680_v33  ;;  %v7239_v33 = vld [vmem:[#allocation29 + $0x8] sm:$0xff] }
0x1da1   : > { %10585 = vmatpush3.bf16.msra.mxu0 %v10478_v10  ;;  %v10508_v39 = vpack.c.bf16 %v7239_v33, %v7238_v13  ;;  %v7271_v13 = vld [vmem:[#allocation29 + $0x108] sm:$0xff] }
0x1da2   : > { %10587 = vmatprep.subr.bf16.mxu0 %v10482_v14 }
0x1da5   : > { %10589 = vmatpush3.bf16.msra.mxu0 %v10482_v14 }
0x1da6   : > { %10591 = vmatprep.subr.bf16.mxu0 %v10486_v31 }
0x1da9   : > { %10593 = vmatpush3.bf16.msra.mxu0 %v10486_v31 }
0x1daa   : > { %10595 = vmatprep.subr.bf16.mxu0 %v10490_v51 }
0x1dad   : > { %10597 = vmatpush3.bf16.msra.mxu0 %v10490_v51 }
0x1dae   : > { %10599 = vmatprep.subr.bf16.mxu0 %v10494_v45 }
0x1db1   : > { %10601 = vmatpush3.bf16.msra.mxu0 %v10494_v45 }
0x1db2   : > { %10603 = vmatprep.subr.bf16.mxu0 %v10498_v48 }
0x1db5   : > { %10605 = vmatpush3.bf16.msra.mxu0 %v10498_v48 }
0x1db6   : > { %10607 = vmatprep.subr.bf16.mxu0 %v10502_v44 }
0x1db9   : > { %10609 = vmatpush3.bf16.msra.mxu0 %v10502_v44 }
0x1e6f   : > { %v6922_v28 = vpop.f32.mrb[170].mxu0 }
0x1e70   : > { %v6935_v19 = vmul.f32 0.01, %v6922_v28  ;;  %v14488_v55 = vpop.f32.mrb[171].mxu0  ;;  %vm6933_vm10 = vcmp.ge.f32.partialorder %v6922_v28, 0.0 }
0x1e72   : > { %v14490_v36 = vsel %vm6933_vm10, %v6922_v28, %v6935_v19  ;;  %v7246_v28 = vld [vmem:[#allocation29 + $0x40] sm:$0xff]  ;;  %v7247_v19 = vld [vmem:[#allocation29 + $0x48] sm:$0xff] }
0x1e73   : > { %v6928_v38 = vpop.f32.mrb[172].mxu0  ;;  %v6939_v25 = vmul.f32 %v14490_v36, %v14490_v36 }
0x1e74   : > { %vm6934_vm13 = vcmp.ge.f32.partialorder %v6928_v38, 0.0  ;;  %v6936_v24 = vmul.f32 0.01, %v6928_v38  ;;  %v14492_v26 = vpop.f32.mrb[173].mxu0 }
0x1e76   : > { %v14494_v11 = vsel %vm6934_vm13, %v6928_v38, %v6936_v24  ;;  %v7264_v38 = vld [vmem:[#allocation29 + $0xd0] sm:$0xff]  ;;  %v7265_v24 = vld [vmem:[#allocation29 + $0xd8] sm:$0xff] }
0x1e77   : > { %v6940_v34 = vmul.f32 %v14494_v11, %v14494_v11  ;;  %v10466_v46 = vpack.c.bf16 %v14494_v11, %v14490_v36 }
0x1e79   : > { %10467 = vmatprep.subr.bf16.mxu1 %v10466_v46  ;;  %v10470_v1 = vpack.c.bf16 %v6940_v34, %v6939_v25  ;;  %v10524_v25 = vpack.c.bf16 %v7247_v19, %v7246_v28  ;;  %v10526_v34 = vpack.c.bf16 %v7265_v24, %v7264_v38  ;;  %v7280_v28 = vld [vmem:[#allocation29 + $0x150] sm:$0xff]  ;;  %v7281_v19 = vld [vmem:[#allocation29 + $0x158] sm:$0xff]  ;;  %v7282_v24 = vld [vmem:[#allocation29 + $0x160] sm:$0xff] }
0x1e7a   : > { %10469 = vmatpush3.bf16.msra.mxu1 %v10466_v46  ;;  %v7248_v46 = vld [vmem:[#allocation29 + $0x50] sm:$0xff]  ;;  %v10558_v38 = vpack.c.bf16 %v7281_v19, %v7280_v28 }
0x1e7b   : > { %10471 = vmatprep.subr.bf16.mxu1 %v10470_v1 }
0x1e7e   : > { %10473 = vmatpush3.bf16.msra.mxu1 %v10470_v1  ;;  %v7249_v1 = vld [vmem:[#allocation29 + $0x58] sm:$0xff] }
0x1e7f   : > { %10475 = vmatprep.subr.bf16.mxu1 %v10474_v60 }
0x1e81   : > { %9448 = vmatmul.mubr.msk.f32.vlgmr.msra.gmra.mrb[124].mxu1 %vm15155_vm5, %v14502_v63 }
0x1e82   : > { %10477 = vmatpush3.bf16.msra.mxu1 %v10474_v60 }
0x1e83   : > { %10479 = vmatprep.subr.bf16.mxu1 %v10478_v10 }
0x1e86   : > { %10481 = vmatpush3.bf16.msra.mxu1 %v10478_v10  ;;  %v10510_v10 = vpack.c.bf16 %v7257_v0, %v7256_v54 }
0x1e87   : > { %10483 = vmatprep.subr.bf16.mxu1 %v10482_v14 }
0x1e8a   : > { %10485 = vmatpush3.bf16.msra.mxu1 %v10482_v14  ;;  %v7259_v14 = vld [vmem:[#allocation29 + $0xa8] sm:$0xff] }
0x1e8b   : > { %10487 = vmatprep.subr.bf16.mxu1 %v10486_v31 }
0x1e8e   : > { %10489 = vmatpush3.bf16.msra.mxu1 %v10486_v31  ;;  %v10514_v31 = vpack.c.bf16 %v7259_v14, %v7258_v58 }
0x1e8f   : > { %10491 = vmatprep.subr.bf16.mxu1 %v10490_v51 }
0x1e92   : > { %10493 = vmatpush3.bf16.msra.mxu1 %v10490_v51  ;;  %v7260_v51 = vld [vmem:[#allocation29 + $0xb0] sm:$0xff] }
0x1e93   : > { %10495 = vmatprep.subr.bf16.mxu1 %v10494_v45 }
0x1e96   : > { %10497 = vmatpush3.bf16.msra.mxu1 %v10494_v45  ;;  %v10518_v45 = vpack.c.bf16 %v7261_v3, %v7260_v51  ;;  %v7275_v51 = vld [vmem:[#allocation29 + $0x128] sm:$0xff] }
0x1e97   : > { %10499 = vmatprep.subr.bf16.mxu1 %v10498_v48 }
0x1e9a   : > { %10501 = vmatpush3.bf16.msra.mxu1 %v10498_v48  ;;  %v7262_v48 = vld [vmem:[#allocation29 + $0xc0] sm:$0xff] }
0x1e9b   : > { %10503 = vmatprep.subr.bf16.mxu1 %v10502_v44 }
0x1e9e   : > { %10505 = vmatpush3.bf16.msra.mxu1 %v10502_v44  ;;  %v10522_v44 = vpack.c.bf16 %v7263_v56, %v7262_v48  ;;  %v7277_v48 = vld [vmem:[#allocation29 + $0x138] sm:$0xff]  ;;  %v7278_v56 = vld [vmem:[#allocation29 + $0x140] sm:$0xff] }
0x1e9f   : > { %v10550_v32 = vpack.c.bf16 %v7277_v48, %v7276_v53 }
0x1f54   : > { %v9449_v5 = vpop.f32.mrb[124].mxu1 }
0x1f55   : > { %v7015_v52 = vpop.f32.mrb[125].mxu1 }
0x1f56   : > { %9482 = vmatprep.mubr.f32.mxu1 %v7015_v52  ;;  %v7267_v52 = vld [vmem:[#allocation29 + $0xe8] sm:$0xff] }
0x1f57   : > { %9483 = vmatmul.mubr.f32.vlgmr.msra.gmra.mrb[126].mxu1 %v9449_v5  ;;  %v7266_v5 = vld [vmem:[#allocation29 + $0xe0] sm:$0xff] }
0x1f58   : > { %7203 = vmatprep.mubr.f32.mxu1 %v14866_v22 }
0x202a   : > { %v9484_v21 = vpop.f32.mrb[126].mxu1 }
0x202b   : > { %v7106_v15 = vpop.f32.mrb[127].mxu1 }
0x202c   : > { %v7116_v9 = vmul.f32 %v7106_v15, %v7106_v15 }
0x202e   : > { %v7117_v16 = vsub.f32 %v9484_v21, %v7116_v9  ;;  %v10528_v21 = vpack.c.bf16 %v7249_v1, %v7248_v46  ;;  %v7250_v9 = vld [vmem:[#allocation29 + $0x60] sm:$0xff] }
0x2030   : > { %v7118_v37 = vadd.f32 1e-05, %v7117_v16  ;;  %v7251_v16 = vld [vmem:[#allocation29 + $0x68] sm:$0xff] }
0x2032   : > { %10947 = vrsqrt.f32 %v7118_v37  ;;  %v10532_v37 = vpack.c.bf16 %v7251_v16, %v7250_v9 }
0x203c   : > { %v10948_v7 = vpop.eup %10947 }
0x203d   : > { %v7124_v20 = vmul.f32 %v10948_v7, %v7123_v62  ;;  %v7268_v62 = vld [vmem:[#allocation29 + $0xf0] sm:$0xff]  ;;  %v7269_v7 = vld [vmem:[#allocation29 + $0xf8] sm:$0xff] }
0x203f   : > { %v7125_v50 = vmul.f32 %v7124_v20, %v7106_v15  ;;  %v10530_v15 = vpack.c.bf16 %v7267_v52, %v7266_v5 }
0x2041   : > { %v7130_v60 = vsub.f32 %v7129_v61, %v7125_v50  ;;  %v7252_v61 = vld [vmem:[#allocation29 + $0x70] sm:$0xff]  ;;  %v7270_v50 = vld [vmem:[#allocation29 + $0x100] sm:$0xff] }
0x2042   : > { %v10536_v40 = vpack.c.bf16 %v7253_v12, %v7252_v61  ;;  %v10538_v33 = vpack.c.bf16 %v7271_v13, %v7270_v50 }
0x2043   : > { %7139 = vmatprep.subr.mxu1 %v7130_v60 }
0x2044   : > { %7140 = vmatpush1.msra.mxu1 %v7124_v20  ;;  %v10534_v20 = vpack.c.bf16 %v7269_v7, %v7268_v62 }
0x2045   : > { %8216 = vmatmul.mubr.msk.f32.vlgmr.msra.gmra.mrb[128].mxu1 %vm15158_vm3, %v14519_v35  ;;  %10507 = vmatprep.subr.bf16.mxu1 %v10506_v29 }
0x2046   : > { %7209 = vmatprep.mubr.f32.mxu1 %v14866_v22  ;;  %10509 = vmatpush3.bf16.msra.mxu1 %v10508_v39  ;;  %v7272_v39 = vld [vmem:[#allocation29 + $0x110] sm:$0xff] }
0x2047   : > { %10511 = vmatprep.subr.bf16.mxu1 %v10510_v10  ;;  %v7273_v10 = vld [vmem:[#allocation29 + $0x118] sm:$0xff] }
0x2049   : > { %8217 = vmatmul.mubr.msk.f32.gmra.mrb[130].mxu1 %vm15159_vm4, %v14527_v30 }
0x204a   : > { %10513 = vmatpush3.bf16.msra.mxu1 %v10512_v18  ;;  %v10542_v18 = vpack.c.bf16 %v7273_v10, %v7272_v39 }
0x204b   : > { %10515 = vmatprep.subr.bf16.mxu1 %v10514_v31 }
0x204e   : > { %10517 = vmatpush3.bf16.msra.mxu1 %v10516_v41 }
0x204f   : > { %10519 = vmatprep.subr.bf16.mxu1 %v10518_v45  ;;  %v10546_v45 = vpack.c.bf16 %v7275_v51, %v7274_v2 }
0x2052   : > { %10521 = vmatpush3.bf16.msra.mxu1 %v10520_v4  ;;  %v7279_v4 = vld [vmem:[#allocation29 + $0x148] sm:$0xff] }
0x2053   : > { %10523 = vmatprep.subr.bf16.mxu1 %v10522_v44  ;;  %v10554_v44 = vpack.c.bf16 %v7279_v4, %v7278_v56 }
0x2056   : > { %10525 = vmatpush3.bf16.msra.mxu1 %v10524_v25  ;;  %v7283_v25 = vld [vmem:[#allocation29 + $0x168] sm:$0xff] }
0x2057   : > { %10527 = vmatprep.subr.bf16.mxu1 %v10526_v34  ;;  %v10562_v43 = vpack.c.bf16 %v7283_v25, %v7282_v24  ;;  %v7284_v34 = vld [vmem:[#allocation29 + $0x170] sm:$0xff] }
0x2058   : > { %v10566_v46 = vpack.c.bf16 %v7285_v57, %v7284_v34 }
0x205a   : > { %10529 = vmatpush3.bf16.msra.mxu1 %v10528_v21 }
0x205b   : > { %10531 = vmatprep.subr.bf16.mxu1 %v10530_v15 }
0x205e   : > { %10533 = vmatpush3.bf16.msra.mxu1 %v10532_v37 }
0x205f   : > { %10535 = vmatprep.subr.bf16.mxu1 %v10534_v20 }
0x2062   : > { %10537 = vmatpush3.bf16.msra.mxu1 %v10536_v40 }
0x2063   : > { %10539 = vmatprep.subr.bf16.mxu1 %v10538_v33 }
0x2118   : > { %v7205_v54 = vpop.f32.mrb[128].mxu1 }
0x2119   : > { %v7216_v0 = vmul.f32 %v7205_v54, %v14490_v36  ;;  %v7207_v60 = vpop.f32.mrb[129].mxu1 }
0x211b   : > { %v7218_v29 = vadd.f32 %v7216_v0, %v7207_v60 }
0x211c   : > { %v7211_v23 = vpop.f32.mrb[130].mxu1 }
0x211d   : > { %v7222_v47 = vrot.slane %v7218_v29, 7  ;;  %v7217_v58 = vmul.f32 %v7211_v23, %v14494_v11  ;;  %7350 = vmatprep.mubr.f32.mxu1 %v7218_v29  ;;  %v7213_v14 = vpop.f32.mrb[131].mxu1  ;;  %v7230_v36 = vrot.slane %v7218_v29, 1 }
0x211f   : > { %v7227_v31 = vsel %vm15160_vm7, 0.0, %v7222_v47  ;;  %v7219_v27 = vadd.f32 %v7217_v58, %v7213_v14 }
0x2120   : > { %8219 = vmatmul.mubr.msk.f32.vlgmr.msra.gmra.mrb[132].mxu1 %vm14394_vm11, %v7227_v31  ;;  %vm15163_vm11 = vmmov %vm15162_vm1 }
0x2121   : > { %v7223_v3 = vrot.slane %v7219_v27, 7  ;;  %v7231_v41 = vrot.slane %v7219_v27, 1  ;;  %10541 = vmatpush3.bf16.msra.mxu1 %v10538_v33  ;;  %7355 = vmatprep.mubr.f32.mxu1 %v7219_v27 }
0x2122   : > { %10543 = vmatprep.subr.bf16.mxu1 %v10542_v18 }
0x2123   : > { %v7224_v11 = vsel %vm15161_vm8, %v7222_v47, %v7223_v3  ;;  %v7232_v59 = vsel %vm15162_vm1, %v7230_v36, %v7231_v41  ;;  %v7235_v1 = vsel %vm15163_vm11, %v7231_v41, 0.0  ;;  %v7601_v47 = vrot.slane %v14510_v42, %v13362_v6 }
0x2124   : > { %8221 = vmatmul.mubr.msk.f32.gmra.mrb[134].mxu1 %vm14409_vm9, %v7224_v11 }
0x2125   : > { %10545 = vmatpush3.bf16.msra.mxu1 %v10542_v18  ;;  %9517 = vmatprep.mubr.msk.f32.mxu1 %vm14418_vm2, %v7232_v59  ;;  %vm15165_vm2 = vmmov %vm15153_vm0 }
0x2126   : > { %10547 = vmatprep.subr.bf16.mxu1 %v10546_v45 }
0x2129   : > { %10549 = vmatpush3.bf16.msra.mxu1 %v10546_v45 }
0x212a   : > { %10551 = vmatprep.subr.bf16.mxu1 %v10550_v32 }
0x212d   : > { %10553 = vmatpush3.bf16.msra.mxu1 %v10550_v32 }
0x212e   : > { %10555 = vmatprep.subr.bf16.mxu1 %v10554_v44 }
0x2131   : > { %10557 = vmatpush3.bf16.msra.mxu1 %v10554_v44 }
0x2132   : > { %10559 = vmatprep.subr.bf16.mxu1 %v10558_v38 }
0x2135   : > { %10561 = vmatpush3.bf16.msra.mxu1 %v10558_v38 }
0x2136   : > { %10563 = vmatprep.subr.bf16.mxu1 %v10562_v43 }
0x2139   : > { %10565 = vmatpush3.bf16.msra.mxu1 %v10562_v43 }
0x213a   : > { %10567 = vmatprep.subr.bf16.mxu1 %v10566_v46 }
0x213d   : > { %10569 = vmatpush3.bf16.msra.mxu1 %v10566_v46 }
0x2140   : > { %9518 = vmatmul.mubr.msk.f32.vlgmr.msra.gmra.mrb[136].mxu1 %vm14427_vm15, %v7235_v1  ;;  %vm15167_vm15 = vmmov %vm15158_vm3 }
0x2141   : > { %9528 = vmatprep.mubr.msk.f32.mxu1 %vm15164_vm12, %v14436_v17 }
0x21f3   : > { %v8858_v5 = vpop.f32.mrb[132].mxu1 }
0x21f4   : > { %v8859_v52 = vpop.f32.mrb[133].mxu1 }
0x21f5   : > { %v8860_v21 = vadd.f32 %v8859_v52, %v8858_v5 }
0x21f7   : > { %v8861_v15 = vpop.f32.mrb[134].mxu1  ;;  %v7353_v9 = vadd.f32 %v8860_v21, %v14488_v55 }
0x21f8   : > { %v8862_v16 = vpop.f32.mrb[135].mxu1 }
0x21f9   : > { %v8863_v37 = vadd.f32 %v8862_v16, %v8861_v15 }
0x21fb   : > { %v7358_v62 = vadd.f32 %v8863_v37, %v14492_v26 }
0x2213   : > { %v9519_v7 = vpop.f32.mrb[136].mxu1 }
0x2214   : > { %v7433_v20 = vadd.f32 %v9519_v7, %v7358_v62  ;;  %v7427_v61 = vpop.f32.mrb[137].mxu1 }
0x2215   : > { %v7428_v12 = vadd.f32 %v7427_v61, %v7353_v9 }
0x2216   : > { %vm7437_vm14 = vcmp.ge.f32.partialorder %v7433_v20, 0.0  ;;  %v7439_v8 = vmul.f32 0.01, %v7433_v20 }
0x2217   : > { %vm7436_vm9 = vcmp.ge.f32.partialorder %v7428_v12, 0.0  ;;  %v7438_v40 = vmul.f32 0.01, %v7428_v12 }
0x2218   : > { %v7441_v50 = vsel %vm7437_vm14, %v7433_v20, %v7439_v8 }
0x2219   : > { %v7440_v17 = vsel %vm7436_vm9, %v7428_v12, %v7438_v40  ;;  %v7443_v13 = vmul.f32 %v7441_v50, %v7441_v50 }
0x221a   : > { %v10570_v33 = vpack.c.bf16 %v7441_v50, %v7440_v17  ;;  %v7442_v54 = vmul.f32 %v7440_v17, %v7440_v17 }
0x221c   : > { %10571 = vmatprep.subr.bf16.mxu1 %v10570_v33  ;;  %v10574_v0 = vpack.c.bf16 %v7443_v13, %v7442_v54 }
0x221d   : > { %10573 = vmatpush3.bf16.msra.mxu1 %v10570_v33 }
0x221e   : > { %10575 = vmatprep.subr.bf16.mxu1 %v10574_v0 }
0x2221   : > { %10577 = vmatpush3.bf16.msra.mxu1 %v10574_v0 }
0x2224   : > { %9529 = vmatmul.mubr.msk.f32.vlgmr.msra.gmra.mrb[138].mxu1 %vm15165_vm2, %v14502_v63  ;;  %v7607_v63 = vrot.slane %v14510_v42, %v15066_v49 }
0x2225   : > { %7673 = vmatprep.mubr.f32.mxu1 %v14866_v22 }
0x22f7   : > { %v9530_v55 = vpop.f32.mrb[138].mxu1 }
0x22f8   : > { %v7510_v26 = vpop.f32.mrb[139].mxu1 }
0x22f9   : > { %9563 = vmatprep.mubr.f32.mxu0 %v7510_v26 }
0x22fa   : > { %9564 = vmatmul.mubr.f32.vlgmr.msra.gmra.mrb[174].mxu0 %v9530_v55 }
0x23cd   : > { %v9565_v60 = vpop.f32.mrb[174].mxu0 }
0x23ce   : > { %v7585_v29 = vpop.f32.mrb[175].mxu0 }
0x23cf   : > { %v7594_v39 = vmul.f32 %v7585_v29, %v7585_v29 }
0x23d1   : > { %v7595_v10 = vsub.f32 %v9565_v60, %v7594_v39 }
0x23d3   : > { %v7596_v23 = vadd.f32 1e-05, %v7595_v10 }
0x23d5   : > { %10949 = vrsqrt.f32 %v7596_v23 }
0x23df   : > { %v10950_v58 = vpop.eup %10949 }
0x23e0   : > { %v7602_v14 = vmul.f32 %v10950_v58, %v7601_v47 }
0x23e2   : > { %v7603_v18 = vmul.f32 %v7602_v14, %v7585_v29 }
0x23e4   : > { %v7608_v31 = vsub.f32 %v7607_v63, %v7603_v18 }
0x23e6   : > { %7609 = vmatprep.subr.mxu1 %v7608_v31 }
0x23e7   : > { %7610 = vmatpush1.msra.mxu1 %v7602_v14 }
0x23e8   : > { %8228 = vmatmul.mubr.msk.f32.vlgmr.msra.gmra.mrb[140].mxu1 %vm15167_vm15, %v14519_v35 }
0x23e9   : > { %7679 = vmatprep.mubr.f32.mxu1 %v14866_v22 }
0x23ec   : > { %8229 = vmatmul.mubr.msk.f32.gmra.mrb[142].mxu1 %vm15168_vm6, %v14527_v30 }
0x24bb   : > { %v7675_v6 = vpop.f32.mrb[140].mxu1 }
0x24bc   : > { %v7686_v27 = vmul.f32 %v7675_v6, %v7440_v17  ;;  %v7677_v2 = vpop.f32.mrb[141].mxu1 }
0x24be   : > { %v7688_v49 = vadd.f32 %v7686_v27, %v7677_v2 }
0x24bf   : > { %v7681_v42 = vpop.f32.mrb[142].mxu1 }
0x24c0   : > { %7690 = vst [vmem:[%s1109_s9] sm:$0xff] %v7688_v49  ;;  %v7687_v51 = vmul.f32 %v7681_v42, %v7441_v50  ;;  %v7683_v36 = vpop.f32.mrb[143].mxu1 }
0x24c2   : > { %v7689_v22 = vadd.f32 %v7687_v51, %v7683_v36 }
0x24c4   : > { %7691 = vst [vmem:[%s1109_s9 + $0x8] sm:$0xff] %v7689_v22 }
0x24c5   : > { %11503 = shalt.err (!%p11500_p0)
}
0x24c6   : > { %s11504_s2 = scalar_lea.hbm %s14568_s10, 256  ;;  %s11508_s29 = scalar_lea.hbm %s15170_s18, 512 }
0x24c7   : > { %p11505_p6 = scmp.ne.s32.totalorder %s14568_s10, %s11504_s2  ;;  %p11509_p13 = scmp.lt.u32.totalorder %s14568_s10, %s15170_s18 }
0x24c8   : > { %p11510_p12 = scmp.lt.u32.totalorder %s11508_s29, %s11504_s2  ;;  %p11512_p2 = scmp.lt.u32.totalorder %s11504_s2, %s14568_s10 }
0x24c9   : > { %p11506_p9 = pnand %p11505_p6, %p15171_p3 }
0x24ca   : > { %p11511_p1 = por %p11510_p12, %p11509_p13 }
0x24cb   : > { %p11507_p10 = pneg %p11506_p9 }
0x24cc   : > { %p11513_p4 = por %p11512_p2, %p11511_p1 }
0x24ce   : > { %p11514_p7 = pnand %p11513_p4, %p11507_p10 }
0x24d0   : > { %11517 = shalt.err (!%p11514_p7)
}
0x24d1   : > { %s11624_s6 = smov 128   ;;  %s11625_s0 = smov 8  }
0x24d2   : > { %10714 = dma.vmem_to_hbm [thread:$0]  (%p15171_p3), %s14563_s5, 256, %s14568_s10, %s14570_s8, %s11624_s6, %s11624_s6, %s11625_s0  }
0x24d3 PF: > { %s15172_s1 = sld [smem:[#allocation47_spill]]  ;;  %s15173_s9 = sld [smem:[#allocation44_spill]] }
0x24d4   : > { %s15174_s4 = sld [smem:[#allocation52_spill]] }
0x24d9   : > { %p10816_p8 = scmp.ge.s32.totalorder %s15172_s1, 2  ;;  %s7721_s27 = sand.u32 1, %s15173_s9  }
0x24da   : > { %p15175_p11 = scmp.ne.s32.totalorder %s15174_s4, 0  ;;  %s7722_s2 = scalar_lea.sflag [#allocation4], %s7721_s27 }
0x24dc   : > { %p10775_p5 = pnand %p10816_p8, %p15175_p11 }
0x24de   : > { %11575 = dma.done.wait (!%p10775_p5), %s7722_s2, 256  }
0x24df   : > { %11577 = vsyncadd (!%p10775_p5), %s7722_s2, 4294967040  ;;  %s15176_s29 = sld [smem:[#allocation49_spill]]  ;;  %s15177_s8 = sld [smem:[#allocation45_spill]] }
0x24e0   : > { %s15178_s5 = sld [smem:[#allocation46_spill]]  ;;  %s15179_s9 = sld [smem:[#allocation50_spill]] }
0x24e5   : > { %p48_p0 = scmp.ge.s32.totalorder %s15176_s29, 4   ;;  %15180 = sst [smem:[#allocation44_spill]] %s15176_s29 }
0x24e7   :  { %50 = sbr.rel (!%p48_p0) target bundleno = 36 (0x24), region = 244 }
0x24ee   :  { %7727 = vsyncpa [#allocation3], 1 }
0x24ef   :  { %7729 = vsyncpa [#allocation3 + $0x1], 1 }
0x24f0   :  { %7730 = vsyncpa [#allocation6], 1 }
0x24f1   :  { %7731 = vsyncpa [#allocation9], 1 }
0x24f2   :  { %7732 = vsyncpa [#allocation12], 1 }
0x24f3   :  { %7733 = vsyncpa [#allocation15], 1 }
0x24f4   :  { %7734 = vsyncpa [#allocation18], 1 }
0x24f5   :  { %7735 = vsyncpa [#allocation21], 1 }
0x24f6   :  { %7736 = vsyncpa [#allocation24], 1 }
0x24f7   :  { %7737 = vsyncpa [#allocation27], 1 }
0x24f8   :  { %7738 = vsyncpa [#allocation30], 1 }
0x24f9   :  { %7739 = vsyncpa [#allocation4], 1 }
0x24fa   :  { %7741 = vsyncpa [#allocation4 + $0x1], 1 }

</bundles_post_ra>
